<compile_context>
chip_gen: v5e
topology: v5e:2x2
jax: 0.10.0
libtpu: 0.0.40
codegen_flags: <defaults>
</compile_context>

<pallas_src>
import math

import jax
import jax.numpy as jnp
from jax.experimental import pallas as pl
from jax.experimental.pallas import tpu as pltpu


def _pcfetch_kernel(x_ref, idx_ref, o_ref):
    # Elementwise add on the whole VMEM tile (VPU); cast to the promoted dtype.
    o_ref[...] = (x_ref[...] + idx_ref[...]).astype(o_ref.dtype)


_FAST_PATH_MAX_ELEMS = 1 << 18        # below 256K elems, XLA's fused add wins
_VMEM_TILE_BUDGET = 24 << 20          # bytes across 3 streams x 2 pipeline buffers
_VMEM_LIMIT_BYTES = 28 << 20          # explicit scoped-VMEM limit (safe on v5e/v6e/v7x)
_COL_CANDIDATES = (1024, 512, 256, 128)  # lane-dense widths, widest first


def pcfetch(input_data: jax.Array, fetch_index: jax.Array) -> jax.Array:
    """out = input_data + fetch_index, elementwise (shapes must match)."""
    assert input_data.shape == fetch_index.shape, "fetch_index must match input shape"
    orig_shape = input_data.shape
    total = math.prod(orig_shape) if orig_shape else 1
    out_dtype = jnp.result_type(input_data.dtype, fetch_index.dtype)

    # Fast path: tiny tensors — pallas_call dispatch + grid overhead dwarfs the work.
    if total < _FAST_PATH_MAX_ELEMS:
        return input_data + fetch_index

    # Widest lane-dense column width that divides the element count (no padding).
    cols = next((c for c in _COL_CANDIDATES if total % c == 0), None)
    if cols is None:
        # Ragged total: zero-padding + slicing would add 2-3x extra HBM passes
        # outside the kernel, which is strictly worse than the fused XLA add.
        return input_data + fetch_index

    rows = total // cols
    x2 = input_data.reshape(rows, cols)
    i2 = fetch_index.reshape(rows, cols)

    # Byte-budgeted row tile: 3 streams (x, idx, out) x 2 pipeline buffers.
    itemsize = max(
        x2.dtype.itemsize, i2.dtype.itemsize, jnp.dtype(out_dtype).itemsize
    )
    block_rows = _VMEM_TILE_BUDGET // (3 * 2 * cols * itemsize)
    block_rows = max(8, (block_rows // 8) * 8)   # sublane-aligned
    block_rows = min(block_rows, rows)           # full-extent block if it all fits

    grid = (pl.cdiv(rows, block_rows),)

    out = pl.pallas_call(
        _pcfetch_kernel,
        out_shape=jax.ShapeDtypeStruct((rows, cols), out_dtype),
        grid=grid,
        in_specs=[
            pl.BlockSpec((block_rows, cols), lambda r: (r, 0)),
            pl.BlockSpec((block_rows, cols), lambda r: (r, 0)),
        ],
        out_specs=pl.BlockSpec((block_rows, cols), lambda r: (r, 0)),
        compiler_params=pltpu.CompilerParams(
            dimension_semantics=("parallel",),
            vmem_limit_bytes=_VMEM_LIMIT_BYTES,
        ),
    )(x2, i2)

    return out.reshape(orig_shape)


if __name__ == "__main__":
    key = jax.random.PRNGKey(0)
    k1, k2, k3, k4, k5, k6 = jax.random.split(key, 6)

    # 1) Module-scale NCHW example (batch=2, channels=4, 16x16 spatial):
    #    routed through the small-input fast path by design.
    x_small = jax.random.normal(k1, (2, 4, 16, 16), dtype=jnp.float32)
    i_small = jax.random.normal(k2, (2, 4, 16, 16), dtype=jnp.float32)
    out_small = jax.block_until_ready(pcfetch(x_small, i_small))
    ref_small = x_small + i_small
    assert out_small.shape == ref_small.shape and out_small.dtype == ref_small.dtype
    assert jnp.allclose(out_small, ref_small, atol=1e-6, rtol=1e-6)

    # 2) Larger NCHW tensor: exercises the Pallas kernel (lane-dense 1024-wide
    #    view, 1024-row tiles, 2-step parallel grid, double-buffered DMA).
    x_big = jax.random.normal(k3, (8, 16, 128, 128), dtype=jnp.float32)
    i_big = jax.random.normal(k4, (8, 16, 128, 128), dtype=jnp.float32)
    out_big = jax.block_until_ready(pcfetch(x_big, i_big))
    assert jnp.allclose(out_big, x_big + i_big, atol=1e-6, rtol=1e-6)

    # 3) Mixed dtypes (f32 data + i32 fetch index) through the Pallas path,
    #    checking the in-kernel dtype promotion matches jnp semantics.
    x_mix = jax.random.normal(k5, (4, 8, 96, 128), dtype=jnp.float32)
    i_mix = jax.random.randint(k6, (4, 8, 96, 128), -16, 16, dtype=jnp.int32)
    out_mix = jax.block_until_ready(pcfetch(x_mix, i_mix))
    ref_mix = x_mix + i_mix
    assert out_mix.dtype == ref_mix.dtype
    assert jnp.allclose(out_mix, ref_mix, atol=1e-6, rtol=1e-6)

    print("KERNEL_OK")
</pallas_src>

<mosaic_0001>
module attributes {stable_mosaic.version = 11 : i64} {
  func.func @_pcfetch_kernel(%arg0: i32, %arg1: memref<1024x1024xf32, #tpu.memory_space<vmem>>, %arg2: memref<1024x1024xf32, #tpu.memory_space<vmem>>, %arg3: memref<1024x1024xf32, #tpu.memory_space<vmem>>) attributes {dimension_semantics = [#tpu.dimension_semantics<parallel>], iteration_bounds = array<i64: 2>, scalar_prefetch = 0 : i64, scratch_operands = 0 : i64, tpu.core_type = #tpu.core_type<tc>, window_params = [{transform_indices = @transform_0, window_bounds = array<i64: 1024, 1024>}, {transform_indices = @transform_1, window_bounds = array<i64: 1024, 1024>}, {transform_indices = @transform_2, window_bounds = array<i64: 1024, 1024>}]} {
    %c0 = arith.constant 0 : index
    %c0_0 = arith.constant 0 : index
    %0 = vector.load %arg1[%c0, %c0_0] : memref<1024x1024xf32, #tpu.memory_space<vmem>>, vector<1024x1024xf32>
    %c0_1 = arith.constant 0 : index
    %c0_2 = arith.constant 0 : index
    %1 = vector.load %arg2[%c0_1, %c0_2] : memref<1024x1024xf32, #tpu.memory_space<vmem>>, vector<1024x1024xf32>
    %2 = arith.addf %0, %1 : vector<1024x1024xf32>
    %c0_3 = arith.constant 0 : index
    %c0_4 = arith.constant 0 : index
    %3 = vector.load %arg3[%c0_3, %c0_4] : memref<1024x1024xf32, #tpu.memory_space<vmem>>, vector<1024x1024xf32>
    tpu.vector_store %arg3[%c0_3, %c0_4], %2 {strides = array<i32>} : memref<1024x1024xf32, #tpu.memory_space<vmem>>, vector<1024x1024xf32>,
    return
  }
  func.func @transform_0(%arg0: i32) -> (i32, i32) {
    %c0_i32 = arith.constant 0 : i32
    %c0_i32_0 = arith.constant 0 : i32
    return %arg0, %c0_i32 : i32, i32
  }
  func.func @transform_1(%arg0: i32) -> (i32, i32) {
    %c0_i32 = arith.constant 0 : i32
    %c0_i32_0 = arith.constant 0 : i32
    return %arg0, %c0_i32 : i32, i32
  }
  func.func @transform_2(%arg0: i32) -> (i32, i32) {
    %c0_i32 = arith.constant 0 : i32
    %c0_i32_0 = arith.constant 0 : i32
    return %arg0, %c0_i32 : i32, i32
  }
}

</mosaic_0001>

<bundles_post_ra>
// kernel: tpu_custom_call.1
= control target key start
LH: loop header
LB: loop body
LE: loop exit
PB: predicated region body
PF: predicated region fallthrough
CT: control target
= control target key end

     0   :  { %7 = vsyncpa [#allocation3], 0  ;;  %s7900_s0 = inlined_call_operand.hbm [shape: f32[2048,1024], index: 0, kind: input, shape index: {}]   ;;  %s7901_s1 = inlined_call_operand.hbm [shape: f32[2048,1024], index: 1, kind: input, shape index: {}]   ;;  %s7902_s2 = inlined_call_operand.hbm [shape: f32[2048,1024], index: 2, kind: output, shape index: {}]  }
   0x1   :  { %9 = vsyncpa [#allocation3 + $0x1], 0 }
   0x2   :  { %10 = vsyncpa [#allocation6], 0 }
   0x3   :  { %12 = vsyncpa [#allocation6 + $0x1], 0 }
   0x4   :  { %13 = vsyncpa [#allocation4], 0 }
   0x5   :  { %15 = vsyncpa [#allocation4 + $0x1], 0  ;;  %s4653_s9 = smov 0   ;;  %s4655_s10 = smov 0  }
   0x6   :  { %s4657_s11 = smov 0   ;;  %s4659_s12 = smov 0  }
   0x7 LB: > { %s4674_s13 = sadd.s32 4294967295, %s4632_s12   ;;  %s4420_s14 = sadd.s32 4294967294, %s4632_s12   ;;  %s4632_s12 = sphi %s4659_s12, %s7913_s12   ;;  %s4628_s11 = sphi %s4657_s11, %s7912_s11   ;;  %s4624_s10 = sphi %s4655_s10, %s7911_s10   ;;  %s4620_s9 = sphi %s4653_s9, %s7910_s9  }
   0x8   : > { %s4678_s15 = sadd.s32 1, %s4632_s12   ;;  %s28_s16 = sadd.s32 1, %s4628_s11 }
   0x9   : > { %s25_s17 = ssub.s32 %s4632_s12, %s4678_s15  ;;  %p35_p0 = scmp.ne.s32.totalorder %s4628_s11, %s4624_s10 }
   0xa   : > { %p26_p1 = scmp.eq.s32.totalorder %s25_s17, 0  ;;  %p36_p2 = scmp.eq.s32.totalorder %s4632_s12, 0 }
   0xb   : > { %p41_p3 = scmp.ne.s32.totalorder %s4624_s10, %s4620_s9  ;;  %p42_p4 = scmp.eq.s32.totalorder %s4674_s13, 0 }
   0xc   : > { %s4690_s18 = scalar_select %p26_p1, %s4628_s11, %s28_s16  }
   0xd   : > { %p4692_p5 = por %p36_p2, %p35_p0  ;;  %p4696_p6 = por %p42_p4, %p41_p3 }
   0xe   : > { %p91_p7 = scmp.eq.s32.totalorder %s4674_s13, 1  ;;  %p97_p8 = scmp.eq.s32.totalorder %s4420_s14, 1 }
   0xf   : > { %p4464_p10 = scmp.lt.s32.totalorder %s4632_s12, 2  ;;  %s4712_s23 = sand.u32 1, %s4628_s11  }
  0x10   : > { %p4703_p11 = por %p91_p7, %p35_p0  ;;  %p4707_p12 = por %p97_p8, %p41_p3 }
  0x11   : > { %s4442_s24 = sshll.u32 %s4632_s12, 13  ;;  %s4423_s25 = sshll.u32 %s4712_s23, 13 }
  0x12   : > { %s127_s28 = scalar_lea.hbm %s7900_s0, %s4442_s24  ;;  %s121_s30 = scalar_lea.vmem [#allocation2], %s4423_s25 }
  0x13   : > { %s128_s29 = sshll.u32 %s127_s28, 4  ;;  %s130_s3 = sshll.u32 %s121_s30, 4  ;;  %s129_s29 = int_to_ptr.hbm [resolvable:$true] %s128_s29  ;;  %s131_s3 = int_to_ptr.vmem [resolvable:$true] %s130_s3 }
  0x14   : > { %p4725_p13 = pnand %p4464_p10, %p4692_p5  ;;  %p4431_p0 = scmp.ge.s32.totalorder %s4632_s12, 1 }
  0x15   : > { %p161_p1 = scmp.lt.s32.totalorder %s4632_s12, 3  ;;  %s118_s5 = scalar_lea.sflag [#allocation3], %s4712_s23 }
  0x16   : > { %s4502_s6 = sshra.s32 %s129_s29, 4  ;;  %p4506_p3 = pneg %p4725_p13  ;;  %s4503_s6 = int_to_ptr.hbm [resolvable:$true] %s4502_s6 }
  0x17   : > { %s4504_s7 = scalar_lea.hbm %s4503_s6, 8192  ;;  %s4509_s16 = scalar_lea.hbm %s7900_s0, 16384 }
  0x18   : > { %p4505_p2 = scmp.ne.s32.totalorder %s4503_s6, %s4504_s7  ;;  %p4510_p5 = scmp.lt.s32.totalorder %s4503_s6, %s7900_s0 }
  0x19   : > { %p4511_p8 = scmp.lt.s32.totalorder %s4509_s16, %s4504_s7 }
  0x1a   : > { %p4507_p4 = pnand %p4506_p3, %p4505_p2 }
  0x1b   : > { %p4512_p10 = por %p4511_p8, %p4510_p5 }
  0x1c   : > { %p4508_p7 = pneg %p4507_p4 }
  0x1e   : > { %p4513_p9 = pnand %p4512_p10, %p4508_p7 }
  0x20   : > { %4516 = shalt.err (!%p4513_p9)
}
  0x21   : > { %s4634_s26 = smov 1024   ;;  %s4635_s27 = smov 64  }
  0x22   : > { %4456 = dma.hbm_to_vmem [thread:$0]  (!%p4725_p13), %s129_s29, 131072, %s131_s3, %s118_s5, %s4634_s26, %s4634_s26, %s4635_s27  }
  0x23   : > { %p4749_p2 = pnand %p4431_p0, %p161_p1  ;;  %s150_s7 = scalar_lea.hbm %s7901_s1, %s4442_s24 }
  0x24   : > { %s151_s8 = sshll.u32 %s150_s7, 4  ;;  %s144_s14 = scalar_lea.vmem [#allocation5], %s4423_s25  ;;  %s152_s8 = int_to_ptr.hbm [resolvable:$true] %s151_s8 }
  0x25   : > { %s153_s16 = sshll.u32 %s144_s14, 4  ;;  %s141_s17 = scalar_lea.sflag [#allocation6], %s4712_s23  ;;  %s154_s16 = int_to_ptr.vmem [resolvable:$true] %s153_s16 }
  0x26   : > { %s4532_s19 = sshra.s32 %s152_s8, 4  ;;  %s4539_s30 = scalar_lea.hbm %s7901_s1, 16384  ;;  %s4533_s19 = int_to_ptr.hbm [resolvable:$true] %s4532_s19 }
  0x27   : > { %s4534_s29 = scalar_lea.hbm %s4533_s19, 8192  ;;  %p4540_p4 = scmp.lt.s32.totalorder %s4533_s19, %s7901_s1 }
  0x28   : > { %p4535_p9 = scmp.ne.s32.totalorder %s4533_s19, %s4534_s29  ;;  %p4541_p7 = scmp.lt.s32.totalorder %s4539_s30, %s4534_s29 }
  0x2a   : > { %p4537_p0 = pnand %p4535_p9, %p4506_p3  ;;  %p4542_p5 = por %p4541_p7, %p4540_p4 }
  0x2c   : > { %p4538_p1 = pneg %p4537_p0 }
  0x2e   : > { %p4543_p8 = pnand %p4542_p5, %p4538_p1 }
  0x30   : > { %4546 = shalt.err (!%p4543_p8)
}
  0x31   : > { %4459 = dma.hbm_to_vmem [thread:$0]  (!%p4725_p13), %s152_s8, 131072, %s154_s16, %s141_s17, %s4634_s26, %s4634_s26, %s4635_s27  }
  0x32   : > { %165 = sbr.rel (%p4749_p2) target bundleno = 1089 (0x441), region = 28  ;;  %s4775_s23 = sand.u32 (!%p4749_p2), 1, %s4624_s10  }
  0x33   : > { %s4432_s25 = sshll.u32 (!%p4749_p2), %s4775_s23, 13  ;;  %s168_s7 = scalar_lea.sflag (!%p4749_p2), [#allocation3], %s4775_s23 }
  0x34   : > { %s4779_s14 = scalar_lea.vmem (!%p4749_p2), [#allocation2], %s4432_s25 }
  0x37   : > { %4607 = dma.done.wait (%p4696_p6), %s168_s7, 131072  }
  0x38   : > { %4609 = vsyncadd (%p4696_p6), %s168_s7, 4294836224  ;;  %s178_s4 = scalar_lea.sflag [#allocation6], %s4775_s23  ;;  %s4786_s26 = scalar_lea.vmem [#allocation5], %s4432_s25 }
  0x39   : > { %4611 = dma.done.wait (%p4696_p6), %s178_s4, 131072  }
  0x3a   : > { %4613 = vsyncadd (%p4696_p6), %s178_s4, 4294836224  ;;  %v211_v0 = vld [vmem:[%s4779_s14] sm:$0xff]  ;;  %v212_v2 = vld [vmem:[%s4779_s14 + $0x8] sm:$0xff]  ;;  %s4801_s20 = scalar_lea.vmem [#allocation7], %s4432_s25  ;;  %s4446_s27 = sshll.u32 %s4674_s13, 13 }
  0x3b   : > { %v1235_v1 = vld [vmem:[%s4786_s26] sm:$0xff]  ;;  %v1236_v4 = vld [vmem:[%s4786_s26 + $0x8] sm:$0xff]  ;;  %v213_v5 = vld [vmem:[%s4779_s14 + $0x10] sm:$0xff]  ;;  %s4320_s8 = scalar_lea.hbm %s7902_s2, %s4446_s27  ;;  %s4321_s16 = sshll.u32 %s4801_s20, 4  ;;  %s4322_s16 = int_to_ptr.vmem [resolvable:$true] %s4321_s16 }
  0x3c   : > { %v2259_v3 = vadd.f32 %v1235_v1, %v211_v0  ;;  %v1237_v6 = vld [vmem:[%s4786_s26 + $0x10] sm:$0xff]  ;;  %v2260_v7 = vadd.f32 %v1236_v4, %v212_v2  ;;  %v214_v9 = vld [vmem:[%s4779_s14 + $0x18] sm:$0xff]  ;;  %v215_v11 = vld [vmem:[%s4779_s14 + $0x20] sm:$0xff]  ;;  %s4323_s17 = sshll.u32 %s4320_s8, 4  ;;  %s4308_s19 = scalar_lea.sflag [#allocation4], %s4775_s23  ;;  %s4324_s17 = int_to_ptr.hbm [resolvable:$true] %s4323_s17 }
  0x3d   : > { %v2261_v8 = vadd.f32 %v1237_v6, %v213_v5  ;;  %v1238_v10 = vld [vmem:[%s4786_s26 + $0x18] sm:$0xff]  ;;  %v1239_v13 = vld [vmem:[%s4786_s26 + $0x20] sm:$0xff]  ;;  %v216_v14 = vld [vmem:[%s4779_s14 + $0x28] sm:$0xff]  ;;  %s4576_s29 = sshra.s32 %s4324_s17, 4  ;;  %s4582_s24 = scalar_lea.hbm %s7902_s2, 16384  ;;  %s4577_s29 = int_to_ptr.hbm [resolvable:$true] %s4576_s29 }
  0x3e   : > { %3283 = vst [vmem:[%s4801_s20] sm:$0xff] %v2259_v3  ;;  %v2262_v12 = vadd.f32 %v1238_v10, %v214_v9  ;;  %v1240_v15 = vld [vmem:[%s4786_s26 + $0x28] sm:$0xff]  ;;  %v2263_v16 = vadd.f32 %v1239_v13, %v215_v11  ;;  %v217_v18 = vld [vmem:[%s4779_s14 + $0x30] sm:$0xff]  ;;  %v218_v20 = vld [vmem:[%s4779_s14 + $0x38] sm:$0xff]  ;;  %s4578_s3 = scalar_lea.hbm %s4577_s29, 8192  ;;  %p4583_p10 = scmp.lt.s32.totalorder %s4577_s29, %s7902_s2 }
  0x3f   : > { %3284 = vst [vmem:[%s4801_s20 + $0x8] sm:$0xff] %v2260_v7  ;;  %v2264_v17 = vadd.f32 %v1240_v15, %v216_v14  ;;  %v1241_v19 = vld [vmem:[%s4786_s26 + $0x30] sm:$0xff]  ;;  %v1242_v22 = vld [vmem:[%s4786_s26 + $0x38] sm:$0xff]  ;;  %v219_v23 = vld [vmem:[%s4779_s14 + $0x40] sm:$0xff]  ;;  %p4579_p6 = scmp.ne.s32.totalorder %s4577_s29, %s4578_s3  ;;  %p4584_p2 = scmp.lt.s32.totalorder %s4582_s24, %s4578_s3 }
  0x40   : > { %3285 = vst [vmem:[%s4801_s20 + $0x10] sm:$0xff] %v2261_v8  ;;  %v2265_v21 = vadd.f32 %v1241_v19, %v217_v18  ;;  %v1243_v24 = vld [vmem:[%s4786_s26 + $0x40] sm:$0xff]  ;;  %v2266_v25 = vadd.f32 %v1242_v22, %v218_v20  ;;  %v220_v26 = vld [vmem:[%s4779_s14 + $0x48] sm:$0xff]  ;;  %v221_v28 = vld [vmem:[%s4779_s14 + $0x50] sm:$0xff] }
  0x41   : > { %3286 = vst [vmem:[%s4801_s20 + $0x18] sm:$0xff] %v2262_v12  ;;  %v1244_v27 = vld [vmem:[%s4786_s26 + $0x48] sm:$0xff]  ;;  %v2267_v29 = vadd.f32 %v1243_v24, %v219_v23  ;;  %v1245_v30 = vld [vmem:[%s4786_s26 + $0x50] sm:$0xff]  ;;  %v222_v31 = vld [vmem:[%s4779_s14 + $0x58] sm:$0xff]  ;;  %p4580_p13 = pnand %p4579_p6, %p4703_p11  ;;  %p4585_p9 = por %p4584_p2, %p4583_p10 }
  0x42   : > { %3287 = vst [vmem:[%s4801_s20 + $0x20] sm:$0xff] %v2263_v16  ;;  %v1246_v32 = vld [vmem:[%s4786_s26 + $0x58] sm:$0xff]  ;;  %v2268_v33 = vadd.f32 %v1244_v27, %v220_v26  ;;  %v223_v34 = vld [vmem:[%s4779_s14 + $0x60] sm:$0xff]  ;;  %v2269_v36 = vadd.f32 %v1245_v30, %v221_v28  ;;  %v224_v37 = vld [vmem:[%s4779_s14 + $0x68] sm:$0xff] }
  0x43   : > { %3288 = vst [vmem:[%s4801_s20 + $0x28] sm:$0xff] %v2264_v17  ;;  %v1247_v35 = vld [vmem:[%s4786_s26 + $0x60] sm:$0xff]  ;;  %v1248_v38 = vld [vmem:[%s4786_s26 + $0x68] sm:$0xff]  ;;  %v2270_v39 = vadd.f32 %v1246_v32, %v222_v31  ;;  %v225_v40 = vld [vmem:[%s4779_s14 + $0x70] sm:$0xff]  ;;  %p4581_p3 = pneg %p4580_p13 }
  0x44   : > { %3289 = vst [vmem:[%s4801_s20 + $0x30] sm:$0xff] %v2265_v21  ;;  %v1249_v41 = vld [vmem:[%s4786_s26 + $0x70] sm:$0xff]  ;;  %v2271_v42 = vadd.f32 %v1247_v35, %v223_v34  ;;  %v226_v43 = vld [vmem:[%s4779_s14 + $0x78] sm:$0xff]  ;;  %v2272_v45 = vadd.f32 %v1248_v38, %v224_v37  ;;  %v227_v46 = vld [vmem:[%s4779_s14 + $0x80] sm:$0xff] }
  0x45   : > { %3290 = vst [vmem:[%s4801_s20 + $0x38] sm:$0xff] %v2266_v25  ;;  %v1250_v44 = vld [vmem:[%s4786_s26 + $0x78] sm:$0xff]  ;;  %v1251_v47 = vld [vmem:[%s4786_s26 + $0x80] sm:$0xff]  ;;  %v2273_v48 = vadd.f32 %v1249_v41, %v225_v40  ;;  %v228_v49 = vld [vmem:[%s4779_s14 + $0x88] sm:$0xff]  ;;  %p4586_p0 = pnand %p4585_p9, %p4581_p3 }
  0x46   : > { %3291 = vst [vmem:[%s4801_s20 + $0x40] sm:$0xff] %v2267_v29  ;;  %v1252_v50 = vld [vmem:[%s4786_s26 + $0x88] sm:$0xff]  ;;  %v2274_v51 = vadd.f32 %v1250_v44, %v226_v43  ;;  %v229_v52 = vld [vmem:[%s4779_s14 + $0x90] sm:$0xff]  ;;  %v2275_v54 = vadd.f32 %v1251_v47, %v227_v46  ;;  %v230_v55 = vld [vmem:[%s4779_s14 + $0x98] sm:$0xff] }
  0x47   : > { %3292 = vst [vmem:[%s4801_s20 + $0x48] sm:$0xff] %v2268_v33  ;;  %v1253_v53 = vld [vmem:[%s4786_s26 + $0x90] sm:$0xff]  ;;  %v1254_v56 = vld [vmem:[%s4786_s26 + $0x98] sm:$0xff]  ;;  %v2276_v57 = vadd.f32 %v1252_v50, %v228_v49  ;;  %v231_v58 = vld [vmem:[%s4779_s14 + $0xa0] sm:$0xff] }
  0x48   : > { %3293 = vst [vmem:[%s4801_s20 + $0x50] sm:$0xff] %v2269_v36  ;;  %v1255_v59 = vld [vmem:[%s4786_s26 + $0xa0] sm:$0xff]  ;;  %v2277_v60 = vadd.f32 %v1253_v53, %v229_v52  ;;  %v232_v61 = vld [vmem:[%s4779_s14 + $0xa8] sm:$0xff]  ;;  %v2278_v63 = vadd.f32 %v1254_v56, %v230_v55  ;;  %v233_v0 = vld [vmem:[%s4779_s14 + $0xb0] sm:$0xff] }
  0x49   : > { %3294 = vst [vmem:[%s4801_s20 + $0x58] sm:$0xff] %v2270_v39  ;;  %v1256_v62 = vld [vmem:[%s4786_s26 + $0xa8] sm:$0xff]  ;;  %v1257_v1 = vld [vmem:[%s4786_s26 + $0xb0] sm:$0xff]  ;;  %v2279_v2 = vadd.f32 %v1255_v59, %v231_v58  ;;  %v234_v3 = vld [vmem:[%s4779_s14 + $0xb8] sm:$0xff] }
  0x4a   : > { %3295 = vst [vmem:[%s4801_s20 + $0x60] sm:$0xff] %v2271_v42  ;;  %v1258_v4 = vld [vmem:[%s4786_s26 + $0xb8] sm:$0xff]  ;;  %v2280_v5 = vadd.f32 %v1256_v62, %v232_v61  ;;  %v235_v6 = vld [vmem:[%s4779_s14 + $0xc0] sm:$0xff]  ;;  %v2281_v8 = vadd.f32 %v1257_v1, %v233_v0  ;;  %v236_v9 = vld [vmem:[%s4779_s14 + $0xc8] sm:$0xff] }
  0x4b   : > { %3296 = vst [vmem:[%s4801_s20 + $0x68] sm:$0xff] %v2272_v45  ;;  %v1259_v7 = vld [vmem:[%s4786_s26 + $0xc0] sm:$0xff]  ;;  %v1260_v10 = vld [vmem:[%s4786_s26 + $0xc8] sm:$0xff]  ;;  %v2282_v11 = vadd.f32 %v1258_v4, %v234_v3  ;;  %v237_v12 = vld [vmem:[%s4779_s14 + $0xd0] sm:$0xff] }
  0x4c   : > { %3297 = vst [vmem:[%s4801_s20 + $0x70] sm:$0xff] %v2273_v48  ;;  %v1261_v13 = vld [vmem:[%s4786_s26 + $0xd0] sm:$0xff]  ;;  %v2283_v14 = vadd.f32 %v1259_v7, %v235_v6  ;;  %v238_v15 = vld [vmem:[%s4779_s14 + $0xd8] sm:$0xff]  ;;  %v2284_v17 = vadd.f32 %v1260_v10, %v236_v9  ;;  %v239_v18 = vld [vmem:[%s4779_s14 + $0xe0] sm:$0xff] }
  0x4d   : > { %3298 = vst [vmem:[%s4801_s20 + $0x78] sm:$0xff] %v2274_v51  ;;  %v1262_v16 = vld [vmem:[%s4786_s26 + $0xd8] sm:$0xff]  ;;  %v1263_v19 = vld [vmem:[%s4786_s26 + $0xe0] sm:$0xff]  ;;  %v2285_v20 = vadd.f32 %v1261_v13, %v237_v12  ;;  %v240_v21 = vld [vmem:[%s4779_s14 + $0xe8] sm:$0xff] }
  0x4e   : > { %3299 = vst [vmem:[%s4801_s20 + $0x80] sm:$0xff] %v2275_v54  ;;  %v1264_v22 = vld [vmem:[%s4786_s26 + $0xe8] sm:$0xff]  ;;  %v2286_v23 = vadd.f32 %v1262_v16, %v238_v15  ;;  %v241_v24 = vld [vmem:[%s4779_s14 + $0xf0] sm:$0xff]  ;;  %v2287_v26 = vadd.f32 %v1263_v19, %v239_v18  ;;  %v242_v27 = vld [vmem:[%s4779_s14 + $0xf8] sm:$0xff] }
  0x4f   : > { %3300 = vst [vmem:[%s4801_s20 + $0x88] sm:$0xff] %v2276_v57  ;;  %v1265_v25 = vld [vmem:[%s4786_s26 + $0xf0] sm:$0xff]  ;;  %v1266_v28 = vld [vmem:[%s4786_s26 + $0xf8] sm:$0xff]  ;;  %v2288_v29 = vadd.f32 %v1264_v22, %v240_v21  ;;  %v243_v30 = vld [vmem:[%s4779_s14 + $0x100] sm:$0xff] }
  0x50   : > { %3301 = vst [vmem:[%s4801_s20 + $0x90] sm:$0xff] %v2277_v60  ;;  %v1267_v31 = vld [vmem:[%s4786_s26 + $0x100] sm:$0xff]  ;;  %v2289_v32 = vadd.f32 %v1265_v25, %v241_v24  ;;  %v244_v33 = vld [vmem:[%s4779_s14 + $0x108] sm:$0xff]  ;;  %v2290_v35 = vadd.f32 %v1266_v28, %v242_v27  ;;  %v245_v36 = vld [vmem:[%s4779_s14 + $0x110] sm:$0xff] }
  0x51   : > { %3302 = vst [vmem:[%s4801_s20 + $0x98] sm:$0xff] %v2278_v63  ;;  %v1268_v34 = vld [vmem:[%s4786_s26 + $0x108] sm:$0xff]  ;;  %v1269_v37 = vld [vmem:[%s4786_s26 + $0x110] sm:$0xff]  ;;  %v2291_v38 = vadd.f32 %v1267_v31, %v243_v30  ;;  %v246_v39 = vld [vmem:[%s4779_s14 + $0x118] sm:$0xff] }
  0x52   : > { %3303 = vst [vmem:[%s4801_s20 + $0xa0] sm:$0xff] %v2279_v2  ;;  %v1270_v40 = vld [vmem:[%s4786_s26 + $0x118] sm:$0xff]  ;;  %v2292_v41 = vadd.f32 %v1268_v34, %v244_v33  ;;  %v247_v42 = vld [vmem:[%s4779_s14 + $0x120] sm:$0xff]  ;;  %v2293_v44 = vadd.f32 %v1269_v37, %v245_v36  ;;  %v248_v45 = vld [vmem:[%s4779_s14 + $0x128] sm:$0xff] }
  0x53   : > { %3304 = vst [vmem:[%s4801_s20 + $0xa8] sm:$0xff] %v2280_v5  ;;  %v1271_v43 = vld [vmem:[%s4786_s26 + $0x120] sm:$0xff]  ;;  %v1272_v46 = vld [vmem:[%s4786_s26 + $0x128] sm:$0xff]  ;;  %v2294_v47 = vadd.f32 %v1270_v40, %v246_v39  ;;  %v249_v48 = vld [vmem:[%s4779_s14 + $0x130] sm:$0xff] }
  0x54   : > { %3305 = vst [vmem:[%s4801_s20 + $0xb0] sm:$0xff] %v2281_v8  ;;  %v1273_v49 = vld [vmem:[%s4786_s26 + $0x130] sm:$0xff]  ;;  %v2295_v50 = vadd.f32 %v1271_v43, %v247_v42  ;;  %v250_v51 = vld [vmem:[%s4779_s14 + $0x138] sm:$0xff]  ;;  %v2296_v53 = vadd.f32 %v1272_v46, %v248_v45  ;;  %v251_v54 = vld [vmem:[%s4779_s14 + $0x140] sm:$0xff] }
  0x55   : > { %3306 = vst [vmem:[%s4801_s20 + $0xb8] sm:$0xff] %v2282_v11  ;;  %v1274_v52 = vld [vmem:[%s4786_s26 + $0x138] sm:$0xff]  ;;  %v1275_v55 = vld [vmem:[%s4786_s26 + $0x140] sm:$0xff]  ;;  %v2297_v56 = vadd.f32 %v1273_v49, %v249_v48  ;;  %v252_v57 = vld [vmem:[%s4779_s14 + $0x148] sm:$0xff] }
  0x56   : > { %3307 = vst [vmem:[%s4801_s20 + $0xc0] sm:$0xff] %v2283_v14  ;;  %v1276_v58 = vld [vmem:[%s4786_s26 + $0x148] sm:$0xff]  ;;  %v2298_v59 = vadd.f32 %v1274_v52, %v250_v51  ;;  %v253_v60 = vld [vmem:[%s4779_s14 + $0x150] sm:$0xff]  ;;  %v2299_v62 = vadd.f32 %v1275_v55, %v251_v54  ;;  %v254_v63 = vld [vmem:[%s4779_s14 + $0x158] sm:$0xff] }
  0x57   : > { %3308 = vst [vmem:[%s4801_s20 + $0xc8] sm:$0xff] %v2284_v17  ;;  %v1277_v61 = vld [vmem:[%s4786_s26 + $0x150] sm:$0xff]  ;;  %v1278_v0 = vld [vmem:[%s4786_s26 + $0x158] sm:$0xff]  ;;  %v2300_v1 = vadd.f32 %v1276_v58, %v252_v57  ;;  %v255_v2 = vld [vmem:[%s4779_s14 + $0x160] sm:$0xff] }
  0x58   : > { %3309 = vst [vmem:[%s4801_s20 + $0xd0] sm:$0xff] %v2285_v20  ;;  %v1279_v3 = vld [vmem:[%s4786_s26 + $0x160] sm:$0xff]  ;;  %v2301_v4 = vadd.f32 %v1277_v61, %v253_v60  ;;  %v256_v5 = vld [vmem:[%s4779_s14 + $0x168] sm:$0xff]  ;;  %v2302_v7 = vadd.f32 %v1278_v0, %v254_v63  ;;  %v257_v8 = vld [vmem:[%s4779_s14 + $0x170] sm:$0xff] }
  0x59   : > { %3310 = vst [vmem:[%s4801_s20 + $0xd8] sm:$0xff] %v2286_v23  ;;  %v1280_v6 = vld [vmem:[%s4786_s26 + $0x168] sm:$0xff]  ;;  %v1281_v9 = vld [vmem:[%s4786_s26 + $0x170] sm:$0xff]  ;;  %v2303_v10 = vadd.f32 %v1279_v3, %v255_v2  ;;  %v258_v11 = vld [vmem:[%s4779_s14 + $0x178] sm:$0xff] }
  0x5a   : > { %3311 = vst [vmem:[%s4801_s20 + $0xe0] sm:$0xff] %v2287_v26  ;;  %v1282_v12 = vld [vmem:[%s4786_s26 + $0x178] sm:$0xff]  ;;  %v2304_v13 = vadd.f32 %v1280_v6, %v256_v5  ;;  %v259_v14 = vld [vmem:[%s4779_s14 + $0x180] sm:$0xff]  ;;  %v2305_v16 = vadd.f32 %v1281_v9, %v257_v8  ;;  %v260_v17 = vld [vmem:[%s4779_s14 + $0x188] sm:$0xff] }
  0x5b   : > { %3312 = vst [vmem:[%s4801_s20 + $0xe8] sm:$0xff] %v2288_v29  ;;  %v1283_v15 = vld [vmem:[%s4786_s26 + $0x180] sm:$0xff]  ;;  %v1284_v18 = vld [vmem:[%s4786_s26 + $0x188] sm:$0xff]  ;;  %v2306_v19 = vadd.f32 %v1282_v12, %v258_v11  ;;  %v261_v20 = vld [vmem:[%s4779_s14 + $0x190] sm:$0xff] }
  0x5c   : > { %3313 = vst [vmem:[%s4801_s20 + $0xf0] sm:$0xff] %v2289_v32  ;;  %v1285_v21 = vld [vmem:[%s4786_s26 + $0x190] sm:$0xff]  ;;  %v2307_v22 = vadd.f32 %v1283_v15, %v259_v14  ;;  %v262_v23 = vld [vmem:[%s4779_s14 + $0x198] sm:$0xff]  ;;  %v2308_v25 = vadd.f32 %v1284_v18, %v260_v17  ;;  %v263_v26 = vld [vmem:[%s4779_s14 + $0x1a0] sm:$0xff] }
  0x5d   : > { %3314 = vst [vmem:[%s4801_s20 + $0xf8] sm:$0xff] %v2290_v35  ;;  %v1286_v24 = vld [vmem:[%s4786_s26 + $0x198] sm:$0xff]  ;;  %v1287_v27 = vld [vmem:[%s4786_s26 + $0x1a0] sm:$0xff]  ;;  %v2309_v28 = vadd.f32 %v1285_v21, %v261_v20  ;;  %v264_v29 = vld [vmem:[%s4779_s14 + $0x1a8] sm:$0xff] }
  0x5e   : > { %3315 = vst [vmem:[%s4801_s20 + $0x100] sm:$0xff] %v2291_v38  ;;  %v1288_v30 = vld [vmem:[%s4786_s26 + $0x1a8] sm:$0xff]  ;;  %v2310_v31 = vadd.f32 %v1286_v24, %v262_v23  ;;  %v265_v32 = vld [vmem:[%s4779_s14 + $0x1b0] sm:$0xff]  ;;  %v2311_v34 = vadd.f32 %v1287_v27, %v263_v26  ;;  %v266_v35 = vld [vmem:[%s4779_s14 + $0x1b8] sm:$0xff] }
  0x5f   : > { %3316 = vst [vmem:[%s4801_s20 + $0x108] sm:$0xff] %v2292_v41  ;;  %v1289_v33 = vld [vmem:[%s4786_s26 + $0x1b0] sm:$0xff]  ;;  %v1290_v36 = vld [vmem:[%s4786_s26 + $0x1b8] sm:$0xff]  ;;  %v2312_v37 = vadd.f32 %v1288_v30, %v264_v29  ;;  %v267_v38 = vld [vmem:[%s4779_s14 + $0x1c0] sm:$0xff] }
  0x60   : > { %3317 = vst [vmem:[%s4801_s20 + $0x110] sm:$0xff] %v2293_v44  ;;  %v1291_v39 = vld [vmem:[%s4786_s26 + $0x1c0] sm:$0xff]  ;;  %v2313_v40 = vadd.f32 %v1289_v33, %v265_v32  ;;  %v268_v41 = vld [vmem:[%s4779_s14 + $0x1c8] sm:$0xff]  ;;  %v2314_v43 = vadd.f32 %v1290_v36, %v266_v35  ;;  %v269_v44 = vld [vmem:[%s4779_s14 + $0x1d0] sm:$0xff] }
  0x61   : > { %3318 = vst [vmem:[%s4801_s20 + $0x118] sm:$0xff] %v2294_v47  ;;  %v1292_v42 = vld [vmem:[%s4786_s26 + $0x1c8] sm:$0xff]  ;;  %v1293_v45 = vld [vmem:[%s4786_s26 + $0x1d0] sm:$0xff]  ;;  %v2315_v46 = vadd.f32 %v1291_v39, %v267_v38  ;;  %v270_v47 = vld [vmem:[%s4779_s14 + $0x1d8] sm:$0xff] }
  0x62   : > { %3319 = vst [vmem:[%s4801_s20 + $0x120] sm:$0xff] %v2295_v50  ;;  %v1294_v48 = vld [vmem:[%s4786_s26 + $0x1d8] sm:$0xff]  ;;  %v2316_v49 = vadd.f32 %v1292_v42, %v268_v41  ;;  %v271_v50 = vld [vmem:[%s4779_s14 + $0x1e0] sm:$0xff]  ;;  %v2317_v52 = vadd.f32 %v1293_v45, %v269_v44  ;;  %v1296_v54 = vld [vmem:[%s4786_s26 + $0x1e8] sm:$0xff] }
  0x63   : > { %3320 = vst [vmem:[%s4801_s20 + $0x128] sm:$0xff] %v2296_v53  ;;  %v1295_v51 = vld [vmem:[%s4786_s26 + $0x1e0] sm:$0xff]  ;;  %v272_v53 = vld [vmem:[%s4779_s14 + $0x1e8] sm:$0xff]  ;;  %v2318_v55 = vadd.f32 %v1294_v48, %v270_v47  ;;  %v1297_v57 = vld [vmem:[%s4786_s26 + $0x1f0] sm:$0xff] }
  0x64   : > { %3321 = vst [vmem:[%s4801_s20 + $0x130] sm:$0xff] %v2297_v56  ;;  %v273_v56 = vld [vmem:[%s4779_s14 + $0x1f0] sm:$0xff]  ;;  %v2319_v58 = vadd.f32 %v1295_v51, %v271_v50  ;;  %v1298_v60 = vld [vmem:[%s4786_s26 + $0x1f8] sm:$0xff]  ;;  %v2320_v61 = vadd.f32 %v1296_v54, %v272_v53  ;;  %v1299_v63 = vld [vmem:[%s4786_s26 + $0x200] sm:$0xff] }
  0x65   : > { %3322 = vst [vmem:[%s4801_s20 + $0x138] sm:$0xff] %v2298_v59  ;;  %v274_v59 = vld [vmem:[%s4779_s14 + $0x1f8] sm:$0xff]  ;;  %v2321_v0 = vadd.f32 %v1297_v57, %v273_v56  ;;  %v1300_v2 = vld [vmem:[%s4786_s26 + $0x208] sm:$0xff]  ;;  %v1301_v5 = vld [vmem:[%s4786_s26 + $0x210] sm:$0xff] }
  0x66   : > { %3323 = vst [vmem:[%s4801_s20 + $0x140] sm:$0xff] %v2299_v62  ;;  %v275_v62 = vld [vmem:[%s4779_s14 + $0x200] sm:$0xff]  ;;  %v2322_v3 = vadd.f32 %v1298_v60, %v274_v59  ;;  %v1302_v8 = vld [vmem:[%s4786_s26 + $0x218] sm:$0xff]  ;;  %v1304_v14 = vld [vmem:[%s4786_s26 + $0x228] sm:$0xff] }
  0x67   : > { %3324 = vst [vmem:[%s4801_s20 + $0x148] sm:$0xff] %v2300_v1  ;;  %v276_v1 = vld [vmem:[%s4779_s14 + $0x208] sm:$0xff]  ;;  %v2323_v6 = vadd.f32 %v1299_v63, %v275_v62  ;;  %v1303_v11 = vld [vmem:[%s4786_s26 + $0x220] sm:$0xff]  ;;  %v1305_v17 = vld [vmem:[%s4786_s26 + $0x230] sm:$0xff] }
  0x68   : > { %3325 = vst [vmem:[%s4801_s20 + $0x150] sm:$0xff] %v2301_v4  ;;  %v277_v4 = vld [vmem:[%s4779_s14 + $0x210] sm:$0xff]  ;;  %v2324_v9 = vadd.f32 %v1300_v2, %v276_v1  ;;  %v1306_v20 = vld [vmem:[%s4786_s26 + $0x238] sm:$0xff]  ;;  %v1307_v23 = vld [vmem:[%s4786_s26 + $0x240] sm:$0xff] }
  0x69   : > { %3326 = vst [vmem:[%s4801_s20 + $0x158] sm:$0xff] %v2302_v7  ;;  %v278_v7 = vld [vmem:[%s4779_s14 + $0x218] sm:$0xff]  ;;  %v2325_v12 = vadd.f32 %v1301_v5, %v277_v4  ;;  %v1308_v26 = vld [vmem:[%s4786_s26 + $0x248] sm:$0xff]  ;;  %v1309_v29 = vld [vmem:[%s4786_s26 + $0x250] sm:$0xff] }
  0x6a   : > { %3327 = vst [vmem:[%s4801_s20 + $0x160] sm:$0xff] %v2303_v10  ;;  %v279_v10 = vld [vmem:[%s4779_s14 + $0x220] sm:$0xff]  ;;  %v2326_v15 = vadd.f32 %v1302_v8, %v278_v7  ;;  %v1310_v32 = vld [vmem:[%s4786_s26 + $0x258] sm:$0xff]  ;;  %v1312_v38 = vld [vmem:[%s4786_s26 + $0x268] sm:$0xff] }
  0x6b   : > { %3328 = vst [vmem:[%s4801_s20 + $0x168] sm:$0xff] %v2304_v13  ;;  %v280_v13 = vld [vmem:[%s4779_s14 + $0x228] sm:$0xff]  ;;  %v2327_v18 = vadd.f32 %v1303_v11, %v279_v10  ;;  %v1311_v35 = vld [vmem:[%s4786_s26 + $0x260] sm:$0xff]  ;;  %v1313_v41 = vld [vmem:[%s4786_s26 + $0x270] sm:$0xff] }
  0x6c   : > { %3329 = vst [vmem:[%s4801_s20 + $0x170] sm:$0xff] %v2305_v16  ;;  %v281_v16 = vld [vmem:[%s4779_s14 + $0x230] sm:$0xff]  ;;  %v2328_v21 = vadd.f32 %v1304_v14, %v280_v13  ;;  %v1314_v44 = vld [vmem:[%s4786_s26 + $0x278] sm:$0xff]  ;;  %v1315_v47 = vld [vmem:[%s4786_s26 + $0x280] sm:$0xff] }
  0x6d   : > { %3330 = vst [vmem:[%s4801_s20 + $0x178] sm:$0xff] %v2306_v19  ;;  %v282_v19 = vld [vmem:[%s4779_s14 + $0x238] sm:$0xff]  ;;  %v2329_v24 = vadd.f32 %v1305_v17, %v281_v16  ;;  %v1316_v50 = vld [vmem:[%s4786_s26 + $0x288] sm:$0xff]  ;;  %v1317_v53 = vld [vmem:[%s4786_s26 + $0x290] sm:$0xff] }
  0x6e   : > { %3331 = vst [vmem:[%s4801_s20 + $0x180] sm:$0xff] %v2307_v22  ;;  %v283_v22 = vld [vmem:[%s4779_s14 + $0x240] sm:$0xff]  ;;  %v2330_v27 = vadd.f32 %v1306_v20, %v282_v19  ;;  %v1318_v56 = vld [vmem:[%s4786_s26 + $0x298] sm:$0xff]  ;;  %v1320_v62 = vld [vmem:[%s4786_s26 + $0x2a8] sm:$0xff] }
  0x6f   : > { %3332 = vst [vmem:[%s4801_s20 + $0x188] sm:$0xff] %v2308_v25  ;;  %v284_v25 = vld [vmem:[%s4779_s14 + $0x248] sm:$0xff]  ;;  %v2331_v30 = vadd.f32 %v1307_v23, %v283_v22  ;;  %v1319_v59 = vld [vmem:[%s4786_s26 + $0x2a0] sm:$0xff]  ;;  %v1321_v1 = vld [vmem:[%s4786_s26 + $0x2b0] sm:$0xff] }
  0x70   : > { %3333 = vst [vmem:[%s4801_s20 + $0x190] sm:$0xff] %v2309_v28  ;;  %v285_v28 = vld [vmem:[%s4779_s14 + $0x250] sm:$0xff]  ;;  %v2332_v33 = vadd.f32 %v1308_v26, %v284_v25  ;;  %v1322_v4 = vld [vmem:[%s4786_s26 + $0x2b8] sm:$0xff]  ;;  %v1323_v7 = vld [vmem:[%s4786_s26 + $0x2c0] sm:$0xff] }
  0x71   : > { %3334 = vst [vmem:[%s4801_s20 + $0x198] sm:$0xff] %v2310_v31  ;;  %v286_v31 = vld [vmem:[%s4779_s14 + $0x258] sm:$0xff]  ;;  %v2333_v36 = vadd.f32 %v1309_v29, %v285_v28  ;;  %v1324_v10 = vld [vmem:[%s4786_s26 + $0x2c8] sm:$0xff]  ;;  %v1325_v13 = vld [vmem:[%s4786_s26 + $0x2d0] sm:$0xff] }
  0x72   : > { %3335 = vst [vmem:[%s4801_s20 + $0x1a0] sm:$0xff] %v2311_v34  ;;  %v287_v34 = vld [vmem:[%s4779_s14 + $0x260] sm:$0xff]  ;;  %v2334_v39 = vadd.f32 %v1310_v32, %v286_v31  ;;  %v1326_v16 = vld [vmem:[%s4786_s26 + $0x2d8] sm:$0xff]  ;;  %v1328_v22 = vld [vmem:[%s4786_s26 + $0x2e8] sm:$0xff] }
  0x73   : > { %3336 = vst [vmem:[%s4801_s20 + $0x1a8] sm:$0xff] %v2312_v37  ;;  %v288_v37 = vld [vmem:[%s4779_s14 + $0x268] sm:$0xff]  ;;  %v2335_v42 = vadd.f32 %v1311_v35, %v287_v34  ;;  %v1327_v19 = vld [vmem:[%s4786_s26 + $0x2e0] sm:$0xff]  ;;  %v1329_v25 = vld [vmem:[%s4786_s26 + $0x2f0] sm:$0xff] }
  0x74   : > { %3337 = vst [vmem:[%s4801_s20 + $0x1b0] sm:$0xff] %v2313_v40  ;;  %v289_v40 = vld [vmem:[%s4779_s14 + $0x270] sm:$0xff]  ;;  %v2336_v45 = vadd.f32 %v1312_v38, %v288_v37  ;;  %v1330_v28 = vld [vmem:[%s4786_s26 + $0x2f8] sm:$0xff]  ;;  %v1331_v31 = vld [vmem:[%s4786_s26 + $0x300] sm:$0xff] }
  0x75   : > { %3338 = vst [vmem:[%s4801_s20 + $0x1b8] sm:$0xff] %v2314_v43  ;;  %v290_v43 = vld [vmem:[%s4779_s14 + $0x278] sm:$0xff]  ;;  %v2337_v48 = vadd.f32 %v1313_v41, %v289_v40  ;;  %v1332_v34 = vld [vmem:[%s4786_s26 + $0x308] sm:$0xff]  ;;  %v1333_v37 = vld [vmem:[%s4786_s26 + $0x310] sm:$0xff] }
  0x76   : > { %3339 = vst [vmem:[%s4801_s20 + $0x1c0] sm:$0xff] %v2315_v46  ;;  %v291_v46 = vld [vmem:[%s4779_s14 + $0x280] sm:$0xff]  ;;  %v2338_v51 = vadd.f32 %v1314_v44, %v290_v43  ;;  %v1334_v40 = vld [vmem:[%s4786_s26 + $0x318] sm:$0xff] }
  0x77   : > { %3340 = vst [vmem:[%s4801_s20 + $0x1c8] sm:$0xff] %v2316_v49  ;;  %v292_v49 = vld [vmem:[%s4779_s14 + $0x288] sm:$0xff]  ;;  %v2339_v54 = vadd.f32 %v1315_v47, %v291_v46  ;;  %v1335_v43 = vld [vmem:[%s4786_s26 + $0x320] sm:$0xff] }
  0x78   : > { %3341 = vst [vmem:[%s4801_s20 + $0x1d0] sm:$0xff] %v2317_v52  ;;  %v293_v52 = vld [vmem:[%s4779_s14 + $0x290] sm:$0xff]  ;;  %v2340_v57 = vadd.f32 %v1316_v50, %v292_v49  ;;  %v1336_v46 = vld [vmem:[%s4786_s26 + $0x328] sm:$0xff] }
  0x79   : > { %3342 = vst [vmem:[%s4801_s20 + $0x1d8] sm:$0xff] %v2318_v55  ;;  %v294_v55 = vld [vmem:[%s4779_s14 + $0x298] sm:$0xff]  ;;  %v2341_v60 = vadd.f32 %v1317_v53, %v293_v52  ;;  %v1337_v49 = vld [vmem:[%s4786_s26 + $0x330] sm:$0xff] }
  0x7a   : > { %3343 = vst [vmem:[%s4801_s20 + $0x1e0] sm:$0xff] %v2319_v58  ;;  %v295_v58 = vld [vmem:[%s4779_s14 + $0x2a0] sm:$0xff]  ;;  %v2342_v63 = vadd.f32 %v1318_v56, %v294_v55  ;;  %v1338_v52 = vld [vmem:[%s4786_s26 + $0x338] sm:$0xff] }
  0x7b   : > { %3344 = vst [vmem:[%s4801_s20 + $0x1e8] sm:$0xff] %v2320_v61  ;;  %v296_v61 = vld [vmem:[%s4779_s14 + $0x2a8] sm:$0xff]  ;;  %v2343_v2 = vadd.f32 %v1319_v59, %v295_v58  ;;  %v1339_v55 = vld [vmem:[%s4786_s26 + $0x340] sm:$0xff] }
  0x7c   : > { %3345 = vst [vmem:[%s4801_s20 + $0x1f0] sm:$0xff] %v2321_v0  ;;  %v297_v0 = vld [vmem:[%s4779_s14 + $0x2b0] sm:$0xff]  ;;  %v2344_v5 = vadd.f32 %v1320_v62, %v296_v61  ;;  %v1340_v58 = vld [vmem:[%s4786_s26 + $0x348] sm:$0xff] }
  0x7d   : > { %3346 = vst [vmem:[%s4801_s20 + $0x1f8] sm:$0xff] %v2322_v3  ;;  %v298_v3 = vld [vmem:[%s4779_s14 + $0x2b8] sm:$0xff]  ;;  %v2345_v8 = vadd.f32 %v1321_v1, %v297_v0  ;;  %v1341_v61 = vld [vmem:[%s4786_s26 + $0x350] sm:$0xff] }
  0x7e   : > { %3347 = vst [vmem:[%s4801_s20 + $0x200] sm:$0xff] %v2323_v6  ;;  %v299_v6 = vld [vmem:[%s4779_s14 + $0x2c0] sm:$0xff]  ;;  %v2346_v11 = vadd.f32 %v1322_v4, %v298_v3  ;;  %v1342_v0 = vld [vmem:[%s4786_s26 + $0x358] sm:$0xff] }
  0x7f   : > { %3348 = vst [vmem:[%s4801_s20 + $0x208] sm:$0xff] %v2324_v9  ;;  %v300_v9 = vld [vmem:[%s4779_s14 + $0x2c8] sm:$0xff]  ;;  %v2347_v14 = vadd.f32 %v1323_v7, %v299_v6  ;;  %v1343_v3 = vld [vmem:[%s4786_s26 + $0x360] sm:$0xff] }
  0x80   : > { %3349 = vst [vmem:[%s4801_s20 + $0x210] sm:$0xff] %v2325_v12  ;;  %v301_v12 = vld [vmem:[%s4779_s14 + $0x2d0] sm:$0xff]  ;;  %v2348_v17 = vadd.f32 %v1324_v10, %v300_v9  ;;  %v1344_v6 = vld [vmem:[%s4786_s26 + $0x368] sm:$0xff] }
  0x81   : > { %3350 = vst [vmem:[%s4801_s20 + $0x218] sm:$0xff] %v2326_v15  ;;  %v302_v15 = vld [vmem:[%s4779_s14 + $0x2d8] sm:$0xff]  ;;  %v2349_v20 = vadd.f32 %v1325_v13, %v301_v12  ;;  %v1345_v9 = vld [vmem:[%s4786_s26 + $0x370] sm:$0xff] }
  0x82   : > { %3351 = vst [vmem:[%s4801_s20 + $0x220] sm:$0xff] %v2327_v18  ;;  %v303_v18 = vld [vmem:[%s4779_s14 + $0x2e0] sm:$0xff]  ;;  %v2350_v23 = vadd.f32 %v1326_v16, %v302_v15  ;;  %v1346_v12 = vld [vmem:[%s4786_s26 + $0x378] sm:$0xff] }
  0x83   : > { %3352 = vst [vmem:[%s4801_s20 + $0x228] sm:$0xff] %v2328_v21  ;;  %v304_v21 = vld [vmem:[%s4779_s14 + $0x2e8] sm:$0xff]  ;;  %v2351_v26 = vadd.f32 %v1327_v19, %v303_v18  ;;  %v1347_v15 = vld [vmem:[%s4786_s26 + $0x380] sm:$0xff] }
  0x84   : > { %3353 = vst [vmem:[%s4801_s20 + $0x230] sm:$0xff] %v2329_v24  ;;  %v305_v24 = vld [vmem:[%s4779_s14 + $0x2f0] sm:$0xff]  ;;  %v2352_v29 = vadd.f32 %v1328_v22, %v304_v21  ;;  %v1348_v18 = vld [vmem:[%s4786_s26 + $0x388] sm:$0xff] }
  0x85   : > { %3354 = vst [vmem:[%s4801_s20 + $0x238] sm:$0xff] %v2330_v27  ;;  %v306_v27 = vld [vmem:[%s4779_s14 + $0x2f8] sm:$0xff]  ;;  %v2353_v32 = vadd.f32 %v1329_v25, %v305_v24  ;;  %v1349_v21 = vld [vmem:[%s4786_s26 + $0x390] sm:$0xff] }
  0x86   : > { %3355 = vst [vmem:[%s4801_s20 + $0x240] sm:$0xff] %v2331_v30  ;;  %v307_v30 = vld [vmem:[%s4779_s14 + $0x300] sm:$0xff]  ;;  %v2354_v35 = vadd.f32 %v1330_v28, %v306_v27  ;;  %v1350_v24 = vld [vmem:[%s4786_s26 + $0x398] sm:$0xff] }
  0x87   : > { %3356 = vst [vmem:[%s4801_s20 + $0x248] sm:$0xff] %v2332_v33  ;;  %v308_v33 = vld [vmem:[%s4779_s14 + $0x308] sm:$0xff]  ;;  %v2355_v38 = vadd.f32 %v1331_v31, %v307_v30  ;;  %v1351_v27 = vld [vmem:[%s4786_s26 + $0x3a0] sm:$0xff] }
  0x88   : > { %3357 = vst [vmem:[%s4801_s20 + $0x250] sm:$0xff] %v2333_v36  ;;  %v309_v36 = vld [vmem:[%s4779_s14 + $0x310] sm:$0xff]  ;;  %v2356_v41 = vadd.f32 %v1332_v34, %v308_v33  ;;  %v1352_v30 = vld [vmem:[%s4786_s26 + $0x3a8] sm:$0xff] }
  0x89   : > { %3358 = vst [vmem:[%s4801_s20 + $0x258] sm:$0xff] %v2334_v39  ;;  %v310_v39 = vld [vmem:[%s4779_s14 + $0x318] sm:$0xff]  ;;  %v2357_v44 = vadd.f32 %v1333_v37, %v309_v36  ;;  %v1353_v33 = vld [vmem:[%s4786_s26 + $0x3b0] sm:$0xff] }
  0x8a   : > { %3359 = vst [vmem:[%s4801_s20 + $0x260] sm:$0xff] %v2335_v42  ;;  %v311_v42 = vld [vmem:[%s4779_s14 + $0x320] sm:$0xff]  ;;  %v2358_v47 = vadd.f32 %v1334_v40, %v310_v39  ;;  %v1354_v36 = vld [vmem:[%s4786_s26 + $0x3b8] sm:$0xff] }
  0x8b   : > { %3360 = vst [vmem:[%s4801_s20 + $0x268] sm:$0xff] %v2336_v45  ;;  %v312_v45 = vld [vmem:[%s4779_s14 + $0x328] sm:$0xff]  ;;  %v2359_v50 = vadd.f32 %v1335_v43, %v311_v42  ;;  %v1355_v39 = vld [vmem:[%s4786_s26 + $0x3c0] sm:$0xff] }
  0x8c   : > { %3361 = vst [vmem:[%s4801_s20 + $0x270] sm:$0xff] %v2337_v48  ;;  %v313_v48 = vld [vmem:[%s4779_s14 + $0x330] sm:$0xff]  ;;  %v2360_v53 = vadd.f32 %v1336_v46, %v312_v45  ;;  %v1356_v42 = vld [vmem:[%s4786_s26 + $0x3c8] sm:$0xff] }
  0x8d   : > { %3362 = vst [vmem:[%s4801_s20 + $0x278] sm:$0xff] %v2338_v51  ;;  %v314_v51 = vld [vmem:[%s4779_s14 + $0x338] sm:$0xff]  ;;  %v2361_v56 = vadd.f32 %v1337_v49, %v313_v48  ;;  %v1357_v45 = vld [vmem:[%s4786_s26 + $0x3d0] sm:$0xff] }
  0x8e   : > { %3363 = vst [vmem:[%s4801_s20 + $0x280] sm:$0xff] %v2339_v54  ;;  %v315_v54 = vld [vmem:[%s4779_s14 + $0x340] sm:$0xff]  ;;  %v2362_v59 = vadd.f32 %v1338_v52, %v314_v51  ;;  %v1358_v48 = vld [vmem:[%s4786_s26 + $0x3d8] sm:$0xff] }
  0x8f   : > { %3364 = vst [vmem:[%s4801_s20 + $0x288] sm:$0xff] %v2340_v57  ;;  %v316_v57 = vld [vmem:[%s4779_s14 + $0x348] sm:$0xff]  ;;  %v2363_v62 = vadd.f32 %v1339_v55, %v315_v54  ;;  %v1359_v51 = vld [vmem:[%s4786_s26 + $0x3e0] sm:$0xff] }
  0x90   : > { %3365 = vst [vmem:[%s4801_s20 + $0x290] sm:$0xff] %v2341_v60  ;;  %v317_v60 = vld [vmem:[%s4779_s14 + $0x350] sm:$0xff]  ;;  %v2364_v1 = vadd.f32 %v1340_v58, %v316_v57  ;;  %v1360_v54 = vld [vmem:[%s4786_s26 + $0x3e8] sm:$0xff] }
  0x91   : > { %3366 = vst [vmem:[%s4801_s20 + $0x298] sm:$0xff] %v2342_v63  ;;  %v318_v63 = vld [vmem:[%s4779_s14 + $0x358] sm:$0xff]  ;;  %v2365_v4 = vadd.f32 %v1341_v61, %v317_v60  ;;  %v1361_v57 = vld [vmem:[%s4786_s26 + $0x3f0] sm:$0xff] }
  0x92   : > { %3367 = vst [vmem:[%s4801_s20 + $0x2a0] sm:$0xff] %v2343_v2  ;;  %v319_v2 = vld [vmem:[%s4779_s14 + $0x360] sm:$0xff]  ;;  %v2366_v7 = vadd.f32 %v1342_v0, %v318_v63  ;;  %v1362_v60 = vld [vmem:[%s4786_s26 + $0x3f8] sm:$0xff] }
  0x93   : > { %3368 = vst [vmem:[%s4801_s20 + $0x2a8] sm:$0xff] %v2344_v5  ;;  %v320_v5 = vld [vmem:[%s4779_s14 + $0x368] sm:$0xff]  ;;  %v2367_v10 = vadd.f32 %v1343_v3, %v319_v2  ;;  %v1363_v63 = vld [vmem:[%s4786_s26 + $0x400] sm:$0xff] }
  0x94   : > { %3369 = vst [vmem:[%s4801_s20 + $0x2b0] sm:$0xff] %v2345_v8  ;;  %v321_v8 = vld [vmem:[%s4779_s14 + $0x370] sm:$0xff]  ;;  %v2368_v13 = vadd.f32 %v1344_v6, %v320_v5  ;;  %v1364_v2 = vld [vmem:[%s4786_s26 + $0x408] sm:$0xff] }
  0x95   : > { %3370 = vst [vmem:[%s4801_s20 + $0x2b8] sm:$0xff] %v2346_v11  ;;  %v322_v11 = vld [vmem:[%s4779_s14 + $0x378] sm:$0xff]  ;;  %v2369_v16 = vadd.f32 %v1345_v9, %v321_v8  ;;  %v1365_v5 = vld [vmem:[%s4786_s26 + $0x410] sm:$0xff] }
  0x96   : > { %3371 = vst [vmem:[%s4801_s20 + $0x2c0] sm:$0xff] %v2347_v14  ;;  %v323_v14 = vld [vmem:[%s4779_s14 + $0x380] sm:$0xff]  ;;  %v2370_v19 = vadd.f32 %v1346_v12, %v322_v11  ;;  %v1366_v8 = vld [vmem:[%s4786_s26 + $0x418] sm:$0xff] }
  0x97   : > { %3372 = vst [vmem:[%s4801_s20 + $0x2c8] sm:$0xff] %v2348_v17  ;;  %v324_v17 = vld [vmem:[%s4779_s14 + $0x388] sm:$0xff]  ;;  %v2371_v22 = vadd.f32 %v1347_v15, %v323_v14  ;;  %v1367_v11 = vld [vmem:[%s4786_s26 + $0x420] sm:$0xff] }
  0x98   : > { %3373 = vst [vmem:[%s4801_s20 + $0x2d0] sm:$0xff] %v2349_v20  ;;  %v325_v20 = vld [vmem:[%s4779_s14 + $0x390] sm:$0xff]  ;;  %v2372_v25 = vadd.f32 %v1348_v18, %v324_v17  ;;  %v1368_v14 = vld [vmem:[%s4786_s26 + $0x428] sm:$0xff] }
  0x99   : > { %3374 = vst [vmem:[%s4801_s20 + $0x2d8] sm:$0xff] %v2350_v23  ;;  %v326_v23 = vld [vmem:[%s4779_s14 + $0x398] sm:$0xff]  ;;  %v2373_v28 = vadd.f32 %v1349_v21, %v325_v20  ;;  %v1369_v17 = vld [vmem:[%s4786_s26 + $0x430] sm:$0xff] }
  0x9a   : > { %3375 = vst [vmem:[%s4801_s20 + $0x2e0] sm:$0xff] %v2351_v26  ;;  %v327_v26 = vld [vmem:[%s4779_s14 + $0x3a0] sm:$0xff]  ;;  %v2374_v31 = vadd.f32 %v1350_v24, %v326_v23  ;;  %v1370_v20 = vld [vmem:[%s4786_s26 + $0x438] sm:$0xff] }
  0x9b   : > { %3376 = vst [vmem:[%s4801_s20 + $0x2e8] sm:$0xff] %v2352_v29  ;;  %v328_v29 = vld [vmem:[%s4779_s14 + $0x3a8] sm:$0xff]  ;;  %v2375_v34 = vadd.f32 %v1351_v27, %v327_v26  ;;  %v1371_v23 = vld [vmem:[%s4786_s26 + $0x440] sm:$0xff] }
  0x9c   : > { %3377 = vst [vmem:[%s4801_s20 + $0x2f0] sm:$0xff] %v2353_v32  ;;  %v329_v32 = vld [vmem:[%s4779_s14 + $0x3b0] sm:$0xff]  ;;  %v2376_v37 = vadd.f32 %v1352_v30, %v328_v29  ;;  %v1372_v26 = vld [vmem:[%s4786_s26 + $0x448] sm:$0xff] }
  0x9d   : > { %3378 = vst [vmem:[%s4801_s20 + $0x2f8] sm:$0xff] %v2354_v35  ;;  %v330_v35 = vld [vmem:[%s4779_s14 + $0x3b8] sm:$0xff]  ;;  %v2377_v40 = vadd.f32 %v1353_v33, %v329_v32  ;;  %v1373_v29 = vld [vmem:[%s4786_s26 + $0x450] sm:$0xff] }
  0x9e   : > { %3379 = vst [vmem:[%s4801_s20 + $0x300] sm:$0xff] %v2355_v38  ;;  %v331_v38 = vld [vmem:[%s4779_s14 + $0x3c0] sm:$0xff]  ;;  %v2378_v43 = vadd.f32 %v1354_v36, %v330_v35  ;;  %v1374_v32 = vld [vmem:[%s4786_s26 + $0x458] sm:$0xff] }
  0x9f   : > { %3380 = vst [vmem:[%s4801_s20 + $0x308] sm:$0xff] %v2356_v41  ;;  %v332_v41 = vld [vmem:[%s4779_s14 + $0x3c8] sm:$0xff]  ;;  %v2379_v46 = vadd.f32 %v1355_v39, %v331_v38  ;;  %v1375_v35 = vld [vmem:[%s4786_s26 + $0x460] sm:$0xff] }
  0xa0   : > { %3381 = vst [vmem:[%s4801_s20 + $0x310] sm:$0xff] %v2357_v44  ;;  %v333_v44 = vld [vmem:[%s4779_s14 + $0x3d0] sm:$0xff]  ;;  %v2380_v49 = vadd.f32 %v1356_v42, %v332_v41  ;;  %v1376_v38 = vld [vmem:[%s4786_s26 + $0x468] sm:$0xff] }
  0xa1   : > { %3382 = vst [vmem:[%s4801_s20 + $0x318] sm:$0xff] %v2358_v47  ;;  %v334_v47 = vld [vmem:[%s4779_s14 + $0x3d8] sm:$0xff]  ;;  %v2381_v52 = vadd.f32 %v1357_v45, %v333_v44  ;;  %v1377_v41 = vld [vmem:[%s4786_s26 + $0x470] sm:$0xff] }
  0xa2   : > { %3383 = vst [vmem:[%s4801_s20 + $0x320] sm:$0xff] %v2359_v50  ;;  %v335_v50 = vld [vmem:[%s4779_s14 + $0x3e0] sm:$0xff]  ;;  %v2382_v55 = vadd.f32 %v1358_v48, %v334_v47  ;;  %v1378_v44 = vld [vmem:[%s4786_s26 + $0x478] sm:$0xff] }
  0xa3   : > { %3384 = vst [vmem:[%s4801_s20 + $0x328] sm:$0xff] %v2360_v53  ;;  %v336_v53 = vld [vmem:[%s4779_s14 + $0x3e8] sm:$0xff]  ;;  %v2383_v58 = vadd.f32 %v1359_v51, %v335_v50  ;;  %v1379_v47 = vld [vmem:[%s4786_s26 + $0x480] sm:$0xff] }
  0xa4   : > { %3385 = vst [vmem:[%s4801_s20 + $0x330] sm:$0xff] %v2361_v56  ;;  %v337_v56 = vld [vmem:[%s4779_s14 + $0x3f0] sm:$0xff]  ;;  %v2384_v61 = vadd.f32 %v1360_v54, %v336_v53  ;;  %v1380_v50 = vld [vmem:[%s4786_s26 + $0x488] sm:$0xff] }
  0xa5   : > { %3386 = vst [vmem:[%s4801_s20 + $0x338] sm:$0xff] %v2362_v59  ;;  %v338_v59 = vld [vmem:[%s4779_s14 + $0x3f8] sm:$0xff]  ;;  %v2385_v0 = vadd.f32 %v1361_v57, %v337_v56  ;;  %v1381_v53 = vld [vmem:[%s4786_s26 + $0x490] sm:$0xff] }
  0xa6   : > { %3387 = vst [vmem:[%s4801_s20 + $0x340] sm:$0xff] %v2363_v62  ;;  %v339_v62 = vld [vmem:[%s4779_s14 + $0x400] sm:$0xff]  ;;  %v2386_v3 = vadd.f32 %v1362_v60, %v338_v59  ;;  %v1382_v56 = vld [vmem:[%s4786_s26 + $0x498] sm:$0xff] }
  0xa7   : > { %3388 = vst [vmem:[%s4801_s20 + $0x348] sm:$0xff] %v2364_v1  ;;  %v340_v1 = vld [vmem:[%s4779_s14 + $0x408] sm:$0xff]  ;;  %v2387_v6 = vadd.f32 %v1363_v63, %v339_v62  ;;  %v1383_v59 = vld [vmem:[%s4786_s26 + $0x4a0] sm:$0xff] }
  0xa8   : > { %3389 = vst [vmem:[%s4801_s20 + $0x350] sm:$0xff] %v2365_v4  ;;  %v341_v4 = vld [vmem:[%s4779_s14 + $0x410] sm:$0xff]  ;;  %v2388_v9 = vadd.f32 %v1364_v2, %v340_v1  ;;  %v1384_v62 = vld [vmem:[%s4786_s26 + $0x4a8] sm:$0xff] }
  0xa9   : > { %3390 = vst [vmem:[%s4801_s20 + $0x358] sm:$0xff] %v2366_v7  ;;  %v342_v7 = vld [vmem:[%s4779_s14 + $0x418] sm:$0xff]  ;;  %v2389_v12 = vadd.f32 %v1365_v5, %v341_v4  ;;  %v1385_v1 = vld [vmem:[%s4786_s26 + $0x4b0] sm:$0xff] }
  0xaa   : > { %3391 = vst [vmem:[%s4801_s20 + $0x360] sm:$0xff] %v2367_v10  ;;  %v343_v10 = vld [vmem:[%s4779_s14 + $0x420] sm:$0xff]  ;;  %v2390_v15 = vadd.f32 %v1366_v8, %v342_v7  ;;  %v1386_v4 = vld [vmem:[%s4786_s26 + $0x4b8] sm:$0xff] }
  0xab   : > { %3392 = vst [vmem:[%s4801_s20 + $0x368] sm:$0xff] %v2368_v13  ;;  %v344_v13 = vld [vmem:[%s4779_s14 + $0x428] sm:$0xff]  ;;  %v2391_v18 = vadd.f32 %v1367_v11, %v343_v10  ;;  %v1387_v7 = vld [vmem:[%s4786_s26 + $0x4c0] sm:$0xff] }
  0xac   : > { %3393 = vst [vmem:[%s4801_s20 + $0x370] sm:$0xff] %v2369_v16  ;;  %v345_v16 = vld [vmem:[%s4779_s14 + $0x430] sm:$0xff]  ;;  %v2392_v21 = vadd.f32 %v1368_v14, %v344_v13  ;;  %v1388_v10 = vld [vmem:[%s4786_s26 + $0x4c8] sm:$0xff] }
  0xad   : > { %3394 = vst [vmem:[%s4801_s20 + $0x378] sm:$0xff] %v2370_v19  ;;  %v346_v19 = vld [vmem:[%s4779_s14 + $0x438] sm:$0xff]  ;;  %v2393_v24 = vadd.f32 %v1369_v17, %v345_v16  ;;  %v1389_v13 = vld [vmem:[%s4786_s26 + $0x4d0] sm:$0xff] }
  0xae   : > { %3395 = vst [vmem:[%s4801_s20 + $0x380] sm:$0xff] %v2371_v22  ;;  %v347_v22 = vld [vmem:[%s4779_s14 + $0x440] sm:$0xff]  ;;  %v2394_v27 = vadd.f32 %v1370_v20, %v346_v19  ;;  %v1390_v16 = vld [vmem:[%s4786_s26 + $0x4d8] sm:$0xff] }
  0xaf   : > { %3396 = vst [vmem:[%s4801_s20 + $0x388] sm:$0xff] %v2372_v25  ;;  %v348_v25 = vld [vmem:[%s4779_s14 + $0x448] sm:$0xff]  ;;  %v2395_v30 = vadd.f32 %v1371_v23, %v347_v22  ;;  %v1391_v19 = vld [vmem:[%s4786_s26 + $0x4e0] sm:$0xff] }
  0xb0   : > { %3397 = vst [vmem:[%s4801_s20 + $0x390] sm:$0xff] %v2373_v28  ;;  %v349_v28 = vld [vmem:[%s4779_s14 + $0x450] sm:$0xff]  ;;  %v2396_v33 = vadd.f32 %v1372_v26, %v348_v25  ;;  %v1392_v22 = vld [vmem:[%s4786_s26 + $0x4e8] sm:$0xff] }
  0xb1   : > { %3398 = vst [vmem:[%s4801_s20 + $0x398] sm:$0xff] %v2374_v31  ;;  %v350_v31 = vld [vmem:[%s4779_s14 + $0x458] sm:$0xff]  ;;  %v2397_v36 = vadd.f32 %v1373_v29, %v349_v28  ;;  %v1393_v25 = vld [vmem:[%s4786_s26 + $0x4f0] sm:$0xff] }
  0xb2   : > { %3399 = vst [vmem:[%s4801_s20 + $0x3a0] sm:$0xff] %v2375_v34  ;;  %v351_v34 = vld [vmem:[%s4779_s14 + $0x460] sm:$0xff]  ;;  %v2398_v39 = vadd.f32 %v1374_v32, %v350_v31  ;;  %v1394_v28 = vld [vmem:[%s4786_s26 + $0x4f8] sm:$0xff] }
  0xb3   : > { %3400 = vst [vmem:[%s4801_s20 + $0x3a8] sm:$0xff] %v2376_v37  ;;  %v352_v37 = vld [vmem:[%s4779_s14 + $0x468] sm:$0xff]  ;;  %v2399_v42 = vadd.f32 %v1375_v35, %v351_v34  ;;  %v1395_v31 = vld [vmem:[%s4786_s26 + $0x500] sm:$0xff] }
  0xb4   : > { %3401 = vst [vmem:[%s4801_s20 + $0x3b0] sm:$0xff] %v2377_v40  ;;  %v353_v40 = vld [vmem:[%s4779_s14 + $0x470] sm:$0xff]  ;;  %v2400_v45 = vadd.f32 %v1376_v38, %v352_v37  ;;  %v1396_v34 = vld [vmem:[%s4786_s26 + $0x508] sm:$0xff] }
  0xb5   : > { %3402 = vst [vmem:[%s4801_s20 + $0x3b8] sm:$0xff] %v2378_v43  ;;  %v354_v43 = vld [vmem:[%s4779_s14 + $0x478] sm:$0xff]  ;;  %v2401_v48 = vadd.f32 %v1377_v41, %v353_v40  ;;  %v1397_v37 = vld [vmem:[%s4786_s26 + $0x510] sm:$0xff] }
  0xb6   : > { %3403 = vst [vmem:[%s4801_s20 + $0x3c0] sm:$0xff] %v2379_v46  ;;  %v355_v46 = vld [vmem:[%s4779_s14 + $0x480] sm:$0xff]  ;;  %v2402_v51 = vadd.f32 %v1378_v44, %v354_v43  ;;  %v1398_v40 = vld [vmem:[%s4786_s26 + $0x518] sm:$0xff] }
  0xb7   : > { %3404 = vst [vmem:[%s4801_s20 + $0x3c8] sm:$0xff] %v2380_v49  ;;  %v356_v49 = vld [vmem:[%s4779_s14 + $0x488] sm:$0xff]  ;;  %v2403_v54 = vadd.f32 %v1379_v47, %v355_v46  ;;  %v1399_v43 = vld [vmem:[%s4786_s26 + $0x520] sm:$0xff] }
  0xb8   : > { %3405 = vst [vmem:[%s4801_s20 + $0x3d0] sm:$0xff] %v2381_v52  ;;  %v357_v52 = vld [vmem:[%s4779_s14 + $0x490] sm:$0xff]  ;;  %v2404_v57 = vadd.f32 %v1380_v50, %v356_v49  ;;  %v1400_v46 = vld [vmem:[%s4786_s26 + $0x528] sm:$0xff] }
  0xb9   : > { %3406 = vst [vmem:[%s4801_s20 + $0x3d8] sm:$0xff] %v2382_v55  ;;  %v358_v55 = vld [vmem:[%s4779_s14 + $0x498] sm:$0xff]  ;;  %v2405_v60 = vadd.f32 %v1381_v53, %v357_v52  ;;  %v1401_v49 = vld [vmem:[%s4786_s26 + $0x530] sm:$0xff] }
  0xba   : > { %3407 = vst [vmem:[%s4801_s20 + $0x3e0] sm:$0xff] %v2383_v58  ;;  %v359_v58 = vld [vmem:[%s4779_s14 + $0x4a0] sm:$0xff]  ;;  %v2406_v63 = vadd.f32 %v1382_v56, %v358_v55  ;;  %v1402_v52 = vld [vmem:[%s4786_s26 + $0x538] sm:$0xff] }
  0xbb   : > { %3408 = vst [vmem:[%s4801_s20 + $0x3e8] sm:$0xff] %v2384_v61  ;;  %v360_v61 = vld [vmem:[%s4779_s14 + $0x4a8] sm:$0xff]  ;;  %v2407_v2 = vadd.f32 %v1383_v59, %v359_v58  ;;  %v1403_v55 = vld [vmem:[%s4786_s26 + $0x540] sm:$0xff] }
  0xbc   : > { %3409 = vst [vmem:[%s4801_s20 + $0x3f0] sm:$0xff] %v2385_v0  ;;  %v361_v0 = vld [vmem:[%s4779_s14 + $0x4b0] sm:$0xff]  ;;  %v2408_v5 = vadd.f32 %v1384_v62, %v360_v61  ;;  %v1404_v58 = vld [vmem:[%s4786_s26 + $0x548] sm:$0xff] }
  0xbd   : > { %3410 = vst [vmem:[%s4801_s20 + $0x3f8] sm:$0xff] %v2386_v3  ;;  %v362_v3 = vld [vmem:[%s4779_s14 + $0x4b8] sm:$0xff]  ;;  %v2409_v8 = vadd.f32 %v1385_v1, %v361_v0  ;;  %v1405_v61 = vld [vmem:[%s4786_s26 + $0x550] sm:$0xff] }
  0xbe   : > { %3411 = vst [vmem:[%s4801_s20 + $0x400] sm:$0xff] %v2387_v6  ;;  %v363_v6 = vld [vmem:[%s4779_s14 + $0x4c0] sm:$0xff]  ;;  %v2410_v11 = vadd.f32 %v1386_v4, %v362_v3  ;;  %v1406_v0 = vld [vmem:[%s4786_s26 + $0x558] sm:$0xff] }
  0xbf   : > { %3412 = vst [vmem:[%s4801_s20 + $0x408] sm:$0xff] %v2388_v9  ;;  %v364_v9 = vld [vmem:[%s4779_s14 + $0x4c8] sm:$0xff]  ;;  %v2411_v14 = vadd.f32 %v1387_v7, %v363_v6  ;;  %v1407_v3 = vld [vmem:[%s4786_s26 + $0x560] sm:$0xff] }
  0xc0   : > { %3413 = vst [vmem:[%s4801_s20 + $0x410] sm:$0xff] %v2389_v12  ;;  %v365_v12 = vld [vmem:[%s4779_s14 + $0x4d0] sm:$0xff]  ;;  %v2412_v17 = vadd.f32 %v1388_v10, %v364_v9  ;;  %v1408_v6 = vld [vmem:[%s4786_s26 + $0x568] sm:$0xff] }
  0xc1   : > { %3414 = vst [vmem:[%s4801_s20 + $0x418] sm:$0xff] %v2390_v15  ;;  %v366_v15 = vld [vmem:[%s4779_s14 + $0x4d8] sm:$0xff]  ;;  %v2413_v20 = vadd.f32 %v1389_v13, %v365_v12  ;;  %v1409_v9 = vld [vmem:[%s4786_s26 + $0x570] sm:$0xff] }
  0xc2   : > { %3415 = vst [vmem:[%s4801_s20 + $0x420] sm:$0xff] %v2391_v18  ;;  %v367_v18 = vld [vmem:[%s4779_s14 + $0x4e0] sm:$0xff]  ;;  %v2414_v23 = vadd.f32 %v1390_v16, %v366_v15  ;;  %v1410_v12 = vld [vmem:[%s4786_s26 + $0x578] sm:$0xff] }
  0xc3   : > { %3416 = vst [vmem:[%s4801_s20 + $0x428] sm:$0xff] %v2392_v21  ;;  %v368_v21 = vld [vmem:[%s4779_s14 + $0x4e8] sm:$0xff]  ;;  %v2415_v26 = vadd.f32 %v1391_v19, %v367_v18  ;;  %v1411_v15 = vld [vmem:[%s4786_s26 + $0x580] sm:$0xff] }
  0xc4   : > { %3417 = vst [vmem:[%s4801_s20 + $0x430] sm:$0xff] %v2393_v24  ;;  %v369_v24 = vld [vmem:[%s4779_s14 + $0x4f0] sm:$0xff]  ;;  %v2416_v29 = vadd.f32 %v1392_v22, %v368_v21  ;;  %v1412_v18 = vld [vmem:[%s4786_s26 + $0x588] sm:$0xff] }
  0xc5   : > { %3418 = vst [vmem:[%s4801_s20 + $0x438] sm:$0xff] %v2394_v27  ;;  %v370_v27 = vld [vmem:[%s4779_s14 + $0x4f8] sm:$0xff]  ;;  %v2417_v32 = vadd.f32 %v1393_v25, %v369_v24  ;;  %v1413_v21 = vld [vmem:[%s4786_s26 + $0x590] sm:$0xff] }
  0xc6   : > { %3419 = vst [vmem:[%s4801_s20 + $0x440] sm:$0xff] %v2395_v30  ;;  %v371_v30 = vld [vmem:[%s4779_s14 + $0x500] sm:$0xff]  ;;  %v2418_v35 = vadd.f32 %v1394_v28, %v370_v27  ;;  %v1414_v24 = vld [vmem:[%s4786_s26 + $0x598] sm:$0xff] }
  0xc7   : > { %3420 = vst [vmem:[%s4801_s20 + $0x448] sm:$0xff] %v2396_v33  ;;  %v372_v33 = vld [vmem:[%s4779_s14 + $0x508] sm:$0xff]  ;;  %v2419_v38 = vadd.f32 %v1395_v31, %v371_v30  ;;  %v1415_v27 = vld [vmem:[%s4786_s26 + $0x5a0] sm:$0xff] }
  0xc8   : > { %3421 = vst [vmem:[%s4801_s20 + $0x450] sm:$0xff] %v2397_v36  ;;  %v373_v36 = vld [vmem:[%s4779_s14 + $0x510] sm:$0xff]  ;;  %v2420_v41 = vadd.f32 %v1396_v34, %v372_v33  ;;  %v1416_v30 = vld [vmem:[%s4786_s26 + $0x5a8] sm:$0xff] }
  0xc9   : > { %3422 = vst [vmem:[%s4801_s20 + $0x458] sm:$0xff] %v2398_v39  ;;  %v374_v39 = vld [vmem:[%s4779_s14 + $0x518] sm:$0xff]  ;;  %v2421_v44 = vadd.f32 %v1397_v37, %v373_v36  ;;  %v1417_v33 = vld [vmem:[%s4786_s26 + $0x5b0] sm:$0xff] }
  0xca   : > { %3423 = vst [vmem:[%s4801_s20 + $0x460] sm:$0xff] %v2399_v42  ;;  %v375_v42 = vld [vmem:[%s4779_s14 + $0x520] sm:$0xff]  ;;  %v2422_v47 = vadd.f32 %v1398_v40, %v374_v39  ;;  %v1418_v36 = vld [vmem:[%s4786_s26 + $0x5b8] sm:$0xff] }
  0xcb   : > { %3424 = vst [vmem:[%s4801_s20 + $0x468] sm:$0xff] %v2400_v45  ;;  %v376_v45 = vld [vmem:[%s4779_s14 + $0x528] sm:$0xff]  ;;  %v2423_v50 = vadd.f32 %v1399_v43, %v375_v42  ;;  %v1419_v39 = vld [vmem:[%s4786_s26 + $0x5c0] sm:$0xff] }
  0xcc   : > { %3425 = vst [vmem:[%s4801_s20 + $0x470] sm:$0xff] %v2401_v48  ;;  %v377_v48 = vld [vmem:[%s4779_s14 + $0x530] sm:$0xff]  ;;  %v2424_v53 = vadd.f32 %v1400_v46, %v376_v45  ;;  %v1420_v42 = vld [vmem:[%s4786_s26 + $0x5c8] sm:$0xff] }
  0xcd   : > { %3426 = vst [vmem:[%s4801_s20 + $0x478] sm:$0xff] %v2402_v51  ;;  %v378_v51 = vld [vmem:[%s4779_s14 + $0x538] sm:$0xff]  ;;  %v2425_v56 = vadd.f32 %v1401_v49, %v377_v48  ;;  %v1421_v45 = vld [vmem:[%s4786_s26 + $0x5d0] sm:$0xff] }
  0xce   : > { %3427 = vst [vmem:[%s4801_s20 + $0x480] sm:$0xff] %v2403_v54  ;;  %v379_v54 = vld [vmem:[%s4779_s14 + $0x540] sm:$0xff]  ;;  %v2426_v59 = vadd.f32 %v1402_v52, %v378_v51  ;;  %v1422_v48 = vld [vmem:[%s4786_s26 + $0x5d8] sm:$0xff] }
  0xcf   : > { %3428 = vst [vmem:[%s4801_s20 + $0x488] sm:$0xff] %v2404_v57  ;;  %v380_v57 = vld [vmem:[%s4779_s14 + $0x548] sm:$0xff]  ;;  %v2427_v62 = vadd.f32 %v1403_v55, %v379_v54  ;;  %v1423_v51 = vld [vmem:[%s4786_s26 + $0x5e0] sm:$0xff] }
  0xd0   : > { %3429 = vst [vmem:[%s4801_s20 + $0x490] sm:$0xff] %v2405_v60  ;;  %v381_v60 = vld [vmem:[%s4779_s14 + $0x550] sm:$0xff]  ;;  %v2428_v1 = vadd.f32 %v1404_v58, %v380_v57  ;;  %v1424_v54 = vld [vmem:[%s4786_s26 + $0x5e8] sm:$0xff] }
  0xd1   : > { %3430 = vst [vmem:[%s4801_s20 + $0x498] sm:$0xff] %v2406_v63  ;;  %v382_v63 = vld [vmem:[%s4779_s14 + $0x558] sm:$0xff]  ;;  %v2429_v4 = vadd.f32 %v1405_v61, %v381_v60  ;;  %v1425_v57 = vld [vmem:[%s4786_s26 + $0x5f0] sm:$0xff] }
  0xd2   : > { %3431 = vst [vmem:[%s4801_s20 + $0x4a0] sm:$0xff] %v2407_v2  ;;  %v383_v2 = vld [vmem:[%s4779_s14 + $0x560] sm:$0xff]  ;;  %v2430_v7 = vadd.f32 %v1406_v0, %v382_v63  ;;  %v1426_v60 = vld [vmem:[%s4786_s26 + $0x5f8] sm:$0xff] }
  0xd3   : > { %3432 = vst [vmem:[%s4801_s20 + $0x4a8] sm:$0xff] %v2408_v5  ;;  %v384_v5 = vld [vmem:[%s4779_s14 + $0x568] sm:$0xff]  ;;  %v2431_v10 = vadd.f32 %v1407_v3, %v383_v2  ;;  %v1427_v63 = vld [vmem:[%s4786_s26 + $0x600] sm:$0xff] }
  0xd4   : > { %3433 = vst [vmem:[%s4801_s20 + $0x4b0] sm:$0xff] %v2409_v8  ;;  %v385_v8 = vld [vmem:[%s4779_s14 + $0x570] sm:$0xff]  ;;  %v2432_v13 = vadd.f32 %v1408_v6, %v384_v5  ;;  %v1428_v2 = vld [vmem:[%s4786_s26 + $0x608] sm:$0xff] }
  0xd5   : > { %3434 = vst [vmem:[%s4801_s20 + $0x4b8] sm:$0xff] %v2410_v11  ;;  %v386_v11 = vld [vmem:[%s4779_s14 + $0x578] sm:$0xff]  ;;  %v2433_v16 = vadd.f32 %v1409_v9, %v385_v8  ;;  %v1429_v5 = vld [vmem:[%s4786_s26 + $0x610] sm:$0xff] }
  0xd6   : > { %3435 = vst [vmem:[%s4801_s20 + $0x4c0] sm:$0xff] %v2411_v14  ;;  %v387_v14 = vld [vmem:[%s4779_s14 + $0x580] sm:$0xff]  ;;  %v2434_v19 = vadd.f32 %v1410_v12, %v386_v11  ;;  %v1430_v8 = vld [vmem:[%s4786_s26 + $0x618] sm:$0xff] }
  0xd7   : > { %3436 = vst [vmem:[%s4801_s20 + $0x4c8] sm:$0xff] %v2412_v17  ;;  %v388_v17 = vld [vmem:[%s4779_s14 + $0x588] sm:$0xff]  ;;  %v2435_v22 = vadd.f32 %v1411_v15, %v387_v14  ;;  %v1431_v11 = vld [vmem:[%s4786_s26 + $0x620] sm:$0xff] }
  0xd8   : > { %3437 = vst [vmem:[%s4801_s20 + $0x4d0] sm:$0xff] %v2413_v20  ;;  %v389_v20 = vld [vmem:[%s4779_s14 + $0x590] sm:$0xff]  ;;  %v2436_v25 = vadd.f32 %v1412_v18, %v388_v17  ;;  %v1432_v14 = vld [vmem:[%s4786_s26 + $0x628] sm:$0xff] }
  0xd9   : > { %3438 = vst [vmem:[%s4801_s20 + $0x4d8] sm:$0xff] %v2414_v23  ;;  %v390_v23 = vld [vmem:[%s4779_s14 + $0x598] sm:$0xff]  ;;  %v2437_v28 = vadd.f32 %v1413_v21, %v389_v20  ;;  %v1433_v17 = vld [vmem:[%s4786_s26 + $0x630] sm:$0xff] }
  0xda   : > { %3439 = vst [vmem:[%s4801_s20 + $0x4e0] sm:$0xff] %v2415_v26  ;;  %v391_v26 = vld [vmem:[%s4779_s14 + $0x5a0] sm:$0xff]  ;;  %v2438_v31 = vadd.f32 %v1414_v24, %v390_v23  ;;  %v1434_v20 = vld [vmem:[%s4786_s26 + $0x638] sm:$0xff] }
  0xdb   : > { %3440 = vst [vmem:[%s4801_s20 + $0x4e8] sm:$0xff] %v2416_v29  ;;  %v392_v29 = vld [vmem:[%s4779_s14 + $0x5a8] sm:$0xff]  ;;  %v2439_v34 = vadd.f32 %v1415_v27, %v391_v26  ;;  %v1435_v23 = vld [vmem:[%s4786_s26 + $0x640] sm:$0xff] }
  0xdc   : > { %3441 = vst [vmem:[%s4801_s20 + $0x4f0] sm:$0xff] %v2417_v32  ;;  %v393_v32 = vld [vmem:[%s4779_s14 + $0x5b0] sm:$0xff]  ;;  %v2440_v37 = vadd.f32 %v1416_v30, %v392_v29  ;;  %v1436_v26 = vld [vmem:[%s4786_s26 + $0x648] sm:$0xff] }
  0xdd   : > { %3442 = vst [vmem:[%s4801_s20 + $0x4f8] sm:$0xff] %v2418_v35  ;;  %v394_v35 = vld [vmem:[%s4779_s14 + $0x5b8] sm:$0xff]  ;;  %v2441_v40 = vadd.f32 %v1417_v33, %v393_v32  ;;  %v1437_v29 = vld [vmem:[%s4786_s26 + $0x650] sm:$0xff] }
  0xde   : > { %3443 = vst [vmem:[%s4801_s20 + $0x500] sm:$0xff] %v2419_v38  ;;  %v395_v38 = vld [vmem:[%s4779_s14 + $0x5c0] sm:$0xff]  ;;  %v2442_v43 = vadd.f32 %v1418_v36, %v394_v35  ;;  %v1438_v32 = vld [vmem:[%s4786_s26 + $0x658] sm:$0xff] }
  0xdf   : > { %3444 = vst [vmem:[%s4801_s20 + $0x508] sm:$0xff] %v2420_v41  ;;  %v396_v41 = vld [vmem:[%s4779_s14 + $0x5c8] sm:$0xff]  ;;  %v2443_v46 = vadd.f32 %v1419_v39, %v395_v38  ;;  %v1439_v35 = vld [vmem:[%s4786_s26 + $0x660] sm:$0xff] }
  0xe0   : > { %3445 = vst [vmem:[%s4801_s20 + $0x510] sm:$0xff] %v2421_v44  ;;  %v397_v44 = vld [vmem:[%s4779_s14 + $0x5d0] sm:$0xff]  ;;  %v2444_v49 = vadd.f32 %v1420_v42, %v396_v41  ;;  %v1440_v38 = vld [vmem:[%s4786_s26 + $0x668] sm:$0xff] }
  0xe1   : > { %3446 = vst [vmem:[%s4801_s20 + $0x518] sm:$0xff] %v2422_v47  ;;  %v398_v47 = vld [vmem:[%s4779_s14 + $0x5d8] sm:$0xff]  ;;  %v2445_v52 = vadd.f32 %v1421_v45, %v397_v44  ;;  %v1441_v41 = vld [vmem:[%s4786_s26 + $0x670] sm:$0xff] }
  0xe2   : > { %3447 = vst [vmem:[%s4801_s20 + $0x520] sm:$0xff] %v2423_v50  ;;  %v399_v50 = vld [vmem:[%s4779_s14 + $0x5e0] sm:$0xff]  ;;  %v2446_v55 = vadd.f32 %v1422_v48, %v398_v47  ;;  %v1442_v44 = vld [vmem:[%s4786_s26 + $0x678] sm:$0xff] }
  0xe3   : > { %3448 = vst [vmem:[%s4801_s20 + $0x528] sm:$0xff] %v2424_v53  ;;  %v400_v53 = vld [vmem:[%s4779_s14 + $0x5e8] sm:$0xff]  ;;  %v2447_v58 = vadd.f32 %v1423_v51, %v399_v50  ;;  %v1443_v47 = vld [vmem:[%s4786_s26 + $0x680] sm:$0xff] }
  0xe4   : > { %3449 = vst [vmem:[%s4801_s20 + $0x530] sm:$0xff] %v2425_v56  ;;  %v401_v56 = vld [vmem:[%s4779_s14 + $0x5f0] sm:$0xff]  ;;  %v2448_v61 = vadd.f32 %v1424_v54, %v400_v53  ;;  %v1444_v50 = vld [vmem:[%s4786_s26 + $0x688] sm:$0xff] }
  0xe5   : > { %3450 = vst [vmem:[%s4801_s20 + $0x538] sm:$0xff] %v2426_v59  ;;  %v402_v59 = vld [vmem:[%s4779_s14 + $0x5f8] sm:$0xff]  ;;  %v2449_v0 = vadd.f32 %v1425_v57, %v401_v56  ;;  %v1445_v53 = vld [vmem:[%s4786_s26 + $0x690] sm:$0xff] }
  0xe6   : > { %3451 = vst [vmem:[%s4801_s20 + $0x540] sm:$0xff] %v2427_v62  ;;  %v403_v62 = vld [vmem:[%s4779_s14 + $0x600] sm:$0xff]  ;;  %v2450_v3 = vadd.f32 %v1426_v60, %v402_v59  ;;  %v1446_v56 = vld [vmem:[%s4786_s26 + $0x698] sm:$0xff] }
  0xe7   : > { %3452 = vst [vmem:[%s4801_s20 + $0x548] sm:$0xff] %v2428_v1  ;;  %v404_v1 = vld [vmem:[%s4779_s14 + $0x608] sm:$0xff]  ;;  %v2451_v6 = vadd.f32 %v1427_v63, %v403_v62  ;;  %v1447_v59 = vld [vmem:[%s4786_s26 + $0x6a0] sm:$0xff] }
  0xe8   : > { %3453 = vst [vmem:[%s4801_s20 + $0x550] sm:$0xff] %v2429_v4  ;;  %v405_v4 = vld [vmem:[%s4779_s14 + $0x610] sm:$0xff]  ;;  %v2452_v9 = vadd.f32 %v1428_v2, %v404_v1  ;;  %v1448_v62 = vld [vmem:[%s4786_s26 + $0x6a8] sm:$0xff] }
  0xe9   : > { %3454 = vst [vmem:[%s4801_s20 + $0x558] sm:$0xff] %v2430_v7  ;;  %v406_v7 = vld [vmem:[%s4779_s14 + $0x618] sm:$0xff]  ;;  %v2453_v12 = vadd.f32 %v1429_v5, %v405_v4  ;;  %v1449_v1 = vld [vmem:[%s4786_s26 + $0x6b0] sm:$0xff] }
  0xea   : > { %3455 = vst [vmem:[%s4801_s20 + $0x560] sm:$0xff] %v2431_v10  ;;  %v407_v10 = vld [vmem:[%s4779_s14 + $0x620] sm:$0xff]  ;;  %v2454_v15 = vadd.f32 %v1430_v8, %v406_v7  ;;  %v1450_v4 = vld [vmem:[%s4786_s26 + $0x6b8] sm:$0xff] }
  0xeb   : > { %3456 = vst [vmem:[%s4801_s20 + $0x568] sm:$0xff] %v2432_v13  ;;  %v408_v13 = vld [vmem:[%s4779_s14 + $0x628] sm:$0xff]  ;;  %v2455_v18 = vadd.f32 %v1431_v11, %v407_v10  ;;  %v1451_v7 = vld [vmem:[%s4786_s26 + $0x6c0] sm:$0xff] }
  0xec   : > { %3457 = vst [vmem:[%s4801_s20 + $0x570] sm:$0xff] %v2433_v16  ;;  %v409_v16 = vld [vmem:[%s4779_s14 + $0x630] sm:$0xff]  ;;  %v2456_v21 = vadd.f32 %v1432_v14, %v408_v13  ;;  %v1452_v10 = vld [vmem:[%s4786_s26 + $0x6c8] sm:$0xff] }
  0xed   : > { %3458 = vst [vmem:[%s4801_s20 + $0x578] sm:$0xff] %v2434_v19  ;;  %v410_v19 = vld [vmem:[%s4779_s14 + $0x638] sm:$0xff]  ;;  %v2457_v24 = vadd.f32 %v1433_v17, %v409_v16  ;;  %v1453_v13 = vld [vmem:[%s4786_s26 + $0x6d0] sm:$0xff] }
  0xee   : > { %3459 = vst [vmem:[%s4801_s20 + $0x580] sm:$0xff] %v2435_v22  ;;  %v411_v22 = vld [vmem:[%s4779_s14 + $0x640] sm:$0xff]  ;;  %v2458_v27 = vadd.f32 %v1434_v20, %v410_v19  ;;  %v1454_v16 = vld [vmem:[%s4786_s26 + $0x6d8] sm:$0xff] }
  0xef   : > { %3460 = vst [vmem:[%s4801_s20 + $0x588] sm:$0xff] %v2436_v25  ;;  %v412_v25 = vld [vmem:[%s4779_s14 + $0x648] sm:$0xff]  ;;  %v2459_v30 = vadd.f32 %v1435_v23, %v411_v22  ;;  %v1455_v19 = vld [vmem:[%s4786_s26 + $0x6e0] sm:$0xff] }
  0xf0   : > { %3461 = vst [vmem:[%s4801_s20 + $0x590] sm:$0xff] %v2437_v28  ;;  %v413_v28 = vld [vmem:[%s4779_s14 + $0x650] sm:$0xff]  ;;  %v2460_v33 = vadd.f32 %v1436_v26, %v412_v25  ;;  %v1456_v22 = vld [vmem:[%s4786_s26 + $0x6e8] sm:$0xff] }
  0xf1   : > { %3462 = vst [vmem:[%s4801_s20 + $0x598] sm:$0xff] %v2438_v31  ;;  %v414_v31 = vld [vmem:[%s4779_s14 + $0x658] sm:$0xff]  ;;  %v2461_v36 = vadd.f32 %v1437_v29, %v413_v28  ;;  %v1457_v25 = vld [vmem:[%s4786_s26 + $0x6f0] sm:$0xff] }
  0xf2   : > { %3463 = vst [vmem:[%s4801_s20 + $0x5a0] sm:$0xff] %v2439_v34  ;;  %v415_v34 = vld [vmem:[%s4779_s14 + $0x660] sm:$0xff]  ;;  %v2462_v39 = vadd.f32 %v1438_v32, %v414_v31  ;;  %v1458_v28 = vld [vmem:[%s4786_s26 + $0x6f8] sm:$0xff] }
  0xf3   : > { %3464 = vst [vmem:[%s4801_s20 + $0x5a8] sm:$0xff] %v2440_v37  ;;  %v416_v37 = vld [vmem:[%s4779_s14 + $0x668] sm:$0xff]  ;;  %v2463_v42 = vadd.f32 %v1439_v35, %v415_v34  ;;  %v1459_v31 = vld [vmem:[%s4786_s26 + $0x700] sm:$0xff] }
  0xf4   : > { %3465 = vst [vmem:[%s4801_s20 + $0x5b0] sm:$0xff] %v2441_v40  ;;  %v417_v40 = vld [vmem:[%s4779_s14 + $0x670] sm:$0xff]  ;;  %v2464_v45 = vadd.f32 %v1440_v38, %v416_v37  ;;  %v1460_v34 = vld [vmem:[%s4786_s26 + $0x708] sm:$0xff] }
  0xf5   : > { %3466 = vst [vmem:[%s4801_s20 + $0x5b8] sm:$0xff] %v2442_v43  ;;  %v418_v43 = vld [vmem:[%s4779_s14 + $0x678] sm:$0xff]  ;;  %v2465_v48 = vadd.f32 %v1441_v41, %v417_v40  ;;  %v1461_v37 = vld [vmem:[%s4786_s26 + $0x710] sm:$0xff] }
  0xf6   : > { %3467 = vst [vmem:[%s4801_s20 + $0x5c0] sm:$0xff] %v2443_v46  ;;  %v419_v46 = vld [vmem:[%s4779_s14 + $0x680] sm:$0xff]  ;;  %v2466_v51 = vadd.f32 %v1442_v44, %v418_v43  ;;  %v1462_v40 = vld [vmem:[%s4786_s26 + $0x718] sm:$0xff] }
  0xf7   : > { %3468 = vst [vmem:[%s4801_s20 + $0x5c8] sm:$0xff] %v2444_v49  ;;  %v420_v49 = vld [vmem:[%s4779_s14 + $0x688] sm:$0xff]  ;;  %v2467_v54 = vadd.f32 %v1443_v47, %v419_v46  ;;  %v1463_v43 = vld [vmem:[%s4786_s26 + $0x720] sm:$0xff] }
  0xf8   : > { %3469 = vst [vmem:[%s4801_s20 + $0x5d0] sm:$0xff] %v2445_v52  ;;  %v421_v52 = vld [vmem:[%s4779_s14 + $0x690] sm:$0xff]  ;;  %v2468_v57 = vadd.f32 %v1444_v50, %v420_v49  ;;  %v1464_v46 = vld [vmem:[%s4786_s26 + $0x728] sm:$0xff] }
  0xf9   : > { %3470 = vst [vmem:[%s4801_s20 + $0x5d8] sm:$0xff] %v2446_v55  ;;  %v422_v55 = vld [vmem:[%s4779_s14 + $0x698] sm:$0xff]  ;;  %v2469_v60 = vadd.f32 %v1445_v53, %v421_v52  ;;  %v1465_v49 = vld [vmem:[%s4786_s26 + $0x730] sm:$0xff] }
  0xfa   : > { %3471 = vst [vmem:[%s4801_s20 + $0x5e0] sm:$0xff] %v2447_v58  ;;  %v423_v58 = vld [vmem:[%s4779_s14 + $0x6a0] sm:$0xff]  ;;  %v2470_v63 = vadd.f32 %v1446_v56, %v422_v55  ;;  %v1466_v52 = vld [vmem:[%s4786_s26 + $0x738] sm:$0xff] }
  0xfb   : > { %3472 = vst [vmem:[%s4801_s20 + $0x5e8] sm:$0xff] %v2448_v61  ;;  %v424_v61 = vld [vmem:[%s4779_s14 + $0x6a8] sm:$0xff]  ;;  %v2471_v2 = vadd.f32 %v1447_v59, %v423_v58  ;;  %v1467_v55 = vld [vmem:[%s4786_s26 + $0x740] sm:$0xff] }
  0xfc   : > { %3473 = vst [vmem:[%s4801_s20 + $0x5f0] sm:$0xff] %v2449_v0  ;;  %v425_v0 = vld [vmem:[%s4779_s14 + $0x6b0] sm:$0xff]  ;;  %v2472_v5 = vadd.f32 %v1448_v62, %v424_v61  ;;  %v1468_v58 = vld [vmem:[%s4786_s26 + $0x748] sm:$0xff] }
  0xfd   : > { %3474 = vst [vmem:[%s4801_s20 + $0x5f8] sm:$0xff] %v2450_v3  ;;  %v426_v3 = vld [vmem:[%s4779_s14 + $0x6b8] sm:$0xff]  ;;  %v2473_v8 = vadd.f32 %v1449_v1, %v425_v0  ;;  %v1469_v61 = vld [vmem:[%s4786_s26 + $0x750] sm:$0xff] }
  0xfe   : > { %3475 = vst [vmem:[%s4801_s20 + $0x600] sm:$0xff] %v2451_v6  ;;  %v427_v6 = vld [vmem:[%s4779_s14 + $0x6c0] sm:$0xff]  ;;  %v2474_v11 = vadd.f32 %v1450_v4, %v426_v3  ;;  %v1470_v0 = vld [vmem:[%s4786_s26 + $0x758] sm:$0xff] }
  0xff   : > { %3476 = vst [vmem:[%s4801_s20 + $0x608] sm:$0xff] %v2452_v9  ;;  %v428_v9 = vld [vmem:[%s4779_s14 + $0x6c8] sm:$0xff]  ;;  %v2475_v14 = vadd.f32 %v1451_v7, %v427_v6  ;;  %v1471_v3 = vld [vmem:[%s4786_s26 + $0x760] sm:$0xff] }
 0x100   : > { %3477 = vst [vmem:[%s4801_s20 + $0x610] sm:$0xff] %v2453_v12  ;;  %v429_v12 = vld [vmem:[%s4779_s14 + $0x6d0] sm:$0xff]  ;;  %v2476_v17 = vadd.f32 %v1452_v10, %v428_v9  ;;  %v1472_v6 = vld [vmem:[%s4786_s26 + $0x768] sm:$0xff] }
 0x101   : > { %3478 = vst [vmem:[%s4801_s20 + $0x618] sm:$0xff] %v2454_v15  ;;  %v430_v15 = vld [vmem:[%s4779_s14 + $0x6d8] sm:$0xff]  ;;  %v2477_v20 = vadd.f32 %v1453_v13, %v429_v12  ;;  %v1473_v9 = vld [vmem:[%s4786_s26 + $0x770] sm:$0xff] }
 0x102   : > { %3479 = vst [vmem:[%s4801_s20 + $0x620] sm:$0xff] %v2455_v18  ;;  %v431_v18 = vld [vmem:[%s4779_s14 + $0x6e0] sm:$0xff]  ;;  %v2478_v23 = vadd.f32 %v1454_v16, %v430_v15  ;;  %v1474_v12 = vld [vmem:[%s4786_s26 + $0x778] sm:$0xff] }
 0x103   : > { %3480 = vst [vmem:[%s4801_s20 + $0x628] sm:$0xff] %v2456_v21  ;;  %v432_v21 = vld [vmem:[%s4779_s14 + $0x6e8] sm:$0xff]  ;;  %v2479_v26 = vadd.f32 %v1455_v19, %v431_v18  ;;  %v1475_v15 = vld [vmem:[%s4786_s26 + $0x780] sm:$0xff] }
 0x104   : > { %3481 = vst [vmem:[%s4801_s20 + $0x630] sm:$0xff] %v2457_v24  ;;  %v433_v24 = vld [vmem:[%s4779_s14 + $0x6f0] sm:$0xff]  ;;  %v2480_v29 = vadd.f32 %v1456_v22, %v432_v21  ;;  %v1476_v18 = vld [vmem:[%s4786_s26 + $0x788] sm:$0xff] }
 0x105   : > { %3482 = vst [vmem:[%s4801_s20 + $0x638] sm:$0xff] %v2458_v27  ;;  %v434_v27 = vld [vmem:[%s4779_s14 + $0x6f8] sm:$0xff]  ;;  %v2481_v32 = vadd.f32 %v1457_v25, %v433_v24  ;;  %v1477_v21 = vld [vmem:[%s4786_s26 + $0x790] sm:$0xff] }
 0x106   : > { %3483 = vst [vmem:[%s4801_s20 + $0x640] sm:$0xff] %v2459_v30  ;;  %v435_v30 = vld [vmem:[%s4779_s14 + $0x700] sm:$0xff]  ;;  %v2482_v35 = vadd.f32 %v1458_v28, %v434_v27  ;;  %v1478_v24 = vld [vmem:[%s4786_s26 + $0x798] sm:$0xff] }
 0x107   : > { %3484 = vst [vmem:[%s4801_s20 + $0x648] sm:$0xff] %v2460_v33  ;;  %v436_v33 = vld [vmem:[%s4779_s14 + $0x708] sm:$0xff]  ;;  %v2483_v38 = vadd.f32 %v1459_v31, %v435_v30  ;;  %v1479_v27 = vld [vmem:[%s4786_s26 + $0x7a0] sm:$0xff] }
 0x108   : > { %3485 = vst [vmem:[%s4801_s20 + $0x650] sm:$0xff] %v2461_v36  ;;  %v437_v36 = vld [vmem:[%s4779_s14 + $0x710] sm:$0xff]  ;;  %v2484_v41 = vadd.f32 %v1460_v34, %v436_v33  ;;  %v1480_v30 = vld [vmem:[%s4786_s26 + $0x7a8] sm:$0xff] }
 0x109   : > { %3486 = vst [vmem:[%s4801_s20 + $0x658] sm:$0xff] %v2462_v39  ;;  %v438_v39 = vld [vmem:[%s4779_s14 + $0x718] sm:$0xff]  ;;  %v2485_v44 = vadd.f32 %v1461_v37, %v437_v36  ;;  %v1481_v33 = vld [vmem:[%s4786_s26 + $0x7b0] sm:$0xff] }
 0x10a   : > { %3487 = vst [vmem:[%s4801_s20 + $0x660] sm:$0xff] %v2463_v42  ;;  %v439_v42 = vld [vmem:[%s4779_s14 + $0x720] sm:$0xff]  ;;  %v2486_v47 = vadd.f32 %v1462_v40, %v438_v39  ;;  %v1482_v36 = vld [vmem:[%s4786_s26 + $0x7b8] sm:$0xff] }
 0x10b   : > { %3488 = vst [vmem:[%s4801_s20 + $0x668] sm:$0xff] %v2464_v45  ;;  %v440_v45 = vld [vmem:[%s4779_s14 + $0x728] sm:$0xff]  ;;  %v2487_v50 = vadd.f32 %v1463_v43, %v439_v42  ;;  %v1483_v39 = vld [vmem:[%s4786_s26 + $0x7c0] sm:$0xff] }
 0x10c   : > { %3489 = vst [vmem:[%s4801_s20 + $0x670] sm:$0xff] %v2465_v48  ;;  %v441_v48 = vld [vmem:[%s4779_s14 + $0x730] sm:$0xff]  ;;  %v2488_v53 = vadd.f32 %v1464_v46, %v440_v45  ;;  %v1484_v42 = vld [vmem:[%s4786_s26 + $0x7c8] sm:$0xff] }
 0x10d   : > { %3490 = vst [vmem:[%s4801_s20 + $0x678] sm:$0xff] %v2466_v51  ;;  %v442_v51 = vld [vmem:[%s4779_s14 + $0x738] sm:$0xff]  ;;  %v2489_v56 = vadd.f32 %v1465_v49, %v441_v48  ;;  %v1485_v45 = vld [vmem:[%s4786_s26 + $0x7d0] sm:$0xff] }
 0x10e   : > { %3491 = vst [vmem:[%s4801_s20 + $0x680] sm:$0xff] %v2467_v54  ;;  %v443_v54 = vld [vmem:[%s4779_s14 + $0x740] sm:$0xff]  ;;  %v2490_v59 = vadd.f32 %v1466_v52, %v442_v51  ;;  %v1486_v48 = vld [vmem:[%s4786_s26 + $0x7d8] sm:$0xff] }
 0x10f   : > { %3492 = vst [vmem:[%s4801_s20 + $0x688] sm:$0xff] %v2468_v57  ;;  %v444_v57 = vld [vmem:[%s4779_s14 + $0x748] sm:$0xff]  ;;  %v2491_v62 = vadd.f32 %v1467_v55, %v443_v54  ;;  %v1487_v51 = vld [vmem:[%s4786_s26 + $0x7e0] sm:$0xff] }
 0x110   : > { %3493 = vst [vmem:[%s4801_s20 + $0x690] sm:$0xff] %v2469_v60  ;;  %v445_v60 = vld [vmem:[%s4779_s14 + $0x750] sm:$0xff]  ;;  %v2492_v1 = vadd.f32 %v1468_v58, %v444_v57  ;;  %v1488_v54 = vld [vmem:[%s4786_s26 + $0x7e8] sm:$0xff] }
 0x111   : > { %3494 = vst [vmem:[%s4801_s20 + $0x698] sm:$0xff] %v2470_v63  ;;  %v446_v63 = vld [vmem:[%s4779_s14 + $0x758] sm:$0xff]  ;;  %v2493_v4 = vadd.f32 %v1469_v61, %v445_v60  ;;  %v1489_v57 = vld [vmem:[%s4786_s26 + $0x7f0] sm:$0xff] }
 0x112   : > { %3495 = vst [vmem:[%s4801_s20 + $0x6a0] sm:$0xff] %v2471_v2  ;;  %v447_v2 = vld [vmem:[%s4779_s14 + $0x760] sm:$0xff]  ;;  %v2494_v7 = vadd.f32 %v1470_v0, %v446_v63  ;;  %v1490_v60 = vld [vmem:[%s4786_s26 + $0x7f8] sm:$0xff] }
 0x113   : > { %3496 = vst [vmem:[%s4801_s20 + $0x6a8] sm:$0xff] %v2472_v5  ;;  %v448_v5 = vld [vmem:[%s4779_s14 + $0x768] sm:$0xff]  ;;  %v2495_v10 = vadd.f32 %v1471_v3, %v447_v2  ;;  %v1491_v63 = vld [vmem:[%s4786_s26 + $0x800] sm:$0xff] }
 0x114   : > { %3497 = vst [vmem:[%s4801_s20 + $0x6b0] sm:$0xff] %v2473_v8  ;;  %v449_v8 = vld [vmem:[%s4779_s14 + $0x770] sm:$0xff]  ;;  %v2496_v13 = vadd.f32 %v1472_v6, %v448_v5  ;;  %v1492_v2 = vld [vmem:[%s4786_s26 + $0x808] sm:$0xff] }
 0x115   : > { %3498 = vst [vmem:[%s4801_s20 + $0x6b8] sm:$0xff] %v2474_v11  ;;  %v450_v11 = vld [vmem:[%s4779_s14 + $0x778] sm:$0xff]  ;;  %v2497_v16 = vadd.f32 %v1473_v9, %v449_v8  ;;  %v1493_v5 = vld [vmem:[%s4786_s26 + $0x810] sm:$0xff] }
 0x116   : > { %3499 = vst [vmem:[%s4801_s20 + $0x6c0] sm:$0xff] %v2475_v14  ;;  %v451_v14 = vld [vmem:[%s4779_s14 + $0x780] sm:$0xff]  ;;  %v2498_v19 = vadd.f32 %v1474_v12, %v450_v11  ;;  %v1494_v8 = vld [vmem:[%s4786_s26 + $0x818] sm:$0xff] }
 0x117   : > { %3500 = vst [vmem:[%s4801_s20 + $0x6c8] sm:$0xff] %v2476_v17  ;;  %v452_v17 = vld [vmem:[%s4779_s14 + $0x788] sm:$0xff]  ;;  %v2499_v22 = vadd.f32 %v1475_v15, %v451_v14  ;;  %v1495_v11 = vld [vmem:[%s4786_s26 + $0x820] sm:$0xff] }
 0x118   : > { %3501 = vst [vmem:[%s4801_s20 + $0x6d0] sm:$0xff] %v2477_v20  ;;  %v453_v20 = vld [vmem:[%s4779_s14 + $0x790] sm:$0xff]  ;;  %v2500_v25 = vadd.f32 %v1476_v18, %v452_v17  ;;  %v1496_v14 = vld [vmem:[%s4786_s26 + $0x828] sm:$0xff] }
 0x119   : > { %3502 = vst [vmem:[%s4801_s20 + $0x6d8] sm:$0xff] %v2478_v23  ;;  %v454_v23 = vld [vmem:[%s4779_s14 + $0x798] sm:$0xff]  ;;  %v2501_v28 = vadd.f32 %v1477_v21, %v453_v20  ;;  %v1497_v17 = vld [vmem:[%s4786_s26 + $0x830] sm:$0xff] }
 0x11a   : > { %3503 = vst [vmem:[%s4801_s20 + $0x6e0] sm:$0xff] %v2479_v26  ;;  %v455_v26 = vld [vmem:[%s4779_s14 + $0x7a0] sm:$0xff]  ;;  %v2502_v31 = vadd.f32 %v1478_v24, %v454_v23  ;;  %v1498_v20 = vld [vmem:[%s4786_s26 + $0x838] sm:$0xff] }
 0x11b   : > { %3504 = vst [vmem:[%s4801_s20 + $0x6e8] sm:$0xff] %v2480_v29  ;;  %v456_v29 = vld [vmem:[%s4779_s14 + $0x7a8] sm:$0xff]  ;;  %v2503_v34 = vadd.f32 %v1479_v27, %v455_v26  ;;  %v1499_v23 = vld [vmem:[%s4786_s26 + $0x840] sm:$0xff] }
 0x11c   : > { %3505 = vst [vmem:[%s4801_s20 + $0x6f0] sm:$0xff] %v2481_v32  ;;  %v457_v32 = vld [vmem:[%s4779_s14 + $0x7b0] sm:$0xff]  ;;  %v2504_v37 = vadd.f32 %v1480_v30, %v456_v29  ;;  %v1500_v26 = vld [vmem:[%s4786_s26 + $0x848] sm:$0xff] }
 0x11d   : > { %3506 = vst [vmem:[%s4801_s20 + $0x6f8] sm:$0xff] %v2482_v35  ;;  %v458_v35 = vld [vmem:[%s4779_s14 + $0x7b8] sm:$0xff]  ;;  %v2505_v40 = vadd.f32 %v1481_v33, %v457_v32  ;;  %v1501_v29 = vld [vmem:[%s4786_s26 + $0x850] sm:$0xff] }
 0x11e   : > { %3507 = vst [vmem:[%s4801_s20 + $0x700] sm:$0xff] %v2483_v38  ;;  %v459_v38 = vld [vmem:[%s4779_s14 + $0x7c0] sm:$0xff]  ;;  %v2506_v43 = vadd.f32 %v1482_v36, %v458_v35  ;;  %v1502_v32 = vld [vmem:[%s4786_s26 + $0x858] sm:$0xff] }
 0x11f   : > { %3508 = vst [vmem:[%s4801_s20 + $0x708] sm:$0xff] %v2484_v41  ;;  %v460_v41 = vld [vmem:[%s4779_s14 + $0x7c8] sm:$0xff]  ;;  %v2507_v46 = vadd.f32 %v1483_v39, %v459_v38  ;;  %v1503_v35 = vld [vmem:[%s4786_s26 + $0x860] sm:$0xff] }
 0x120   : > { %3509 = vst [vmem:[%s4801_s20 + $0x710] sm:$0xff] %v2485_v44  ;;  %v461_v44 = vld [vmem:[%s4779_s14 + $0x7d0] sm:$0xff]  ;;  %v2508_v49 = vadd.f32 %v1484_v42, %v460_v41  ;;  %v1504_v38 = vld [vmem:[%s4786_s26 + $0x868] sm:$0xff] }
 0x121   : > { %3510 = vst [vmem:[%s4801_s20 + $0x718] sm:$0xff] %v2486_v47  ;;  %v462_v47 = vld [vmem:[%s4779_s14 + $0x7d8] sm:$0xff]  ;;  %v2509_v52 = vadd.f32 %v1485_v45, %v461_v44  ;;  %v1505_v41 = vld [vmem:[%s4786_s26 + $0x870] sm:$0xff] }
 0x122   : > { %3511 = vst [vmem:[%s4801_s20 + $0x720] sm:$0xff] %v2487_v50  ;;  %v463_v50 = vld [vmem:[%s4779_s14 + $0x7e0] sm:$0xff]  ;;  %v2510_v55 = vadd.f32 %v1486_v48, %v462_v47  ;;  %v1506_v44 = vld [vmem:[%s4786_s26 + $0x878] sm:$0xff] }
 0x123   : > { %3512 = vst [vmem:[%s4801_s20 + $0x728] sm:$0xff] %v2488_v53  ;;  %v464_v53 = vld [vmem:[%s4779_s14 + $0x7e8] sm:$0xff]  ;;  %v2511_v58 = vadd.f32 %v1487_v51, %v463_v50  ;;  %v1507_v47 = vld [vmem:[%s4786_s26 + $0x880] sm:$0xff] }
 0x124   : > { %3513 = vst [vmem:[%s4801_s20 + $0x730] sm:$0xff] %v2489_v56  ;;  %v465_v56 = vld [vmem:[%s4779_s14 + $0x7f0] sm:$0xff]  ;;  %v2512_v61 = vadd.f32 %v1488_v54, %v464_v53  ;;  %v1508_v50 = vld [vmem:[%s4786_s26 + $0x888] sm:$0xff] }
 0x125   : > { %3514 = vst [vmem:[%s4801_s20 + $0x738] sm:$0xff] %v2490_v59  ;;  %v466_v59 = vld [vmem:[%s4779_s14 + $0x7f8] sm:$0xff]  ;;  %v2513_v0 = vadd.f32 %v1489_v57, %v465_v56  ;;  %v1509_v53 = vld [vmem:[%s4786_s26 + $0x890] sm:$0xff] }
 0x126   : > { %3515 = vst [vmem:[%s4801_s20 + $0x740] sm:$0xff] %v2491_v62  ;;  %v467_v62 = vld [vmem:[%s4779_s14 + $0x800] sm:$0xff]  ;;  %v2514_v3 = vadd.f32 %v1490_v60, %v466_v59  ;;  %v1510_v56 = vld [vmem:[%s4786_s26 + $0x898] sm:$0xff] }
 0x127   : > { %3516 = vst [vmem:[%s4801_s20 + $0x748] sm:$0xff] %v2492_v1  ;;  %v468_v1 = vld [vmem:[%s4779_s14 + $0x808] sm:$0xff]  ;;  %v2515_v6 = vadd.f32 %v1491_v63, %v467_v62  ;;  %v1511_v59 = vld [vmem:[%s4786_s26 + $0x8a0] sm:$0xff] }
 0x128   : > { %3517 = vst [vmem:[%s4801_s20 + $0x750] sm:$0xff] %v2493_v4  ;;  %v469_v4 = vld [vmem:[%s4779_s14 + $0x810] sm:$0xff]  ;;  %v2516_v9 = vadd.f32 %v1492_v2, %v468_v1  ;;  %v1512_v62 = vld [vmem:[%s4786_s26 + $0x8a8] sm:$0xff] }
 0x129   : > { %3518 = vst [vmem:[%s4801_s20 + $0x758] sm:$0xff] %v2494_v7  ;;  %v470_v7 = vld [vmem:[%s4779_s14 + $0x818] sm:$0xff]  ;;  %v2517_v12 = vadd.f32 %v1493_v5, %v469_v4  ;;  %v1513_v1 = vld [vmem:[%s4786_s26 + $0x8b0] sm:$0xff] }
 0x12a   : > { %3519 = vst [vmem:[%s4801_s20 + $0x760] sm:$0xff] %v2495_v10  ;;  %v471_v10 = vld [vmem:[%s4779_s14 + $0x820] sm:$0xff]  ;;  %v2518_v15 = vadd.f32 %v1494_v8, %v470_v7  ;;  %v1514_v4 = vld [vmem:[%s4786_s26 + $0x8b8] sm:$0xff] }
 0x12b   : > { %3520 = vst [vmem:[%s4801_s20 + $0x768] sm:$0xff] %v2496_v13  ;;  %v472_v13 = vld [vmem:[%s4779_s14 + $0x828] sm:$0xff]  ;;  %v2519_v18 = vadd.f32 %v1495_v11, %v471_v10  ;;  %v1515_v7 = vld [vmem:[%s4786_s26 + $0x8c0] sm:$0xff] }
 0x12c   : > { %3521 = vst [vmem:[%s4801_s20 + $0x770] sm:$0xff] %v2497_v16  ;;  %v473_v16 = vld [vmem:[%s4779_s14 + $0x830] sm:$0xff]  ;;  %v2520_v21 = vadd.f32 %v1496_v14, %v472_v13  ;;  %v1516_v10 = vld [vmem:[%s4786_s26 + $0x8c8] sm:$0xff] }
 0x12d   : > { %3522 = vst [vmem:[%s4801_s20 + $0x778] sm:$0xff] %v2498_v19  ;;  %v474_v19 = vld [vmem:[%s4779_s14 + $0x838] sm:$0xff]  ;;  %v2521_v24 = vadd.f32 %v1497_v17, %v473_v16  ;;  %v1517_v13 = vld [vmem:[%s4786_s26 + $0x8d0] sm:$0xff] }
 0x12e   : > { %3523 = vst [vmem:[%s4801_s20 + $0x780] sm:$0xff] %v2499_v22  ;;  %v475_v22 = vld [vmem:[%s4779_s14 + $0x840] sm:$0xff]  ;;  %v2522_v27 = vadd.f32 %v1498_v20, %v474_v19  ;;  %v1518_v16 = vld [vmem:[%s4786_s26 + $0x8d8] sm:$0xff] }
 0x12f   : > { %3524 = vst [vmem:[%s4801_s20 + $0x788] sm:$0xff] %v2500_v25  ;;  %v476_v25 = vld [vmem:[%s4779_s14 + $0x848] sm:$0xff]  ;;  %v2523_v30 = vadd.f32 %v1499_v23, %v475_v22  ;;  %v1519_v19 = vld [vmem:[%s4786_s26 + $0x8e0] sm:$0xff] }
 0x130   : > { %3525 = vst [vmem:[%s4801_s20 + $0x790] sm:$0xff] %v2501_v28  ;;  %v477_v28 = vld [vmem:[%s4779_s14 + $0x850] sm:$0xff]  ;;  %v2524_v33 = vadd.f32 %v1500_v26, %v476_v25  ;;  %v1520_v22 = vld [vmem:[%s4786_s26 + $0x8e8] sm:$0xff] }
 0x131   : > { %3526 = vst [vmem:[%s4801_s20 + $0x798] sm:$0xff] %v2502_v31  ;;  %v478_v31 = vld [vmem:[%s4779_s14 + $0x858] sm:$0xff]  ;;  %v2525_v36 = vadd.f32 %v1501_v29, %v477_v28  ;;  %v1521_v25 = vld [vmem:[%s4786_s26 + $0x8f0] sm:$0xff] }
 0x132   : > { %3527 = vst [vmem:[%s4801_s20 + $0x7a0] sm:$0xff] %v2503_v34  ;;  %v479_v34 = vld [vmem:[%s4779_s14 + $0x860] sm:$0xff]  ;;  %v2526_v39 = vadd.f32 %v1502_v32, %v478_v31  ;;  %v1522_v28 = vld [vmem:[%s4786_s26 + $0x8f8] sm:$0xff] }
 0x133   : > { %3528 = vst [vmem:[%s4801_s20 + $0x7a8] sm:$0xff] %v2504_v37  ;;  %v480_v37 = vld [vmem:[%s4779_s14 + $0x868] sm:$0xff]  ;;  %v2527_v42 = vadd.f32 %v1503_v35, %v479_v34  ;;  %v1523_v31 = vld [vmem:[%s4786_s26 + $0x900] sm:$0xff] }
 0x134   : > { %3529 = vst [vmem:[%s4801_s20 + $0x7b0] sm:$0xff] %v2505_v40  ;;  %v481_v40 = vld [vmem:[%s4779_s14 + $0x870] sm:$0xff]  ;;  %v2528_v45 = vadd.f32 %v1504_v38, %v480_v37  ;;  %v1524_v34 = vld [vmem:[%s4786_s26 + $0x908] sm:$0xff] }
 0x135   : > { %3530 = vst [vmem:[%s4801_s20 + $0x7b8] sm:$0xff] %v2506_v43  ;;  %v482_v43 = vld [vmem:[%s4779_s14 + $0x878] sm:$0xff]  ;;  %v2529_v48 = vadd.f32 %v1505_v41, %v481_v40  ;;  %v1525_v37 = vld [vmem:[%s4786_s26 + $0x910] sm:$0xff] }
 0x136   : > { %3531 = vst [vmem:[%s4801_s20 + $0x7c0] sm:$0xff] %v2507_v46  ;;  %v483_v46 = vld [vmem:[%s4779_s14 + $0x880] sm:$0xff]  ;;  %v2530_v51 = vadd.f32 %v1506_v44, %v482_v43  ;;  %v1526_v40 = vld [vmem:[%s4786_s26 + $0x918] sm:$0xff] }
 0x137   : > { %3532 = vst [vmem:[%s4801_s20 + $0x7c8] sm:$0xff] %v2508_v49  ;;  %v484_v49 = vld [vmem:[%s4779_s14 + $0x888] sm:$0xff]  ;;  %v2531_v54 = vadd.f32 %v1507_v47, %v483_v46  ;;  %v1527_v43 = vld [vmem:[%s4786_s26 + $0x920] sm:$0xff] }
 0x138   : > { %3533 = vst [vmem:[%s4801_s20 + $0x7d0] sm:$0xff] %v2509_v52  ;;  %v485_v52 = vld [vmem:[%s4779_s14 + $0x890] sm:$0xff]  ;;  %v2532_v57 = vadd.f32 %v1508_v50, %v484_v49  ;;  %v1528_v46 = vld [vmem:[%s4786_s26 + $0x928] sm:$0xff] }
 0x139   : > { %3534 = vst [vmem:[%s4801_s20 + $0x7d8] sm:$0xff] %v2510_v55  ;;  %v486_v55 = vld [vmem:[%s4779_s14 + $0x898] sm:$0xff]  ;;  %v2533_v60 = vadd.f32 %v1509_v53, %v485_v52  ;;  %v1529_v49 = vld [vmem:[%s4786_s26 + $0x930] sm:$0xff] }
 0x13a   : > { %3535 = vst [vmem:[%s4801_s20 + $0x7e0] sm:$0xff] %v2511_v58  ;;  %v487_v58 = vld [vmem:[%s4779_s14 + $0x8a0] sm:$0xff]  ;;  %v2534_v63 = vadd.f32 %v1510_v56, %v486_v55  ;;  %v1530_v52 = vld [vmem:[%s4786_s26 + $0x938] sm:$0xff] }
 0x13b   : > { %3536 = vst [vmem:[%s4801_s20 + $0x7e8] sm:$0xff] %v2512_v61  ;;  %v488_v61 = vld [vmem:[%s4779_s14 + $0x8a8] sm:$0xff]  ;;  %v2535_v2 = vadd.f32 %v1511_v59, %v487_v58  ;;  %v1531_v55 = vld [vmem:[%s4786_s26 + $0x940] sm:$0xff] }
 0x13c   : > { %3537 = vst [vmem:[%s4801_s20 + $0x7f0] sm:$0xff] %v2513_v0  ;;  %v489_v0 = vld [vmem:[%s4779_s14 + $0x8b0] sm:$0xff]  ;;  %v2536_v5 = vadd.f32 %v1512_v62, %v488_v61  ;;  %v1532_v58 = vld [vmem:[%s4786_s26 + $0x948] sm:$0xff] }
 0x13d   : > { %3538 = vst [vmem:[%s4801_s20 + $0x7f8] sm:$0xff] %v2514_v3  ;;  %v490_v3 = vld [vmem:[%s4779_s14 + $0x8b8] sm:$0xff]  ;;  %v2537_v8 = vadd.f32 %v1513_v1, %v489_v0  ;;  %v1533_v61 = vld [vmem:[%s4786_s26 + $0x950] sm:$0xff] }
 0x13e   : > { %3539 = vst [vmem:[%s4801_s20 + $0x800] sm:$0xff] %v2515_v6  ;;  %v491_v6 = vld [vmem:[%s4779_s14 + $0x8c0] sm:$0xff]  ;;  %v2538_v11 = vadd.f32 %v1514_v4, %v490_v3  ;;  %v1534_v0 = vld [vmem:[%s4786_s26 + $0x958] sm:$0xff] }
 0x13f   : > { %3540 = vst [vmem:[%s4801_s20 + $0x808] sm:$0xff] %v2516_v9  ;;  %v492_v9 = vld [vmem:[%s4779_s14 + $0x8c8] sm:$0xff]  ;;  %v2539_v14 = vadd.f32 %v1515_v7, %v491_v6  ;;  %v1535_v3 = vld [vmem:[%s4786_s26 + $0x960] sm:$0xff] }
 0x140   : > { %3541 = vst [vmem:[%s4801_s20 + $0x810] sm:$0xff] %v2517_v12  ;;  %v493_v12 = vld [vmem:[%s4779_s14 + $0x8d0] sm:$0xff]  ;;  %v2540_v17 = vadd.f32 %v1516_v10, %v492_v9  ;;  %v1536_v6 = vld [vmem:[%s4786_s26 + $0x968] sm:$0xff] }
 0x141   : > { %3542 = vst [vmem:[%s4801_s20 + $0x818] sm:$0xff] %v2518_v15  ;;  %v494_v15 = vld [vmem:[%s4779_s14 + $0x8d8] sm:$0xff]  ;;  %v2541_v20 = vadd.f32 %v1517_v13, %v493_v12  ;;  %v1537_v9 = vld [vmem:[%s4786_s26 + $0x970] sm:$0xff] }
 0x142   : > { %3543 = vst [vmem:[%s4801_s20 + $0x820] sm:$0xff] %v2519_v18  ;;  %v495_v18 = vld [vmem:[%s4779_s14 + $0x8e0] sm:$0xff]  ;;  %v2542_v23 = vadd.f32 %v1518_v16, %v494_v15  ;;  %v1538_v12 = vld [vmem:[%s4786_s26 + $0x978] sm:$0xff] }
 0x143   : > { %3544 = vst [vmem:[%s4801_s20 + $0x828] sm:$0xff] %v2520_v21  ;;  %v496_v21 = vld [vmem:[%s4779_s14 + $0x8e8] sm:$0xff]  ;;  %v2543_v26 = vadd.f32 %v1519_v19, %v495_v18  ;;  %v1539_v15 = vld [vmem:[%s4786_s26 + $0x980] sm:$0xff] }
 0x144   : > { %3545 = vst [vmem:[%s4801_s20 + $0x830] sm:$0xff] %v2521_v24  ;;  %v497_v24 = vld [vmem:[%s4779_s14 + $0x8f0] sm:$0xff]  ;;  %v2544_v29 = vadd.f32 %v1520_v22, %v496_v21  ;;  %v1540_v18 = vld [vmem:[%s4786_s26 + $0x988] sm:$0xff] }
 0x145   : > { %3546 = vst [vmem:[%s4801_s20 + $0x838] sm:$0xff] %v2522_v27  ;;  %v498_v27 = vld [vmem:[%s4779_s14 + $0x8f8] sm:$0xff]  ;;  %v2545_v32 = vadd.f32 %v1521_v25, %v497_v24  ;;  %v1541_v21 = vld [vmem:[%s4786_s26 + $0x990] sm:$0xff] }
 0x146   : > { %3547 = vst [vmem:[%s4801_s20 + $0x840] sm:$0xff] %v2523_v30  ;;  %v499_v30 = vld [vmem:[%s4779_s14 + $0x900] sm:$0xff]  ;;  %v2546_v35 = vadd.f32 %v1522_v28, %v498_v27  ;;  %v1542_v24 = vld [vmem:[%s4786_s26 + $0x998] sm:$0xff] }
 0x147   : > { %3548 = vst [vmem:[%s4801_s20 + $0x848] sm:$0xff] %v2524_v33  ;;  %v500_v33 = vld [vmem:[%s4779_s14 + $0x908] sm:$0xff]  ;;  %v2547_v38 = vadd.f32 %v1523_v31, %v499_v30  ;;  %v1543_v27 = vld [vmem:[%s4786_s26 + $0x9a0] sm:$0xff] }
 0x148   : > { %3549 = vst [vmem:[%s4801_s20 + $0x850] sm:$0xff] %v2525_v36  ;;  %v501_v36 = vld [vmem:[%s4779_s14 + $0x910] sm:$0xff]  ;;  %v2548_v41 = vadd.f32 %v1524_v34, %v500_v33  ;;  %v1544_v30 = vld [vmem:[%s4786_s26 + $0x9a8] sm:$0xff] }
 0x149   : > { %3550 = vst [vmem:[%s4801_s20 + $0x858] sm:$0xff] %v2526_v39  ;;  %v502_v39 = vld [vmem:[%s4779_s14 + $0x918] sm:$0xff]  ;;  %v2549_v44 = vadd.f32 %v1525_v37, %v501_v36  ;;  %v1545_v33 = vld [vmem:[%s4786_s26 + $0x9b0] sm:$0xff] }
 0x14a   : > { %3551 = vst [vmem:[%s4801_s20 + $0x860] sm:$0xff] %v2527_v42  ;;  %v503_v42 = vld [vmem:[%s4779_s14 + $0x920] sm:$0xff]  ;;  %v2550_v47 = vadd.f32 %v1526_v40, %v502_v39  ;;  %v1546_v36 = vld [vmem:[%s4786_s26 + $0x9b8] sm:$0xff] }
 0x14b   : > { %3552 = vst [vmem:[%s4801_s20 + $0x868] sm:$0xff] %v2528_v45  ;;  %v504_v45 = vld [vmem:[%s4779_s14 + $0x928] sm:$0xff]  ;;  %v2551_v50 = vadd.f32 %v1527_v43, %v503_v42  ;;  %v1547_v39 = vld [vmem:[%s4786_s26 + $0x9c0] sm:$0xff] }
 0x14c   : > { %3553 = vst [vmem:[%s4801_s20 + $0x870] sm:$0xff] %v2529_v48  ;;  %v505_v48 = vld [vmem:[%s4779_s14 + $0x930] sm:$0xff]  ;;  %v2552_v53 = vadd.f32 %v1528_v46, %v504_v45  ;;  %v1548_v42 = vld [vmem:[%s4786_s26 + $0x9c8] sm:$0xff] }
 0x14d   : > { %3554 = vst [vmem:[%s4801_s20 + $0x878] sm:$0xff] %v2530_v51  ;;  %v506_v51 = vld [vmem:[%s4779_s14 + $0x938] sm:$0xff]  ;;  %v2553_v56 = vadd.f32 %v1529_v49, %v505_v48  ;;  %v1549_v45 = vld [vmem:[%s4786_s26 + $0x9d0] sm:$0xff] }
 0x14e   : > { %3555 = vst [vmem:[%s4801_s20 + $0x880] sm:$0xff] %v2531_v54  ;;  %v507_v54 = vld [vmem:[%s4779_s14 + $0x940] sm:$0xff]  ;;  %v2554_v59 = vadd.f32 %v1530_v52, %v506_v51  ;;  %v1550_v48 = vld [vmem:[%s4786_s26 + $0x9d8] sm:$0xff] }
 0x14f   : > { %3556 = vst [vmem:[%s4801_s20 + $0x888] sm:$0xff] %v2532_v57  ;;  %v508_v57 = vld [vmem:[%s4779_s14 + $0x948] sm:$0xff]  ;;  %v2555_v62 = vadd.f32 %v1531_v55, %v507_v54  ;;  %v1551_v51 = vld [vmem:[%s4786_s26 + $0x9e0] sm:$0xff] }
 0x150   : > { %3557 = vst [vmem:[%s4801_s20 + $0x890] sm:$0xff] %v2533_v60  ;;  %v509_v60 = vld [vmem:[%s4779_s14 + $0x950] sm:$0xff]  ;;  %v2556_v1 = vadd.f32 %v1532_v58, %v508_v57  ;;  %v1552_v54 = vld [vmem:[%s4786_s26 + $0x9e8] sm:$0xff] }
 0x151   : > { %3558 = vst [vmem:[%s4801_s20 + $0x898] sm:$0xff] %v2534_v63  ;;  %v510_v63 = vld [vmem:[%s4779_s14 + $0x958] sm:$0xff]  ;;  %v2557_v4 = vadd.f32 %v1533_v61, %v509_v60  ;;  %v1553_v57 = vld [vmem:[%s4786_s26 + $0x9f0] sm:$0xff] }
 0x152   : > { %3559 = vst [vmem:[%s4801_s20 + $0x8a0] sm:$0xff] %v2535_v2  ;;  %v511_v2 = vld [vmem:[%s4779_s14 + $0x960] sm:$0xff]  ;;  %v2558_v7 = vadd.f32 %v1534_v0, %v510_v63  ;;  %v1554_v60 = vld [vmem:[%s4786_s26 + $0x9f8] sm:$0xff] }
 0x153   : > { %3560 = vst [vmem:[%s4801_s20 + $0x8a8] sm:$0xff] %v2536_v5  ;;  %v512_v5 = vld [vmem:[%s4779_s14 + $0x968] sm:$0xff]  ;;  %v2559_v10 = vadd.f32 %v1535_v3, %v511_v2  ;;  %v1555_v63 = vld [vmem:[%s4786_s26 + $0xa00] sm:$0xff] }
 0x154   : > { %3561 = vst [vmem:[%s4801_s20 + $0x8b0] sm:$0xff] %v2537_v8  ;;  %v513_v8 = vld [vmem:[%s4779_s14 + $0x970] sm:$0xff]  ;;  %v2560_v13 = vadd.f32 %v1536_v6, %v512_v5  ;;  %v1556_v2 = vld [vmem:[%s4786_s26 + $0xa08] sm:$0xff] }
 0x155   : > { %3562 = vst [vmem:[%s4801_s20 + $0x8b8] sm:$0xff] %v2538_v11  ;;  %v514_v11 = vld [vmem:[%s4779_s14 + $0x978] sm:$0xff]  ;;  %v2561_v16 = vadd.f32 %v1537_v9, %v513_v8  ;;  %v1557_v5 = vld [vmem:[%s4786_s26 + $0xa10] sm:$0xff] }
 0x156   : > { %3563 = vst [vmem:[%s4801_s20 + $0x8c0] sm:$0xff] %v2539_v14  ;;  %v515_v14 = vld [vmem:[%s4779_s14 + $0x980] sm:$0xff]  ;;  %v2562_v19 = vadd.f32 %v1538_v12, %v514_v11  ;;  %v1558_v8 = vld [vmem:[%s4786_s26 + $0xa18] sm:$0xff] }
 0x157   : > { %3564 = vst [vmem:[%s4801_s20 + $0x8c8] sm:$0xff] %v2540_v17  ;;  %v516_v17 = vld [vmem:[%s4779_s14 + $0x988] sm:$0xff]  ;;  %v2563_v22 = vadd.f32 %v1539_v15, %v515_v14  ;;  %v1559_v11 = vld [vmem:[%s4786_s26 + $0xa20] sm:$0xff] }
 0x158   : > { %3565 = vst [vmem:[%s4801_s20 + $0x8d0] sm:$0xff] %v2541_v20  ;;  %v517_v20 = vld [vmem:[%s4779_s14 + $0x990] sm:$0xff]  ;;  %v2564_v25 = vadd.f32 %v1540_v18, %v516_v17  ;;  %v1560_v14 = vld [vmem:[%s4786_s26 + $0xa28] sm:$0xff] }
 0x159   : > { %3566 = vst [vmem:[%s4801_s20 + $0x8d8] sm:$0xff] %v2542_v23  ;;  %v518_v23 = vld [vmem:[%s4779_s14 + $0x998] sm:$0xff]  ;;  %v2565_v28 = vadd.f32 %v1541_v21, %v517_v20  ;;  %v1561_v17 = vld [vmem:[%s4786_s26 + $0xa30] sm:$0xff] }
 0x15a   : > { %3567 = vst [vmem:[%s4801_s20 + $0x8e0] sm:$0xff] %v2543_v26  ;;  %v519_v26 = vld [vmem:[%s4779_s14 + $0x9a0] sm:$0xff]  ;;  %v2566_v31 = vadd.f32 %v1542_v24, %v518_v23  ;;  %v1562_v20 = vld [vmem:[%s4786_s26 + $0xa38] sm:$0xff] }
 0x15b   : > { %3568 = vst [vmem:[%s4801_s20 + $0x8e8] sm:$0xff] %v2544_v29  ;;  %v520_v29 = vld [vmem:[%s4779_s14 + $0x9a8] sm:$0xff]  ;;  %v2567_v34 = vadd.f32 %v1543_v27, %v519_v26  ;;  %v1563_v23 = vld [vmem:[%s4786_s26 + $0xa40] sm:$0xff] }
 0x15c   : > { %3569 = vst [vmem:[%s4801_s20 + $0x8f0] sm:$0xff] %v2545_v32  ;;  %v521_v32 = vld [vmem:[%s4779_s14 + $0x9b0] sm:$0xff]  ;;  %v2568_v37 = vadd.f32 %v1544_v30, %v520_v29  ;;  %v1564_v26 = vld [vmem:[%s4786_s26 + $0xa48] sm:$0xff] }
 0x15d   : > { %3570 = vst [vmem:[%s4801_s20 + $0x8f8] sm:$0xff] %v2546_v35  ;;  %v522_v35 = vld [vmem:[%s4779_s14 + $0x9b8] sm:$0xff]  ;;  %v2569_v40 = vadd.f32 %v1545_v33, %v521_v32  ;;  %v1565_v29 = vld [vmem:[%s4786_s26 + $0xa50] sm:$0xff] }
 0x15e   : > { %3571 = vst [vmem:[%s4801_s20 + $0x900] sm:$0xff] %v2547_v38  ;;  %v523_v38 = vld [vmem:[%s4779_s14 + $0x9c0] sm:$0xff]  ;;  %v2570_v43 = vadd.f32 %v1546_v36, %v522_v35  ;;  %v1566_v32 = vld [vmem:[%s4786_s26 + $0xa58] sm:$0xff] }
 0x15f   : > { %3572 = vst [vmem:[%s4801_s20 + $0x908] sm:$0xff] %v2548_v41  ;;  %v524_v41 = vld [vmem:[%s4779_s14 + $0x9c8] sm:$0xff]  ;;  %v2571_v46 = vadd.f32 %v1547_v39, %v523_v38  ;;  %v1567_v35 = vld [vmem:[%s4786_s26 + $0xa60] sm:$0xff] }
 0x160   : > { %3573 = vst [vmem:[%s4801_s20 + $0x910] sm:$0xff] %v2549_v44  ;;  %v525_v44 = vld [vmem:[%s4779_s14 + $0x9d0] sm:$0xff]  ;;  %v2572_v49 = vadd.f32 %v1548_v42, %v524_v41  ;;  %v1568_v38 = vld [vmem:[%s4786_s26 + $0xa68] sm:$0xff] }
 0x161   : > { %3574 = vst [vmem:[%s4801_s20 + $0x918] sm:$0xff] %v2550_v47  ;;  %v526_v47 = vld [vmem:[%s4779_s14 + $0x9d8] sm:$0xff]  ;;  %v2573_v52 = vadd.f32 %v1549_v45, %v525_v44  ;;  %v1569_v41 = vld [vmem:[%s4786_s26 + $0xa70] sm:$0xff] }
 0x162   : > { %3575 = vst [vmem:[%s4801_s20 + $0x920] sm:$0xff] %v2551_v50  ;;  %v527_v50 = vld [vmem:[%s4779_s14 + $0x9e0] sm:$0xff]  ;;  %v2574_v55 = vadd.f32 %v1550_v48, %v526_v47  ;;  %v1570_v44 = vld [vmem:[%s4786_s26 + $0xa78] sm:$0xff] }
 0x163   : > { %3576 = vst [vmem:[%s4801_s20 + $0x928] sm:$0xff] %v2552_v53  ;;  %v528_v53 = vld [vmem:[%s4779_s14 + $0x9e8] sm:$0xff]  ;;  %v2575_v58 = vadd.f32 %v1551_v51, %v527_v50  ;;  %v1571_v47 = vld [vmem:[%s4786_s26 + $0xa80] sm:$0xff] }
 0x164   : > { %3577 = vst [vmem:[%s4801_s20 + $0x930] sm:$0xff] %v2553_v56  ;;  %v529_v56 = vld [vmem:[%s4779_s14 + $0x9f0] sm:$0xff]  ;;  %v2576_v61 = vadd.f32 %v1552_v54, %v528_v53  ;;  %v1572_v50 = vld [vmem:[%s4786_s26 + $0xa88] sm:$0xff] }
 0x165   : > { %3578 = vst [vmem:[%s4801_s20 + $0x938] sm:$0xff] %v2554_v59  ;;  %v530_v59 = vld [vmem:[%s4779_s14 + $0x9f8] sm:$0xff]  ;;  %v2577_v0 = vadd.f32 %v1553_v57, %v529_v56  ;;  %v1573_v53 = vld [vmem:[%s4786_s26 + $0xa90] sm:$0xff] }
 0x166   : > { %3579 = vst [vmem:[%s4801_s20 + $0x940] sm:$0xff] %v2555_v62  ;;  %v531_v62 = vld [vmem:[%s4779_s14 + $0xa00] sm:$0xff]  ;;  %v2578_v3 = vadd.f32 %v1554_v60, %v530_v59  ;;  %v1574_v56 = vld [vmem:[%s4786_s26 + $0xa98] sm:$0xff] }
 0x167   : > { %3580 = vst [vmem:[%s4801_s20 + $0x948] sm:$0xff] %v2556_v1  ;;  %v532_v1 = vld [vmem:[%s4779_s14 + $0xa08] sm:$0xff]  ;;  %v2579_v6 = vadd.f32 %v1555_v63, %v531_v62  ;;  %v1575_v59 = vld [vmem:[%s4786_s26 + $0xaa0] sm:$0xff] }
 0x168   : > { %3581 = vst [vmem:[%s4801_s20 + $0x950] sm:$0xff] %v2557_v4  ;;  %v533_v4 = vld [vmem:[%s4779_s14 + $0xa10] sm:$0xff]  ;;  %v2580_v9 = vadd.f32 %v1556_v2, %v532_v1  ;;  %v1576_v62 = vld [vmem:[%s4786_s26 + $0xaa8] sm:$0xff] }
 0x169   : > { %3582 = vst [vmem:[%s4801_s20 + $0x958] sm:$0xff] %v2558_v7  ;;  %v534_v7 = vld [vmem:[%s4779_s14 + $0xa18] sm:$0xff]  ;;  %v2581_v12 = vadd.f32 %v1557_v5, %v533_v4  ;;  %v1577_v1 = vld [vmem:[%s4786_s26 + $0xab0] sm:$0xff] }
 0x16a   : > { %3583 = vst [vmem:[%s4801_s20 + $0x960] sm:$0xff] %v2559_v10  ;;  %v535_v10 = vld [vmem:[%s4779_s14 + $0xa20] sm:$0xff]  ;;  %v2582_v15 = vadd.f32 %v1558_v8, %v534_v7  ;;  %v1578_v4 = vld [vmem:[%s4786_s26 + $0xab8] sm:$0xff] }
 0x16b   : > { %3584 = vst [vmem:[%s4801_s20 + $0x968] sm:$0xff] %v2560_v13  ;;  %v536_v13 = vld [vmem:[%s4779_s14 + $0xa28] sm:$0xff]  ;;  %v2583_v18 = vadd.f32 %v1559_v11, %v535_v10  ;;  %v1579_v7 = vld [vmem:[%s4786_s26 + $0xac0] sm:$0xff] }
 0x16c   : > { %3585 = vst [vmem:[%s4801_s20 + $0x970] sm:$0xff] %v2561_v16  ;;  %v537_v16 = vld [vmem:[%s4779_s14 + $0xa30] sm:$0xff]  ;;  %v2584_v21 = vadd.f32 %v1560_v14, %v536_v13  ;;  %v1580_v10 = vld [vmem:[%s4786_s26 + $0xac8] sm:$0xff] }
 0x16d   : > { %3586 = vst [vmem:[%s4801_s20 + $0x978] sm:$0xff] %v2562_v19  ;;  %v538_v19 = vld [vmem:[%s4779_s14 + $0xa38] sm:$0xff]  ;;  %v2585_v24 = vadd.f32 %v1561_v17, %v537_v16  ;;  %v1581_v13 = vld [vmem:[%s4786_s26 + $0xad0] sm:$0xff] }
 0x16e   : > { %3587 = vst [vmem:[%s4801_s20 + $0x980] sm:$0xff] %v2563_v22  ;;  %v539_v22 = vld [vmem:[%s4779_s14 + $0xa40] sm:$0xff]  ;;  %v2586_v27 = vadd.f32 %v1562_v20, %v538_v19  ;;  %v1582_v16 = vld [vmem:[%s4786_s26 + $0xad8] sm:$0xff] }
 0x16f   : > { %3588 = vst [vmem:[%s4801_s20 + $0x988] sm:$0xff] %v2564_v25  ;;  %v540_v25 = vld [vmem:[%s4779_s14 + $0xa48] sm:$0xff]  ;;  %v2587_v30 = vadd.f32 %v1563_v23, %v539_v22  ;;  %v1583_v19 = vld [vmem:[%s4786_s26 + $0xae0] sm:$0xff] }
 0x170   : > { %3589 = vst [vmem:[%s4801_s20 + $0x990] sm:$0xff] %v2565_v28  ;;  %v541_v28 = vld [vmem:[%s4779_s14 + $0xa50] sm:$0xff]  ;;  %v2588_v33 = vadd.f32 %v1564_v26, %v540_v25  ;;  %v1584_v22 = vld [vmem:[%s4786_s26 + $0xae8] sm:$0xff] }
 0x171   : > { %3590 = vst [vmem:[%s4801_s20 + $0x998] sm:$0xff] %v2566_v31  ;;  %v542_v31 = vld [vmem:[%s4779_s14 + $0xa58] sm:$0xff]  ;;  %v2589_v36 = vadd.f32 %v1565_v29, %v541_v28  ;;  %v1585_v25 = vld [vmem:[%s4786_s26 + $0xaf0] sm:$0xff] }
 0x172   : > { %3591 = vst [vmem:[%s4801_s20 + $0x9a0] sm:$0xff] %v2567_v34  ;;  %v543_v34 = vld [vmem:[%s4779_s14 + $0xa60] sm:$0xff]  ;;  %v2590_v39 = vadd.f32 %v1566_v32, %v542_v31  ;;  %v1586_v28 = vld [vmem:[%s4786_s26 + $0xaf8] sm:$0xff] }
 0x173   : > { %3592 = vst [vmem:[%s4801_s20 + $0x9a8] sm:$0xff] %v2568_v37  ;;  %v544_v37 = vld [vmem:[%s4779_s14 + $0xa68] sm:$0xff]  ;;  %v2591_v42 = vadd.f32 %v1567_v35, %v543_v34  ;;  %v1587_v31 = vld [vmem:[%s4786_s26 + $0xb00] sm:$0xff] }
 0x174   : > { %3593 = vst [vmem:[%s4801_s20 + $0x9b0] sm:$0xff] %v2569_v40  ;;  %v545_v40 = vld [vmem:[%s4779_s14 + $0xa70] sm:$0xff]  ;;  %v2592_v45 = vadd.f32 %v1568_v38, %v544_v37  ;;  %v1588_v34 = vld [vmem:[%s4786_s26 + $0xb08] sm:$0xff] }
 0x175   : > { %3594 = vst [vmem:[%s4801_s20 + $0x9b8] sm:$0xff] %v2570_v43  ;;  %v546_v43 = vld [vmem:[%s4779_s14 + $0xa78] sm:$0xff]  ;;  %v2593_v48 = vadd.f32 %v1569_v41, %v545_v40  ;;  %v1589_v37 = vld [vmem:[%s4786_s26 + $0xb10] sm:$0xff] }
 0x176   : > { %3595 = vst [vmem:[%s4801_s20 + $0x9c0] sm:$0xff] %v2571_v46  ;;  %v547_v46 = vld [vmem:[%s4779_s14 + $0xa80] sm:$0xff]  ;;  %v2594_v51 = vadd.f32 %v1570_v44, %v546_v43  ;;  %v1590_v40 = vld [vmem:[%s4786_s26 + $0xb18] sm:$0xff] }
 0x177   : > { %3596 = vst [vmem:[%s4801_s20 + $0x9c8] sm:$0xff] %v2572_v49  ;;  %v548_v49 = vld [vmem:[%s4779_s14 + $0xa88] sm:$0xff]  ;;  %v2595_v54 = vadd.f32 %v1571_v47, %v547_v46  ;;  %v1591_v43 = vld [vmem:[%s4786_s26 + $0xb20] sm:$0xff] }
 0x178   : > { %3597 = vst [vmem:[%s4801_s20 + $0x9d0] sm:$0xff] %v2573_v52  ;;  %v549_v52 = vld [vmem:[%s4779_s14 + $0xa90] sm:$0xff]  ;;  %v2596_v57 = vadd.f32 %v1572_v50, %v548_v49  ;;  %v1592_v46 = vld [vmem:[%s4786_s26 + $0xb28] sm:$0xff] }
 0x179   : > { %3598 = vst [vmem:[%s4801_s20 + $0x9d8] sm:$0xff] %v2574_v55  ;;  %v550_v55 = vld [vmem:[%s4779_s14 + $0xa98] sm:$0xff]  ;;  %v2597_v60 = vadd.f32 %v1573_v53, %v549_v52  ;;  %v1593_v49 = vld [vmem:[%s4786_s26 + $0xb30] sm:$0xff] }
 0x17a   : > { %3599 = vst [vmem:[%s4801_s20 + $0x9e0] sm:$0xff] %v2575_v58  ;;  %v551_v58 = vld [vmem:[%s4779_s14 + $0xaa0] sm:$0xff]  ;;  %v2598_v63 = vadd.f32 %v1574_v56, %v550_v55  ;;  %v1594_v52 = vld [vmem:[%s4786_s26 + $0xb38] sm:$0xff] }
 0x17b   : > { %3600 = vst [vmem:[%s4801_s20 + $0x9e8] sm:$0xff] %v2576_v61  ;;  %v552_v61 = vld [vmem:[%s4779_s14 + $0xaa8] sm:$0xff]  ;;  %v2599_v2 = vadd.f32 %v1575_v59, %v551_v58  ;;  %v1595_v55 = vld [vmem:[%s4786_s26 + $0xb40] sm:$0xff] }
 0x17c   : > { %3601 = vst [vmem:[%s4801_s20 + $0x9f0] sm:$0xff] %v2577_v0  ;;  %v553_v0 = vld [vmem:[%s4779_s14 + $0xab0] sm:$0xff]  ;;  %v2600_v5 = vadd.f32 %v1576_v62, %v552_v61  ;;  %v1596_v58 = vld [vmem:[%s4786_s26 + $0xb48] sm:$0xff] }
 0x17d   : > { %3602 = vst [vmem:[%s4801_s20 + $0x9f8] sm:$0xff] %v2578_v3  ;;  %v554_v3 = vld [vmem:[%s4779_s14 + $0xab8] sm:$0xff]  ;;  %v2601_v8 = vadd.f32 %v1577_v1, %v553_v0  ;;  %v1597_v61 = vld [vmem:[%s4786_s26 + $0xb50] sm:$0xff] }
 0x17e   : > { %3603 = vst [vmem:[%s4801_s20 + $0xa00] sm:$0xff] %v2579_v6  ;;  %v555_v6 = vld [vmem:[%s4779_s14 + $0xac0] sm:$0xff]  ;;  %v2602_v11 = vadd.f32 %v1578_v4, %v554_v3  ;;  %v1598_v0 = vld [vmem:[%s4786_s26 + $0xb58] sm:$0xff] }
 0x17f   : > { %3604 = vst [vmem:[%s4801_s20 + $0xa08] sm:$0xff] %v2580_v9  ;;  %v556_v9 = vld [vmem:[%s4779_s14 + $0xac8] sm:$0xff]  ;;  %v2603_v14 = vadd.f32 %v1579_v7, %v555_v6  ;;  %v1599_v3 = vld [vmem:[%s4786_s26 + $0xb60] sm:$0xff] }
 0x180   : > { %3605 = vst [vmem:[%s4801_s20 + $0xa10] sm:$0xff] %v2581_v12  ;;  %v557_v12 = vld [vmem:[%s4779_s14 + $0xad0] sm:$0xff]  ;;  %v2604_v17 = vadd.f32 %v1580_v10, %v556_v9  ;;  %v1600_v6 = vld [vmem:[%s4786_s26 + $0xb68] sm:$0xff] }
 0x181   : > { %3606 = vst [vmem:[%s4801_s20 + $0xa18] sm:$0xff] %v2582_v15  ;;  %v558_v15 = vld [vmem:[%s4779_s14 + $0xad8] sm:$0xff]  ;;  %v2605_v20 = vadd.f32 %v1581_v13, %v557_v12  ;;  %v1601_v9 = vld [vmem:[%s4786_s26 + $0xb70] sm:$0xff] }
 0x182   : > { %3607 = vst [vmem:[%s4801_s20 + $0xa20] sm:$0xff] %v2583_v18  ;;  %v559_v18 = vld [vmem:[%s4779_s14 + $0xae0] sm:$0xff]  ;;  %v2606_v23 = vadd.f32 %v1582_v16, %v558_v15  ;;  %v1602_v12 = vld [vmem:[%s4786_s26 + $0xb78] sm:$0xff] }
 0x183   : > { %3608 = vst [vmem:[%s4801_s20 + $0xa28] sm:$0xff] %v2584_v21  ;;  %v560_v21 = vld [vmem:[%s4779_s14 + $0xae8] sm:$0xff]  ;;  %v2607_v26 = vadd.f32 %v1583_v19, %v559_v18  ;;  %v1603_v15 = vld [vmem:[%s4786_s26 + $0xb80] sm:$0xff] }
 0x184   : > { %3609 = vst [vmem:[%s4801_s20 + $0xa30] sm:$0xff] %v2585_v24  ;;  %v561_v24 = vld [vmem:[%s4779_s14 + $0xaf0] sm:$0xff]  ;;  %v2608_v29 = vadd.f32 %v1584_v22, %v560_v21  ;;  %v1604_v18 = vld [vmem:[%s4786_s26 + $0xb88] sm:$0xff] }
 0x185   : > { %3610 = vst [vmem:[%s4801_s20 + $0xa38] sm:$0xff] %v2586_v27  ;;  %v562_v27 = vld [vmem:[%s4779_s14 + $0xaf8] sm:$0xff]  ;;  %v2609_v32 = vadd.f32 %v1585_v25, %v561_v24  ;;  %v1605_v21 = vld [vmem:[%s4786_s26 + $0xb90] sm:$0xff] }
 0x186   : > { %3611 = vst [vmem:[%s4801_s20 + $0xa40] sm:$0xff] %v2587_v30  ;;  %v563_v30 = vld [vmem:[%s4779_s14 + $0xb00] sm:$0xff]  ;;  %v2610_v35 = vadd.f32 %v1586_v28, %v562_v27  ;;  %v1606_v24 = vld [vmem:[%s4786_s26 + $0xb98] sm:$0xff] }
 0x187   : > { %3612 = vst [vmem:[%s4801_s20 + $0xa48] sm:$0xff] %v2588_v33  ;;  %v564_v33 = vld [vmem:[%s4779_s14 + $0xb08] sm:$0xff]  ;;  %v2611_v38 = vadd.f32 %v1587_v31, %v563_v30  ;;  %v1607_v27 = vld [vmem:[%s4786_s26 + $0xba0] sm:$0xff] }
 0x188   : > { %3613 = vst [vmem:[%s4801_s20 + $0xa50] sm:$0xff] %v2589_v36  ;;  %v565_v36 = vld [vmem:[%s4779_s14 + $0xb10] sm:$0xff]  ;;  %v2612_v41 = vadd.f32 %v1588_v34, %v564_v33  ;;  %v1608_v30 = vld [vmem:[%s4786_s26 + $0xba8] sm:$0xff] }
 0x189   : > { %3614 = vst [vmem:[%s4801_s20 + $0xa58] sm:$0xff] %v2590_v39  ;;  %v566_v39 = vld [vmem:[%s4779_s14 + $0xb18] sm:$0xff]  ;;  %v2613_v44 = vadd.f32 %v1589_v37, %v565_v36  ;;  %v1609_v33 = vld [vmem:[%s4786_s26 + $0xbb0] sm:$0xff] }
 0x18a   : > { %3615 = vst [vmem:[%s4801_s20 + $0xa60] sm:$0xff] %v2591_v42  ;;  %v567_v42 = vld [vmem:[%s4779_s14 + $0xb20] sm:$0xff]  ;;  %v2614_v47 = vadd.f32 %v1590_v40, %v566_v39  ;;  %v1610_v36 = vld [vmem:[%s4786_s26 + $0xbb8] sm:$0xff] }
 0x18b   : > { %3616 = vst [vmem:[%s4801_s20 + $0xa68] sm:$0xff] %v2592_v45  ;;  %v568_v45 = vld [vmem:[%s4779_s14 + $0xb28] sm:$0xff]  ;;  %v2615_v50 = vadd.f32 %v1591_v43, %v567_v42  ;;  %v1611_v39 = vld [vmem:[%s4786_s26 + $0xbc0] sm:$0xff] }
 0x18c   : > { %3617 = vst [vmem:[%s4801_s20 + $0xa70] sm:$0xff] %v2593_v48  ;;  %v569_v48 = vld [vmem:[%s4779_s14 + $0xb30] sm:$0xff]  ;;  %v2616_v53 = vadd.f32 %v1592_v46, %v568_v45  ;;  %v1612_v42 = vld [vmem:[%s4786_s26 + $0xbc8] sm:$0xff] }
 0x18d   : > { %3618 = vst [vmem:[%s4801_s20 + $0xa78] sm:$0xff] %v2594_v51  ;;  %v570_v51 = vld [vmem:[%s4779_s14 + $0xb38] sm:$0xff]  ;;  %v2617_v56 = vadd.f32 %v1593_v49, %v569_v48  ;;  %v1613_v45 = vld [vmem:[%s4786_s26 + $0xbd0] sm:$0xff] }
 0x18e   : > { %3619 = vst [vmem:[%s4801_s20 + $0xa80] sm:$0xff] %v2595_v54  ;;  %v571_v54 = vld [vmem:[%s4779_s14 + $0xb40] sm:$0xff]  ;;  %v2618_v59 = vadd.f32 %v1594_v52, %v570_v51  ;;  %v1614_v48 = vld [vmem:[%s4786_s26 + $0xbd8] sm:$0xff] }
 0x18f   : > { %3620 = vst [vmem:[%s4801_s20 + $0xa88] sm:$0xff] %v2596_v57  ;;  %v572_v57 = vld [vmem:[%s4779_s14 + $0xb48] sm:$0xff]  ;;  %v2619_v62 = vadd.f32 %v1595_v55, %v571_v54  ;;  %v1615_v51 = vld [vmem:[%s4786_s26 + $0xbe0] sm:$0xff] }
 0x190   : > { %3621 = vst [vmem:[%s4801_s20 + $0xa90] sm:$0xff] %v2597_v60  ;;  %v573_v60 = vld [vmem:[%s4779_s14 + $0xb50] sm:$0xff]  ;;  %v2620_v1 = vadd.f32 %v1596_v58, %v572_v57  ;;  %v1616_v54 = vld [vmem:[%s4786_s26 + $0xbe8] sm:$0xff] }
 0x191   : > { %3622 = vst [vmem:[%s4801_s20 + $0xa98] sm:$0xff] %v2598_v63  ;;  %v574_v63 = vld [vmem:[%s4779_s14 + $0xb58] sm:$0xff]  ;;  %v2621_v4 = vadd.f32 %v1597_v61, %v573_v60  ;;  %v1617_v57 = vld [vmem:[%s4786_s26 + $0xbf0] sm:$0xff] }
 0x192   : > { %3623 = vst [vmem:[%s4801_s20 + $0xaa0] sm:$0xff] %v2599_v2  ;;  %v575_v2 = vld [vmem:[%s4779_s14 + $0xb60] sm:$0xff]  ;;  %v2622_v7 = vadd.f32 %v1598_v0, %v574_v63  ;;  %v1618_v60 = vld [vmem:[%s4786_s26 + $0xbf8] sm:$0xff] }
 0x193   : > { %3624 = vst [vmem:[%s4801_s20 + $0xaa8] sm:$0xff] %v2600_v5  ;;  %v576_v5 = vld [vmem:[%s4779_s14 + $0xb68] sm:$0xff]  ;;  %v2623_v10 = vadd.f32 %v1599_v3, %v575_v2  ;;  %v1619_v63 = vld [vmem:[%s4786_s26 + $0xc00] sm:$0xff] }
 0x194   : > { %3625 = vst [vmem:[%s4801_s20 + $0xab0] sm:$0xff] %v2601_v8  ;;  %v577_v8 = vld [vmem:[%s4779_s14 + $0xb70] sm:$0xff]  ;;  %v2624_v13 = vadd.f32 %v1600_v6, %v576_v5  ;;  %v1620_v2 = vld [vmem:[%s4786_s26 + $0xc08] sm:$0xff] }
 0x195   : > { %3626 = vst [vmem:[%s4801_s20 + $0xab8] sm:$0xff] %v2602_v11  ;;  %v578_v11 = vld [vmem:[%s4779_s14 + $0xb78] sm:$0xff]  ;;  %v2625_v16 = vadd.f32 %v1601_v9, %v577_v8  ;;  %v1621_v5 = vld [vmem:[%s4786_s26 + $0xc10] sm:$0xff] }
 0x196   : > { %3627 = vst [vmem:[%s4801_s20 + $0xac0] sm:$0xff] %v2603_v14  ;;  %v579_v14 = vld [vmem:[%s4779_s14 + $0xb80] sm:$0xff]  ;;  %v2626_v19 = vadd.f32 %v1602_v12, %v578_v11  ;;  %v1622_v8 = vld [vmem:[%s4786_s26 + $0xc18] sm:$0xff] }
 0x197   : > { %3628 = vst [vmem:[%s4801_s20 + $0xac8] sm:$0xff] %v2604_v17  ;;  %v580_v17 = vld [vmem:[%s4779_s14 + $0xb88] sm:$0xff]  ;;  %v2627_v22 = vadd.f32 %v1603_v15, %v579_v14  ;;  %v1623_v11 = vld [vmem:[%s4786_s26 + $0xc20] sm:$0xff] }
 0x198   : > { %3629 = vst [vmem:[%s4801_s20 + $0xad0] sm:$0xff] %v2605_v20  ;;  %v581_v20 = vld [vmem:[%s4779_s14 + $0xb90] sm:$0xff]  ;;  %v2628_v25 = vadd.f32 %v1604_v18, %v580_v17  ;;  %v1624_v14 = vld [vmem:[%s4786_s26 + $0xc28] sm:$0xff] }
 0x199   : > { %3630 = vst [vmem:[%s4801_s20 + $0xad8] sm:$0xff] %v2606_v23  ;;  %v582_v23 = vld [vmem:[%s4779_s14 + $0xb98] sm:$0xff]  ;;  %v2629_v28 = vadd.f32 %v1605_v21, %v581_v20  ;;  %v1625_v17 = vld [vmem:[%s4786_s26 + $0xc30] sm:$0xff] }
 0x19a   : > { %3631 = vst [vmem:[%s4801_s20 + $0xae0] sm:$0xff] %v2607_v26  ;;  %v583_v26 = vld [vmem:[%s4779_s14 + $0xba0] sm:$0xff]  ;;  %v2630_v31 = vadd.f32 %v1606_v24, %v582_v23  ;;  %v1626_v20 = vld [vmem:[%s4786_s26 + $0xc38] sm:$0xff] }
 0x19b   : > { %3632 = vst [vmem:[%s4801_s20 + $0xae8] sm:$0xff] %v2608_v29  ;;  %v584_v29 = vld [vmem:[%s4779_s14 + $0xba8] sm:$0xff]  ;;  %v2631_v34 = vadd.f32 %v1607_v27, %v583_v26  ;;  %v1627_v23 = vld [vmem:[%s4786_s26 + $0xc40] sm:$0xff] }
 0x19c   : > { %3633 = vst [vmem:[%s4801_s20 + $0xaf0] sm:$0xff] %v2609_v32  ;;  %v585_v32 = vld [vmem:[%s4779_s14 + $0xbb0] sm:$0xff]  ;;  %v2632_v37 = vadd.f32 %v1608_v30, %v584_v29  ;;  %v1628_v26 = vld [vmem:[%s4786_s26 + $0xc48] sm:$0xff] }
 0x19d   : > { %3634 = vst [vmem:[%s4801_s20 + $0xaf8] sm:$0xff] %v2610_v35  ;;  %v586_v35 = vld [vmem:[%s4779_s14 + $0xbb8] sm:$0xff]  ;;  %v2633_v40 = vadd.f32 %v1609_v33, %v585_v32  ;;  %v1629_v29 = vld [vmem:[%s4786_s26 + $0xc50] sm:$0xff] }
 0x19e   : > { %3635 = vst [vmem:[%s4801_s20 + $0xb00] sm:$0xff] %v2611_v38  ;;  %v587_v38 = vld [vmem:[%s4779_s14 + $0xbc0] sm:$0xff]  ;;  %v2634_v43 = vadd.f32 %v1610_v36, %v586_v35  ;;  %v1630_v32 = vld [vmem:[%s4786_s26 + $0xc58] sm:$0xff] }
 0x19f   : > { %3636 = vst [vmem:[%s4801_s20 + $0xb08] sm:$0xff] %v2612_v41  ;;  %v588_v41 = vld [vmem:[%s4779_s14 + $0xbc8] sm:$0xff]  ;;  %v2635_v46 = vadd.f32 %v1611_v39, %v587_v38  ;;  %v1631_v35 = vld [vmem:[%s4786_s26 + $0xc60] sm:$0xff] }
 0x1a0   : > { %3637 = vst [vmem:[%s4801_s20 + $0xb10] sm:$0xff] %v2613_v44  ;;  %v589_v44 = vld [vmem:[%s4779_s14 + $0xbd0] sm:$0xff]  ;;  %v2636_v49 = vadd.f32 %v1612_v42, %v588_v41  ;;  %v1632_v38 = vld [vmem:[%s4786_s26 + $0xc68] sm:$0xff] }
 0x1a1   : > { %3638 = vst [vmem:[%s4801_s20 + $0xb18] sm:$0xff] %v2614_v47  ;;  %v590_v47 = vld [vmem:[%s4779_s14 + $0xbd8] sm:$0xff]  ;;  %v2637_v52 = vadd.f32 %v1613_v45, %v589_v44  ;;  %v1633_v41 = vld [vmem:[%s4786_s26 + $0xc70] sm:$0xff] }
 0x1a2   : > { %3639 = vst [vmem:[%s4801_s20 + $0xb20] sm:$0xff] %v2615_v50  ;;  %v591_v50 = vld [vmem:[%s4779_s14 + $0xbe0] sm:$0xff]  ;;  %v2638_v55 = vadd.f32 %v1614_v48, %v590_v47  ;;  %v1634_v44 = vld [vmem:[%s4786_s26 + $0xc78] sm:$0xff] }
 0x1a3   : > { %3640 = vst [vmem:[%s4801_s20 + $0xb28] sm:$0xff] %v2616_v53  ;;  %v592_v53 = vld [vmem:[%s4779_s14 + $0xbe8] sm:$0xff]  ;;  %v2639_v58 = vadd.f32 %v1615_v51, %v591_v50  ;;  %v1635_v47 = vld [vmem:[%s4786_s26 + $0xc80] sm:$0xff] }
 0x1a4   : > { %3641 = vst [vmem:[%s4801_s20 + $0xb30] sm:$0xff] %v2617_v56  ;;  %v593_v56 = vld [vmem:[%s4779_s14 + $0xbf0] sm:$0xff]  ;;  %v2640_v61 = vadd.f32 %v1616_v54, %v592_v53  ;;  %v1636_v50 = vld [vmem:[%s4786_s26 + $0xc88] sm:$0xff] }
 0x1a5   : > { %3642 = vst [vmem:[%s4801_s20 + $0xb38] sm:$0xff] %v2618_v59  ;;  %v594_v59 = vld [vmem:[%s4779_s14 + $0xbf8] sm:$0xff]  ;;  %v2641_v0 = vadd.f32 %v1617_v57, %v593_v56  ;;  %v1637_v53 = vld [vmem:[%s4786_s26 + $0xc90] sm:$0xff] }
 0x1a6   : > { %3643 = vst [vmem:[%s4801_s20 + $0xb40] sm:$0xff] %v2619_v62  ;;  %v595_v62 = vld [vmem:[%s4779_s14 + $0xc00] sm:$0xff]  ;;  %v2642_v3 = vadd.f32 %v1618_v60, %v594_v59  ;;  %v1638_v56 = vld [vmem:[%s4786_s26 + $0xc98] sm:$0xff] }
 0x1a7   : > { %3644 = vst [vmem:[%s4801_s20 + $0xb48] sm:$0xff] %v2620_v1  ;;  %v596_v1 = vld [vmem:[%s4779_s14 + $0xc08] sm:$0xff]  ;;  %v2643_v6 = vadd.f32 %v1619_v63, %v595_v62  ;;  %v1639_v59 = vld [vmem:[%s4786_s26 + $0xca0] sm:$0xff] }
 0x1a8   : > { %3645 = vst [vmem:[%s4801_s20 + $0xb50] sm:$0xff] %v2621_v4  ;;  %v597_v4 = vld [vmem:[%s4779_s14 + $0xc10] sm:$0xff]  ;;  %v2644_v9 = vadd.f32 %v1620_v2, %v596_v1  ;;  %v1640_v62 = vld [vmem:[%s4786_s26 + $0xca8] sm:$0xff] }
 0x1a9   : > { %3646 = vst [vmem:[%s4801_s20 + $0xb58] sm:$0xff] %v2622_v7  ;;  %v598_v7 = vld [vmem:[%s4779_s14 + $0xc18] sm:$0xff]  ;;  %v2645_v12 = vadd.f32 %v1621_v5, %v597_v4  ;;  %v1641_v1 = vld [vmem:[%s4786_s26 + $0xcb0] sm:$0xff] }
 0x1aa   : > { %3647 = vst [vmem:[%s4801_s20 + $0xb60] sm:$0xff] %v2623_v10  ;;  %v599_v10 = vld [vmem:[%s4779_s14 + $0xc20] sm:$0xff]  ;;  %v2646_v15 = vadd.f32 %v1622_v8, %v598_v7  ;;  %v1642_v4 = vld [vmem:[%s4786_s26 + $0xcb8] sm:$0xff] }
 0x1ab   : > { %3648 = vst [vmem:[%s4801_s20 + $0xb68] sm:$0xff] %v2624_v13  ;;  %v600_v13 = vld [vmem:[%s4779_s14 + $0xc28] sm:$0xff]  ;;  %v2647_v18 = vadd.f32 %v1623_v11, %v599_v10  ;;  %v1643_v7 = vld [vmem:[%s4786_s26 + $0xcc0] sm:$0xff] }
 0x1ac   : > { %3649 = vst [vmem:[%s4801_s20 + $0xb70] sm:$0xff] %v2625_v16  ;;  %v601_v16 = vld [vmem:[%s4779_s14 + $0xc30] sm:$0xff]  ;;  %v2648_v21 = vadd.f32 %v1624_v14, %v600_v13  ;;  %v1644_v10 = vld [vmem:[%s4786_s26 + $0xcc8] sm:$0xff] }
 0x1ad   : > { %3650 = vst [vmem:[%s4801_s20 + $0xb78] sm:$0xff] %v2626_v19  ;;  %v602_v19 = vld [vmem:[%s4779_s14 + $0xc38] sm:$0xff]  ;;  %v2649_v24 = vadd.f32 %v1625_v17, %v601_v16  ;;  %v1645_v13 = vld [vmem:[%s4786_s26 + $0xcd0] sm:$0xff] }
 0x1ae   : > { %3651 = vst [vmem:[%s4801_s20 + $0xb80] sm:$0xff] %v2627_v22  ;;  %v603_v22 = vld [vmem:[%s4779_s14 + $0xc40] sm:$0xff]  ;;  %v2650_v27 = vadd.f32 %v1626_v20, %v602_v19  ;;  %v1646_v16 = vld [vmem:[%s4786_s26 + $0xcd8] sm:$0xff] }
 0x1af   : > { %3652 = vst [vmem:[%s4801_s20 + $0xb88] sm:$0xff] %v2628_v25  ;;  %v604_v25 = vld [vmem:[%s4779_s14 + $0xc48] sm:$0xff]  ;;  %v2651_v30 = vadd.f32 %v1627_v23, %v603_v22  ;;  %v1647_v19 = vld [vmem:[%s4786_s26 + $0xce0] sm:$0xff] }
 0x1b0   : > { %3653 = vst [vmem:[%s4801_s20 + $0xb90] sm:$0xff] %v2629_v28  ;;  %v605_v28 = vld [vmem:[%s4779_s14 + $0xc50] sm:$0xff]  ;;  %v2652_v33 = vadd.f32 %v1628_v26, %v604_v25  ;;  %v1648_v22 = vld [vmem:[%s4786_s26 + $0xce8] sm:$0xff] }
 0x1b1   : > { %3654 = vst [vmem:[%s4801_s20 + $0xb98] sm:$0xff] %v2630_v31  ;;  %v606_v31 = vld [vmem:[%s4779_s14 + $0xc58] sm:$0xff]  ;;  %v2653_v36 = vadd.f32 %v1629_v29, %v605_v28  ;;  %v1649_v25 = vld [vmem:[%s4786_s26 + $0xcf0] sm:$0xff] }
 0x1b2   : > { %3655 = vst [vmem:[%s4801_s20 + $0xba0] sm:$0xff] %v2631_v34  ;;  %v607_v34 = vld [vmem:[%s4779_s14 + $0xc60] sm:$0xff]  ;;  %v2654_v39 = vadd.f32 %v1630_v32, %v606_v31  ;;  %v1650_v28 = vld [vmem:[%s4786_s26 + $0xcf8] sm:$0xff] }
 0x1b3   : > { %3656 = vst [vmem:[%s4801_s20 + $0xba8] sm:$0xff] %v2632_v37  ;;  %v608_v37 = vld [vmem:[%s4779_s14 + $0xc68] sm:$0xff]  ;;  %v2655_v42 = vadd.f32 %v1631_v35, %v607_v34  ;;  %v1651_v31 = vld [vmem:[%s4786_s26 + $0xd00] sm:$0xff] }
 0x1b4   : > { %3657 = vst [vmem:[%s4801_s20 + $0xbb0] sm:$0xff] %v2633_v40  ;;  %v609_v40 = vld [vmem:[%s4779_s14 + $0xc70] sm:$0xff]  ;;  %v2656_v45 = vadd.f32 %v1632_v38, %v608_v37  ;;  %v1652_v34 = vld [vmem:[%s4786_s26 + $0xd08] sm:$0xff] }
 0x1b5   : > { %3658 = vst [vmem:[%s4801_s20 + $0xbb8] sm:$0xff] %v2634_v43  ;;  %v610_v43 = vld [vmem:[%s4779_s14 + $0xc78] sm:$0xff]  ;;  %v2657_v48 = vadd.f32 %v1633_v41, %v609_v40  ;;  %v1653_v37 = vld [vmem:[%s4786_s26 + $0xd10] sm:$0xff] }
 0x1b6   : > { %3659 = vst [vmem:[%s4801_s20 + $0xbc0] sm:$0xff] %v2635_v46  ;;  %v611_v46 = vld [vmem:[%s4779_s14 + $0xc80] sm:$0xff]  ;;  %v2658_v51 = vadd.f32 %v1634_v44, %v610_v43  ;;  %v1654_v40 = vld [vmem:[%s4786_s26 + $0xd18] sm:$0xff] }
 0x1b7   : > { %3660 = vst [vmem:[%s4801_s20 + $0xbc8] sm:$0xff] %v2636_v49  ;;  %v612_v49 = vld [vmem:[%s4779_s14 + $0xc88] sm:$0xff]  ;;  %v2659_v54 = vadd.f32 %v1635_v47, %v611_v46  ;;  %v1655_v43 = vld [vmem:[%s4786_s26 + $0xd20] sm:$0xff] }
 0x1b8   : > { %3661 = vst [vmem:[%s4801_s20 + $0xbd0] sm:$0xff] %v2637_v52  ;;  %v613_v52 = vld [vmem:[%s4779_s14 + $0xc90] sm:$0xff]  ;;  %v2660_v57 = vadd.f32 %v1636_v50, %v612_v49  ;;  %v1656_v46 = vld [vmem:[%s4786_s26 + $0xd28] sm:$0xff] }
 0x1b9   : > { %3662 = vst [vmem:[%s4801_s20 + $0xbd8] sm:$0xff] %v2638_v55  ;;  %v614_v55 = vld [vmem:[%s4779_s14 + $0xc98] sm:$0xff]  ;;  %v2661_v60 = vadd.f32 %v1637_v53, %v613_v52  ;;  %v1657_v49 = vld [vmem:[%s4786_s26 + $0xd30] sm:$0xff] }
 0x1ba   : > { %3663 = vst [vmem:[%s4801_s20 + $0xbe0] sm:$0xff] %v2639_v58  ;;  %v615_v58 = vld [vmem:[%s4779_s14 + $0xca0] sm:$0xff]  ;;  %v2662_v63 = vadd.f32 %v1638_v56, %v614_v55  ;;  %v1658_v52 = vld [vmem:[%s4786_s26 + $0xd38] sm:$0xff] }
 0x1bb   : > { %3664 = vst [vmem:[%s4801_s20 + $0xbe8] sm:$0xff] %v2640_v61  ;;  %v616_v61 = vld [vmem:[%s4779_s14 + $0xca8] sm:$0xff]  ;;  %v2663_v2 = vadd.f32 %v1639_v59, %v615_v58  ;;  %v1659_v55 = vld [vmem:[%s4786_s26 + $0xd40] sm:$0xff] }
 0x1bc   : > { %3665 = vst [vmem:[%s4801_s20 + $0xbf0] sm:$0xff] %v2641_v0  ;;  %v617_v0 = vld [vmem:[%s4779_s14 + $0xcb0] sm:$0xff]  ;;  %v2664_v5 = vadd.f32 %v1640_v62, %v616_v61  ;;  %v1660_v58 = vld [vmem:[%s4786_s26 + $0xd48] sm:$0xff] }
 0x1bd   : > { %3666 = vst [vmem:[%s4801_s20 + $0xbf8] sm:$0xff] %v2642_v3  ;;  %v618_v3 = vld [vmem:[%s4779_s14 + $0xcb8] sm:$0xff]  ;;  %v2665_v8 = vadd.f32 %v1641_v1, %v617_v0  ;;  %v1661_v61 = vld [vmem:[%s4786_s26 + $0xd50] sm:$0xff] }
 0x1be   : > { %3667 = vst [vmem:[%s4801_s20 + $0xc00] sm:$0xff] %v2643_v6  ;;  %v619_v6 = vld [vmem:[%s4779_s14 + $0xcc0] sm:$0xff]  ;;  %v2666_v11 = vadd.f32 %v1642_v4, %v618_v3  ;;  %v1662_v0 = vld [vmem:[%s4786_s26 + $0xd58] sm:$0xff] }
 0x1bf   : > { %3668 = vst [vmem:[%s4801_s20 + $0xc08] sm:$0xff] %v2644_v9  ;;  %v620_v9 = vld [vmem:[%s4779_s14 + $0xcc8] sm:$0xff]  ;;  %v2667_v14 = vadd.f32 %v1643_v7, %v619_v6  ;;  %v1663_v3 = vld [vmem:[%s4786_s26 + $0xd60] sm:$0xff] }
 0x1c0   : > { %3669 = vst [vmem:[%s4801_s20 + $0xc10] sm:$0xff] %v2645_v12  ;;  %v621_v12 = vld [vmem:[%s4779_s14 + $0xcd0] sm:$0xff]  ;;  %v2668_v17 = vadd.f32 %v1644_v10, %v620_v9  ;;  %v1664_v6 = vld [vmem:[%s4786_s26 + $0xd68] sm:$0xff] }
 0x1c1   : > { %3670 = vst [vmem:[%s4801_s20 + $0xc18] sm:$0xff] %v2646_v15  ;;  %v622_v15 = vld [vmem:[%s4779_s14 + $0xcd8] sm:$0xff]  ;;  %v2669_v20 = vadd.f32 %v1645_v13, %v621_v12  ;;  %v1665_v9 = vld [vmem:[%s4786_s26 + $0xd70] sm:$0xff] }
 0x1c2   : > { %3671 = vst [vmem:[%s4801_s20 + $0xc20] sm:$0xff] %v2647_v18  ;;  %v623_v18 = vld [vmem:[%s4779_s14 + $0xce0] sm:$0xff]  ;;  %v2670_v23 = vadd.f32 %v1646_v16, %v622_v15  ;;  %v1666_v12 = vld [vmem:[%s4786_s26 + $0xd78] sm:$0xff] }
 0x1c3   : > { %3672 = vst [vmem:[%s4801_s20 + $0xc28] sm:$0xff] %v2648_v21  ;;  %v624_v21 = vld [vmem:[%s4779_s14 + $0xce8] sm:$0xff]  ;;  %v2671_v26 = vadd.f32 %v1647_v19, %v623_v18  ;;  %v1667_v15 = vld [vmem:[%s4786_s26 + $0xd80] sm:$0xff] }
 0x1c4   : > { %3673 = vst [vmem:[%s4801_s20 + $0xc30] sm:$0xff] %v2649_v24  ;;  %v625_v24 = vld [vmem:[%s4779_s14 + $0xcf0] sm:$0xff]  ;;  %v2672_v29 = vadd.f32 %v1648_v22, %v624_v21  ;;  %v1668_v18 = vld [vmem:[%s4786_s26 + $0xd88] sm:$0xff] }
 0x1c5   : > { %3674 = vst [vmem:[%s4801_s20 + $0xc38] sm:$0xff] %v2650_v27  ;;  %v626_v27 = vld [vmem:[%s4779_s14 + $0xcf8] sm:$0xff]  ;;  %v2673_v32 = vadd.f32 %v1649_v25, %v625_v24  ;;  %v1669_v21 = vld [vmem:[%s4786_s26 + $0xd90] sm:$0xff] }
 0x1c6   : > { %3675 = vst [vmem:[%s4801_s20 + $0xc40] sm:$0xff] %v2651_v30  ;;  %v627_v30 = vld [vmem:[%s4779_s14 + $0xd00] sm:$0xff]  ;;  %v2674_v35 = vadd.f32 %v1650_v28, %v626_v27  ;;  %v1670_v24 = vld [vmem:[%s4786_s26 + $0xd98] sm:$0xff] }
 0x1c7   : > { %3676 = vst [vmem:[%s4801_s20 + $0xc48] sm:$0xff] %v2652_v33  ;;  %v628_v33 = vld [vmem:[%s4779_s14 + $0xd08] sm:$0xff]  ;;  %v2675_v38 = vadd.f32 %v1651_v31, %v627_v30  ;;  %v1671_v27 = vld [vmem:[%s4786_s26 + $0xda0] sm:$0xff] }
 0x1c8   : > { %3677 = vst [vmem:[%s4801_s20 + $0xc50] sm:$0xff] %v2653_v36  ;;  %v629_v36 = vld [vmem:[%s4779_s14 + $0xd10] sm:$0xff]  ;;  %v2676_v41 = vadd.f32 %v1652_v34, %v628_v33  ;;  %v1672_v30 = vld [vmem:[%s4786_s26 + $0xda8] sm:$0xff] }
 0x1c9   : > { %3678 = vst [vmem:[%s4801_s20 + $0xc58] sm:$0xff] %v2654_v39  ;;  %v630_v39 = vld [vmem:[%s4779_s14 + $0xd18] sm:$0xff]  ;;  %v2677_v44 = vadd.f32 %v1653_v37, %v629_v36  ;;  %v1673_v33 = vld [vmem:[%s4786_s26 + $0xdb0] sm:$0xff] }
 0x1ca   : > { %3679 = vst [vmem:[%s4801_s20 + $0xc60] sm:$0xff] %v2655_v42  ;;  %v631_v42 = vld [vmem:[%s4779_s14 + $0xd20] sm:$0xff]  ;;  %v2678_v47 = vadd.f32 %v1654_v40, %v630_v39  ;;  %v1674_v36 = vld [vmem:[%s4786_s26 + $0xdb8] sm:$0xff] }
 0x1cb   : > { %3680 = vst [vmem:[%s4801_s20 + $0xc68] sm:$0xff] %v2656_v45  ;;  %v632_v45 = vld [vmem:[%s4779_s14 + $0xd28] sm:$0xff]  ;;  %v2679_v50 = vadd.f32 %v1655_v43, %v631_v42  ;;  %v1675_v39 = vld [vmem:[%s4786_s26 + $0xdc0] sm:$0xff] }
 0x1cc   : > { %3681 = vst [vmem:[%s4801_s20 + $0xc70] sm:$0xff] %v2657_v48  ;;  %v633_v48 = vld [vmem:[%s4779_s14 + $0xd30] sm:$0xff]  ;;  %v2680_v53 = vadd.f32 %v1656_v46, %v632_v45  ;;  %v1676_v42 = vld [vmem:[%s4786_s26 + $0xdc8] sm:$0xff] }
 0x1cd   : > { %3682 = vst [vmem:[%s4801_s20 + $0xc78] sm:$0xff] %v2658_v51  ;;  %v634_v51 = vld [vmem:[%s4779_s14 + $0xd38] sm:$0xff]  ;;  %v2681_v56 = vadd.f32 %v1657_v49, %v633_v48  ;;  %v1677_v45 = vld [vmem:[%s4786_s26 + $0xdd0] sm:$0xff] }
 0x1ce   : > { %3683 = vst [vmem:[%s4801_s20 + $0xc80] sm:$0xff] %v2659_v54  ;;  %v635_v54 = vld [vmem:[%s4779_s14 + $0xd40] sm:$0xff]  ;;  %v2682_v59 = vadd.f32 %v1658_v52, %v634_v51  ;;  %v1678_v48 = vld [vmem:[%s4786_s26 + $0xdd8] sm:$0xff] }
 0x1cf   : > { %3684 = vst [vmem:[%s4801_s20 + $0xc88] sm:$0xff] %v2660_v57  ;;  %v636_v57 = vld [vmem:[%s4779_s14 + $0xd48] sm:$0xff]  ;;  %v2683_v62 = vadd.f32 %v1659_v55, %v635_v54  ;;  %v1679_v51 = vld [vmem:[%s4786_s26 + $0xde0] sm:$0xff] }
 0x1d0   : > { %3685 = vst [vmem:[%s4801_s20 + $0xc90] sm:$0xff] %v2661_v60  ;;  %v637_v60 = vld [vmem:[%s4779_s14 + $0xd50] sm:$0xff]  ;;  %v2684_v1 = vadd.f32 %v1660_v58, %v636_v57  ;;  %v1680_v54 = vld [vmem:[%s4786_s26 + $0xde8] sm:$0xff] }
 0x1d1   : > { %3686 = vst [vmem:[%s4801_s20 + $0xc98] sm:$0xff] %v2662_v63  ;;  %v638_v63 = vld [vmem:[%s4779_s14 + $0xd58] sm:$0xff]  ;;  %v2685_v4 = vadd.f32 %v1661_v61, %v637_v60  ;;  %v1681_v57 = vld [vmem:[%s4786_s26 + $0xdf0] sm:$0xff] }
 0x1d2   : > { %3687 = vst [vmem:[%s4801_s20 + $0xca0] sm:$0xff] %v2663_v2  ;;  %v639_v2 = vld [vmem:[%s4779_s14 + $0xd60] sm:$0xff]  ;;  %v2686_v7 = vadd.f32 %v1662_v0, %v638_v63  ;;  %v1682_v60 = vld [vmem:[%s4786_s26 + $0xdf8] sm:$0xff] }
 0x1d3   : > { %3688 = vst [vmem:[%s4801_s20 + $0xca8] sm:$0xff] %v2664_v5  ;;  %v640_v5 = vld [vmem:[%s4779_s14 + $0xd68] sm:$0xff]  ;;  %v2687_v10 = vadd.f32 %v1663_v3, %v639_v2  ;;  %v1683_v63 = vld [vmem:[%s4786_s26 + $0xe00] sm:$0xff] }
 0x1d4   : > { %3689 = vst [vmem:[%s4801_s20 + $0xcb0] sm:$0xff] %v2665_v8  ;;  %v641_v8 = vld [vmem:[%s4779_s14 + $0xd70] sm:$0xff]  ;;  %v2688_v13 = vadd.f32 %v1664_v6, %v640_v5  ;;  %v1684_v2 = vld [vmem:[%s4786_s26 + $0xe08] sm:$0xff] }
 0x1d5   : > { %3690 = vst [vmem:[%s4801_s20 + $0xcb8] sm:$0xff] %v2666_v11  ;;  %v642_v11 = vld [vmem:[%s4779_s14 + $0xd78] sm:$0xff]  ;;  %v2689_v16 = vadd.f32 %v1665_v9, %v641_v8  ;;  %v1685_v5 = vld [vmem:[%s4786_s26 + $0xe10] sm:$0xff] }
 0x1d6   : > { %3691 = vst [vmem:[%s4801_s20 + $0xcc0] sm:$0xff] %v2667_v14  ;;  %v643_v14 = vld [vmem:[%s4779_s14 + $0xd80] sm:$0xff]  ;;  %v2690_v19 = vadd.f32 %v1666_v12, %v642_v11  ;;  %v1686_v8 = vld [vmem:[%s4786_s26 + $0xe18] sm:$0xff] }
 0x1d7   : > { %3692 = vst [vmem:[%s4801_s20 + $0xcc8] sm:$0xff] %v2668_v17  ;;  %v644_v17 = vld [vmem:[%s4779_s14 + $0xd88] sm:$0xff]  ;;  %v2691_v22 = vadd.f32 %v1667_v15, %v643_v14  ;;  %v1687_v11 = vld [vmem:[%s4786_s26 + $0xe20] sm:$0xff] }
 0x1d8   : > { %3693 = vst [vmem:[%s4801_s20 + $0xcd0] sm:$0xff] %v2669_v20  ;;  %v645_v20 = vld [vmem:[%s4779_s14 + $0xd90] sm:$0xff]  ;;  %v2692_v25 = vadd.f32 %v1668_v18, %v644_v17  ;;  %v1688_v14 = vld [vmem:[%s4786_s26 + $0xe28] sm:$0xff] }
 0x1d9   : > { %3694 = vst [vmem:[%s4801_s20 + $0xcd8] sm:$0xff] %v2670_v23  ;;  %v646_v23 = vld [vmem:[%s4779_s14 + $0xd98] sm:$0xff]  ;;  %v2693_v28 = vadd.f32 %v1669_v21, %v645_v20  ;;  %v1689_v17 = vld [vmem:[%s4786_s26 + $0xe30] sm:$0xff] }
 0x1da   : > { %3695 = vst [vmem:[%s4801_s20 + $0xce0] sm:$0xff] %v2671_v26  ;;  %v647_v26 = vld [vmem:[%s4779_s14 + $0xda0] sm:$0xff]  ;;  %v2694_v31 = vadd.f32 %v1670_v24, %v646_v23  ;;  %v1690_v20 = vld [vmem:[%s4786_s26 + $0xe38] sm:$0xff] }
 0x1db   : > { %3696 = vst [vmem:[%s4801_s20 + $0xce8] sm:$0xff] %v2672_v29  ;;  %v648_v29 = vld [vmem:[%s4779_s14 + $0xda8] sm:$0xff]  ;;  %v2695_v34 = vadd.f32 %v1671_v27, %v647_v26  ;;  %v1691_v23 = vld [vmem:[%s4786_s26 + $0xe40] sm:$0xff] }
 0x1dc   : > { %3697 = vst [vmem:[%s4801_s20 + $0xcf0] sm:$0xff] %v2673_v32  ;;  %v649_v32 = vld [vmem:[%s4779_s14 + $0xdb0] sm:$0xff]  ;;  %v2696_v37 = vadd.f32 %v1672_v30, %v648_v29  ;;  %v1692_v26 = vld [vmem:[%s4786_s26 + $0xe48] sm:$0xff] }
 0x1dd   : > { %3698 = vst [vmem:[%s4801_s20 + $0xcf8] sm:$0xff] %v2674_v35  ;;  %v650_v35 = vld [vmem:[%s4779_s14 + $0xdb8] sm:$0xff]  ;;  %v2697_v40 = vadd.f32 %v1673_v33, %v649_v32  ;;  %v1693_v29 = vld [vmem:[%s4786_s26 + $0xe50] sm:$0xff] }
 0x1de   : > { %3699 = vst [vmem:[%s4801_s20 + $0xd00] sm:$0xff] %v2675_v38  ;;  %v651_v38 = vld [vmem:[%s4779_s14 + $0xdc0] sm:$0xff]  ;;  %v2698_v43 = vadd.f32 %v1674_v36, %v650_v35  ;;  %v1694_v32 = vld [vmem:[%s4786_s26 + $0xe58] sm:$0xff] }
 0x1df   : > { %3700 = vst [vmem:[%s4801_s20 + $0xd08] sm:$0xff] %v2676_v41  ;;  %v652_v41 = vld [vmem:[%s4779_s14 + $0xdc8] sm:$0xff]  ;;  %v2699_v46 = vadd.f32 %v1675_v39, %v651_v38  ;;  %v1695_v35 = vld [vmem:[%s4786_s26 + $0xe60] sm:$0xff] }
 0x1e0   : > { %3701 = vst [vmem:[%s4801_s20 + $0xd10] sm:$0xff] %v2677_v44  ;;  %v653_v44 = vld [vmem:[%s4779_s14 + $0xdd0] sm:$0xff]  ;;  %v2700_v49 = vadd.f32 %v1676_v42, %v652_v41  ;;  %v1696_v38 = vld [vmem:[%s4786_s26 + $0xe68] sm:$0xff] }
 0x1e1   : > { %3702 = vst [vmem:[%s4801_s20 + $0xd18] sm:$0xff] %v2678_v47  ;;  %v654_v47 = vld [vmem:[%s4779_s14 + $0xdd8] sm:$0xff]  ;;  %v2701_v52 = vadd.f32 %v1677_v45, %v653_v44  ;;  %v1697_v41 = vld [vmem:[%s4786_s26 + $0xe70] sm:$0xff] }
 0x1e2   : > { %3703 = vst [vmem:[%s4801_s20 + $0xd20] sm:$0xff] %v2679_v50  ;;  %v655_v50 = vld [vmem:[%s4779_s14 + $0xde0] sm:$0xff]  ;;  %v2702_v55 = vadd.f32 %v1678_v48, %v654_v47  ;;  %v1698_v44 = vld [vmem:[%s4786_s26 + $0xe78] sm:$0xff] }
 0x1e3   : > { %3704 = vst [vmem:[%s4801_s20 + $0xd28] sm:$0xff] %v2680_v53  ;;  %v656_v53 = vld [vmem:[%s4779_s14 + $0xde8] sm:$0xff]  ;;  %v2703_v58 = vadd.f32 %v1679_v51, %v655_v50  ;;  %v1699_v47 = vld [vmem:[%s4786_s26 + $0xe80] sm:$0xff] }
 0x1e4   : > { %3705 = vst [vmem:[%s4801_s20 + $0xd30] sm:$0xff] %v2681_v56  ;;  %v657_v56 = vld [vmem:[%s4779_s14 + $0xdf0] sm:$0xff]  ;;  %v2704_v61 = vadd.f32 %v1680_v54, %v656_v53  ;;  %v1700_v50 = vld [vmem:[%s4786_s26 + $0xe88] sm:$0xff] }
 0x1e5   : > { %3706 = vst [vmem:[%s4801_s20 + $0xd38] sm:$0xff] %v2682_v59  ;;  %v658_v59 = vld [vmem:[%s4779_s14 + $0xdf8] sm:$0xff]  ;;  %v2705_v0 = vadd.f32 %v1681_v57, %v657_v56  ;;  %v1701_v53 = vld [vmem:[%s4786_s26 + $0xe90] sm:$0xff] }
 0x1e6   : > { %3707 = vst [vmem:[%s4801_s20 + $0xd40] sm:$0xff] %v2683_v62  ;;  %v659_v62 = vld [vmem:[%s4779_s14 + $0xe00] sm:$0xff]  ;;  %v2706_v3 = vadd.f32 %v1682_v60, %v658_v59  ;;  %v1702_v56 = vld [vmem:[%s4786_s26 + $0xe98] sm:$0xff] }
 0x1e7   : > { %3708 = vst [vmem:[%s4801_s20 + $0xd48] sm:$0xff] %v2684_v1  ;;  %v660_v1 = vld [vmem:[%s4779_s14 + $0xe08] sm:$0xff]  ;;  %v2707_v6 = vadd.f32 %v1683_v63, %v659_v62  ;;  %v1703_v59 = vld [vmem:[%s4786_s26 + $0xea0] sm:$0xff] }
 0x1e8   : > { %3709 = vst [vmem:[%s4801_s20 + $0xd50] sm:$0xff] %v2685_v4  ;;  %v661_v4 = vld [vmem:[%s4779_s14 + $0xe10] sm:$0xff]  ;;  %v2708_v9 = vadd.f32 %v1684_v2, %v660_v1  ;;  %v1704_v62 = vld [vmem:[%s4786_s26 + $0xea8] sm:$0xff] }
 0x1e9   : > { %3710 = vst [vmem:[%s4801_s20 + $0xd58] sm:$0xff] %v2686_v7  ;;  %v662_v7 = vld [vmem:[%s4779_s14 + $0xe18] sm:$0xff]  ;;  %v2709_v12 = vadd.f32 %v1685_v5, %v661_v4  ;;  %v1705_v1 = vld [vmem:[%s4786_s26 + $0xeb0] sm:$0xff] }
 0x1ea   : > { %3711 = vst [vmem:[%s4801_s20 + $0xd60] sm:$0xff] %v2687_v10  ;;  %v663_v10 = vld [vmem:[%s4779_s14 + $0xe20] sm:$0xff]  ;;  %v2710_v15 = vadd.f32 %v1686_v8, %v662_v7  ;;  %v1706_v4 = vld [vmem:[%s4786_s26 + $0xeb8] sm:$0xff] }
 0x1eb   : > { %3712 = vst [vmem:[%s4801_s20 + $0xd68] sm:$0xff] %v2688_v13  ;;  %v664_v13 = vld [vmem:[%s4779_s14 + $0xe28] sm:$0xff]  ;;  %v2711_v18 = vadd.f32 %v1687_v11, %v663_v10  ;;  %v1707_v7 = vld [vmem:[%s4786_s26 + $0xec0] sm:$0xff] }
 0x1ec   : > { %3713 = vst [vmem:[%s4801_s20 + $0xd70] sm:$0xff] %v2689_v16  ;;  %v665_v16 = vld [vmem:[%s4779_s14 + $0xe30] sm:$0xff]  ;;  %v2712_v21 = vadd.f32 %v1688_v14, %v664_v13  ;;  %v1708_v10 = vld [vmem:[%s4786_s26 + $0xec8] sm:$0xff] }
 0x1ed   : > { %3714 = vst [vmem:[%s4801_s20 + $0xd78] sm:$0xff] %v2690_v19  ;;  %v666_v19 = vld [vmem:[%s4779_s14 + $0xe38] sm:$0xff]  ;;  %v2713_v24 = vadd.f32 %v1689_v17, %v665_v16  ;;  %v1709_v13 = vld [vmem:[%s4786_s26 + $0xed0] sm:$0xff] }
 0x1ee   : > { %3715 = vst [vmem:[%s4801_s20 + $0xd80] sm:$0xff] %v2691_v22  ;;  %v667_v22 = vld [vmem:[%s4779_s14 + $0xe40] sm:$0xff]  ;;  %v2714_v27 = vadd.f32 %v1690_v20, %v666_v19  ;;  %v1710_v16 = vld [vmem:[%s4786_s26 + $0xed8] sm:$0xff] }
 0x1ef   : > { %3716 = vst [vmem:[%s4801_s20 + $0xd88] sm:$0xff] %v2692_v25  ;;  %v668_v25 = vld [vmem:[%s4779_s14 + $0xe48] sm:$0xff]  ;;  %v2715_v30 = vadd.f32 %v1691_v23, %v667_v22  ;;  %v1711_v19 = vld [vmem:[%s4786_s26 + $0xee0] sm:$0xff] }
 0x1f0   : > { %3717 = vst [vmem:[%s4801_s20 + $0xd90] sm:$0xff] %v2693_v28  ;;  %v669_v28 = vld [vmem:[%s4779_s14 + $0xe50] sm:$0xff]  ;;  %v2716_v33 = vadd.f32 %v1692_v26, %v668_v25  ;;  %v1712_v22 = vld [vmem:[%s4786_s26 + $0xee8] sm:$0xff] }
 0x1f1   : > { %3718 = vst [vmem:[%s4801_s20 + $0xd98] sm:$0xff] %v2694_v31  ;;  %v670_v31 = vld [vmem:[%s4779_s14 + $0xe58] sm:$0xff]  ;;  %v2717_v36 = vadd.f32 %v1693_v29, %v669_v28  ;;  %v1713_v25 = vld [vmem:[%s4786_s26 + $0xef0] sm:$0xff] }
 0x1f2   : > { %3719 = vst [vmem:[%s4801_s20 + $0xda0] sm:$0xff] %v2695_v34  ;;  %v671_v34 = vld [vmem:[%s4779_s14 + $0xe60] sm:$0xff]  ;;  %v2718_v39 = vadd.f32 %v1694_v32, %v670_v31  ;;  %v1714_v28 = vld [vmem:[%s4786_s26 + $0xef8] sm:$0xff] }
 0x1f3   : > { %3720 = vst [vmem:[%s4801_s20 + $0xda8] sm:$0xff] %v2696_v37  ;;  %v672_v37 = vld [vmem:[%s4779_s14 + $0xe68] sm:$0xff]  ;;  %v2719_v42 = vadd.f32 %v1695_v35, %v671_v34  ;;  %v1715_v31 = vld [vmem:[%s4786_s26 + $0xf00] sm:$0xff] }
 0x1f4   : > { %3721 = vst [vmem:[%s4801_s20 + $0xdb0] sm:$0xff] %v2697_v40  ;;  %v673_v40 = vld [vmem:[%s4779_s14 + $0xe70] sm:$0xff]  ;;  %v2720_v45 = vadd.f32 %v1696_v38, %v672_v37  ;;  %v1716_v34 = vld [vmem:[%s4786_s26 + $0xf08] sm:$0xff] }
 0x1f5   : > { %3722 = vst [vmem:[%s4801_s20 + $0xdb8] sm:$0xff] %v2698_v43  ;;  %v674_v43 = vld [vmem:[%s4779_s14 + $0xe78] sm:$0xff]  ;;  %v2721_v48 = vadd.f32 %v1697_v41, %v673_v40  ;;  %v1717_v37 = vld [vmem:[%s4786_s26 + $0xf10] sm:$0xff] }
 0x1f6   : > { %3723 = vst [vmem:[%s4801_s20 + $0xdc0] sm:$0xff] %v2699_v46  ;;  %v675_v46 = vld [vmem:[%s4779_s14 + $0xe80] sm:$0xff]  ;;  %v2722_v51 = vadd.f32 %v1698_v44, %v674_v43  ;;  %v1718_v40 = vld [vmem:[%s4786_s26 + $0xf18] sm:$0xff] }
 0x1f7   : > { %3724 = vst [vmem:[%s4801_s20 + $0xdc8] sm:$0xff] %v2700_v49  ;;  %v676_v49 = vld [vmem:[%s4779_s14 + $0xe88] sm:$0xff]  ;;  %v2723_v54 = vadd.f32 %v1699_v47, %v675_v46  ;;  %v1719_v43 = vld [vmem:[%s4786_s26 + $0xf20] sm:$0xff] }
 0x1f8   : > { %3725 = vst [vmem:[%s4801_s20 + $0xdd0] sm:$0xff] %v2701_v52  ;;  %v677_v52 = vld [vmem:[%s4779_s14 + $0xe90] sm:$0xff]  ;;  %v2724_v57 = vadd.f32 %v1700_v50, %v676_v49  ;;  %v1720_v46 = vld [vmem:[%s4786_s26 + $0xf28] sm:$0xff] }
 0x1f9   : > { %3726 = vst [vmem:[%s4801_s20 + $0xdd8] sm:$0xff] %v2702_v55  ;;  %v678_v55 = vld [vmem:[%s4779_s14 + $0xe98] sm:$0xff]  ;;  %v2725_v60 = vadd.f32 %v1701_v53, %v677_v52  ;;  %v1721_v49 = vld [vmem:[%s4786_s26 + $0xf30] sm:$0xff] }
 0x1fa   : > { %3727 = vst [vmem:[%s4801_s20 + $0xde0] sm:$0xff] %v2703_v58  ;;  %v679_v58 = vld [vmem:[%s4779_s14 + $0xea0] sm:$0xff]  ;;  %v2726_v63 = vadd.f32 %v1702_v56, %v678_v55  ;;  %v1722_v52 = vld [vmem:[%s4786_s26 + $0xf38] sm:$0xff] }
 0x1fb   : > { %3728 = vst [vmem:[%s4801_s20 + $0xde8] sm:$0xff] %v2704_v61  ;;  %v680_v61 = vld [vmem:[%s4779_s14 + $0xea8] sm:$0xff]  ;;  %v2727_v2 = vadd.f32 %v1703_v59, %v679_v58  ;;  %v1723_v55 = vld [vmem:[%s4786_s26 + $0xf40] sm:$0xff] }
 0x1fc   : > { %3729 = vst [vmem:[%s4801_s20 + $0xdf0] sm:$0xff] %v2705_v0  ;;  %v681_v0 = vld [vmem:[%s4779_s14 + $0xeb0] sm:$0xff]  ;;  %v2728_v5 = vadd.f32 %v1704_v62, %v680_v61  ;;  %v1724_v58 = vld [vmem:[%s4786_s26 + $0xf48] sm:$0xff] }
 0x1fd   : > { %3730 = vst [vmem:[%s4801_s20 + $0xdf8] sm:$0xff] %v2706_v3  ;;  %v682_v3 = vld [vmem:[%s4779_s14 + $0xeb8] sm:$0xff]  ;;  %v2729_v8 = vadd.f32 %v1705_v1, %v681_v0  ;;  %v1725_v61 = vld [vmem:[%s4786_s26 + $0xf50] sm:$0xff] }
 0x1fe   : > { %3731 = vst [vmem:[%s4801_s20 + $0xe00] sm:$0xff] %v2707_v6  ;;  %v683_v6 = vld [vmem:[%s4779_s14 + $0xec0] sm:$0xff]  ;;  %v2730_v11 = vadd.f32 %v1706_v4, %v682_v3  ;;  %v1726_v0 = vld [vmem:[%s4786_s26 + $0xf58] sm:$0xff] }
 0x1ff   : > { %3732 = vst [vmem:[%s4801_s20 + $0xe08] sm:$0xff] %v2708_v9  ;;  %v684_v9 = vld [vmem:[%s4779_s14 + $0xec8] sm:$0xff]  ;;  %v2731_v14 = vadd.f32 %v1707_v7, %v683_v6  ;;  %v1727_v3 = vld [vmem:[%s4786_s26 + $0xf60] sm:$0xff] }
 0x200   : > { %3733 = vst [vmem:[%s4801_s20 + $0xe10] sm:$0xff] %v2709_v12  ;;  %v685_v12 = vld [vmem:[%s4779_s14 + $0xed0] sm:$0xff]  ;;  %v2732_v17 = vadd.f32 %v1708_v10, %v684_v9  ;;  %v1728_v6 = vld [vmem:[%s4786_s26 + $0xf68] sm:$0xff] }
 0x201   : > { %3734 = vst [vmem:[%s4801_s20 + $0xe18] sm:$0xff] %v2710_v15  ;;  %v686_v15 = vld [vmem:[%s4779_s14 + $0xed8] sm:$0xff]  ;;  %v2733_v20 = vadd.f32 %v1709_v13, %v685_v12  ;;  %v1729_v9 = vld [vmem:[%s4786_s26 + $0xf70] sm:$0xff] }
 0x202   : > { %3735 = vst [vmem:[%s4801_s20 + $0xe20] sm:$0xff] %v2711_v18  ;;  %v687_v18 = vld [vmem:[%s4779_s14 + $0xee0] sm:$0xff]  ;;  %v2734_v23 = vadd.f32 %v1710_v16, %v686_v15  ;;  %v1730_v12 = vld [vmem:[%s4786_s26 + $0xf78] sm:$0xff] }
 0x203   : > { %3736 = vst [vmem:[%s4801_s20 + $0xe28] sm:$0xff] %v2712_v21  ;;  %v688_v21 = vld [vmem:[%s4779_s14 + $0xee8] sm:$0xff]  ;;  %v2735_v26 = vadd.f32 %v1711_v19, %v687_v18  ;;  %v1731_v15 = vld [vmem:[%s4786_s26 + $0xf80] sm:$0xff] }
 0x204   : > { %3737 = vst [vmem:[%s4801_s20 + $0xe30] sm:$0xff] %v2713_v24  ;;  %v689_v24 = vld [vmem:[%s4779_s14 + $0xef0] sm:$0xff]  ;;  %v2736_v29 = vadd.f32 %v1712_v22, %v688_v21  ;;  %v1732_v18 = vld [vmem:[%s4786_s26 + $0xf88] sm:$0xff] }
 0x205   : > { %3738 = vst [vmem:[%s4801_s20 + $0xe38] sm:$0xff] %v2714_v27  ;;  %v690_v27 = vld [vmem:[%s4779_s14 + $0xef8] sm:$0xff]  ;;  %v2737_v32 = vadd.f32 %v1713_v25, %v689_v24  ;;  %v1733_v21 = vld [vmem:[%s4786_s26 + $0xf90] sm:$0xff] }
 0x206   : > { %3739 = vst [vmem:[%s4801_s20 + $0xe40] sm:$0xff] %v2715_v30  ;;  %v691_v30 = vld [vmem:[%s4779_s14 + $0xf00] sm:$0xff]  ;;  %v2738_v35 = vadd.f32 %v1714_v28, %v690_v27  ;;  %v1734_v24 = vld [vmem:[%s4786_s26 + $0xf98] sm:$0xff] }
 0x207   : > { %3740 = vst [vmem:[%s4801_s20 + $0xe48] sm:$0xff] %v2716_v33  ;;  %v692_v33 = vld [vmem:[%s4779_s14 + $0xf08] sm:$0xff]  ;;  %v2739_v38 = vadd.f32 %v1715_v31, %v691_v30  ;;  %v1735_v27 = vld [vmem:[%s4786_s26 + $0xfa0] sm:$0xff] }
 0x208   : > { %3741 = vst [vmem:[%s4801_s20 + $0xe50] sm:$0xff] %v2717_v36  ;;  %v693_v36 = vld [vmem:[%s4779_s14 + $0xf10] sm:$0xff]  ;;  %v2740_v41 = vadd.f32 %v1716_v34, %v692_v33  ;;  %v1736_v30 = vld [vmem:[%s4786_s26 + $0xfa8] sm:$0xff] }
 0x209   : > { %3742 = vst [vmem:[%s4801_s20 + $0xe58] sm:$0xff] %v2718_v39  ;;  %v694_v39 = vld [vmem:[%s4779_s14 + $0xf18] sm:$0xff]  ;;  %v2741_v44 = vadd.f32 %v1717_v37, %v693_v36  ;;  %v1737_v33 = vld [vmem:[%s4786_s26 + $0xfb0] sm:$0xff] }
 0x20a   : > { %3743 = vst [vmem:[%s4801_s20 + $0xe60] sm:$0xff] %v2719_v42  ;;  %v695_v42 = vld [vmem:[%s4779_s14 + $0xf20] sm:$0xff]  ;;  %v2742_v47 = vadd.f32 %v1718_v40, %v694_v39  ;;  %v1738_v36 = vld [vmem:[%s4786_s26 + $0xfb8] sm:$0xff] }
 0x20b   : > { %3744 = vst [vmem:[%s4801_s20 + $0xe68] sm:$0xff] %v2720_v45  ;;  %v696_v45 = vld [vmem:[%s4779_s14 + $0xf28] sm:$0xff]  ;;  %v2743_v50 = vadd.f32 %v1719_v43, %v695_v42  ;;  %v1739_v39 = vld [vmem:[%s4786_s26 + $0xfc0] sm:$0xff] }
 0x20c   : > { %3745 = vst [vmem:[%s4801_s20 + $0xe70] sm:$0xff] %v2721_v48  ;;  %v697_v48 = vld [vmem:[%s4779_s14 + $0xf30] sm:$0xff]  ;;  %v2744_v53 = vadd.f32 %v1720_v46, %v696_v45  ;;  %v1740_v42 = vld [vmem:[%s4786_s26 + $0xfc8] sm:$0xff] }
 0x20d   : > { %3746 = vst [vmem:[%s4801_s20 + $0xe78] sm:$0xff] %v2722_v51  ;;  %v698_v51 = vld [vmem:[%s4779_s14 + $0xf38] sm:$0xff]  ;;  %v2745_v56 = vadd.f32 %v1721_v49, %v697_v48  ;;  %v1741_v45 = vld [vmem:[%s4786_s26 + $0xfd0] sm:$0xff] }
 0x20e   : > { %3747 = vst [vmem:[%s4801_s20 + $0xe80] sm:$0xff] %v2723_v54  ;;  %v699_v54 = vld [vmem:[%s4779_s14 + $0xf40] sm:$0xff]  ;;  %v2746_v59 = vadd.f32 %v1722_v52, %v698_v51  ;;  %v1742_v48 = vld [vmem:[%s4786_s26 + $0xfd8] sm:$0xff] }
 0x20f   : > { %3748 = vst [vmem:[%s4801_s20 + $0xe88] sm:$0xff] %v2724_v57  ;;  %v700_v57 = vld [vmem:[%s4779_s14 + $0xf48] sm:$0xff]  ;;  %v2747_v62 = vadd.f32 %v1723_v55, %v699_v54  ;;  %v1743_v51 = vld [vmem:[%s4786_s26 + $0xfe0] sm:$0xff] }
 0x210   : > { %3749 = vst [vmem:[%s4801_s20 + $0xe90] sm:$0xff] %v2725_v60  ;;  %v701_v60 = vld [vmem:[%s4779_s14 + $0xf50] sm:$0xff]  ;;  %v2748_v1 = vadd.f32 %v1724_v58, %v700_v57  ;;  %v1744_v54 = vld [vmem:[%s4786_s26 + $0xfe8] sm:$0xff] }
 0x211   : > { %3750 = vst [vmem:[%s4801_s20 + $0xe98] sm:$0xff] %v2726_v63  ;;  %v702_v63 = vld [vmem:[%s4779_s14 + $0xf58] sm:$0xff]  ;;  %v2749_v4 = vadd.f32 %v1725_v61, %v701_v60  ;;  %v1745_v57 = vld [vmem:[%s4786_s26 + $0xff0] sm:$0xff] }
 0x212   : > { %3751 = vst [vmem:[%s4801_s20 + $0xea0] sm:$0xff] %v2727_v2  ;;  %v703_v2 = vld [vmem:[%s4779_s14 + $0xf60] sm:$0xff]  ;;  %v2750_v7 = vadd.f32 %v1726_v0, %v702_v63  ;;  %v1746_v60 = vld [vmem:[%s4786_s26 + $0xff8] sm:$0xff] }
 0x213   : > { %3752 = vst [vmem:[%s4801_s20 + $0xea8] sm:$0xff] %v2728_v5  ;;  %v704_v5 = vld [vmem:[%s4779_s14 + $0xf68] sm:$0xff]  ;;  %v2751_v10 = vadd.f32 %v1727_v3, %v703_v2  ;;  %v1747_v63 = vld [vmem:[%s4786_s26 + $0x1000] sm:$0xff] }
 0x214   : > { %3753 = vst [vmem:[%s4801_s20 + $0xeb0] sm:$0xff] %v2729_v8  ;;  %v705_v8 = vld [vmem:[%s4779_s14 + $0xf70] sm:$0xff]  ;;  %v2752_v13 = vadd.f32 %v1728_v6, %v704_v5  ;;  %v1748_v2 = vld [vmem:[%s4786_s26 + $0x1008] sm:$0xff] }
 0x215   : > { %3754 = vst [vmem:[%s4801_s20 + $0xeb8] sm:$0xff] %v2730_v11  ;;  %v706_v11 = vld [vmem:[%s4779_s14 + $0xf78] sm:$0xff]  ;;  %v2753_v16 = vadd.f32 %v1729_v9, %v705_v8  ;;  %v1749_v5 = vld [vmem:[%s4786_s26 + $0x1010] sm:$0xff] }
 0x216   : > { %3755 = vst [vmem:[%s4801_s20 + $0xec0] sm:$0xff] %v2731_v14  ;;  %v707_v14 = vld [vmem:[%s4779_s14 + $0xf80] sm:$0xff]  ;;  %v2754_v19 = vadd.f32 %v1730_v12, %v706_v11  ;;  %v1750_v8 = vld [vmem:[%s4786_s26 + $0x1018] sm:$0xff] }
 0x217   : > { %3756 = vst [vmem:[%s4801_s20 + $0xec8] sm:$0xff] %v2732_v17  ;;  %v708_v17 = vld [vmem:[%s4779_s14 + $0xf88] sm:$0xff]  ;;  %v2755_v22 = vadd.f32 %v1731_v15, %v707_v14  ;;  %v1751_v11 = vld [vmem:[%s4786_s26 + $0x1020] sm:$0xff] }
 0x218   : > { %3757 = vst [vmem:[%s4801_s20 + $0xed0] sm:$0xff] %v2733_v20  ;;  %v709_v20 = vld [vmem:[%s4779_s14 + $0xf90] sm:$0xff]  ;;  %v2756_v25 = vadd.f32 %v1732_v18, %v708_v17  ;;  %v1752_v14 = vld [vmem:[%s4786_s26 + $0x1028] sm:$0xff] }
 0x219   : > { %3758 = vst [vmem:[%s4801_s20 + $0xed8] sm:$0xff] %v2734_v23  ;;  %v710_v23 = vld [vmem:[%s4779_s14 + $0xf98] sm:$0xff]  ;;  %v2757_v28 = vadd.f32 %v1733_v21, %v709_v20  ;;  %v1753_v17 = vld [vmem:[%s4786_s26 + $0x1030] sm:$0xff] }
 0x21a   : > { %3759 = vst [vmem:[%s4801_s20 + $0xee0] sm:$0xff] %v2735_v26  ;;  %v711_v26 = vld [vmem:[%s4779_s14 + $0xfa0] sm:$0xff]  ;;  %v2758_v31 = vadd.f32 %v1734_v24, %v710_v23  ;;  %v1754_v20 = vld [vmem:[%s4786_s26 + $0x1038] sm:$0xff] }
 0x21b   : > { %3760 = vst [vmem:[%s4801_s20 + $0xee8] sm:$0xff] %v2736_v29  ;;  %v712_v29 = vld [vmem:[%s4779_s14 + $0xfa8] sm:$0xff]  ;;  %v2759_v34 = vadd.f32 %v1735_v27, %v711_v26  ;;  %v1755_v23 = vld [vmem:[%s4786_s26 + $0x1040] sm:$0xff] }
 0x21c   : > { %3761 = vst [vmem:[%s4801_s20 + $0xef0] sm:$0xff] %v2737_v32  ;;  %v713_v32 = vld [vmem:[%s4779_s14 + $0xfb0] sm:$0xff]  ;;  %v2760_v37 = vadd.f32 %v1736_v30, %v712_v29  ;;  %v1756_v26 = vld [vmem:[%s4786_s26 + $0x1048] sm:$0xff] }
 0x21d   : > { %3762 = vst [vmem:[%s4801_s20 + $0xef8] sm:$0xff] %v2738_v35  ;;  %v714_v35 = vld [vmem:[%s4779_s14 + $0xfb8] sm:$0xff]  ;;  %v2761_v40 = vadd.f32 %v1737_v33, %v713_v32  ;;  %v1757_v29 = vld [vmem:[%s4786_s26 + $0x1050] sm:$0xff] }
 0x21e   : > { %3763 = vst [vmem:[%s4801_s20 + $0xf00] sm:$0xff] %v2739_v38  ;;  %v715_v38 = vld [vmem:[%s4779_s14 + $0xfc0] sm:$0xff]  ;;  %v2762_v43 = vadd.f32 %v1738_v36, %v714_v35  ;;  %v1758_v32 = vld [vmem:[%s4786_s26 + $0x1058] sm:$0xff] }
 0x21f   : > { %3764 = vst [vmem:[%s4801_s20 + $0xf08] sm:$0xff] %v2740_v41  ;;  %v716_v41 = vld [vmem:[%s4779_s14 + $0xfc8] sm:$0xff]  ;;  %v2763_v46 = vadd.f32 %v1739_v39, %v715_v38  ;;  %v1759_v35 = vld [vmem:[%s4786_s26 + $0x1060] sm:$0xff] }
 0x220   : > { %3765 = vst [vmem:[%s4801_s20 + $0xf10] sm:$0xff] %v2741_v44  ;;  %v717_v44 = vld [vmem:[%s4779_s14 + $0xfd0] sm:$0xff]  ;;  %v2764_v49 = vadd.f32 %v1740_v42, %v716_v41  ;;  %v1760_v38 = vld [vmem:[%s4786_s26 + $0x1068] sm:$0xff] }
 0x221   : > { %3766 = vst [vmem:[%s4801_s20 + $0xf18] sm:$0xff] %v2742_v47  ;;  %v718_v47 = vld [vmem:[%s4779_s14 + $0xfd8] sm:$0xff]  ;;  %v2765_v52 = vadd.f32 %v1741_v45, %v717_v44  ;;  %v1761_v41 = vld [vmem:[%s4786_s26 + $0x1070] sm:$0xff] }
 0x222   : > { %3767 = vst [vmem:[%s4801_s20 + $0xf20] sm:$0xff] %v2743_v50  ;;  %v719_v50 = vld [vmem:[%s4779_s14 + $0xfe0] sm:$0xff]  ;;  %v2766_v55 = vadd.f32 %v1742_v48, %v718_v47  ;;  %v1762_v44 = vld [vmem:[%s4786_s26 + $0x1078] sm:$0xff] }
 0x223   : > { %3768 = vst [vmem:[%s4801_s20 + $0xf28] sm:$0xff] %v2744_v53  ;;  %v720_v53 = vld [vmem:[%s4779_s14 + $0xfe8] sm:$0xff]  ;;  %v2767_v58 = vadd.f32 %v1743_v51, %v719_v50  ;;  %v1763_v47 = vld [vmem:[%s4786_s26 + $0x1080] sm:$0xff] }
 0x224   : > { %3769 = vst [vmem:[%s4801_s20 + $0xf30] sm:$0xff] %v2745_v56  ;;  %v721_v56 = vld [vmem:[%s4779_s14 + $0xff0] sm:$0xff]  ;;  %v2768_v61 = vadd.f32 %v1744_v54, %v720_v53  ;;  %v1764_v50 = vld [vmem:[%s4786_s26 + $0x1088] sm:$0xff] }
 0x225   : > { %3770 = vst [vmem:[%s4801_s20 + $0xf38] sm:$0xff] %v2746_v59  ;;  %v722_v59 = vld [vmem:[%s4779_s14 + $0xff8] sm:$0xff]  ;;  %v2769_v0 = vadd.f32 %v1745_v57, %v721_v56  ;;  %v1765_v53 = vld [vmem:[%s4786_s26 + $0x1090] sm:$0xff] }
 0x226   : > { %3771 = vst [vmem:[%s4801_s20 + $0xf40] sm:$0xff] %v2747_v62  ;;  %v723_v62 = vld [vmem:[%s4779_s14 + $0x1000] sm:$0xff]  ;;  %v2770_v3 = vadd.f32 %v1746_v60, %v722_v59  ;;  %v1766_v56 = vld [vmem:[%s4786_s26 + $0x1098] sm:$0xff] }
 0x227   : > { %3772 = vst [vmem:[%s4801_s20 + $0xf48] sm:$0xff] %v2748_v1  ;;  %v724_v1 = vld [vmem:[%s4779_s14 + $0x1008] sm:$0xff]  ;;  %v2771_v6 = vadd.f32 %v1747_v63, %v723_v62  ;;  %v1767_v59 = vld [vmem:[%s4786_s26 + $0x10a0] sm:$0xff] }
 0x228   : > { %3773 = vst [vmem:[%s4801_s20 + $0xf50] sm:$0xff] %v2749_v4  ;;  %v725_v4 = vld [vmem:[%s4779_s14 + $0x1010] sm:$0xff]  ;;  %v2772_v9 = vadd.f32 %v1748_v2, %v724_v1  ;;  %v1768_v62 = vld [vmem:[%s4786_s26 + $0x10a8] sm:$0xff] }
 0x229   : > { %3774 = vst [vmem:[%s4801_s20 + $0xf58] sm:$0xff] %v2750_v7  ;;  %v726_v7 = vld [vmem:[%s4779_s14 + $0x1018] sm:$0xff]  ;;  %v2773_v12 = vadd.f32 %v1749_v5, %v725_v4  ;;  %v1769_v1 = vld [vmem:[%s4786_s26 + $0x10b0] sm:$0xff] }
 0x22a   : > { %3775 = vst [vmem:[%s4801_s20 + $0xf60] sm:$0xff] %v2751_v10  ;;  %v727_v10 = vld [vmem:[%s4779_s14 + $0x1020] sm:$0xff]  ;;  %v2774_v15 = vadd.f32 %v1750_v8, %v726_v7  ;;  %v1770_v4 = vld [vmem:[%s4786_s26 + $0x10b8] sm:$0xff] }
 0x22b   : > { %3776 = vst [vmem:[%s4801_s20 + $0xf68] sm:$0xff] %v2752_v13  ;;  %v728_v13 = vld [vmem:[%s4779_s14 + $0x1028] sm:$0xff]  ;;  %v2775_v18 = vadd.f32 %v1751_v11, %v727_v10  ;;  %v1771_v7 = vld [vmem:[%s4786_s26 + $0x10c0] sm:$0xff] }
 0x22c   : > { %3777 = vst [vmem:[%s4801_s20 + $0xf70] sm:$0xff] %v2753_v16  ;;  %v729_v16 = vld [vmem:[%s4779_s14 + $0x1030] sm:$0xff]  ;;  %v2776_v21 = vadd.f32 %v1752_v14, %v728_v13  ;;  %v1772_v10 = vld [vmem:[%s4786_s26 + $0x10c8] sm:$0xff] }
 0x22d   : > { %3778 = vst [vmem:[%s4801_s20 + $0xf78] sm:$0xff] %v2754_v19  ;;  %v730_v19 = vld [vmem:[%s4779_s14 + $0x1038] sm:$0xff]  ;;  %v2777_v24 = vadd.f32 %v1753_v17, %v729_v16  ;;  %v1773_v13 = vld [vmem:[%s4786_s26 + $0x10d0] sm:$0xff] }
 0x22e   : > { %3779 = vst [vmem:[%s4801_s20 + $0xf80] sm:$0xff] %v2755_v22  ;;  %v731_v22 = vld [vmem:[%s4779_s14 + $0x1040] sm:$0xff]  ;;  %v2778_v27 = vadd.f32 %v1754_v20, %v730_v19  ;;  %v1774_v16 = vld [vmem:[%s4786_s26 + $0x10d8] sm:$0xff] }
 0x22f   : > { %3780 = vst [vmem:[%s4801_s20 + $0xf88] sm:$0xff] %v2756_v25  ;;  %v732_v25 = vld [vmem:[%s4779_s14 + $0x1048] sm:$0xff]  ;;  %v2779_v30 = vadd.f32 %v1755_v23, %v731_v22  ;;  %v1775_v19 = vld [vmem:[%s4786_s26 + $0x10e0] sm:$0xff] }
 0x230   : > { %3781 = vst [vmem:[%s4801_s20 + $0xf90] sm:$0xff] %v2757_v28  ;;  %v733_v28 = vld [vmem:[%s4779_s14 + $0x1050] sm:$0xff]  ;;  %v2780_v33 = vadd.f32 %v1756_v26, %v732_v25  ;;  %v1776_v22 = vld [vmem:[%s4786_s26 + $0x10e8] sm:$0xff] }
 0x231   : > { %3782 = vst [vmem:[%s4801_s20 + $0xf98] sm:$0xff] %v2758_v31  ;;  %v734_v31 = vld [vmem:[%s4779_s14 + $0x1058] sm:$0xff]  ;;  %v2781_v36 = vadd.f32 %v1757_v29, %v733_v28  ;;  %v1777_v25 = vld [vmem:[%s4786_s26 + $0x10f0] sm:$0xff] }
 0x232   : > { %3783 = vst [vmem:[%s4801_s20 + $0xfa0] sm:$0xff] %v2759_v34  ;;  %v735_v34 = vld [vmem:[%s4779_s14 + $0x1060] sm:$0xff]  ;;  %v2782_v39 = vadd.f32 %v1758_v32, %v734_v31  ;;  %v1778_v28 = vld [vmem:[%s4786_s26 + $0x10f8] sm:$0xff] }
 0x233   : > { %3784 = vst [vmem:[%s4801_s20 + $0xfa8] sm:$0xff] %v2760_v37  ;;  %v736_v37 = vld [vmem:[%s4779_s14 + $0x1068] sm:$0xff]  ;;  %v2783_v42 = vadd.f32 %v1759_v35, %v735_v34  ;;  %v1779_v31 = vld [vmem:[%s4786_s26 + $0x1100] sm:$0xff] }
 0x234   : > { %3785 = vst [vmem:[%s4801_s20 + $0xfb0] sm:$0xff] %v2761_v40  ;;  %v737_v40 = vld [vmem:[%s4779_s14 + $0x1070] sm:$0xff]  ;;  %v2784_v45 = vadd.f32 %v1760_v38, %v736_v37  ;;  %v1780_v34 = vld [vmem:[%s4786_s26 + $0x1108] sm:$0xff] }
 0x235   : > { %3786 = vst [vmem:[%s4801_s20 + $0xfb8] sm:$0xff] %v2762_v43  ;;  %v738_v43 = vld [vmem:[%s4779_s14 + $0x1078] sm:$0xff]  ;;  %v2785_v48 = vadd.f32 %v1761_v41, %v737_v40  ;;  %v1781_v37 = vld [vmem:[%s4786_s26 + $0x1110] sm:$0xff] }
 0x236   : > { %3787 = vst [vmem:[%s4801_s20 + $0xfc0] sm:$0xff] %v2763_v46  ;;  %v739_v46 = vld [vmem:[%s4779_s14 + $0x1080] sm:$0xff]  ;;  %v2786_v51 = vadd.f32 %v1762_v44, %v738_v43  ;;  %v1782_v40 = vld [vmem:[%s4786_s26 + $0x1118] sm:$0xff] }
 0x237   : > { %3788 = vst [vmem:[%s4801_s20 + $0xfc8] sm:$0xff] %v2764_v49  ;;  %v740_v49 = vld [vmem:[%s4779_s14 + $0x1088] sm:$0xff]  ;;  %v2787_v54 = vadd.f32 %v1763_v47, %v739_v46  ;;  %v1783_v43 = vld [vmem:[%s4786_s26 + $0x1120] sm:$0xff] }
 0x238   : > { %3789 = vst [vmem:[%s4801_s20 + $0xfd0] sm:$0xff] %v2765_v52  ;;  %v741_v52 = vld [vmem:[%s4779_s14 + $0x1090] sm:$0xff]  ;;  %v2788_v57 = vadd.f32 %v1764_v50, %v740_v49  ;;  %v1784_v46 = vld [vmem:[%s4786_s26 + $0x1128] sm:$0xff] }
 0x239   : > { %3790 = vst [vmem:[%s4801_s20 + $0xfd8] sm:$0xff] %v2766_v55  ;;  %v742_v55 = vld [vmem:[%s4779_s14 + $0x1098] sm:$0xff]  ;;  %v2789_v60 = vadd.f32 %v1765_v53, %v741_v52  ;;  %v1785_v49 = vld [vmem:[%s4786_s26 + $0x1130] sm:$0xff] }
 0x23a   : > { %3791 = vst [vmem:[%s4801_s20 + $0xfe0] sm:$0xff] %v2767_v58  ;;  %v743_v58 = vld [vmem:[%s4779_s14 + $0x10a0] sm:$0xff]  ;;  %v2790_v63 = vadd.f32 %v1766_v56, %v742_v55  ;;  %v1786_v52 = vld [vmem:[%s4786_s26 + $0x1138] sm:$0xff] }
 0x23b   : > { %3792 = vst [vmem:[%s4801_s20 + $0xfe8] sm:$0xff] %v2768_v61  ;;  %v744_v61 = vld [vmem:[%s4779_s14 + $0x10a8] sm:$0xff]  ;;  %v2791_v2 = vadd.f32 %v1767_v59, %v743_v58  ;;  %v1787_v55 = vld [vmem:[%s4786_s26 + $0x1140] sm:$0xff] }
 0x23c   : > { %3793 = vst [vmem:[%s4801_s20 + $0xff0] sm:$0xff] %v2769_v0  ;;  %v745_v0 = vld [vmem:[%s4779_s14 + $0x10b0] sm:$0xff]  ;;  %v2792_v5 = vadd.f32 %v1768_v62, %v744_v61  ;;  %v1788_v58 = vld [vmem:[%s4786_s26 + $0x1148] sm:$0xff] }
 0x23d   : > { %3794 = vst [vmem:[%s4801_s20 + $0xff8] sm:$0xff] %v2770_v3  ;;  %v746_v3 = vld [vmem:[%s4779_s14 + $0x10b8] sm:$0xff]  ;;  %v2793_v8 = vadd.f32 %v1769_v1, %v745_v0  ;;  %v1789_v61 = vld [vmem:[%s4786_s26 + $0x1150] sm:$0xff] }
 0x23e   : > { %3795 = vst [vmem:[%s4801_s20 + $0x1000] sm:$0xff] %v2771_v6  ;;  %v747_v6 = vld [vmem:[%s4779_s14 + $0x10c0] sm:$0xff]  ;;  %v2794_v11 = vadd.f32 %v1770_v4, %v746_v3  ;;  %v1790_v0 = vld [vmem:[%s4786_s26 + $0x1158] sm:$0xff] }
 0x23f   : > { %3796 = vst [vmem:[%s4801_s20 + $0x1008] sm:$0xff] %v2772_v9  ;;  %v748_v9 = vld [vmem:[%s4779_s14 + $0x10c8] sm:$0xff]  ;;  %v2795_v14 = vadd.f32 %v1771_v7, %v747_v6  ;;  %v1791_v3 = vld [vmem:[%s4786_s26 + $0x1160] sm:$0xff] }
 0x240   : > { %3797 = vst [vmem:[%s4801_s20 + $0x1010] sm:$0xff] %v2773_v12  ;;  %v749_v12 = vld [vmem:[%s4779_s14 + $0x10d0] sm:$0xff]  ;;  %v2796_v17 = vadd.f32 %v1772_v10, %v748_v9  ;;  %v1792_v6 = vld [vmem:[%s4786_s26 + $0x1168] sm:$0xff] }
 0x241   : > { %3798 = vst [vmem:[%s4801_s20 + $0x1018] sm:$0xff] %v2774_v15  ;;  %v750_v15 = vld [vmem:[%s4779_s14 + $0x10d8] sm:$0xff]  ;;  %v2797_v20 = vadd.f32 %v1773_v13, %v749_v12  ;;  %v1793_v9 = vld [vmem:[%s4786_s26 + $0x1170] sm:$0xff] }
 0x242   : > { %3799 = vst [vmem:[%s4801_s20 + $0x1020] sm:$0xff] %v2775_v18  ;;  %v751_v18 = vld [vmem:[%s4779_s14 + $0x10e0] sm:$0xff]  ;;  %v2798_v23 = vadd.f32 %v1774_v16, %v750_v15  ;;  %v1794_v12 = vld [vmem:[%s4786_s26 + $0x1178] sm:$0xff] }
 0x243   : > { %3800 = vst [vmem:[%s4801_s20 + $0x1028] sm:$0xff] %v2776_v21  ;;  %v752_v21 = vld [vmem:[%s4779_s14 + $0x10e8] sm:$0xff]  ;;  %v2799_v26 = vadd.f32 %v1775_v19, %v751_v18  ;;  %v1795_v15 = vld [vmem:[%s4786_s26 + $0x1180] sm:$0xff] }
 0x244   : > { %3801 = vst [vmem:[%s4801_s20 + $0x1030] sm:$0xff] %v2777_v24  ;;  %v753_v24 = vld [vmem:[%s4779_s14 + $0x10f0] sm:$0xff]  ;;  %v2800_v29 = vadd.f32 %v1776_v22, %v752_v21  ;;  %v1796_v18 = vld [vmem:[%s4786_s26 + $0x1188] sm:$0xff] }
 0x245   : > { %3802 = vst [vmem:[%s4801_s20 + $0x1038] sm:$0xff] %v2778_v27  ;;  %v754_v27 = vld [vmem:[%s4779_s14 + $0x10f8] sm:$0xff]  ;;  %v2801_v32 = vadd.f32 %v1777_v25, %v753_v24  ;;  %v1797_v21 = vld [vmem:[%s4786_s26 + $0x1190] sm:$0xff] }
 0x246   : > { %3803 = vst [vmem:[%s4801_s20 + $0x1040] sm:$0xff] %v2779_v30  ;;  %v755_v30 = vld [vmem:[%s4779_s14 + $0x1100] sm:$0xff]  ;;  %v2802_v35 = vadd.f32 %v1778_v28, %v754_v27  ;;  %v1798_v24 = vld [vmem:[%s4786_s26 + $0x1198] sm:$0xff] }
 0x247   : > { %3804 = vst [vmem:[%s4801_s20 + $0x1048] sm:$0xff] %v2780_v33  ;;  %v756_v33 = vld [vmem:[%s4779_s14 + $0x1108] sm:$0xff]  ;;  %v2803_v38 = vadd.f32 %v1779_v31, %v755_v30  ;;  %v1799_v27 = vld [vmem:[%s4786_s26 + $0x11a0] sm:$0xff] }
 0x248   : > { %3805 = vst [vmem:[%s4801_s20 + $0x1050] sm:$0xff] %v2781_v36  ;;  %v757_v36 = vld [vmem:[%s4779_s14 + $0x1110] sm:$0xff]  ;;  %v2804_v41 = vadd.f32 %v1780_v34, %v756_v33  ;;  %v1800_v30 = vld [vmem:[%s4786_s26 + $0x11a8] sm:$0xff] }
 0x249   : > { %3806 = vst [vmem:[%s4801_s20 + $0x1058] sm:$0xff] %v2782_v39  ;;  %v758_v39 = vld [vmem:[%s4779_s14 + $0x1118] sm:$0xff]  ;;  %v2805_v44 = vadd.f32 %v1781_v37, %v757_v36  ;;  %v1801_v33 = vld [vmem:[%s4786_s26 + $0x11b0] sm:$0xff] }
 0x24a   : > { %3807 = vst [vmem:[%s4801_s20 + $0x1060] sm:$0xff] %v2783_v42  ;;  %v759_v42 = vld [vmem:[%s4779_s14 + $0x1120] sm:$0xff]  ;;  %v2806_v47 = vadd.f32 %v1782_v40, %v758_v39  ;;  %v1802_v36 = vld [vmem:[%s4786_s26 + $0x11b8] sm:$0xff] }
 0x24b   : > { %3808 = vst [vmem:[%s4801_s20 + $0x1068] sm:$0xff] %v2784_v45  ;;  %v760_v45 = vld [vmem:[%s4779_s14 + $0x1128] sm:$0xff]  ;;  %v2807_v50 = vadd.f32 %v1783_v43, %v759_v42  ;;  %v1803_v39 = vld [vmem:[%s4786_s26 + $0x11c0] sm:$0xff] }
 0x24c   : > { %3809 = vst [vmem:[%s4801_s20 + $0x1070] sm:$0xff] %v2785_v48  ;;  %v761_v48 = vld [vmem:[%s4779_s14 + $0x1130] sm:$0xff]  ;;  %v2808_v53 = vadd.f32 %v1784_v46, %v760_v45  ;;  %v1804_v42 = vld [vmem:[%s4786_s26 + $0x11c8] sm:$0xff] }
 0x24d   : > { %3810 = vst [vmem:[%s4801_s20 + $0x1078] sm:$0xff] %v2786_v51  ;;  %v762_v51 = vld [vmem:[%s4779_s14 + $0x1138] sm:$0xff]  ;;  %v2809_v56 = vadd.f32 %v1785_v49, %v761_v48  ;;  %v1805_v45 = vld [vmem:[%s4786_s26 + $0x11d0] sm:$0xff] }
 0x24e   : > { %3811 = vst [vmem:[%s4801_s20 + $0x1080] sm:$0xff] %v2787_v54  ;;  %v763_v54 = vld [vmem:[%s4779_s14 + $0x1140] sm:$0xff]  ;;  %v2810_v59 = vadd.f32 %v1786_v52, %v762_v51  ;;  %v1806_v48 = vld [vmem:[%s4786_s26 + $0x11d8] sm:$0xff] }
 0x24f   : > { %3812 = vst [vmem:[%s4801_s20 + $0x1088] sm:$0xff] %v2788_v57  ;;  %v764_v57 = vld [vmem:[%s4779_s14 + $0x1148] sm:$0xff]  ;;  %v2811_v62 = vadd.f32 %v1787_v55, %v763_v54  ;;  %v1807_v51 = vld [vmem:[%s4786_s26 + $0x11e0] sm:$0xff] }
 0x250   : > { %3813 = vst [vmem:[%s4801_s20 + $0x1090] sm:$0xff] %v2789_v60  ;;  %v765_v60 = vld [vmem:[%s4779_s14 + $0x1150] sm:$0xff]  ;;  %v2812_v1 = vadd.f32 %v1788_v58, %v764_v57  ;;  %v1808_v54 = vld [vmem:[%s4786_s26 + $0x11e8] sm:$0xff] }
 0x251   : > { %3814 = vst [vmem:[%s4801_s20 + $0x1098] sm:$0xff] %v2790_v63  ;;  %v766_v63 = vld [vmem:[%s4779_s14 + $0x1158] sm:$0xff]  ;;  %v2813_v4 = vadd.f32 %v1789_v61, %v765_v60  ;;  %v1809_v57 = vld [vmem:[%s4786_s26 + $0x11f0] sm:$0xff] }
 0x252   : > { %3815 = vst [vmem:[%s4801_s20 + $0x10a0] sm:$0xff] %v2791_v2  ;;  %v767_v2 = vld [vmem:[%s4779_s14 + $0x1160] sm:$0xff]  ;;  %v2814_v7 = vadd.f32 %v1790_v0, %v766_v63  ;;  %v1810_v60 = vld [vmem:[%s4786_s26 + $0x11f8] sm:$0xff] }
 0x253   : > { %3816 = vst [vmem:[%s4801_s20 + $0x10a8] sm:$0xff] %v2792_v5  ;;  %v768_v5 = vld [vmem:[%s4779_s14 + $0x1168] sm:$0xff]  ;;  %v2815_v10 = vadd.f32 %v1791_v3, %v767_v2  ;;  %v1811_v63 = vld [vmem:[%s4786_s26 + $0x1200] sm:$0xff] }
 0x254   : > { %3817 = vst [vmem:[%s4801_s20 + $0x10b0] sm:$0xff] %v2793_v8  ;;  %v769_v8 = vld [vmem:[%s4779_s14 + $0x1170] sm:$0xff]  ;;  %v2816_v13 = vadd.f32 %v1792_v6, %v768_v5  ;;  %v1812_v2 = vld [vmem:[%s4786_s26 + $0x1208] sm:$0xff] }
 0x255   : > { %3818 = vst [vmem:[%s4801_s20 + $0x10b8] sm:$0xff] %v2794_v11  ;;  %v770_v11 = vld [vmem:[%s4779_s14 + $0x1178] sm:$0xff]  ;;  %v2817_v16 = vadd.f32 %v1793_v9, %v769_v8  ;;  %v1813_v5 = vld [vmem:[%s4786_s26 + $0x1210] sm:$0xff] }
 0x256   : > { %3819 = vst [vmem:[%s4801_s20 + $0x10c0] sm:$0xff] %v2795_v14  ;;  %v771_v14 = vld [vmem:[%s4779_s14 + $0x1180] sm:$0xff]  ;;  %v2818_v19 = vadd.f32 %v1794_v12, %v770_v11  ;;  %v1814_v8 = vld [vmem:[%s4786_s26 + $0x1218] sm:$0xff] }
 0x257   : > { %3820 = vst [vmem:[%s4801_s20 + $0x10c8] sm:$0xff] %v2796_v17  ;;  %v772_v17 = vld [vmem:[%s4779_s14 + $0x1188] sm:$0xff]  ;;  %v2819_v22 = vadd.f32 %v1795_v15, %v771_v14  ;;  %v1815_v11 = vld [vmem:[%s4786_s26 + $0x1220] sm:$0xff] }
 0x258   : > { %3821 = vst [vmem:[%s4801_s20 + $0x10d0] sm:$0xff] %v2797_v20  ;;  %v773_v20 = vld [vmem:[%s4779_s14 + $0x1190] sm:$0xff]  ;;  %v2820_v25 = vadd.f32 %v1796_v18, %v772_v17  ;;  %v1816_v14 = vld [vmem:[%s4786_s26 + $0x1228] sm:$0xff] }
 0x259   : > { %3822 = vst [vmem:[%s4801_s20 + $0x10d8] sm:$0xff] %v2798_v23  ;;  %v774_v23 = vld [vmem:[%s4779_s14 + $0x1198] sm:$0xff]  ;;  %v2821_v28 = vadd.f32 %v1797_v21, %v773_v20  ;;  %v1817_v17 = vld [vmem:[%s4786_s26 + $0x1230] sm:$0xff] }
 0x25a   : > { %3823 = vst [vmem:[%s4801_s20 + $0x10e0] sm:$0xff] %v2799_v26  ;;  %v775_v26 = vld [vmem:[%s4779_s14 + $0x11a0] sm:$0xff]  ;;  %v2822_v31 = vadd.f32 %v1798_v24, %v774_v23  ;;  %v1818_v20 = vld [vmem:[%s4786_s26 + $0x1238] sm:$0xff] }
 0x25b   : > { %3824 = vst [vmem:[%s4801_s20 + $0x10e8] sm:$0xff] %v2800_v29  ;;  %v776_v29 = vld [vmem:[%s4779_s14 + $0x11a8] sm:$0xff]  ;;  %v2823_v34 = vadd.f32 %v1799_v27, %v775_v26  ;;  %v1819_v23 = vld [vmem:[%s4786_s26 + $0x1240] sm:$0xff] }
 0x25c   : > { %3825 = vst [vmem:[%s4801_s20 + $0x10f0] sm:$0xff] %v2801_v32  ;;  %v777_v32 = vld [vmem:[%s4779_s14 + $0x11b0] sm:$0xff]  ;;  %v2824_v37 = vadd.f32 %v1800_v30, %v776_v29  ;;  %v1820_v26 = vld [vmem:[%s4786_s26 + $0x1248] sm:$0xff] }
 0x25d   : > { %3826 = vst [vmem:[%s4801_s20 + $0x10f8] sm:$0xff] %v2802_v35  ;;  %v778_v35 = vld [vmem:[%s4779_s14 + $0x11b8] sm:$0xff]  ;;  %v2825_v40 = vadd.f32 %v1801_v33, %v777_v32  ;;  %v1821_v29 = vld [vmem:[%s4786_s26 + $0x1250] sm:$0xff] }
 0x25e   : > { %3827 = vst [vmem:[%s4801_s20 + $0x1100] sm:$0xff] %v2803_v38  ;;  %v779_v38 = vld [vmem:[%s4779_s14 + $0x11c0] sm:$0xff]  ;;  %v2826_v43 = vadd.f32 %v1802_v36, %v778_v35  ;;  %v1822_v32 = vld [vmem:[%s4786_s26 + $0x1258] sm:$0xff] }
 0x25f   : > { %3828 = vst [vmem:[%s4801_s20 + $0x1108] sm:$0xff] %v2804_v41  ;;  %v780_v41 = vld [vmem:[%s4779_s14 + $0x11c8] sm:$0xff]  ;;  %v2827_v46 = vadd.f32 %v1803_v39, %v779_v38  ;;  %v1823_v35 = vld [vmem:[%s4786_s26 + $0x1260] sm:$0xff] }
 0x260   : > { %3829 = vst [vmem:[%s4801_s20 + $0x1110] sm:$0xff] %v2805_v44  ;;  %v781_v44 = vld [vmem:[%s4779_s14 + $0x11d0] sm:$0xff]  ;;  %v2828_v49 = vadd.f32 %v1804_v42, %v780_v41  ;;  %v1824_v38 = vld [vmem:[%s4786_s26 + $0x1268] sm:$0xff] }
 0x261   : > { %3830 = vst [vmem:[%s4801_s20 + $0x1118] sm:$0xff] %v2806_v47  ;;  %v782_v47 = vld [vmem:[%s4779_s14 + $0x11d8] sm:$0xff]  ;;  %v2829_v52 = vadd.f32 %v1805_v45, %v781_v44  ;;  %v1825_v41 = vld [vmem:[%s4786_s26 + $0x1270] sm:$0xff] }
 0x262   : > { %3831 = vst [vmem:[%s4801_s20 + $0x1120] sm:$0xff] %v2807_v50  ;;  %v783_v50 = vld [vmem:[%s4779_s14 + $0x11e0] sm:$0xff]  ;;  %v2830_v55 = vadd.f32 %v1806_v48, %v782_v47  ;;  %v1826_v44 = vld [vmem:[%s4786_s26 + $0x1278] sm:$0xff] }
 0x263   : > { %3832 = vst [vmem:[%s4801_s20 + $0x1128] sm:$0xff] %v2808_v53  ;;  %v784_v53 = vld [vmem:[%s4779_s14 + $0x11e8] sm:$0xff]  ;;  %v2831_v58 = vadd.f32 %v1807_v51, %v783_v50  ;;  %v1827_v47 = vld [vmem:[%s4786_s26 + $0x1280] sm:$0xff] }
 0x264   : > { %3833 = vst [vmem:[%s4801_s20 + $0x1130] sm:$0xff] %v2809_v56  ;;  %v785_v56 = vld [vmem:[%s4779_s14 + $0x11f0] sm:$0xff]  ;;  %v2832_v61 = vadd.f32 %v1808_v54, %v784_v53  ;;  %v1828_v50 = vld [vmem:[%s4786_s26 + $0x1288] sm:$0xff] }
 0x265   : > { %3834 = vst [vmem:[%s4801_s20 + $0x1138] sm:$0xff] %v2810_v59  ;;  %v786_v59 = vld [vmem:[%s4779_s14 + $0x11f8] sm:$0xff]  ;;  %v2833_v0 = vadd.f32 %v1809_v57, %v785_v56  ;;  %v1829_v53 = vld [vmem:[%s4786_s26 + $0x1290] sm:$0xff] }
 0x266   : > { %3835 = vst [vmem:[%s4801_s20 + $0x1140] sm:$0xff] %v2811_v62  ;;  %v787_v62 = vld [vmem:[%s4779_s14 + $0x1200] sm:$0xff]  ;;  %v2834_v3 = vadd.f32 %v1810_v60, %v786_v59  ;;  %v1830_v56 = vld [vmem:[%s4786_s26 + $0x1298] sm:$0xff] }
 0x267   : > { %3836 = vst [vmem:[%s4801_s20 + $0x1148] sm:$0xff] %v2812_v1  ;;  %v788_v1 = vld [vmem:[%s4779_s14 + $0x1208] sm:$0xff]  ;;  %v2835_v6 = vadd.f32 %v1811_v63, %v787_v62  ;;  %v1831_v59 = vld [vmem:[%s4786_s26 + $0x12a0] sm:$0xff] }
 0x268   : > { %3837 = vst [vmem:[%s4801_s20 + $0x1150] sm:$0xff] %v2813_v4  ;;  %v789_v4 = vld [vmem:[%s4779_s14 + $0x1210] sm:$0xff]  ;;  %v2836_v9 = vadd.f32 %v1812_v2, %v788_v1  ;;  %v1832_v62 = vld [vmem:[%s4786_s26 + $0x12a8] sm:$0xff] }
 0x269   : > { %3838 = vst [vmem:[%s4801_s20 + $0x1158] sm:$0xff] %v2814_v7  ;;  %v790_v7 = vld [vmem:[%s4779_s14 + $0x1218] sm:$0xff]  ;;  %v2837_v12 = vadd.f32 %v1813_v5, %v789_v4  ;;  %v1833_v1 = vld [vmem:[%s4786_s26 + $0x12b0] sm:$0xff] }
 0x26a   : > { %3839 = vst [vmem:[%s4801_s20 + $0x1160] sm:$0xff] %v2815_v10  ;;  %v791_v10 = vld [vmem:[%s4779_s14 + $0x1220] sm:$0xff]  ;;  %v2838_v15 = vadd.f32 %v1814_v8, %v790_v7  ;;  %v1834_v4 = vld [vmem:[%s4786_s26 + $0x12b8] sm:$0xff] }
 0x26b   : > { %3840 = vst [vmem:[%s4801_s20 + $0x1168] sm:$0xff] %v2816_v13  ;;  %v792_v13 = vld [vmem:[%s4779_s14 + $0x1228] sm:$0xff]  ;;  %v2839_v18 = vadd.f32 %v1815_v11, %v791_v10  ;;  %v1835_v7 = vld [vmem:[%s4786_s26 + $0x12c0] sm:$0xff] }
 0x26c   : > { %3841 = vst [vmem:[%s4801_s20 + $0x1170] sm:$0xff] %v2817_v16  ;;  %v793_v16 = vld [vmem:[%s4779_s14 + $0x1230] sm:$0xff]  ;;  %v2840_v21 = vadd.f32 %v1816_v14, %v792_v13  ;;  %v1836_v10 = vld [vmem:[%s4786_s26 + $0x12c8] sm:$0xff] }
 0x26d   : > { %3842 = vst [vmem:[%s4801_s20 + $0x1178] sm:$0xff] %v2818_v19  ;;  %v794_v19 = vld [vmem:[%s4779_s14 + $0x1238] sm:$0xff]  ;;  %v2841_v24 = vadd.f32 %v1817_v17, %v793_v16  ;;  %v1837_v13 = vld [vmem:[%s4786_s26 + $0x12d0] sm:$0xff] }
 0x26e   : > { %3843 = vst [vmem:[%s4801_s20 + $0x1180] sm:$0xff] %v2819_v22  ;;  %v795_v22 = vld [vmem:[%s4779_s14 + $0x1240] sm:$0xff]  ;;  %v2842_v27 = vadd.f32 %v1818_v20, %v794_v19  ;;  %v1838_v16 = vld [vmem:[%s4786_s26 + $0x12d8] sm:$0xff] }
 0x26f   : > { %3844 = vst [vmem:[%s4801_s20 + $0x1188] sm:$0xff] %v2820_v25  ;;  %v796_v25 = vld [vmem:[%s4779_s14 + $0x1248] sm:$0xff]  ;;  %v2843_v30 = vadd.f32 %v1819_v23, %v795_v22  ;;  %v1839_v19 = vld [vmem:[%s4786_s26 + $0x12e0] sm:$0xff] }
 0x270   : > { %3845 = vst [vmem:[%s4801_s20 + $0x1190] sm:$0xff] %v2821_v28  ;;  %v797_v28 = vld [vmem:[%s4779_s14 + $0x1250] sm:$0xff]  ;;  %v2844_v33 = vadd.f32 %v1820_v26, %v796_v25  ;;  %v1840_v22 = vld [vmem:[%s4786_s26 + $0x12e8] sm:$0xff] }
 0x271   : > { %3846 = vst [vmem:[%s4801_s20 + $0x1198] sm:$0xff] %v2822_v31  ;;  %v798_v31 = vld [vmem:[%s4779_s14 + $0x1258] sm:$0xff]  ;;  %v2845_v36 = vadd.f32 %v1821_v29, %v797_v28  ;;  %v1841_v25 = vld [vmem:[%s4786_s26 + $0x12f0] sm:$0xff] }
 0x272   : > { %3847 = vst [vmem:[%s4801_s20 + $0x11a0] sm:$0xff] %v2823_v34  ;;  %v799_v34 = vld [vmem:[%s4779_s14 + $0x1260] sm:$0xff]  ;;  %v2846_v39 = vadd.f32 %v1822_v32, %v798_v31  ;;  %v1842_v28 = vld [vmem:[%s4786_s26 + $0x12f8] sm:$0xff] }
 0x273   : > { %3848 = vst [vmem:[%s4801_s20 + $0x11a8] sm:$0xff] %v2824_v37  ;;  %v800_v37 = vld [vmem:[%s4779_s14 + $0x1268] sm:$0xff]  ;;  %v2847_v42 = vadd.f32 %v1823_v35, %v799_v34  ;;  %v1843_v31 = vld [vmem:[%s4786_s26 + $0x1300] sm:$0xff] }
 0x274   : > { %3849 = vst [vmem:[%s4801_s20 + $0x11b0] sm:$0xff] %v2825_v40  ;;  %v801_v40 = vld [vmem:[%s4779_s14 + $0x1270] sm:$0xff]  ;;  %v2848_v45 = vadd.f32 %v1824_v38, %v800_v37  ;;  %v1844_v34 = vld [vmem:[%s4786_s26 + $0x1308] sm:$0xff] }
 0x275   : > { %3850 = vst [vmem:[%s4801_s20 + $0x11b8] sm:$0xff] %v2826_v43  ;;  %v802_v43 = vld [vmem:[%s4779_s14 + $0x1278] sm:$0xff]  ;;  %v2849_v48 = vadd.f32 %v1825_v41, %v801_v40  ;;  %v1845_v37 = vld [vmem:[%s4786_s26 + $0x1310] sm:$0xff] }
 0x276   : > { %3851 = vst [vmem:[%s4801_s20 + $0x11c0] sm:$0xff] %v2827_v46  ;;  %v803_v46 = vld [vmem:[%s4779_s14 + $0x1280] sm:$0xff]  ;;  %v2850_v51 = vadd.f32 %v1826_v44, %v802_v43  ;;  %v1846_v40 = vld [vmem:[%s4786_s26 + $0x1318] sm:$0xff] }
 0x277   : > { %3852 = vst [vmem:[%s4801_s20 + $0x11c8] sm:$0xff] %v2828_v49  ;;  %v804_v49 = vld [vmem:[%s4779_s14 + $0x1288] sm:$0xff]  ;;  %v2851_v54 = vadd.f32 %v1827_v47, %v803_v46  ;;  %v1847_v43 = vld [vmem:[%s4786_s26 + $0x1320] sm:$0xff] }
 0x278   : > { %3853 = vst [vmem:[%s4801_s20 + $0x11d0] sm:$0xff] %v2829_v52  ;;  %v805_v52 = vld [vmem:[%s4779_s14 + $0x1290] sm:$0xff]  ;;  %v2852_v57 = vadd.f32 %v1828_v50, %v804_v49  ;;  %v1848_v46 = vld [vmem:[%s4786_s26 + $0x1328] sm:$0xff] }
 0x279   : > { %3854 = vst [vmem:[%s4801_s20 + $0x11d8] sm:$0xff] %v2830_v55  ;;  %v806_v55 = vld [vmem:[%s4779_s14 + $0x1298] sm:$0xff]  ;;  %v2853_v60 = vadd.f32 %v1829_v53, %v805_v52  ;;  %v1849_v49 = vld [vmem:[%s4786_s26 + $0x1330] sm:$0xff] }
 0x27a   : > { %3855 = vst [vmem:[%s4801_s20 + $0x11e0] sm:$0xff] %v2831_v58  ;;  %v807_v58 = vld [vmem:[%s4779_s14 + $0x12a0] sm:$0xff]  ;;  %v2854_v63 = vadd.f32 %v1830_v56, %v806_v55  ;;  %v1850_v52 = vld [vmem:[%s4786_s26 + $0x1338] sm:$0xff] }
 0x27b   : > { %3856 = vst [vmem:[%s4801_s20 + $0x11e8] sm:$0xff] %v2832_v61  ;;  %v808_v61 = vld [vmem:[%s4779_s14 + $0x12a8] sm:$0xff]  ;;  %v2855_v2 = vadd.f32 %v1831_v59, %v807_v58  ;;  %v1851_v55 = vld [vmem:[%s4786_s26 + $0x1340] sm:$0xff] }
 0x27c   : > { %3857 = vst [vmem:[%s4801_s20 + $0x11f0] sm:$0xff] %v2833_v0  ;;  %v809_v0 = vld [vmem:[%s4779_s14 + $0x12b0] sm:$0xff]  ;;  %v2856_v5 = vadd.f32 %v1832_v62, %v808_v61  ;;  %v1852_v58 = vld [vmem:[%s4786_s26 + $0x1348] sm:$0xff] }
 0x27d   : > { %3858 = vst [vmem:[%s4801_s20 + $0x11f8] sm:$0xff] %v2834_v3  ;;  %v810_v3 = vld [vmem:[%s4779_s14 + $0x12b8] sm:$0xff]  ;;  %v2857_v8 = vadd.f32 %v1833_v1, %v809_v0  ;;  %v1853_v61 = vld [vmem:[%s4786_s26 + $0x1350] sm:$0xff] }
 0x27e   : > { %3859 = vst [vmem:[%s4801_s20 + $0x1200] sm:$0xff] %v2835_v6  ;;  %v811_v6 = vld [vmem:[%s4779_s14 + $0x12c0] sm:$0xff]  ;;  %v2858_v11 = vadd.f32 %v1834_v4, %v810_v3  ;;  %v1854_v0 = vld [vmem:[%s4786_s26 + $0x1358] sm:$0xff] }
 0x27f   : > { %3860 = vst [vmem:[%s4801_s20 + $0x1208] sm:$0xff] %v2836_v9  ;;  %v812_v9 = vld [vmem:[%s4779_s14 + $0x12c8] sm:$0xff]  ;;  %v2859_v14 = vadd.f32 %v1835_v7, %v811_v6  ;;  %v1855_v3 = vld [vmem:[%s4786_s26 + $0x1360] sm:$0xff] }
 0x280   : > { %3861 = vst [vmem:[%s4801_s20 + $0x1210] sm:$0xff] %v2837_v12  ;;  %v813_v12 = vld [vmem:[%s4779_s14 + $0x12d0] sm:$0xff]  ;;  %v2860_v17 = vadd.f32 %v1836_v10, %v812_v9  ;;  %v1856_v6 = vld [vmem:[%s4786_s26 + $0x1368] sm:$0xff] }
 0x281   : > { %3862 = vst [vmem:[%s4801_s20 + $0x1218] sm:$0xff] %v2838_v15  ;;  %v814_v15 = vld [vmem:[%s4779_s14 + $0x12d8] sm:$0xff]  ;;  %v2861_v20 = vadd.f32 %v1837_v13, %v813_v12  ;;  %v1857_v9 = vld [vmem:[%s4786_s26 + $0x1370] sm:$0xff] }
 0x282   : > { %3863 = vst [vmem:[%s4801_s20 + $0x1220] sm:$0xff] %v2839_v18  ;;  %v815_v18 = vld [vmem:[%s4779_s14 + $0x12e0] sm:$0xff]  ;;  %v2862_v23 = vadd.f32 %v1838_v16, %v814_v15  ;;  %v1858_v12 = vld [vmem:[%s4786_s26 + $0x1378] sm:$0xff] }
 0x283   : > { %3864 = vst [vmem:[%s4801_s20 + $0x1228] sm:$0xff] %v2840_v21  ;;  %v816_v21 = vld [vmem:[%s4779_s14 + $0x12e8] sm:$0xff]  ;;  %v2863_v26 = vadd.f32 %v1839_v19, %v815_v18  ;;  %v1859_v15 = vld [vmem:[%s4786_s26 + $0x1380] sm:$0xff] }
 0x284   : > { %3865 = vst [vmem:[%s4801_s20 + $0x1230] sm:$0xff] %v2841_v24  ;;  %v817_v24 = vld [vmem:[%s4779_s14 + $0x12f0] sm:$0xff]  ;;  %v2864_v29 = vadd.f32 %v1840_v22, %v816_v21  ;;  %v1860_v18 = vld [vmem:[%s4786_s26 + $0x1388] sm:$0xff] }
 0x285   : > { %3866 = vst [vmem:[%s4801_s20 + $0x1238] sm:$0xff] %v2842_v27  ;;  %v818_v27 = vld [vmem:[%s4779_s14 + $0x12f8] sm:$0xff]  ;;  %v2865_v32 = vadd.f32 %v1841_v25, %v817_v24  ;;  %v1861_v21 = vld [vmem:[%s4786_s26 + $0x1390] sm:$0xff] }
 0x286   : > { %3867 = vst [vmem:[%s4801_s20 + $0x1240] sm:$0xff] %v2843_v30  ;;  %v819_v30 = vld [vmem:[%s4779_s14 + $0x1300] sm:$0xff]  ;;  %v2866_v35 = vadd.f32 %v1842_v28, %v818_v27  ;;  %v1862_v24 = vld [vmem:[%s4786_s26 + $0x1398] sm:$0xff] }
 0x287   : > { %3868 = vst [vmem:[%s4801_s20 + $0x1248] sm:$0xff] %v2844_v33  ;;  %v820_v33 = vld [vmem:[%s4779_s14 + $0x1308] sm:$0xff]  ;;  %v2867_v38 = vadd.f32 %v1843_v31, %v819_v30  ;;  %v1863_v27 = vld [vmem:[%s4786_s26 + $0x13a0] sm:$0xff] }
 0x288   : > { %3869 = vst [vmem:[%s4801_s20 + $0x1250] sm:$0xff] %v2845_v36  ;;  %v821_v36 = vld [vmem:[%s4779_s14 + $0x1310] sm:$0xff]  ;;  %v2868_v41 = vadd.f32 %v1844_v34, %v820_v33  ;;  %v1864_v30 = vld [vmem:[%s4786_s26 + $0x13a8] sm:$0xff] }
 0x289   : > { %3870 = vst [vmem:[%s4801_s20 + $0x1258] sm:$0xff] %v2846_v39  ;;  %v822_v39 = vld [vmem:[%s4779_s14 + $0x1318] sm:$0xff]  ;;  %v2869_v44 = vadd.f32 %v1845_v37, %v821_v36  ;;  %v1865_v33 = vld [vmem:[%s4786_s26 + $0x13b0] sm:$0xff] }
 0x28a   : > { %3871 = vst [vmem:[%s4801_s20 + $0x1260] sm:$0xff] %v2847_v42  ;;  %v823_v42 = vld [vmem:[%s4779_s14 + $0x1320] sm:$0xff]  ;;  %v2870_v47 = vadd.f32 %v1846_v40, %v822_v39  ;;  %v1866_v36 = vld [vmem:[%s4786_s26 + $0x13b8] sm:$0xff] }
 0x28b   : > { %3872 = vst [vmem:[%s4801_s20 + $0x1268] sm:$0xff] %v2848_v45  ;;  %v824_v45 = vld [vmem:[%s4779_s14 + $0x1328] sm:$0xff]  ;;  %v2871_v50 = vadd.f32 %v1847_v43, %v823_v42  ;;  %v1867_v39 = vld [vmem:[%s4786_s26 + $0x13c0] sm:$0xff] }
 0x28c   : > { %3873 = vst [vmem:[%s4801_s20 + $0x1270] sm:$0xff] %v2849_v48  ;;  %v825_v48 = vld [vmem:[%s4779_s14 + $0x1330] sm:$0xff]  ;;  %v2872_v53 = vadd.f32 %v1848_v46, %v824_v45  ;;  %v1868_v42 = vld [vmem:[%s4786_s26 + $0x13c8] sm:$0xff] }
 0x28d   : > { %3874 = vst [vmem:[%s4801_s20 + $0x1278] sm:$0xff] %v2850_v51  ;;  %v826_v51 = vld [vmem:[%s4779_s14 + $0x1338] sm:$0xff]  ;;  %v2873_v56 = vadd.f32 %v1849_v49, %v825_v48  ;;  %v1869_v45 = vld [vmem:[%s4786_s26 + $0x13d0] sm:$0xff] }
 0x28e   : > { %3875 = vst [vmem:[%s4801_s20 + $0x1280] sm:$0xff] %v2851_v54  ;;  %v827_v54 = vld [vmem:[%s4779_s14 + $0x1340] sm:$0xff]  ;;  %v2874_v59 = vadd.f32 %v1850_v52, %v826_v51  ;;  %v1870_v48 = vld [vmem:[%s4786_s26 + $0x13d8] sm:$0xff] }
 0x28f   : > { %3876 = vst [vmem:[%s4801_s20 + $0x1288] sm:$0xff] %v2852_v57  ;;  %v828_v57 = vld [vmem:[%s4779_s14 + $0x1348] sm:$0xff]  ;;  %v2875_v62 = vadd.f32 %v1851_v55, %v827_v54  ;;  %v1871_v51 = vld [vmem:[%s4786_s26 + $0x13e0] sm:$0xff] }
 0x290   : > { %3877 = vst [vmem:[%s4801_s20 + $0x1290] sm:$0xff] %v2853_v60  ;;  %v829_v60 = vld [vmem:[%s4779_s14 + $0x1350] sm:$0xff]  ;;  %v2876_v1 = vadd.f32 %v1852_v58, %v828_v57  ;;  %v1872_v54 = vld [vmem:[%s4786_s26 + $0x13e8] sm:$0xff] }
 0x291   : > { %3878 = vst [vmem:[%s4801_s20 + $0x1298] sm:$0xff] %v2854_v63  ;;  %v830_v63 = vld [vmem:[%s4779_s14 + $0x1358] sm:$0xff]  ;;  %v2877_v4 = vadd.f32 %v1853_v61, %v829_v60  ;;  %v1873_v57 = vld [vmem:[%s4786_s26 + $0x13f0] sm:$0xff] }
 0x292   : > { %3879 = vst [vmem:[%s4801_s20 + $0x12a0] sm:$0xff] %v2855_v2  ;;  %v831_v2 = vld [vmem:[%s4779_s14 + $0x1360] sm:$0xff]  ;;  %v2878_v7 = vadd.f32 %v1854_v0, %v830_v63  ;;  %v1874_v60 = vld [vmem:[%s4786_s26 + $0x13f8] sm:$0xff] }
 0x293   : > { %3880 = vst [vmem:[%s4801_s20 + $0x12a8] sm:$0xff] %v2856_v5  ;;  %v832_v5 = vld [vmem:[%s4779_s14 + $0x1368] sm:$0xff]  ;;  %v2879_v10 = vadd.f32 %v1855_v3, %v831_v2  ;;  %v1875_v63 = vld [vmem:[%s4786_s26 + $0x1400] sm:$0xff] }
 0x294   : > { %3881 = vst [vmem:[%s4801_s20 + $0x12b0] sm:$0xff] %v2857_v8  ;;  %v833_v8 = vld [vmem:[%s4779_s14 + $0x1370] sm:$0xff]  ;;  %v2880_v13 = vadd.f32 %v1856_v6, %v832_v5  ;;  %v1876_v2 = vld [vmem:[%s4786_s26 + $0x1408] sm:$0xff] }
 0x295   : > { %3882 = vst [vmem:[%s4801_s20 + $0x12b8] sm:$0xff] %v2858_v11  ;;  %v834_v11 = vld [vmem:[%s4779_s14 + $0x1378] sm:$0xff]  ;;  %v2881_v16 = vadd.f32 %v1857_v9, %v833_v8  ;;  %v1877_v5 = vld [vmem:[%s4786_s26 + $0x1410] sm:$0xff] }
 0x296   : > { %3883 = vst [vmem:[%s4801_s20 + $0x12c0] sm:$0xff] %v2859_v14  ;;  %v835_v14 = vld [vmem:[%s4779_s14 + $0x1380] sm:$0xff]  ;;  %v2882_v19 = vadd.f32 %v1858_v12, %v834_v11  ;;  %v1878_v8 = vld [vmem:[%s4786_s26 + $0x1418] sm:$0xff] }
 0x297   : > { %3884 = vst [vmem:[%s4801_s20 + $0x12c8] sm:$0xff] %v2860_v17  ;;  %v836_v17 = vld [vmem:[%s4779_s14 + $0x1388] sm:$0xff]  ;;  %v2883_v22 = vadd.f32 %v1859_v15, %v835_v14  ;;  %v1879_v11 = vld [vmem:[%s4786_s26 + $0x1420] sm:$0xff] }
 0x298   : > { %3885 = vst [vmem:[%s4801_s20 + $0x12d0] sm:$0xff] %v2861_v20  ;;  %v837_v20 = vld [vmem:[%s4779_s14 + $0x1390] sm:$0xff]  ;;  %v2884_v25 = vadd.f32 %v1860_v18, %v836_v17  ;;  %v1880_v14 = vld [vmem:[%s4786_s26 + $0x1428] sm:$0xff] }
 0x299   : > { %3886 = vst [vmem:[%s4801_s20 + $0x12d8] sm:$0xff] %v2862_v23  ;;  %v838_v23 = vld [vmem:[%s4779_s14 + $0x1398] sm:$0xff]  ;;  %v2885_v28 = vadd.f32 %v1861_v21, %v837_v20  ;;  %v1881_v17 = vld [vmem:[%s4786_s26 + $0x1430] sm:$0xff] }
 0x29a   : > { %3887 = vst [vmem:[%s4801_s20 + $0x12e0] sm:$0xff] %v2863_v26  ;;  %v839_v26 = vld [vmem:[%s4779_s14 + $0x13a0] sm:$0xff]  ;;  %v2886_v31 = vadd.f32 %v1862_v24, %v838_v23  ;;  %v1882_v20 = vld [vmem:[%s4786_s26 + $0x1438] sm:$0xff] }
 0x29b   : > { %3888 = vst [vmem:[%s4801_s20 + $0x12e8] sm:$0xff] %v2864_v29  ;;  %v840_v29 = vld [vmem:[%s4779_s14 + $0x13a8] sm:$0xff]  ;;  %v2887_v34 = vadd.f32 %v1863_v27, %v839_v26  ;;  %v1883_v23 = vld [vmem:[%s4786_s26 + $0x1440] sm:$0xff] }
 0x29c   : > { %3889 = vst [vmem:[%s4801_s20 + $0x12f0] sm:$0xff] %v2865_v32  ;;  %v841_v32 = vld [vmem:[%s4779_s14 + $0x13b0] sm:$0xff]  ;;  %v2888_v37 = vadd.f32 %v1864_v30, %v840_v29  ;;  %v1884_v26 = vld [vmem:[%s4786_s26 + $0x1448] sm:$0xff] }
 0x29d   : > { %3890 = vst [vmem:[%s4801_s20 + $0x12f8] sm:$0xff] %v2866_v35  ;;  %v842_v35 = vld [vmem:[%s4779_s14 + $0x13b8] sm:$0xff]  ;;  %v2889_v40 = vadd.f32 %v1865_v33, %v841_v32  ;;  %v1885_v29 = vld [vmem:[%s4786_s26 + $0x1450] sm:$0xff] }
 0x29e   : > { %3891 = vst [vmem:[%s4801_s20 + $0x1300] sm:$0xff] %v2867_v38  ;;  %v843_v38 = vld [vmem:[%s4779_s14 + $0x13c0] sm:$0xff]  ;;  %v2890_v43 = vadd.f32 %v1866_v36, %v842_v35  ;;  %v1886_v32 = vld [vmem:[%s4786_s26 + $0x1458] sm:$0xff] }
 0x29f   : > { %3892 = vst [vmem:[%s4801_s20 + $0x1308] sm:$0xff] %v2868_v41  ;;  %v844_v41 = vld [vmem:[%s4779_s14 + $0x13c8] sm:$0xff]  ;;  %v2891_v46 = vadd.f32 %v1867_v39, %v843_v38  ;;  %v1887_v35 = vld [vmem:[%s4786_s26 + $0x1460] sm:$0xff] }
 0x2a0   : > { %3893 = vst [vmem:[%s4801_s20 + $0x1310] sm:$0xff] %v2869_v44  ;;  %v845_v44 = vld [vmem:[%s4779_s14 + $0x13d0] sm:$0xff]  ;;  %v2892_v49 = vadd.f32 %v1868_v42, %v844_v41  ;;  %v1888_v38 = vld [vmem:[%s4786_s26 + $0x1468] sm:$0xff] }
 0x2a1   : > { %3894 = vst [vmem:[%s4801_s20 + $0x1318] sm:$0xff] %v2870_v47  ;;  %v846_v47 = vld [vmem:[%s4779_s14 + $0x13d8] sm:$0xff]  ;;  %v2893_v52 = vadd.f32 %v1869_v45, %v845_v44  ;;  %v1889_v41 = vld [vmem:[%s4786_s26 + $0x1470] sm:$0xff] }
 0x2a2   : > { %3895 = vst [vmem:[%s4801_s20 + $0x1320] sm:$0xff] %v2871_v50  ;;  %v847_v50 = vld [vmem:[%s4779_s14 + $0x13e0] sm:$0xff]  ;;  %v2894_v55 = vadd.f32 %v1870_v48, %v846_v47  ;;  %v1890_v44 = vld [vmem:[%s4786_s26 + $0x1478] sm:$0xff] }
 0x2a3   : > { %3896 = vst [vmem:[%s4801_s20 + $0x1328] sm:$0xff] %v2872_v53  ;;  %v848_v53 = vld [vmem:[%s4779_s14 + $0x13e8] sm:$0xff]  ;;  %v2895_v58 = vadd.f32 %v1871_v51, %v847_v50  ;;  %v1891_v47 = vld [vmem:[%s4786_s26 + $0x1480] sm:$0xff] }
 0x2a4   : > { %3897 = vst [vmem:[%s4801_s20 + $0x1330] sm:$0xff] %v2873_v56  ;;  %v849_v56 = vld [vmem:[%s4779_s14 + $0x13f0] sm:$0xff]  ;;  %v2896_v61 = vadd.f32 %v1872_v54, %v848_v53  ;;  %v1892_v50 = vld [vmem:[%s4786_s26 + $0x1488] sm:$0xff] }
 0x2a5   : > { %3898 = vst [vmem:[%s4801_s20 + $0x1338] sm:$0xff] %v2874_v59  ;;  %v850_v59 = vld [vmem:[%s4779_s14 + $0x13f8] sm:$0xff]  ;;  %v2897_v0 = vadd.f32 %v1873_v57, %v849_v56  ;;  %v1893_v53 = vld [vmem:[%s4786_s26 + $0x1490] sm:$0xff] }
 0x2a6   : > { %3899 = vst [vmem:[%s4801_s20 + $0x1340] sm:$0xff] %v2875_v62  ;;  %v851_v62 = vld [vmem:[%s4779_s14 + $0x1400] sm:$0xff]  ;;  %v2898_v3 = vadd.f32 %v1874_v60, %v850_v59  ;;  %v1894_v56 = vld [vmem:[%s4786_s26 + $0x1498] sm:$0xff] }
 0x2a7   : > { %3900 = vst [vmem:[%s4801_s20 + $0x1348] sm:$0xff] %v2876_v1  ;;  %v852_v1 = vld [vmem:[%s4779_s14 + $0x1408] sm:$0xff]  ;;  %v2899_v6 = vadd.f32 %v1875_v63, %v851_v62  ;;  %v1895_v59 = vld [vmem:[%s4786_s26 + $0x14a0] sm:$0xff] }
 0x2a8   : > { %3901 = vst [vmem:[%s4801_s20 + $0x1350] sm:$0xff] %v2877_v4  ;;  %v853_v4 = vld [vmem:[%s4779_s14 + $0x1410] sm:$0xff]  ;;  %v2900_v9 = vadd.f32 %v1876_v2, %v852_v1  ;;  %v1896_v62 = vld [vmem:[%s4786_s26 + $0x14a8] sm:$0xff] }
 0x2a9   : > { %3902 = vst [vmem:[%s4801_s20 + $0x1358] sm:$0xff] %v2878_v7  ;;  %v854_v7 = vld [vmem:[%s4779_s14 + $0x1418] sm:$0xff]  ;;  %v2901_v12 = vadd.f32 %v1877_v5, %v853_v4  ;;  %v1897_v1 = vld [vmem:[%s4786_s26 + $0x14b0] sm:$0xff] }
 0x2aa   : > { %3903 = vst [vmem:[%s4801_s20 + $0x1360] sm:$0xff] %v2879_v10  ;;  %v855_v10 = vld [vmem:[%s4779_s14 + $0x1420] sm:$0xff]  ;;  %v2902_v15 = vadd.f32 %v1878_v8, %v854_v7  ;;  %v1898_v4 = vld [vmem:[%s4786_s26 + $0x14b8] sm:$0xff] }
 0x2ab   : > { %3904 = vst [vmem:[%s4801_s20 + $0x1368] sm:$0xff] %v2880_v13  ;;  %v856_v13 = vld [vmem:[%s4779_s14 + $0x1428] sm:$0xff]  ;;  %v2903_v18 = vadd.f32 %v1879_v11, %v855_v10  ;;  %v1899_v7 = vld [vmem:[%s4786_s26 + $0x14c0] sm:$0xff] }
 0x2ac   : > { %3905 = vst [vmem:[%s4801_s20 + $0x1370] sm:$0xff] %v2881_v16  ;;  %v857_v16 = vld [vmem:[%s4779_s14 + $0x1430] sm:$0xff]  ;;  %v2904_v21 = vadd.f32 %v1880_v14, %v856_v13  ;;  %v1900_v10 = vld [vmem:[%s4786_s26 + $0x14c8] sm:$0xff] }
 0x2ad   : > { %3906 = vst [vmem:[%s4801_s20 + $0x1378] sm:$0xff] %v2882_v19  ;;  %v858_v19 = vld [vmem:[%s4779_s14 + $0x1438] sm:$0xff]  ;;  %v2905_v24 = vadd.f32 %v1881_v17, %v857_v16  ;;  %v1901_v13 = vld [vmem:[%s4786_s26 + $0x14d0] sm:$0xff] }
 0x2ae   : > { %3907 = vst [vmem:[%s4801_s20 + $0x1380] sm:$0xff] %v2883_v22  ;;  %v859_v22 = vld [vmem:[%s4779_s14 + $0x1440] sm:$0xff]  ;;  %v2906_v27 = vadd.f32 %v1882_v20, %v858_v19  ;;  %v1902_v16 = vld [vmem:[%s4786_s26 + $0x14d8] sm:$0xff] }
 0x2af   : > { %3908 = vst [vmem:[%s4801_s20 + $0x1388] sm:$0xff] %v2884_v25  ;;  %v860_v25 = vld [vmem:[%s4779_s14 + $0x1448] sm:$0xff]  ;;  %v2907_v30 = vadd.f32 %v1883_v23, %v859_v22  ;;  %v1903_v19 = vld [vmem:[%s4786_s26 + $0x14e0] sm:$0xff] }
 0x2b0   : > { %3909 = vst [vmem:[%s4801_s20 + $0x1390] sm:$0xff] %v2885_v28  ;;  %v861_v28 = vld [vmem:[%s4779_s14 + $0x1450] sm:$0xff]  ;;  %v2908_v33 = vadd.f32 %v1884_v26, %v860_v25  ;;  %v1904_v22 = vld [vmem:[%s4786_s26 + $0x14e8] sm:$0xff] }
 0x2b1   : > { %3910 = vst [vmem:[%s4801_s20 + $0x1398] sm:$0xff] %v2886_v31  ;;  %v862_v31 = vld [vmem:[%s4779_s14 + $0x1458] sm:$0xff]  ;;  %v2909_v36 = vadd.f32 %v1885_v29, %v861_v28  ;;  %v1905_v25 = vld [vmem:[%s4786_s26 + $0x14f0] sm:$0xff] }
 0x2b2   : > { %3911 = vst [vmem:[%s4801_s20 + $0x13a0] sm:$0xff] %v2887_v34  ;;  %v863_v34 = vld [vmem:[%s4779_s14 + $0x1460] sm:$0xff]  ;;  %v2910_v39 = vadd.f32 %v1886_v32, %v862_v31  ;;  %v1906_v28 = vld [vmem:[%s4786_s26 + $0x14f8] sm:$0xff] }
 0x2b3   : > { %3912 = vst [vmem:[%s4801_s20 + $0x13a8] sm:$0xff] %v2888_v37  ;;  %v864_v37 = vld [vmem:[%s4779_s14 + $0x1468] sm:$0xff]  ;;  %v2911_v42 = vadd.f32 %v1887_v35, %v863_v34  ;;  %v1907_v31 = vld [vmem:[%s4786_s26 + $0x1500] sm:$0xff] }
 0x2b4   : > { %3913 = vst [vmem:[%s4801_s20 + $0x13b0] sm:$0xff] %v2889_v40  ;;  %v865_v40 = vld [vmem:[%s4779_s14 + $0x1470] sm:$0xff]  ;;  %v2912_v45 = vadd.f32 %v1888_v38, %v864_v37  ;;  %v1908_v34 = vld [vmem:[%s4786_s26 + $0x1508] sm:$0xff] }
 0x2b5   : > { %3914 = vst [vmem:[%s4801_s20 + $0x13b8] sm:$0xff] %v2890_v43  ;;  %v866_v43 = vld [vmem:[%s4779_s14 + $0x1478] sm:$0xff]  ;;  %v2913_v48 = vadd.f32 %v1889_v41, %v865_v40  ;;  %v1909_v37 = vld [vmem:[%s4786_s26 + $0x1510] sm:$0xff] }
 0x2b6   : > { %3915 = vst [vmem:[%s4801_s20 + $0x13c0] sm:$0xff] %v2891_v46  ;;  %v867_v46 = vld [vmem:[%s4779_s14 + $0x1480] sm:$0xff]  ;;  %v2914_v51 = vadd.f32 %v1890_v44, %v866_v43  ;;  %v1910_v40 = vld [vmem:[%s4786_s26 + $0x1518] sm:$0xff] }
 0x2b7   : > { %3916 = vst [vmem:[%s4801_s20 + $0x13c8] sm:$0xff] %v2892_v49  ;;  %v868_v49 = vld [vmem:[%s4779_s14 + $0x1488] sm:$0xff]  ;;  %v2915_v54 = vadd.f32 %v1891_v47, %v867_v46  ;;  %v1911_v43 = vld [vmem:[%s4786_s26 + $0x1520] sm:$0xff] }
 0x2b8   : > { %3917 = vst [vmem:[%s4801_s20 + $0x13d0] sm:$0xff] %v2893_v52  ;;  %v869_v52 = vld [vmem:[%s4779_s14 + $0x1490] sm:$0xff]  ;;  %v2916_v57 = vadd.f32 %v1892_v50, %v868_v49  ;;  %v1912_v46 = vld [vmem:[%s4786_s26 + $0x1528] sm:$0xff] }
 0x2b9   : > { %3918 = vst [vmem:[%s4801_s20 + $0x13d8] sm:$0xff] %v2894_v55  ;;  %v870_v55 = vld [vmem:[%s4779_s14 + $0x1498] sm:$0xff]  ;;  %v2917_v60 = vadd.f32 %v1893_v53, %v869_v52  ;;  %v1913_v49 = vld [vmem:[%s4786_s26 + $0x1530] sm:$0xff] }
 0x2ba   : > { %3919 = vst [vmem:[%s4801_s20 + $0x13e0] sm:$0xff] %v2895_v58  ;;  %v871_v58 = vld [vmem:[%s4779_s14 + $0x14a0] sm:$0xff]  ;;  %v2918_v63 = vadd.f32 %v1894_v56, %v870_v55  ;;  %v1914_v52 = vld [vmem:[%s4786_s26 + $0x1538] sm:$0xff] }
 0x2bb   : > { %3920 = vst [vmem:[%s4801_s20 + $0x13e8] sm:$0xff] %v2896_v61  ;;  %v872_v61 = vld [vmem:[%s4779_s14 + $0x14a8] sm:$0xff]  ;;  %v2919_v2 = vadd.f32 %v1895_v59, %v871_v58  ;;  %v1915_v55 = vld [vmem:[%s4786_s26 + $0x1540] sm:$0xff] }
 0x2bc   : > { %3921 = vst [vmem:[%s4801_s20 + $0x13f0] sm:$0xff] %v2897_v0  ;;  %v873_v0 = vld [vmem:[%s4779_s14 + $0x14b0] sm:$0xff]  ;;  %v2920_v5 = vadd.f32 %v1896_v62, %v872_v61  ;;  %v1916_v58 = vld [vmem:[%s4786_s26 + $0x1548] sm:$0xff] }
 0x2bd   : > { %3922 = vst [vmem:[%s4801_s20 + $0x13f8] sm:$0xff] %v2898_v3  ;;  %v874_v3 = vld [vmem:[%s4779_s14 + $0x14b8] sm:$0xff]  ;;  %v2921_v8 = vadd.f32 %v1897_v1, %v873_v0  ;;  %v1917_v61 = vld [vmem:[%s4786_s26 + $0x1550] sm:$0xff] }
 0x2be   : > { %3923 = vst [vmem:[%s4801_s20 + $0x1400] sm:$0xff] %v2899_v6  ;;  %v875_v6 = vld [vmem:[%s4779_s14 + $0x14c0] sm:$0xff]  ;;  %v2922_v11 = vadd.f32 %v1898_v4, %v874_v3  ;;  %v1918_v0 = vld [vmem:[%s4786_s26 + $0x1558] sm:$0xff] }
 0x2bf   : > { %3924 = vst [vmem:[%s4801_s20 + $0x1408] sm:$0xff] %v2900_v9  ;;  %v876_v9 = vld [vmem:[%s4779_s14 + $0x14c8] sm:$0xff]  ;;  %v2923_v14 = vadd.f32 %v1899_v7, %v875_v6  ;;  %v1919_v3 = vld [vmem:[%s4786_s26 + $0x1560] sm:$0xff] }
 0x2c0   : > { %3925 = vst [vmem:[%s4801_s20 + $0x1410] sm:$0xff] %v2901_v12  ;;  %v877_v12 = vld [vmem:[%s4779_s14 + $0x14d0] sm:$0xff]  ;;  %v2924_v17 = vadd.f32 %v1900_v10, %v876_v9  ;;  %v1920_v6 = vld [vmem:[%s4786_s26 + $0x1568] sm:$0xff] }
 0x2c1   : > { %3926 = vst [vmem:[%s4801_s20 + $0x1418] sm:$0xff] %v2902_v15  ;;  %v878_v15 = vld [vmem:[%s4779_s14 + $0x14d8] sm:$0xff]  ;;  %v2925_v20 = vadd.f32 %v1901_v13, %v877_v12  ;;  %v1921_v9 = vld [vmem:[%s4786_s26 + $0x1570] sm:$0xff] }
 0x2c2   : > { %3927 = vst [vmem:[%s4801_s20 + $0x1420] sm:$0xff] %v2903_v18  ;;  %v879_v18 = vld [vmem:[%s4779_s14 + $0x14e0] sm:$0xff]  ;;  %v2926_v23 = vadd.f32 %v1902_v16, %v878_v15  ;;  %v1922_v12 = vld [vmem:[%s4786_s26 + $0x1578] sm:$0xff] }
 0x2c3   : > { %3928 = vst [vmem:[%s4801_s20 + $0x1428] sm:$0xff] %v2904_v21  ;;  %v880_v21 = vld [vmem:[%s4779_s14 + $0x14e8] sm:$0xff]  ;;  %v2927_v26 = vadd.f32 %v1903_v19, %v879_v18  ;;  %v1923_v15 = vld [vmem:[%s4786_s26 + $0x1580] sm:$0xff] }
 0x2c4   : > { %3929 = vst [vmem:[%s4801_s20 + $0x1430] sm:$0xff] %v2905_v24  ;;  %v881_v24 = vld [vmem:[%s4779_s14 + $0x14f0] sm:$0xff]  ;;  %v2928_v29 = vadd.f32 %v1904_v22, %v880_v21  ;;  %v1924_v18 = vld [vmem:[%s4786_s26 + $0x1588] sm:$0xff] }
 0x2c5   : > { %3930 = vst [vmem:[%s4801_s20 + $0x1438] sm:$0xff] %v2906_v27  ;;  %v882_v27 = vld [vmem:[%s4779_s14 + $0x14f8] sm:$0xff]  ;;  %v2929_v32 = vadd.f32 %v1905_v25, %v881_v24  ;;  %v1925_v21 = vld [vmem:[%s4786_s26 + $0x1590] sm:$0xff] }
 0x2c6   : > { %3931 = vst [vmem:[%s4801_s20 + $0x1440] sm:$0xff] %v2907_v30  ;;  %v883_v30 = vld [vmem:[%s4779_s14 + $0x1500] sm:$0xff]  ;;  %v2930_v35 = vadd.f32 %v1906_v28, %v882_v27  ;;  %v1926_v24 = vld [vmem:[%s4786_s26 + $0x1598] sm:$0xff] }
 0x2c7   : > { %3932 = vst [vmem:[%s4801_s20 + $0x1448] sm:$0xff] %v2908_v33  ;;  %v884_v33 = vld [vmem:[%s4779_s14 + $0x1508] sm:$0xff]  ;;  %v2931_v38 = vadd.f32 %v1907_v31, %v883_v30  ;;  %v1927_v27 = vld [vmem:[%s4786_s26 + $0x15a0] sm:$0xff] }
 0x2c8   : > { %3933 = vst [vmem:[%s4801_s20 + $0x1450] sm:$0xff] %v2909_v36  ;;  %v885_v36 = vld [vmem:[%s4779_s14 + $0x1510] sm:$0xff]  ;;  %v2932_v41 = vadd.f32 %v1908_v34, %v884_v33  ;;  %v1928_v30 = vld [vmem:[%s4786_s26 + $0x15a8] sm:$0xff] }
 0x2c9   : > { %3934 = vst [vmem:[%s4801_s20 + $0x1458] sm:$0xff] %v2910_v39  ;;  %v886_v39 = vld [vmem:[%s4779_s14 + $0x1518] sm:$0xff]  ;;  %v2933_v44 = vadd.f32 %v1909_v37, %v885_v36  ;;  %v1929_v33 = vld [vmem:[%s4786_s26 + $0x15b0] sm:$0xff] }
 0x2ca   : > { %3935 = vst [vmem:[%s4801_s20 + $0x1460] sm:$0xff] %v2911_v42  ;;  %v887_v42 = vld [vmem:[%s4779_s14 + $0x1520] sm:$0xff]  ;;  %v2934_v47 = vadd.f32 %v1910_v40, %v886_v39  ;;  %v1930_v36 = vld [vmem:[%s4786_s26 + $0x15b8] sm:$0xff] }
 0x2cb   : > { %3936 = vst [vmem:[%s4801_s20 + $0x1468] sm:$0xff] %v2912_v45  ;;  %v888_v45 = vld [vmem:[%s4779_s14 + $0x1528] sm:$0xff]  ;;  %v2935_v50 = vadd.f32 %v1911_v43, %v887_v42  ;;  %v1931_v39 = vld [vmem:[%s4786_s26 + $0x15c0] sm:$0xff] }
 0x2cc   : > { %3937 = vst [vmem:[%s4801_s20 + $0x1470] sm:$0xff] %v2913_v48  ;;  %v889_v48 = vld [vmem:[%s4779_s14 + $0x1530] sm:$0xff]  ;;  %v2936_v53 = vadd.f32 %v1912_v46, %v888_v45  ;;  %v1932_v42 = vld [vmem:[%s4786_s26 + $0x15c8] sm:$0xff] }
 0x2cd   : > { %3938 = vst [vmem:[%s4801_s20 + $0x1478] sm:$0xff] %v2914_v51  ;;  %v890_v51 = vld [vmem:[%s4779_s14 + $0x1538] sm:$0xff]  ;;  %v2937_v56 = vadd.f32 %v1913_v49, %v889_v48  ;;  %v1933_v45 = vld [vmem:[%s4786_s26 + $0x15d0] sm:$0xff] }
 0x2ce   : > { %3939 = vst [vmem:[%s4801_s20 + $0x1480] sm:$0xff] %v2915_v54  ;;  %v891_v54 = vld [vmem:[%s4779_s14 + $0x1540] sm:$0xff]  ;;  %v2938_v59 = vadd.f32 %v1914_v52, %v890_v51  ;;  %v1934_v48 = vld [vmem:[%s4786_s26 + $0x15d8] sm:$0xff] }
 0x2cf   : > { %3940 = vst [vmem:[%s4801_s20 + $0x1488] sm:$0xff] %v2916_v57  ;;  %v892_v57 = vld [vmem:[%s4779_s14 + $0x1548] sm:$0xff]  ;;  %v2939_v62 = vadd.f32 %v1915_v55, %v891_v54  ;;  %v1935_v51 = vld [vmem:[%s4786_s26 + $0x15e0] sm:$0xff] }
 0x2d0   : > { %3941 = vst [vmem:[%s4801_s20 + $0x1490] sm:$0xff] %v2917_v60  ;;  %v893_v60 = vld [vmem:[%s4779_s14 + $0x1550] sm:$0xff]  ;;  %v2940_v1 = vadd.f32 %v1916_v58, %v892_v57  ;;  %v1936_v54 = vld [vmem:[%s4786_s26 + $0x15e8] sm:$0xff] }
 0x2d1   : > { %3942 = vst [vmem:[%s4801_s20 + $0x1498] sm:$0xff] %v2918_v63  ;;  %v894_v63 = vld [vmem:[%s4779_s14 + $0x1558] sm:$0xff]  ;;  %v2941_v4 = vadd.f32 %v1917_v61, %v893_v60  ;;  %v1937_v57 = vld [vmem:[%s4786_s26 + $0x15f0] sm:$0xff] }
 0x2d2   : > { %3943 = vst [vmem:[%s4801_s20 + $0x14a0] sm:$0xff] %v2919_v2  ;;  %v895_v2 = vld [vmem:[%s4779_s14 + $0x1560] sm:$0xff]  ;;  %v2942_v7 = vadd.f32 %v1918_v0, %v894_v63  ;;  %v1938_v60 = vld [vmem:[%s4786_s26 + $0x15f8] sm:$0xff] }
 0x2d3   : > { %3944 = vst [vmem:[%s4801_s20 + $0x14a8] sm:$0xff] %v2920_v5  ;;  %v896_v5 = vld [vmem:[%s4779_s14 + $0x1568] sm:$0xff]  ;;  %v2943_v10 = vadd.f32 %v1919_v3, %v895_v2  ;;  %v1939_v63 = vld [vmem:[%s4786_s26 + $0x1600] sm:$0xff] }
 0x2d4   : > { %3945 = vst [vmem:[%s4801_s20 + $0x14b0] sm:$0xff] %v2921_v8  ;;  %v897_v8 = vld [vmem:[%s4779_s14 + $0x1570] sm:$0xff]  ;;  %v2944_v13 = vadd.f32 %v1920_v6, %v896_v5  ;;  %v1940_v2 = vld [vmem:[%s4786_s26 + $0x1608] sm:$0xff] }
 0x2d5   : > { %3946 = vst [vmem:[%s4801_s20 + $0x14b8] sm:$0xff] %v2922_v11  ;;  %v898_v11 = vld [vmem:[%s4779_s14 + $0x1578] sm:$0xff]  ;;  %v2945_v16 = vadd.f32 %v1921_v9, %v897_v8  ;;  %v1941_v5 = vld [vmem:[%s4786_s26 + $0x1610] sm:$0xff] }
 0x2d6   : > { %3947 = vst [vmem:[%s4801_s20 + $0x14c0] sm:$0xff] %v2923_v14  ;;  %v899_v14 = vld [vmem:[%s4779_s14 + $0x1580] sm:$0xff]  ;;  %v2946_v19 = vadd.f32 %v1922_v12, %v898_v11  ;;  %v1942_v8 = vld [vmem:[%s4786_s26 + $0x1618] sm:$0xff] }
 0x2d7   : > { %3948 = vst [vmem:[%s4801_s20 + $0x14c8] sm:$0xff] %v2924_v17  ;;  %v900_v17 = vld [vmem:[%s4779_s14 + $0x1588] sm:$0xff]  ;;  %v2947_v22 = vadd.f32 %v1923_v15, %v899_v14  ;;  %v1943_v11 = vld [vmem:[%s4786_s26 + $0x1620] sm:$0xff] }
 0x2d8   : > { %3949 = vst [vmem:[%s4801_s20 + $0x14d0] sm:$0xff] %v2925_v20  ;;  %v901_v20 = vld [vmem:[%s4779_s14 + $0x1590] sm:$0xff]  ;;  %v2948_v25 = vadd.f32 %v1924_v18, %v900_v17  ;;  %v1944_v14 = vld [vmem:[%s4786_s26 + $0x1628] sm:$0xff] }
 0x2d9   : > { %3950 = vst [vmem:[%s4801_s20 + $0x14d8] sm:$0xff] %v2926_v23  ;;  %v902_v23 = vld [vmem:[%s4779_s14 + $0x1598] sm:$0xff]  ;;  %v2949_v28 = vadd.f32 %v1925_v21, %v901_v20  ;;  %v1945_v17 = vld [vmem:[%s4786_s26 + $0x1630] sm:$0xff] }
 0x2da   : > { %3951 = vst [vmem:[%s4801_s20 + $0x14e0] sm:$0xff] %v2927_v26  ;;  %v903_v26 = vld [vmem:[%s4779_s14 + $0x15a0] sm:$0xff]  ;;  %v2950_v31 = vadd.f32 %v1926_v24, %v902_v23  ;;  %v1946_v20 = vld [vmem:[%s4786_s26 + $0x1638] sm:$0xff] }
 0x2db   : > { %3952 = vst [vmem:[%s4801_s20 + $0x14e8] sm:$0xff] %v2928_v29  ;;  %v904_v29 = vld [vmem:[%s4779_s14 + $0x15a8] sm:$0xff]  ;;  %v2951_v34 = vadd.f32 %v1927_v27, %v903_v26  ;;  %v1947_v23 = vld [vmem:[%s4786_s26 + $0x1640] sm:$0xff] }
 0x2dc   : > { %3953 = vst [vmem:[%s4801_s20 + $0x14f0] sm:$0xff] %v2929_v32  ;;  %v905_v32 = vld [vmem:[%s4779_s14 + $0x15b0] sm:$0xff]  ;;  %v2952_v37 = vadd.f32 %v1928_v30, %v904_v29  ;;  %v1948_v26 = vld [vmem:[%s4786_s26 + $0x1648] sm:$0xff] }
 0x2dd   : > { %3954 = vst [vmem:[%s4801_s20 + $0x14f8] sm:$0xff] %v2930_v35  ;;  %v906_v35 = vld [vmem:[%s4779_s14 + $0x15b8] sm:$0xff]  ;;  %v2953_v40 = vadd.f32 %v1929_v33, %v905_v32  ;;  %v1949_v29 = vld [vmem:[%s4786_s26 + $0x1650] sm:$0xff] }
 0x2de   : > { %3955 = vst [vmem:[%s4801_s20 + $0x1500] sm:$0xff] %v2931_v38  ;;  %v907_v38 = vld [vmem:[%s4779_s14 + $0x15c0] sm:$0xff]  ;;  %v2954_v43 = vadd.f32 %v1930_v36, %v906_v35  ;;  %v1950_v32 = vld [vmem:[%s4786_s26 + $0x1658] sm:$0xff] }
 0x2df   : > { %3956 = vst [vmem:[%s4801_s20 + $0x1508] sm:$0xff] %v2932_v41  ;;  %v908_v41 = vld [vmem:[%s4779_s14 + $0x15c8] sm:$0xff]  ;;  %v2955_v46 = vadd.f32 %v1931_v39, %v907_v38  ;;  %v1951_v35 = vld [vmem:[%s4786_s26 + $0x1660] sm:$0xff] }
 0x2e0   : > { %3957 = vst [vmem:[%s4801_s20 + $0x1510] sm:$0xff] %v2933_v44  ;;  %v909_v44 = vld [vmem:[%s4779_s14 + $0x15d0] sm:$0xff]  ;;  %v2956_v49 = vadd.f32 %v1932_v42, %v908_v41  ;;  %v1952_v38 = vld [vmem:[%s4786_s26 + $0x1668] sm:$0xff] }
 0x2e1   : > { %3958 = vst [vmem:[%s4801_s20 + $0x1518] sm:$0xff] %v2934_v47  ;;  %v910_v47 = vld [vmem:[%s4779_s14 + $0x15d8] sm:$0xff]  ;;  %v2957_v52 = vadd.f32 %v1933_v45, %v909_v44  ;;  %v1953_v41 = vld [vmem:[%s4786_s26 + $0x1670] sm:$0xff] }
 0x2e2   : > { %3959 = vst [vmem:[%s4801_s20 + $0x1520] sm:$0xff] %v2935_v50  ;;  %v911_v50 = vld [vmem:[%s4779_s14 + $0x15e0] sm:$0xff]  ;;  %v2958_v55 = vadd.f32 %v1934_v48, %v910_v47  ;;  %v1954_v44 = vld [vmem:[%s4786_s26 + $0x1678] sm:$0xff] }
 0x2e3   : > { %3960 = vst [vmem:[%s4801_s20 + $0x1528] sm:$0xff] %v2936_v53  ;;  %v912_v53 = vld [vmem:[%s4779_s14 + $0x15e8] sm:$0xff]  ;;  %v2959_v58 = vadd.f32 %v1935_v51, %v911_v50  ;;  %v1955_v47 = vld [vmem:[%s4786_s26 + $0x1680] sm:$0xff] }
 0x2e4   : > { %3961 = vst [vmem:[%s4801_s20 + $0x1530] sm:$0xff] %v2937_v56  ;;  %v913_v56 = vld [vmem:[%s4779_s14 + $0x15f0] sm:$0xff]  ;;  %v2960_v61 = vadd.f32 %v1936_v54, %v912_v53  ;;  %v1956_v50 = vld [vmem:[%s4786_s26 + $0x1688] sm:$0xff] }
 0x2e5   : > { %3962 = vst [vmem:[%s4801_s20 + $0x1538] sm:$0xff] %v2938_v59  ;;  %v914_v59 = vld [vmem:[%s4779_s14 + $0x15f8] sm:$0xff]  ;;  %v2961_v0 = vadd.f32 %v1937_v57, %v913_v56  ;;  %v1957_v53 = vld [vmem:[%s4786_s26 + $0x1690] sm:$0xff] }
 0x2e6   : > { %3963 = vst [vmem:[%s4801_s20 + $0x1540] sm:$0xff] %v2939_v62  ;;  %v915_v62 = vld [vmem:[%s4779_s14 + $0x1600] sm:$0xff]  ;;  %v2962_v3 = vadd.f32 %v1938_v60, %v914_v59  ;;  %v1958_v56 = vld [vmem:[%s4786_s26 + $0x1698] sm:$0xff] }
 0x2e7   : > { %3964 = vst [vmem:[%s4801_s20 + $0x1548] sm:$0xff] %v2940_v1  ;;  %v916_v1 = vld [vmem:[%s4779_s14 + $0x1608] sm:$0xff]  ;;  %v2963_v6 = vadd.f32 %v1939_v63, %v915_v62  ;;  %v1959_v59 = vld [vmem:[%s4786_s26 + $0x16a0] sm:$0xff] }
 0x2e8   : > { %3965 = vst [vmem:[%s4801_s20 + $0x1550] sm:$0xff] %v2941_v4  ;;  %v917_v4 = vld [vmem:[%s4779_s14 + $0x1610] sm:$0xff]  ;;  %v2964_v9 = vadd.f32 %v1940_v2, %v916_v1  ;;  %v1960_v62 = vld [vmem:[%s4786_s26 + $0x16a8] sm:$0xff] }
 0x2e9   : > { %3966 = vst [vmem:[%s4801_s20 + $0x1558] sm:$0xff] %v2942_v7  ;;  %v918_v7 = vld [vmem:[%s4779_s14 + $0x1618] sm:$0xff]  ;;  %v2965_v12 = vadd.f32 %v1941_v5, %v917_v4  ;;  %v1961_v1 = vld [vmem:[%s4786_s26 + $0x16b0] sm:$0xff] }
 0x2ea   : > { %3967 = vst [vmem:[%s4801_s20 + $0x1560] sm:$0xff] %v2943_v10  ;;  %v919_v10 = vld [vmem:[%s4779_s14 + $0x1620] sm:$0xff]  ;;  %v2966_v15 = vadd.f32 %v1942_v8, %v918_v7  ;;  %v1962_v4 = vld [vmem:[%s4786_s26 + $0x16b8] sm:$0xff] }
 0x2eb   : > { %3968 = vst [vmem:[%s4801_s20 + $0x1568] sm:$0xff] %v2944_v13  ;;  %v920_v13 = vld [vmem:[%s4779_s14 + $0x1628] sm:$0xff]  ;;  %v2967_v18 = vadd.f32 %v1943_v11, %v919_v10  ;;  %v1963_v7 = vld [vmem:[%s4786_s26 + $0x16c0] sm:$0xff] }
 0x2ec   : > { %3969 = vst [vmem:[%s4801_s20 + $0x1570] sm:$0xff] %v2945_v16  ;;  %v921_v16 = vld [vmem:[%s4779_s14 + $0x1630] sm:$0xff]  ;;  %v2968_v21 = vadd.f32 %v1944_v14, %v920_v13  ;;  %v1964_v10 = vld [vmem:[%s4786_s26 + $0x16c8] sm:$0xff] }
 0x2ed   : > { %3970 = vst [vmem:[%s4801_s20 + $0x1578] sm:$0xff] %v2946_v19  ;;  %v922_v19 = vld [vmem:[%s4779_s14 + $0x1638] sm:$0xff]  ;;  %v2969_v24 = vadd.f32 %v1945_v17, %v921_v16  ;;  %v1965_v13 = vld [vmem:[%s4786_s26 + $0x16d0] sm:$0xff] }
 0x2ee   : > { %3971 = vst [vmem:[%s4801_s20 + $0x1580] sm:$0xff] %v2947_v22  ;;  %v923_v22 = vld [vmem:[%s4779_s14 + $0x1640] sm:$0xff]  ;;  %v2970_v27 = vadd.f32 %v1946_v20, %v922_v19  ;;  %v1966_v16 = vld [vmem:[%s4786_s26 + $0x16d8] sm:$0xff] }
 0x2ef   : > { %3972 = vst [vmem:[%s4801_s20 + $0x1588] sm:$0xff] %v2948_v25  ;;  %v924_v25 = vld [vmem:[%s4779_s14 + $0x1648] sm:$0xff]  ;;  %v2971_v30 = vadd.f32 %v1947_v23, %v923_v22  ;;  %v1967_v19 = vld [vmem:[%s4786_s26 + $0x16e0] sm:$0xff] }
 0x2f0   : > { %3973 = vst [vmem:[%s4801_s20 + $0x1590] sm:$0xff] %v2949_v28  ;;  %v925_v28 = vld [vmem:[%s4779_s14 + $0x1650] sm:$0xff]  ;;  %v2972_v33 = vadd.f32 %v1948_v26, %v924_v25  ;;  %v1968_v22 = vld [vmem:[%s4786_s26 + $0x16e8] sm:$0xff] }
 0x2f1   : > { %3974 = vst [vmem:[%s4801_s20 + $0x1598] sm:$0xff] %v2950_v31  ;;  %v926_v31 = vld [vmem:[%s4779_s14 + $0x1658] sm:$0xff]  ;;  %v2973_v36 = vadd.f32 %v1949_v29, %v925_v28  ;;  %v1969_v25 = vld [vmem:[%s4786_s26 + $0x16f0] sm:$0xff] }
 0x2f2   : > { %3975 = vst [vmem:[%s4801_s20 + $0x15a0] sm:$0xff] %v2951_v34  ;;  %v927_v34 = vld [vmem:[%s4779_s14 + $0x1660] sm:$0xff]  ;;  %v2974_v39 = vadd.f32 %v1950_v32, %v926_v31  ;;  %v1970_v28 = vld [vmem:[%s4786_s26 + $0x16f8] sm:$0xff] }
 0x2f3   : > { %3976 = vst [vmem:[%s4801_s20 + $0x15a8] sm:$0xff] %v2952_v37  ;;  %v928_v37 = vld [vmem:[%s4779_s14 + $0x1668] sm:$0xff]  ;;  %v2975_v42 = vadd.f32 %v1951_v35, %v927_v34  ;;  %v1971_v31 = vld [vmem:[%s4786_s26 + $0x1700] sm:$0xff] }
 0x2f4   : > { %3977 = vst [vmem:[%s4801_s20 + $0x15b0] sm:$0xff] %v2953_v40  ;;  %v929_v40 = vld [vmem:[%s4779_s14 + $0x1670] sm:$0xff]  ;;  %v2976_v45 = vadd.f32 %v1952_v38, %v928_v37  ;;  %v1972_v34 = vld [vmem:[%s4786_s26 + $0x1708] sm:$0xff] }
 0x2f5   : > { %3978 = vst [vmem:[%s4801_s20 + $0x15b8] sm:$0xff] %v2954_v43  ;;  %v930_v43 = vld [vmem:[%s4779_s14 + $0x1678] sm:$0xff]  ;;  %v2977_v48 = vadd.f32 %v1953_v41, %v929_v40  ;;  %v1973_v37 = vld [vmem:[%s4786_s26 + $0x1710] sm:$0xff] }
 0x2f6   : > { %3979 = vst [vmem:[%s4801_s20 + $0x15c0] sm:$0xff] %v2955_v46  ;;  %v931_v46 = vld [vmem:[%s4779_s14 + $0x1680] sm:$0xff]  ;;  %v2978_v51 = vadd.f32 %v1954_v44, %v930_v43  ;;  %v1974_v40 = vld [vmem:[%s4786_s26 + $0x1718] sm:$0xff] }
 0x2f7   : > { %3980 = vst [vmem:[%s4801_s20 + $0x15c8] sm:$0xff] %v2956_v49  ;;  %v932_v49 = vld [vmem:[%s4779_s14 + $0x1688] sm:$0xff]  ;;  %v2979_v54 = vadd.f32 %v1955_v47, %v931_v46  ;;  %v1975_v43 = vld [vmem:[%s4786_s26 + $0x1720] sm:$0xff] }
 0x2f8   : > { %3981 = vst [vmem:[%s4801_s20 + $0x15d0] sm:$0xff] %v2957_v52  ;;  %v933_v52 = vld [vmem:[%s4779_s14 + $0x1690] sm:$0xff]  ;;  %v2980_v57 = vadd.f32 %v1956_v50, %v932_v49  ;;  %v1976_v46 = vld [vmem:[%s4786_s26 + $0x1728] sm:$0xff] }
 0x2f9   : > { %3982 = vst [vmem:[%s4801_s20 + $0x15d8] sm:$0xff] %v2958_v55  ;;  %v934_v55 = vld [vmem:[%s4779_s14 + $0x1698] sm:$0xff]  ;;  %v2981_v60 = vadd.f32 %v1957_v53, %v933_v52  ;;  %v1977_v49 = vld [vmem:[%s4786_s26 + $0x1730] sm:$0xff] }
 0x2fa   : > { %3983 = vst [vmem:[%s4801_s20 + $0x15e0] sm:$0xff] %v2959_v58  ;;  %v935_v58 = vld [vmem:[%s4779_s14 + $0x16a0] sm:$0xff]  ;;  %v2982_v63 = vadd.f32 %v1958_v56, %v934_v55  ;;  %v1978_v52 = vld [vmem:[%s4786_s26 + $0x1738] sm:$0xff] }
 0x2fb   : > { %3984 = vst [vmem:[%s4801_s20 + $0x15e8] sm:$0xff] %v2960_v61  ;;  %v936_v61 = vld [vmem:[%s4779_s14 + $0x16a8] sm:$0xff]  ;;  %v2983_v2 = vadd.f32 %v1959_v59, %v935_v58  ;;  %v1979_v55 = vld [vmem:[%s4786_s26 + $0x1740] sm:$0xff] }
 0x2fc   : > { %3985 = vst [vmem:[%s4801_s20 + $0x15f0] sm:$0xff] %v2961_v0  ;;  %v937_v0 = vld [vmem:[%s4779_s14 + $0x16b0] sm:$0xff]  ;;  %v2984_v5 = vadd.f32 %v1960_v62, %v936_v61  ;;  %v1980_v58 = vld [vmem:[%s4786_s26 + $0x1748] sm:$0xff] }
 0x2fd   : > { %3986 = vst [vmem:[%s4801_s20 + $0x15f8] sm:$0xff] %v2962_v3  ;;  %v938_v3 = vld [vmem:[%s4779_s14 + $0x16b8] sm:$0xff]  ;;  %v2985_v8 = vadd.f32 %v1961_v1, %v937_v0  ;;  %v1981_v61 = vld [vmem:[%s4786_s26 + $0x1750] sm:$0xff] }
 0x2fe   : > { %3987 = vst [vmem:[%s4801_s20 + $0x1600] sm:$0xff] %v2963_v6  ;;  %v939_v6 = vld [vmem:[%s4779_s14 + $0x16c0] sm:$0xff]  ;;  %v2986_v11 = vadd.f32 %v1962_v4, %v938_v3  ;;  %v1982_v0 = vld [vmem:[%s4786_s26 + $0x1758] sm:$0xff] }
 0x2ff   : > { %3988 = vst [vmem:[%s4801_s20 + $0x1608] sm:$0xff] %v2964_v9  ;;  %v940_v9 = vld [vmem:[%s4779_s14 + $0x16c8] sm:$0xff]  ;;  %v2987_v14 = vadd.f32 %v1963_v7, %v939_v6  ;;  %v1983_v3 = vld [vmem:[%s4786_s26 + $0x1760] sm:$0xff] }
 0x300   : > { %3989 = vst [vmem:[%s4801_s20 + $0x1610] sm:$0xff] %v2965_v12  ;;  %v941_v12 = vld [vmem:[%s4779_s14 + $0x16d0] sm:$0xff]  ;;  %v2988_v17 = vadd.f32 %v1964_v10, %v940_v9  ;;  %v1984_v6 = vld [vmem:[%s4786_s26 + $0x1768] sm:$0xff] }
 0x301   : > { %3990 = vst [vmem:[%s4801_s20 + $0x1618] sm:$0xff] %v2966_v15  ;;  %v942_v15 = vld [vmem:[%s4779_s14 + $0x16d8] sm:$0xff]  ;;  %v2989_v20 = vadd.f32 %v1965_v13, %v941_v12  ;;  %v1985_v9 = vld [vmem:[%s4786_s26 + $0x1770] sm:$0xff] }
 0x302   : > { %3991 = vst [vmem:[%s4801_s20 + $0x1620] sm:$0xff] %v2967_v18  ;;  %v943_v18 = vld [vmem:[%s4779_s14 + $0x16e0] sm:$0xff]  ;;  %v2990_v23 = vadd.f32 %v1966_v16, %v942_v15  ;;  %v1986_v12 = vld [vmem:[%s4786_s26 + $0x1778] sm:$0xff] }
 0x303   : > { %3992 = vst [vmem:[%s4801_s20 + $0x1628] sm:$0xff] %v2968_v21  ;;  %v944_v21 = vld [vmem:[%s4779_s14 + $0x16e8] sm:$0xff]  ;;  %v2991_v26 = vadd.f32 %v1967_v19, %v943_v18  ;;  %v1987_v15 = vld [vmem:[%s4786_s26 + $0x1780] sm:$0xff] }
 0x304   : > { %3993 = vst [vmem:[%s4801_s20 + $0x1630] sm:$0xff] %v2969_v24  ;;  %v945_v24 = vld [vmem:[%s4779_s14 + $0x16f0] sm:$0xff]  ;;  %v2992_v29 = vadd.f32 %v1968_v22, %v944_v21  ;;  %v1988_v18 = vld [vmem:[%s4786_s26 + $0x1788] sm:$0xff] }
 0x305   : > { %3994 = vst [vmem:[%s4801_s20 + $0x1638] sm:$0xff] %v2970_v27  ;;  %v946_v27 = vld [vmem:[%s4779_s14 + $0x16f8] sm:$0xff]  ;;  %v2993_v32 = vadd.f32 %v1969_v25, %v945_v24  ;;  %v1989_v21 = vld [vmem:[%s4786_s26 + $0x1790] sm:$0xff] }
 0x306   : > { %3995 = vst [vmem:[%s4801_s20 + $0x1640] sm:$0xff] %v2971_v30  ;;  %v947_v30 = vld [vmem:[%s4779_s14 + $0x1700] sm:$0xff]  ;;  %v2994_v35 = vadd.f32 %v1970_v28, %v946_v27  ;;  %v1990_v24 = vld [vmem:[%s4786_s26 + $0x1798] sm:$0xff] }
 0x307   : > { %3996 = vst [vmem:[%s4801_s20 + $0x1648] sm:$0xff] %v2972_v33  ;;  %v948_v33 = vld [vmem:[%s4779_s14 + $0x1708] sm:$0xff]  ;;  %v2995_v38 = vadd.f32 %v1971_v31, %v947_v30  ;;  %v1991_v27 = vld [vmem:[%s4786_s26 + $0x17a0] sm:$0xff] }
 0x308   : > { %3997 = vst [vmem:[%s4801_s20 + $0x1650] sm:$0xff] %v2973_v36  ;;  %v949_v36 = vld [vmem:[%s4779_s14 + $0x1710] sm:$0xff]  ;;  %v2996_v41 = vadd.f32 %v1972_v34, %v948_v33  ;;  %v1992_v30 = vld [vmem:[%s4786_s26 + $0x17a8] sm:$0xff] }
 0x309   : > { %3998 = vst [vmem:[%s4801_s20 + $0x1658] sm:$0xff] %v2974_v39  ;;  %v950_v39 = vld [vmem:[%s4779_s14 + $0x1718] sm:$0xff]  ;;  %v2997_v44 = vadd.f32 %v1973_v37, %v949_v36  ;;  %v1993_v33 = vld [vmem:[%s4786_s26 + $0x17b0] sm:$0xff] }
 0x30a   : > { %3999 = vst [vmem:[%s4801_s20 + $0x1660] sm:$0xff] %v2975_v42  ;;  %v951_v42 = vld [vmem:[%s4779_s14 + $0x1720] sm:$0xff]  ;;  %v2998_v47 = vadd.f32 %v1974_v40, %v950_v39  ;;  %v1994_v36 = vld [vmem:[%s4786_s26 + $0x17b8] sm:$0xff] }
 0x30b   : > { %4000 = vst [vmem:[%s4801_s20 + $0x1668] sm:$0xff] %v2976_v45  ;;  %v952_v45 = vld [vmem:[%s4779_s14 + $0x1728] sm:$0xff]  ;;  %v2999_v50 = vadd.f32 %v1975_v43, %v951_v42  ;;  %v1995_v39 = vld [vmem:[%s4786_s26 + $0x17c0] sm:$0xff] }
 0x30c   : > { %4001 = vst [vmem:[%s4801_s20 + $0x1670] sm:$0xff] %v2977_v48  ;;  %v953_v48 = vld [vmem:[%s4779_s14 + $0x1730] sm:$0xff]  ;;  %v3000_v53 = vadd.f32 %v1976_v46, %v952_v45  ;;  %v1996_v42 = vld [vmem:[%s4786_s26 + $0x17c8] sm:$0xff] }
 0x30d   : > { %4002 = vst [vmem:[%s4801_s20 + $0x1678] sm:$0xff] %v2978_v51  ;;  %v954_v51 = vld [vmem:[%s4779_s14 + $0x1738] sm:$0xff]  ;;  %v3001_v56 = vadd.f32 %v1977_v49, %v953_v48  ;;  %v1997_v45 = vld [vmem:[%s4786_s26 + $0x17d0] sm:$0xff] }
 0x30e   : > { %4003 = vst [vmem:[%s4801_s20 + $0x1680] sm:$0xff] %v2979_v54  ;;  %v955_v54 = vld [vmem:[%s4779_s14 + $0x1740] sm:$0xff]  ;;  %v3002_v59 = vadd.f32 %v1978_v52, %v954_v51  ;;  %v1998_v48 = vld [vmem:[%s4786_s26 + $0x17d8] sm:$0xff] }
 0x30f   : > { %4004 = vst [vmem:[%s4801_s20 + $0x1688] sm:$0xff] %v2980_v57  ;;  %v956_v57 = vld [vmem:[%s4779_s14 + $0x1748] sm:$0xff]  ;;  %v3003_v62 = vadd.f32 %v1979_v55, %v955_v54  ;;  %v1999_v51 = vld [vmem:[%s4786_s26 + $0x17e0] sm:$0xff] }
 0x310   : > { %4005 = vst [vmem:[%s4801_s20 + $0x1690] sm:$0xff] %v2981_v60  ;;  %v957_v60 = vld [vmem:[%s4779_s14 + $0x1750] sm:$0xff]  ;;  %v3004_v1 = vadd.f32 %v1980_v58, %v956_v57  ;;  %v2000_v54 = vld [vmem:[%s4786_s26 + $0x17e8] sm:$0xff] }
 0x311   : > { %4006 = vst [vmem:[%s4801_s20 + $0x1698] sm:$0xff] %v2982_v63  ;;  %v958_v63 = vld [vmem:[%s4779_s14 + $0x1758] sm:$0xff]  ;;  %v3005_v4 = vadd.f32 %v1981_v61, %v957_v60  ;;  %v2001_v57 = vld [vmem:[%s4786_s26 + $0x17f0] sm:$0xff] }
 0x312   : > { %4007 = vst [vmem:[%s4801_s20 + $0x16a0] sm:$0xff] %v2983_v2  ;;  %v959_v2 = vld [vmem:[%s4779_s14 + $0x1760] sm:$0xff]  ;;  %v3006_v7 = vadd.f32 %v1982_v0, %v958_v63  ;;  %v2002_v60 = vld [vmem:[%s4786_s26 + $0x17f8] sm:$0xff] }
 0x313   : > { %4008 = vst [vmem:[%s4801_s20 + $0x16a8] sm:$0xff] %v2984_v5  ;;  %v960_v5 = vld [vmem:[%s4779_s14 + $0x1768] sm:$0xff]  ;;  %v3007_v10 = vadd.f32 %v1983_v3, %v959_v2  ;;  %v2003_v63 = vld [vmem:[%s4786_s26 + $0x1800] sm:$0xff] }
 0x314   : > { %4009 = vst [vmem:[%s4801_s20 + $0x16b0] sm:$0xff] %v2985_v8  ;;  %v961_v8 = vld [vmem:[%s4779_s14 + $0x1770] sm:$0xff]  ;;  %v3008_v13 = vadd.f32 %v1984_v6, %v960_v5  ;;  %v2004_v2 = vld [vmem:[%s4786_s26 + $0x1808] sm:$0xff] }
 0x315   : > { %4010 = vst [vmem:[%s4801_s20 + $0x16b8] sm:$0xff] %v2986_v11  ;;  %v962_v11 = vld [vmem:[%s4779_s14 + $0x1778] sm:$0xff]  ;;  %v3009_v16 = vadd.f32 %v1985_v9, %v961_v8  ;;  %v2005_v5 = vld [vmem:[%s4786_s26 + $0x1810] sm:$0xff] }
 0x316   : > { %4011 = vst [vmem:[%s4801_s20 + $0x16c0] sm:$0xff] %v2987_v14  ;;  %v963_v14 = vld [vmem:[%s4779_s14 + $0x1780] sm:$0xff]  ;;  %v3010_v19 = vadd.f32 %v1986_v12, %v962_v11  ;;  %v2006_v8 = vld [vmem:[%s4786_s26 + $0x1818] sm:$0xff] }
 0x317   : > { %4012 = vst [vmem:[%s4801_s20 + $0x16c8] sm:$0xff] %v2988_v17  ;;  %v964_v17 = vld [vmem:[%s4779_s14 + $0x1788] sm:$0xff]  ;;  %v3011_v22 = vadd.f32 %v1987_v15, %v963_v14  ;;  %v2007_v11 = vld [vmem:[%s4786_s26 + $0x1820] sm:$0xff] }
 0x318   : > { %4013 = vst [vmem:[%s4801_s20 + $0x16d0] sm:$0xff] %v2989_v20  ;;  %v965_v20 = vld [vmem:[%s4779_s14 + $0x1790] sm:$0xff]  ;;  %v3012_v25 = vadd.f32 %v1988_v18, %v964_v17  ;;  %v2008_v14 = vld [vmem:[%s4786_s26 + $0x1828] sm:$0xff] }
 0x319   : > { %4014 = vst [vmem:[%s4801_s20 + $0x16d8] sm:$0xff] %v2990_v23  ;;  %v966_v23 = vld [vmem:[%s4779_s14 + $0x1798] sm:$0xff]  ;;  %v3013_v28 = vadd.f32 %v1989_v21, %v965_v20  ;;  %v2009_v17 = vld [vmem:[%s4786_s26 + $0x1830] sm:$0xff] }
 0x31a   : > { %4015 = vst [vmem:[%s4801_s20 + $0x16e0] sm:$0xff] %v2991_v26  ;;  %v967_v26 = vld [vmem:[%s4779_s14 + $0x17a0] sm:$0xff]  ;;  %v3014_v31 = vadd.f32 %v1990_v24, %v966_v23  ;;  %v2010_v20 = vld [vmem:[%s4786_s26 + $0x1838] sm:$0xff] }
 0x31b   : > { %4016 = vst [vmem:[%s4801_s20 + $0x16e8] sm:$0xff] %v2992_v29  ;;  %v968_v29 = vld [vmem:[%s4779_s14 + $0x17a8] sm:$0xff]  ;;  %v3015_v34 = vadd.f32 %v1991_v27, %v967_v26  ;;  %v2011_v23 = vld [vmem:[%s4786_s26 + $0x1840] sm:$0xff] }
 0x31c   : > { %4017 = vst [vmem:[%s4801_s20 + $0x16f0] sm:$0xff] %v2993_v32  ;;  %v969_v32 = vld [vmem:[%s4779_s14 + $0x17b0] sm:$0xff]  ;;  %v3016_v37 = vadd.f32 %v1992_v30, %v968_v29  ;;  %v2012_v26 = vld [vmem:[%s4786_s26 + $0x1848] sm:$0xff] }
 0x31d   : > { %4018 = vst [vmem:[%s4801_s20 + $0x16f8] sm:$0xff] %v2994_v35  ;;  %v970_v35 = vld [vmem:[%s4779_s14 + $0x17b8] sm:$0xff]  ;;  %v3017_v40 = vadd.f32 %v1993_v33, %v969_v32  ;;  %v2013_v29 = vld [vmem:[%s4786_s26 + $0x1850] sm:$0xff] }
 0x31e   : > { %4019 = vst [vmem:[%s4801_s20 + $0x1700] sm:$0xff] %v2995_v38  ;;  %v971_v38 = vld [vmem:[%s4779_s14 + $0x17c0] sm:$0xff]  ;;  %v3018_v43 = vadd.f32 %v1994_v36, %v970_v35  ;;  %v2014_v32 = vld [vmem:[%s4786_s26 + $0x1858] sm:$0xff] }
 0x31f   : > { %4020 = vst [vmem:[%s4801_s20 + $0x1708] sm:$0xff] %v2996_v41  ;;  %v972_v41 = vld [vmem:[%s4779_s14 + $0x17c8] sm:$0xff]  ;;  %v3019_v46 = vadd.f32 %v1995_v39, %v971_v38  ;;  %v2015_v35 = vld [vmem:[%s4786_s26 + $0x1860] sm:$0xff] }
 0x320   : > { %4021 = vst [vmem:[%s4801_s20 + $0x1710] sm:$0xff] %v2997_v44  ;;  %v973_v44 = vld [vmem:[%s4779_s14 + $0x17d0] sm:$0xff]  ;;  %v3020_v49 = vadd.f32 %v1996_v42, %v972_v41  ;;  %v2016_v38 = vld [vmem:[%s4786_s26 + $0x1868] sm:$0xff] }
 0x321   : > { %4022 = vst [vmem:[%s4801_s20 + $0x1718] sm:$0xff] %v2998_v47  ;;  %v974_v47 = vld [vmem:[%s4779_s14 + $0x17d8] sm:$0xff]  ;;  %v3021_v52 = vadd.f32 %v1997_v45, %v973_v44  ;;  %v2017_v41 = vld [vmem:[%s4786_s26 + $0x1870] sm:$0xff] }
 0x322   : > { %4023 = vst [vmem:[%s4801_s20 + $0x1720] sm:$0xff] %v2999_v50  ;;  %v975_v50 = vld [vmem:[%s4779_s14 + $0x17e0] sm:$0xff]  ;;  %v3022_v55 = vadd.f32 %v1998_v48, %v974_v47  ;;  %v2018_v44 = vld [vmem:[%s4786_s26 + $0x1878] sm:$0xff] }
 0x323   : > { %4024 = vst [vmem:[%s4801_s20 + $0x1728] sm:$0xff] %v3000_v53  ;;  %v976_v53 = vld [vmem:[%s4779_s14 + $0x17e8] sm:$0xff]  ;;  %v3023_v58 = vadd.f32 %v1999_v51, %v975_v50  ;;  %v2019_v47 = vld [vmem:[%s4786_s26 + $0x1880] sm:$0xff] }
 0x324   : > { %4025 = vst [vmem:[%s4801_s20 + $0x1730] sm:$0xff] %v3001_v56  ;;  %v977_v56 = vld [vmem:[%s4779_s14 + $0x17f0] sm:$0xff]  ;;  %v3024_v61 = vadd.f32 %v2000_v54, %v976_v53  ;;  %v2020_v50 = vld [vmem:[%s4786_s26 + $0x1888] sm:$0xff] }
 0x325   : > { %4026 = vst [vmem:[%s4801_s20 + $0x1738] sm:$0xff] %v3002_v59  ;;  %v978_v59 = vld [vmem:[%s4779_s14 + $0x17f8] sm:$0xff]  ;;  %v3025_v0 = vadd.f32 %v2001_v57, %v977_v56  ;;  %v2021_v53 = vld [vmem:[%s4786_s26 + $0x1890] sm:$0xff] }
 0x326   : > { %4027 = vst [vmem:[%s4801_s20 + $0x1740] sm:$0xff] %v3003_v62  ;;  %v979_v62 = vld [vmem:[%s4779_s14 + $0x1800] sm:$0xff]  ;;  %v3026_v3 = vadd.f32 %v2002_v60, %v978_v59  ;;  %v2022_v56 = vld [vmem:[%s4786_s26 + $0x1898] sm:$0xff] }
 0x327   : > { %4028 = vst [vmem:[%s4801_s20 + $0x1748] sm:$0xff] %v3004_v1  ;;  %v980_v1 = vld [vmem:[%s4779_s14 + $0x1808] sm:$0xff]  ;;  %v3027_v6 = vadd.f32 %v2003_v63, %v979_v62  ;;  %v2023_v59 = vld [vmem:[%s4786_s26 + $0x18a0] sm:$0xff] }
 0x328   : > { %4029 = vst [vmem:[%s4801_s20 + $0x1750] sm:$0xff] %v3005_v4  ;;  %v981_v4 = vld [vmem:[%s4779_s14 + $0x1810] sm:$0xff]  ;;  %v3028_v9 = vadd.f32 %v2004_v2, %v980_v1  ;;  %v2024_v62 = vld [vmem:[%s4786_s26 + $0x18a8] sm:$0xff] }
 0x329   : > { %4030 = vst [vmem:[%s4801_s20 + $0x1758] sm:$0xff] %v3006_v7  ;;  %v982_v7 = vld [vmem:[%s4779_s14 + $0x1818] sm:$0xff]  ;;  %v3029_v12 = vadd.f32 %v2005_v5, %v981_v4  ;;  %v2025_v1 = vld [vmem:[%s4786_s26 + $0x18b0] sm:$0xff] }
 0x32a   : > { %4031 = vst [vmem:[%s4801_s20 + $0x1760] sm:$0xff] %v3007_v10  ;;  %v983_v10 = vld [vmem:[%s4779_s14 + $0x1820] sm:$0xff]  ;;  %v3030_v15 = vadd.f32 %v2006_v8, %v982_v7  ;;  %v2026_v4 = vld [vmem:[%s4786_s26 + $0x18b8] sm:$0xff] }
 0x32b   : > { %4032 = vst [vmem:[%s4801_s20 + $0x1768] sm:$0xff] %v3008_v13  ;;  %v984_v13 = vld [vmem:[%s4779_s14 + $0x1828] sm:$0xff]  ;;  %v3031_v18 = vadd.f32 %v2007_v11, %v983_v10  ;;  %v2027_v7 = vld [vmem:[%s4786_s26 + $0x18c0] sm:$0xff] }
 0x32c   : > { %4033 = vst [vmem:[%s4801_s20 + $0x1770] sm:$0xff] %v3009_v16  ;;  %v985_v16 = vld [vmem:[%s4779_s14 + $0x1830] sm:$0xff]  ;;  %v3032_v21 = vadd.f32 %v2008_v14, %v984_v13  ;;  %v2028_v10 = vld [vmem:[%s4786_s26 + $0x18c8] sm:$0xff] }
 0x32d   : > { %4034 = vst [vmem:[%s4801_s20 + $0x1778] sm:$0xff] %v3010_v19  ;;  %v986_v19 = vld [vmem:[%s4779_s14 + $0x1838] sm:$0xff]  ;;  %v3033_v24 = vadd.f32 %v2009_v17, %v985_v16  ;;  %v2029_v13 = vld [vmem:[%s4786_s26 + $0x18d0] sm:$0xff] }
 0x32e   : > { %4035 = vst [vmem:[%s4801_s20 + $0x1780] sm:$0xff] %v3011_v22  ;;  %v987_v22 = vld [vmem:[%s4779_s14 + $0x1840] sm:$0xff]  ;;  %v3034_v27 = vadd.f32 %v2010_v20, %v986_v19  ;;  %v2030_v16 = vld [vmem:[%s4786_s26 + $0x18d8] sm:$0xff] }
 0x32f   : > { %4036 = vst [vmem:[%s4801_s20 + $0x1788] sm:$0xff] %v3012_v25  ;;  %v988_v25 = vld [vmem:[%s4779_s14 + $0x1848] sm:$0xff]  ;;  %v3035_v30 = vadd.f32 %v2011_v23, %v987_v22  ;;  %v2031_v19 = vld [vmem:[%s4786_s26 + $0x18e0] sm:$0xff] }
 0x330   : > { %4037 = vst [vmem:[%s4801_s20 + $0x1790] sm:$0xff] %v3013_v28  ;;  %v989_v28 = vld [vmem:[%s4779_s14 + $0x1850] sm:$0xff]  ;;  %v3036_v33 = vadd.f32 %v2012_v26, %v988_v25  ;;  %v2032_v22 = vld [vmem:[%s4786_s26 + $0x18e8] sm:$0xff] }
 0x331   : > { %4038 = vst [vmem:[%s4801_s20 + $0x1798] sm:$0xff] %v3014_v31  ;;  %v990_v31 = vld [vmem:[%s4779_s14 + $0x1858] sm:$0xff]  ;;  %v3037_v36 = vadd.f32 %v2013_v29, %v989_v28  ;;  %v2033_v25 = vld [vmem:[%s4786_s26 + $0x18f0] sm:$0xff] }
 0x332   : > { %4039 = vst [vmem:[%s4801_s20 + $0x17a0] sm:$0xff] %v3015_v34  ;;  %v991_v34 = vld [vmem:[%s4779_s14 + $0x1860] sm:$0xff]  ;;  %v3038_v39 = vadd.f32 %v2014_v32, %v990_v31  ;;  %v2034_v28 = vld [vmem:[%s4786_s26 + $0x18f8] sm:$0xff] }
 0x333   : > { %4040 = vst [vmem:[%s4801_s20 + $0x17a8] sm:$0xff] %v3016_v37  ;;  %v992_v37 = vld [vmem:[%s4779_s14 + $0x1868] sm:$0xff]  ;;  %v3039_v42 = vadd.f32 %v2015_v35, %v991_v34  ;;  %v2035_v31 = vld [vmem:[%s4786_s26 + $0x1900] sm:$0xff] }
 0x334   : > { %4041 = vst [vmem:[%s4801_s20 + $0x17b0] sm:$0xff] %v3017_v40  ;;  %v993_v40 = vld [vmem:[%s4779_s14 + $0x1870] sm:$0xff]  ;;  %v3040_v45 = vadd.f32 %v2016_v38, %v992_v37  ;;  %v2036_v34 = vld [vmem:[%s4786_s26 + $0x1908] sm:$0xff] }
 0x335   : > { %4042 = vst [vmem:[%s4801_s20 + $0x17b8] sm:$0xff] %v3018_v43  ;;  %v994_v43 = vld [vmem:[%s4779_s14 + $0x1878] sm:$0xff]  ;;  %v3041_v48 = vadd.f32 %v2017_v41, %v993_v40  ;;  %v2037_v37 = vld [vmem:[%s4786_s26 + $0x1910] sm:$0xff] }
 0x336   : > { %4043 = vst [vmem:[%s4801_s20 + $0x17c0] sm:$0xff] %v3019_v46  ;;  %v995_v46 = vld [vmem:[%s4779_s14 + $0x1880] sm:$0xff]  ;;  %v3042_v51 = vadd.f32 %v2018_v44, %v994_v43  ;;  %v2038_v40 = vld [vmem:[%s4786_s26 + $0x1918] sm:$0xff] }
 0x337   : > { %4044 = vst [vmem:[%s4801_s20 + $0x17c8] sm:$0xff] %v3020_v49  ;;  %v996_v49 = vld [vmem:[%s4779_s14 + $0x1888] sm:$0xff]  ;;  %v3043_v54 = vadd.f32 %v2019_v47, %v995_v46  ;;  %v2039_v43 = vld [vmem:[%s4786_s26 + $0x1920] sm:$0xff] }
 0x338   : > { %4045 = vst [vmem:[%s4801_s20 + $0x17d0] sm:$0xff] %v3021_v52  ;;  %v997_v52 = vld [vmem:[%s4779_s14 + $0x1890] sm:$0xff]  ;;  %v3044_v57 = vadd.f32 %v2020_v50, %v996_v49  ;;  %v2040_v46 = vld [vmem:[%s4786_s26 + $0x1928] sm:$0xff] }
 0x339   : > { %4046 = vst [vmem:[%s4801_s20 + $0x17d8] sm:$0xff] %v3022_v55  ;;  %v998_v55 = vld [vmem:[%s4779_s14 + $0x1898] sm:$0xff]  ;;  %v3045_v60 = vadd.f32 %v2021_v53, %v997_v52  ;;  %v2041_v49 = vld [vmem:[%s4786_s26 + $0x1930] sm:$0xff] }
 0x33a   : > { %4047 = vst [vmem:[%s4801_s20 + $0x17e0] sm:$0xff] %v3023_v58  ;;  %v999_v58 = vld [vmem:[%s4779_s14 + $0x18a0] sm:$0xff]  ;;  %v3046_v63 = vadd.f32 %v2022_v56, %v998_v55  ;;  %v2042_v52 = vld [vmem:[%s4786_s26 + $0x1938] sm:$0xff] }
 0x33b   : > { %4048 = vst [vmem:[%s4801_s20 + $0x17e8] sm:$0xff] %v3024_v61  ;;  %v1000_v61 = vld [vmem:[%s4779_s14 + $0x18a8] sm:$0xff]  ;;  %v3047_v2 = vadd.f32 %v2023_v59, %v999_v58  ;;  %v2043_v55 = vld [vmem:[%s4786_s26 + $0x1940] sm:$0xff] }
 0x33c   : > { %4049 = vst [vmem:[%s4801_s20 + $0x17f0] sm:$0xff] %v3025_v0  ;;  %v1001_v0 = vld [vmem:[%s4779_s14 + $0x18b0] sm:$0xff]  ;;  %v3048_v5 = vadd.f32 %v2024_v62, %v1000_v61  ;;  %v2044_v58 = vld [vmem:[%s4786_s26 + $0x1948] sm:$0xff] }
 0x33d   : > { %4050 = vst [vmem:[%s4801_s20 + $0x17f8] sm:$0xff] %v3026_v3  ;;  %v1002_v3 = vld [vmem:[%s4779_s14 + $0x18b8] sm:$0xff]  ;;  %v3049_v8 = vadd.f32 %v2025_v1, %v1001_v0  ;;  %v2045_v61 = vld [vmem:[%s4786_s26 + $0x1950] sm:$0xff] }
 0x33e   : > { %4051 = vst [vmem:[%s4801_s20 + $0x1800] sm:$0xff] %v3027_v6  ;;  %v1003_v6 = vld [vmem:[%s4779_s14 + $0x18c0] sm:$0xff]  ;;  %v3050_v11 = vadd.f32 %v2026_v4, %v1002_v3  ;;  %v2046_v0 = vld [vmem:[%s4786_s26 + $0x1958] sm:$0xff] }
 0x33f   : > { %4052 = vst [vmem:[%s4801_s20 + $0x1808] sm:$0xff] %v3028_v9  ;;  %v1004_v9 = vld [vmem:[%s4779_s14 + $0x18c8] sm:$0xff]  ;;  %v3051_v14 = vadd.f32 %v2027_v7, %v1003_v6  ;;  %v2047_v3 = vld [vmem:[%s4786_s26 + $0x1960] sm:$0xff] }
 0x340   : > { %4053 = vst [vmem:[%s4801_s20 + $0x1810] sm:$0xff] %v3029_v12  ;;  %v1005_v12 = vld [vmem:[%s4779_s14 + $0x18d0] sm:$0xff]  ;;  %v3052_v17 = vadd.f32 %v2028_v10, %v1004_v9  ;;  %v2048_v6 = vld [vmem:[%s4786_s26 + $0x1968] sm:$0xff] }
 0x341   : > { %4054 = vst [vmem:[%s4801_s20 + $0x1818] sm:$0xff] %v3030_v15  ;;  %v1006_v15 = vld [vmem:[%s4779_s14 + $0x18d8] sm:$0xff]  ;;  %v3053_v20 = vadd.f32 %v2029_v13, %v1005_v12  ;;  %v2049_v9 = vld [vmem:[%s4786_s26 + $0x1970] sm:$0xff] }
 0x342   : > { %4055 = vst [vmem:[%s4801_s20 + $0x1820] sm:$0xff] %v3031_v18  ;;  %v1007_v18 = vld [vmem:[%s4779_s14 + $0x18e0] sm:$0xff]  ;;  %v3054_v23 = vadd.f32 %v2030_v16, %v1006_v15  ;;  %v2050_v12 = vld [vmem:[%s4786_s26 + $0x1978] sm:$0xff] }
 0x343   : > { %4056 = vst [vmem:[%s4801_s20 + $0x1828] sm:$0xff] %v3032_v21  ;;  %v1008_v21 = vld [vmem:[%s4779_s14 + $0x18e8] sm:$0xff]  ;;  %v3055_v26 = vadd.f32 %v2031_v19, %v1007_v18  ;;  %v2051_v15 = vld [vmem:[%s4786_s26 + $0x1980] sm:$0xff] }
 0x344   : > { %4057 = vst [vmem:[%s4801_s20 + $0x1830] sm:$0xff] %v3033_v24  ;;  %v1009_v24 = vld [vmem:[%s4779_s14 + $0x18f0] sm:$0xff]  ;;  %v3056_v29 = vadd.f32 %v2032_v22, %v1008_v21  ;;  %v2052_v18 = vld [vmem:[%s4786_s26 + $0x1988] sm:$0xff] }
 0x345   : > { %4058 = vst [vmem:[%s4801_s20 + $0x1838] sm:$0xff] %v3034_v27  ;;  %v1010_v27 = vld [vmem:[%s4779_s14 + $0x18f8] sm:$0xff]  ;;  %v3057_v32 = vadd.f32 %v2033_v25, %v1009_v24  ;;  %v2053_v21 = vld [vmem:[%s4786_s26 + $0x1990] sm:$0xff] }
 0x346   : > { %4059 = vst [vmem:[%s4801_s20 + $0x1840] sm:$0xff] %v3035_v30  ;;  %v1011_v30 = vld [vmem:[%s4779_s14 + $0x1900] sm:$0xff]  ;;  %v3058_v35 = vadd.f32 %v2034_v28, %v1010_v27  ;;  %v2054_v24 = vld [vmem:[%s4786_s26 + $0x1998] sm:$0xff] }
 0x347   : > { %4060 = vst [vmem:[%s4801_s20 + $0x1848] sm:$0xff] %v3036_v33  ;;  %v1012_v33 = vld [vmem:[%s4779_s14 + $0x1908] sm:$0xff]  ;;  %v3059_v38 = vadd.f32 %v2035_v31, %v1011_v30  ;;  %v2055_v27 = vld [vmem:[%s4786_s26 + $0x19a0] sm:$0xff] }
 0x348   : > { %4061 = vst [vmem:[%s4801_s20 + $0x1850] sm:$0xff] %v3037_v36  ;;  %v1013_v36 = vld [vmem:[%s4779_s14 + $0x1910] sm:$0xff]  ;;  %v3060_v41 = vadd.f32 %v2036_v34, %v1012_v33  ;;  %v2056_v30 = vld [vmem:[%s4786_s26 + $0x19a8] sm:$0xff] }
 0x349   : > { %4062 = vst [vmem:[%s4801_s20 + $0x1858] sm:$0xff] %v3038_v39  ;;  %v1014_v39 = vld [vmem:[%s4779_s14 + $0x1918] sm:$0xff]  ;;  %v3061_v44 = vadd.f32 %v2037_v37, %v1013_v36  ;;  %v2057_v33 = vld [vmem:[%s4786_s26 + $0x19b0] sm:$0xff] }
 0x34a   : > { %4063 = vst [vmem:[%s4801_s20 + $0x1860] sm:$0xff] %v3039_v42  ;;  %v1015_v42 = vld [vmem:[%s4779_s14 + $0x1920] sm:$0xff]  ;;  %v3062_v47 = vadd.f32 %v2038_v40, %v1014_v39  ;;  %v2058_v36 = vld [vmem:[%s4786_s26 + $0x19b8] sm:$0xff] }
 0x34b   : > { %4064 = vst [vmem:[%s4801_s20 + $0x1868] sm:$0xff] %v3040_v45  ;;  %v1016_v45 = vld [vmem:[%s4779_s14 + $0x1928] sm:$0xff]  ;;  %v3063_v50 = vadd.f32 %v2039_v43, %v1015_v42  ;;  %v2059_v39 = vld [vmem:[%s4786_s26 + $0x19c0] sm:$0xff] }
 0x34c   : > { %4065 = vst [vmem:[%s4801_s20 + $0x1870] sm:$0xff] %v3041_v48  ;;  %v1017_v48 = vld [vmem:[%s4779_s14 + $0x1930] sm:$0xff]  ;;  %v3064_v53 = vadd.f32 %v2040_v46, %v1016_v45  ;;  %v2060_v42 = vld [vmem:[%s4786_s26 + $0x19c8] sm:$0xff] }
 0x34d   : > { %4066 = vst [vmem:[%s4801_s20 + $0x1878] sm:$0xff] %v3042_v51  ;;  %v1018_v51 = vld [vmem:[%s4779_s14 + $0x1938] sm:$0xff]  ;;  %v3065_v56 = vadd.f32 %v2041_v49, %v1017_v48  ;;  %v2061_v45 = vld [vmem:[%s4786_s26 + $0x19d0] sm:$0xff] }
 0x34e   : > { %4067 = vst [vmem:[%s4801_s20 + $0x1880] sm:$0xff] %v3043_v54  ;;  %v1019_v54 = vld [vmem:[%s4779_s14 + $0x1940] sm:$0xff]  ;;  %v3066_v59 = vadd.f32 %v2042_v52, %v1018_v51  ;;  %v2062_v48 = vld [vmem:[%s4786_s26 + $0x19d8] sm:$0xff] }
 0x34f   : > { %4068 = vst [vmem:[%s4801_s20 + $0x1888] sm:$0xff] %v3044_v57  ;;  %v1020_v57 = vld [vmem:[%s4779_s14 + $0x1948] sm:$0xff]  ;;  %v3067_v62 = vadd.f32 %v2043_v55, %v1019_v54  ;;  %v2063_v51 = vld [vmem:[%s4786_s26 + $0x19e0] sm:$0xff] }
 0x350   : > { %4069 = vst [vmem:[%s4801_s20 + $0x1890] sm:$0xff] %v3045_v60  ;;  %v1021_v60 = vld [vmem:[%s4779_s14 + $0x1950] sm:$0xff]  ;;  %v3068_v1 = vadd.f32 %v2044_v58, %v1020_v57  ;;  %v2064_v54 = vld [vmem:[%s4786_s26 + $0x19e8] sm:$0xff] }
 0x351   : > { %4070 = vst [vmem:[%s4801_s20 + $0x1898] sm:$0xff] %v3046_v63  ;;  %v1022_v63 = vld [vmem:[%s4779_s14 + $0x1958] sm:$0xff]  ;;  %v3069_v4 = vadd.f32 %v2045_v61, %v1021_v60  ;;  %v2065_v57 = vld [vmem:[%s4786_s26 + $0x19f0] sm:$0xff] }
 0x352   : > { %4071 = vst [vmem:[%s4801_s20 + $0x18a0] sm:$0xff] %v3047_v2  ;;  %v1023_v2 = vld [vmem:[%s4779_s14 + $0x1960] sm:$0xff]  ;;  %v3070_v7 = vadd.f32 %v2046_v0, %v1022_v63  ;;  %v2066_v60 = vld [vmem:[%s4786_s26 + $0x19f8] sm:$0xff] }
 0x353   : > { %4072 = vst [vmem:[%s4801_s20 + $0x18a8] sm:$0xff] %v3048_v5  ;;  %v1024_v5 = vld [vmem:[%s4779_s14 + $0x1968] sm:$0xff]  ;;  %v3071_v10 = vadd.f32 %v2047_v3, %v1023_v2  ;;  %v2067_v63 = vld [vmem:[%s4786_s26 + $0x1a00] sm:$0xff] }
 0x354   : > { %4073 = vst [vmem:[%s4801_s20 + $0x18b0] sm:$0xff] %v3049_v8  ;;  %v1025_v8 = vld [vmem:[%s4779_s14 + $0x1970] sm:$0xff]  ;;  %v3072_v13 = vadd.f32 %v2048_v6, %v1024_v5  ;;  %v2068_v2 = vld [vmem:[%s4786_s26 + $0x1a08] sm:$0xff] }
 0x355   : > { %4074 = vst [vmem:[%s4801_s20 + $0x18b8] sm:$0xff] %v3050_v11  ;;  %v1026_v11 = vld [vmem:[%s4779_s14 + $0x1978] sm:$0xff]  ;;  %v3073_v16 = vadd.f32 %v2049_v9, %v1025_v8  ;;  %v2069_v5 = vld [vmem:[%s4786_s26 + $0x1a10] sm:$0xff] }
 0x356   : > { %4075 = vst [vmem:[%s4801_s20 + $0x18c0] sm:$0xff] %v3051_v14  ;;  %v1027_v14 = vld [vmem:[%s4779_s14 + $0x1980] sm:$0xff]  ;;  %v3074_v19 = vadd.f32 %v2050_v12, %v1026_v11  ;;  %v2070_v8 = vld [vmem:[%s4786_s26 + $0x1a18] sm:$0xff] }
 0x357   : > { %4076 = vst [vmem:[%s4801_s20 + $0x18c8] sm:$0xff] %v3052_v17  ;;  %v1028_v17 = vld [vmem:[%s4779_s14 + $0x1988] sm:$0xff]  ;;  %v3075_v22 = vadd.f32 %v2051_v15, %v1027_v14  ;;  %v2071_v11 = vld [vmem:[%s4786_s26 + $0x1a20] sm:$0xff] }
 0x358   : > { %4077 = vst [vmem:[%s4801_s20 + $0x18d0] sm:$0xff] %v3053_v20  ;;  %v1029_v20 = vld [vmem:[%s4779_s14 + $0x1990] sm:$0xff]  ;;  %v3076_v25 = vadd.f32 %v2052_v18, %v1028_v17  ;;  %v2072_v14 = vld [vmem:[%s4786_s26 + $0x1a28] sm:$0xff] }
 0x359   : > { %4078 = vst [vmem:[%s4801_s20 + $0x18d8] sm:$0xff] %v3054_v23  ;;  %v1030_v23 = vld [vmem:[%s4779_s14 + $0x1998] sm:$0xff]  ;;  %v3077_v28 = vadd.f32 %v2053_v21, %v1029_v20  ;;  %v2073_v17 = vld [vmem:[%s4786_s26 + $0x1a30] sm:$0xff] }
 0x35a   : > { %4079 = vst [vmem:[%s4801_s20 + $0x18e0] sm:$0xff] %v3055_v26  ;;  %v1031_v26 = vld [vmem:[%s4779_s14 + $0x19a0] sm:$0xff]  ;;  %v3078_v31 = vadd.f32 %v2054_v24, %v1030_v23  ;;  %v2074_v20 = vld [vmem:[%s4786_s26 + $0x1a38] sm:$0xff] }
 0x35b   : > { %4080 = vst [vmem:[%s4801_s20 + $0x18e8] sm:$0xff] %v3056_v29  ;;  %v1032_v29 = vld [vmem:[%s4779_s14 + $0x19a8] sm:$0xff]  ;;  %v3079_v34 = vadd.f32 %v2055_v27, %v1031_v26  ;;  %v2075_v23 = vld [vmem:[%s4786_s26 + $0x1a40] sm:$0xff] }
 0x35c   : > { %4081 = vst [vmem:[%s4801_s20 + $0x18f0] sm:$0xff] %v3057_v32  ;;  %v1033_v32 = vld [vmem:[%s4779_s14 + $0x19b0] sm:$0xff]  ;;  %v3080_v37 = vadd.f32 %v2056_v30, %v1032_v29  ;;  %v2076_v26 = vld [vmem:[%s4786_s26 + $0x1a48] sm:$0xff] }
 0x35d   : > { %4082 = vst [vmem:[%s4801_s20 + $0x18f8] sm:$0xff] %v3058_v35  ;;  %v1034_v35 = vld [vmem:[%s4779_s14 + $0x19b8] sm:$0xff]  ;;  %v3081_v40 = vadd.f32 %v2057_v33, %v1033_v32  ;;  %v2077_v29 = vld [vmem:[%s4786_s26 + $0x1a50] sm:$0xff] }
 0x35e   : > { %4083 = vst [vmem:[%s4801_s20 + $0x1900] sm:$0xff] %v3059_v38  ;;  %v1035_v38 = vld [vmem:[%s4779_s14 + $0x19c0] sm:$0xff]  ;;  %v3082_v43 = vadd.f32 %v2058_v36, %v1034_v35  ;;  %v2078_v32 = vld [vmem:[%s4786_s26 + $0x1a58] sm:$0xff] }
 0x35f   : > { %4084 = vst [vmem:[%s4801_s20 + $0x1908] sm:$0xff] %v3060_v41  ;;  %v1036_v41 = vld [vmem:[%s4779_s14 + $0x19c8] sm:$0xff]  ;;  %v3083_v46 = vadd.f32 %v2059_v39, %v1035_v38  ;;  %v2079_v35 = vld [vmem:[%s4786_s26 + $0x1a60] sm:$0xff] }
 0x360   : > { %4085 = vst [vmem:[%s4801_s20 + $0x1910] sm:$0xff] %v3061_v44  ;;  %v1037_v44 = vld [vmem:[%s4779_s14 + $0x19d0] sm:$0xff]  ;;  %v3084_v49 = vadd.f32 %v2060_v42, %v1036_v41  ;;  %v2080_v38 = vld [vmem:[%s4786_s26 + $0x1a68] sm:$0xff] }
 0x361   : > { %4086 = vst [vmem:[%s4801_s20 + $0x1918] sm:$0xff] %v3062_v47  ;;  %v1038_v47 = vld [vmem:[%s4779_s14 + $0x19d8] sm:$0xff]  ;;  %v3085_v52 = vadd.f32 %v2061_v45, %v1037_v44  ;;  %v2081_v41 = vld [vmem:[%s4786_s26 + $0x1a70] sm:$0xff] }
 0x362   : > { %4087 = vst [vmem:[%s4801_s20 + $0x1920] sm:$0xff] %v3063_v50  ;;  %v1039_v50 = vld [vmem:[%s4779_s14 + $0x19e0] sm:$0xff]  ;;  %v3086_v55 = vadd.f32 %v2062_v48, %v1038_v47  ;;  %v2082_v44 = vld [vmem:[%s4786_s26 + $0x1a78] sm:$0xff] }
 0x363   : > { %4088 = vst [vmem:[%s4801_s20 + $0x1928] sm:$0xff] %v3064_v53  ;;  %v1040_v53 = vld [vmem:[%s4779_s14 + $0x19e8] sm:$0xff]  ;;  %v3087_v58 = vadd.f32 %v2063_v51, %v1039_v50  ;;  %v2083_v47 = vld [vmem:[%s4786_s26 + $0x1a80] sm:$0xff] }
 0x364   : > { %4089 = vst [vmem:[%s4801_s20 + $0x1930] sm:$0xff] %v3065_v56  ;;  %v1041_v56 = vld [vmem:[%s4779_s14 + $0x19f0] sm:$0xff]  ;;  %v3088_v61 = vadd.f32 %v2064_v54, %v1040_v53  ;;  %v2084_v50 = vld [vmem:[%s4786_s26 + $0x1a88] sm:$0xff] }
 0x365   : > { %4090 = vst [vmem:[%s4801_s20 + $0x1938] sm:$0xff] %v3066_v59  ;;  %v1042_v59 = vld [vmem:[%s4779_s14 + $0x19f8] sm:$0xff]  ;;  %v3089_v0 = vadd.f32 %v2065_v57, %v1041_v56  ;;  %v2085_v53 = vld [vmem:[%s4786_s26 + $0x1a90] sm:$0xff] }
 0x366   : > { %4091 = vst [vmem:[%s4801_s20 + $0x1940] sm:$0xff] %v3067_v62  ;;  %v1043_v62 = vld [vmem:[%s4779_s14 + $0x1a00] sm:$0xff]  ;;  %v3090_v3 = vadd.f32 %v2066_v60, %v1042_v59  ;;  %v2086_v56 = vld [vmem:[%s4786_s26 + $0x1a98] sm:$0xff] }
 0x367   : > { %4092 = vst [vmem:[%s4801_s20 + $0x1948] sm:$0xff] %v3068_v1  ;;  %v1044_v1 = vld [vmem:[%s4779_s14 + $0x1a08] sm:$0xff]  ;;  %v3091_v6 = vadd.f32 %v2067_v63, %v1043_v62  ;;  %v2087_v59 = vld [vmem:[%s4786_s26 + $0x1aa0] sm:$0xff] }
 0x368   : > { %4093 = vst [vmem:[%s4801_s20 + $0x1950] sm:$0xff] %v3069_v4  ;;  %v1045_v4 = vld [vmem:[%s4779_s14 + $0x1a10] sm:$0xff]  ;;  %v3092_v9 = vadd.f32 %v2068_v2, %v1044_v1  ;;  %v2088_v62 = vld [vmem:[%s4786_s26 + $0x1aa8] sm:$0xff] }
 0x369   : > { %4094 = vst [vmem:[%s4801_s20 + $0x1958] sm:$0xff] %v3070_v7  ;;  %v1046_v7 = vld [vmem:[%s4779_s14 + $0x1a18] sm:$0xff]  ;;  %v3093_v12 = vadd.f32 %v2069_v5, %v1045_v4  ;;  %v2089_v1 = vld [vmem:[%s4786_s26 + $0x1ab0] sm:$0xff] }
 0x36a   : > { %4095 = vst [vmem:[%s4801_s20 + $0x1960] sm:$0xff] %v3071_v10  ;;  %v1047_v10 = vld [vmem:[%s4779_s14 + $0x1a20] sm:$0xff]  ;;  %v3094_v15 = vadd.f32 %v2070_v8, %v1046_v7  ;;  %v2090_v4 = vld [vmem:[%s4786_s26 + $0x1ab8] sm:$0xff] }
 0x36b   : > { %4096 = vst [vmem:[%s4801_s20 + $0x1968] sm:$0xff] %v3072_v13  ;;  %v1048_v13 = vld [vmem:[%s4779_s14 + $0x1a28] sm:$0xff]  ;;  %v3095_v18 = vadd.f32 %v2071_v11, %v1047_v10  ;;  %v2091_v7 = vld [vmem:[%s4786_s26 + $0x1ac0] sm:$0xff] }
 0x36c   : > { %4097 = vst [vmem:[%s4801_s20 + $0x1970] sm:$0xff] %v3073_v16  ;;  %v1049_v16 = vld [vmem:[%s4779_s14 + $0x1a30] sm:$0xff]  ;;  %v3096_v21 = vadd.f32 %v2072_v14, %v1048_v13  ;;  %v2092_v10 = vld [vmem:[%s4786_s26 + $0x1ac8] sm:$0xff] }
 0x36d   : > { %4098 = vst [vmem:[%s4801_s20 + $0x1978] sm:$0xff] %v3074_v19  ;;  %v1050_v19 = vld [vmem:[%s4779_s14 + $0x1a38] sm:$0xff]  ;;  %v3097_v24 = vadd.f32 %v2073_v17, %v1049_v16  ;;  %v2093_v13 = vld [vmem:[%s4786_s26 + $0x1ad0] sm:$0xff] }
 0x36e   : > { %4099 = vst [vmem:[%s4801_s20 + $0x1980] sm:$0xff] %v3075_v22  ;;  %v1051_v22 = vld [vmem:[%s4779_s14 + $0x1a40] sm:$0xff]  ;;  %v3098_v27 = vadd.f32 %v2074_v20, %v1050_v19  ;;  %v2094_v16 = vld [vmem:[%s4786_s26 + $0x1ad8] sm:$0xff] }
 0x36f   : > { %4100 = vst [vmem:[%s4801_s20 + $0x1988] sm:$0xff] %v3076_v25  ;;  %v1052_v25 = vld [vmem:[%s4779_s14 + $0x1a48] sm:$0xff]  ;;  %v3099_v30 = vadd.f32 %v2075_v23, %v1051_v22  ;;  %v2095_v19 = vld [vmem:[%s4786_s26 + $0x1ae0] sm:$0xff] }
 0x370   : > { %4101 = vst [vmem:[%s4801_s20 + $0x1990] sm:$0xff] %v3077_v28  ;;  %v1053_v28 = vld [vmem:[%s4779_s14 + $0x1a50] sm:$0xff]  ;;  %v3100_v33 = vadd.f32 %v2076_v26, %v1052_v25  ;;  %v2096_v22 = vld [vmem:[%s4786_s26 + $0x1ae8] sm:$0xff] }
 0x371   : > { %4102 = vst [vmem:[%s4801_s20 + $0x1998] sm:$0xff] %v3078_v31  ;;  %v1054_v31 = vld [vmem:[%s4779_s14 + $0x1a58] sm:$0xff]  ;;  %v3101_v36 = vadd.f32 %v2077_v29, %v1053_v28  ;;  %v2097_v25 = vld [vmem:[%s4786_s26 + $0x1af0] sm:$0xff] }
 0x372   : > { %4103 = vst [vmem:[%s4801_s20 + $0x19a0] sm:$0xff] %v3079_v34  ;;  %v1055_v34 = vld [vmem:[%s4779_s14 + $0x1a60] sm:$0xff]  ;;  %v3102_v39 = vadd.f32 %v2078_v32, %v1054_v31  ;;  %v2098_v28 = vld [vmem:[%s4786_s26 + $0x1af8] sm:$0xff] }
 0x373   : > { %4104 = vst [vmem:[%s4801_s20 + $0x19a8] sm:$0xff] %v3080_v37  ;;  %v1056_v37 = vld [vmem:[%s4779_s14 + $0x1a68] sm:$0xff]  ;;  %v3103_v42 = vadd.f32 %v2079_v35, %v1055_v34  ;;  %v2099_v31 = vld [vmem:[%s4786_s26 + $0x1b00] sm:$0xff] }
 0x374   : > { %4105 = vst [vmem:[%s4801_s20 + $0x19b0] sm:$0xff] %v3081_v40  ;;  %v1057_v40 = vld [vmem:[%s4779_s14 + $0x1a70] sm:$0xff]  ;;  %v3104_v45 = vadd.f32 %v2080_v38, %v1056_v37  ;;  %v2100_v34 = vld [vmem:[%s4786_s26 + $0x1b08] sm:$0xff] }
 0x375   : > { %4106 = vst [vmem:[%s4801_s20 + $0x19b8] sm:$0xff] %v3082_v43  ;;  %v1058_v43 = vld [vmem:[%s4779_s14 + $0x1a78] sm:$0xff]  ;;  %v3105_v48 = vadd.f32 %v2081_v41, %v1057_v40  ;;  %v2101_v37 = vld [vmem:[%s4786_s26 + $0x1b10] sm:$0xff] }
 0x376   : > { %4107 = vst [vmem:[%s4801_s20 + $0x19c0] sm:$0xff] %v3083_v46  ;;  %v1059_v46 = vld [vmem:[%s4779_s14 + $0x1a80] sm:$0xff]  ;;  %v3106_v51 = vadd.f32 %v2082_v44, %v1058_v43  ;;  %v2102_v40 = vld [vmem:[%s4786_s26 + $0x1b18] sm:$0xff] }
 0x377   : > { %4108 = vst [vmem:[%s4801_s20 + $0x19c8] sm:$0xff] %v3084_v49  ;;  %v1060_v49 = vld [vmem:[%s4779_s14 + $0x1a88] sm:$0xff]  ;;  %v3107_v54 = vadd.f32 %v2083_v47, %v1059_v46  ;;  %v2103_v43 = vld [vmem:[%s4786_s26 + $0x1b20] sm:$0xff] }
 0x378   : > { %4109 = vst [vmem:[%s4801_s20 + $0x19d0] sm:$0xff] %v3085_v52  ;;  %v1061_v52 = vld [vmem:[%s4779_s14 + $0x1a90] sm:$0xff]  ;;  %v3108_v57 = vadd.f32 %v2084_v50, %v1060_v49  ;;  %v2104_v46 = vld [vmem:[%s4786_s26 + $0x1b28] sm:$0xff] }
 0x379   : > { %4110 = vst [vmem:[%s4801_s20 + $0x19d8] sm:$0xff] %v3086_v55  ;;  %v1062_v55 = vld [vmem:[%s4779_s14 + $0x1a98] sm:$0xff]  ;;  %v3109_v60 = vadd.f32 %v2085_v53, %v1061_v52  ;;  %v2105_v49 = vld [vmem:[%s4786_s26 + $0x1b30] sm:$0xff] }
 0x37a   : > { %4111 = vst [vmem:[%s4801_s20 + $0x19e0] sm:$0xff] %v3087_v58  ;;  %v1063_v58 = vld [vmem:[%s4779_s14 + $0x1aa0] sm:$0xff]  ;;  %v3110_v63 = vadd.f32 %v2086_v56, %v1062_v55  ;;  %v2106_v52 = vld [vmem:[%s4786_s26 + $0x1b38] sm:$0xff] }
 0x37b   : > { %4112 = vst [vmem:[%s4801_s20 + $0x19e8] sm:$0xff] %v3088_v61  ;;  %v1064_v61 = vld [vmem:[%s4779_s14 + $0x1aa8] sm:$0xff]  ;;  %v3111_v2 = vadd.f32 %v2087_v59, %v1063_v58  ;;  %v2107_v55 = vld [vmem:[%s4786_s26 + $0x1b40] sm:$0xff] }
 0x37c   : > { %4113 = vst [vmem:[%s4801_s20 + $0x19f0] sm:$0xff] %v3089_v0  ;;  %v1065_v0 = vld [vmem:[%s4779_s14 + $0x1ab0] sm:$0xff]  ;;  %v3112_v5 = vadd.f32 %v2088_v62, %v1064_v61  ;;  %v2108_v58 = vld [vmem:[%s4786_s26 + $0x1b48] sm:$0xff] }
 0x37d   : > { %4114 = vst [vmem:[%s4801_s20 + $0x19f8] sm:$0xff] %v3090_v3  ;;  %v1066_v3 = vld [vmem:[%s4779_s14 + $0x1ab8] sm:$0xff]  ;;  %v3113_v8 = vadd.f32 %v2089_v1, %v1065_v0  ;;  %v2109_v61 = vld [vmem:[%s4786_s26 + $0x1b50] sm:$0xff] }
 0x37e   : > { %4115 = vst [vmem:[%s4801_s20 + $0x1a00] sm:$0xff] %v3091_v6  ;;  %v1067_v6 = vld [vmem:[%s4779_s14 + $0x1ac0] sm:$0xff]  ;;  %v3114_v11 = vadd.f32 %v2090_v4, %v1066_v3  ;;  %v2110_v0 = vld [vmem:[%s4786_s26 + $0x1b58] sm:$0xff] }
 0x37f   : > { %4116 = vst [vmem:[%s4801_s20 + $0x1a08] sm:$0xff] %v3092_v9  ;;  %v1068_v9 = vld [vmem:[%s4779_s14 + $0x1ac8] sm:$0xff]  ;;  %v3115_v14 = vadd.f32 %v2091_v7, %v1067_v6  ;;  %v2111_v3 = vld [vmem:[%s4786_s26 + $0x1b60] sm:$0xff] }
 0x380   : > { %4117 = vst [vmem:[%s4801_s20 + $0x1a10] sm:$0xff] %v3093_v12  ;;  %v1069_v12 = vld [vmem:[%s4779_s14 + $0x1ad0] sm:$0xff]  ;;  %v3116_v17 = vadd.f32 %v2092_v10, %v1068_v9  ;;  %v2112_v6 = vld [vmem:[%s4786_s26 + $0x1b68] sm:$0xff] }
 0x381   : > { %4118 = vst [vmem:[%s4801_s20 + $0x1a18] sm:$0xff] %v3094_v15  ;;  %v1070_v15 = vld [vmem:[%s4779_s14 + $0x1ad8] sm:$0xff]  ;;  %v3117_v20 = vadd.f32 %v2093_v13, %v1069_v12  ;;  %v2113_v9 = vld [vmem:[%s4786_s26 + $0x1b70] sm:$0xff] }
 0x382   : > { %4119 = vst [vmem:[%s4801_s20 + $0x1a20] sm:$0xff] %v3095_v18  ;;  %v1071_v18 = vld [vmem:[%s4779_s14 + $0x1ae0] sm:$0xff]  ;;  %v3118_v23 = vadd.f32 %v2094_v16, %v1070_v15  ;;  %v2114_v12 = vld [vmem:[%s4786_s26 + $0x1b78] sm:$0xff] }
 0x383   : > { %4120 = vst [vmem:[%s4801_s20 + $0x1a28] sm:$0xff] %v3096_v21  ;;  %v1072_v21 = vld [vmem:[%s4779_s14 + $0x1ae8] sm:$0xff]  ;;  %v3119_v26 = vadd.f32 %v2095_v19, %v1071_v18  ;;  %v2115_v15 = vld [vmem:[%s4786_s26 + $0x1b80] sm:$0xff] }
 0x384   : > { %4121 = vst [vmem:[%s4801_s20 + $0x1a30] sm:$0xff] %v3097_v24  ;;  %v1073_v24 = vld [vmem:[%s4779_s14 + $0x1af0] sm:$0xff]  ;;  %v3120_v29 = vadd.f32 %v2096_v22, %v1072_v21  ;;  %v2116_v18 = vld [vmem:[%s4786_s26 + $0x1b88] sm:$0xff] }
 0x385   : > { %4122 = vst [vmem:[%s4801_s20 + $0x1a38] sm:$0xff] %v3098_v27  ;;  %v1074_v27 = vld [vmem:[%s4779_s14 + $0x1af8] sm:$0xff]  ;;  %v3121_v32 = vadd.f32 %v2097_v25, %v1073_v24  ;;  %v2117_v21 = vld [vmem:[%s4786_s26 + $0x1b90] sm:$0xff] }
 0x386   : > { %4123 = vst [vmem:[%s4801_s20 + $0x1a40] sm:$0xff] %v3099_v30  ;;  %v1075_v30 = vld [vmem:[%s4779_s14 + $0x1b00] sm:$0xff]  ;;  %v3122_v35 = vadd.f32 %v2098_v28, %v1074_v27  ;;  %v2118_v24 = vld [vmem:[%s4786_s26 + $0x1b98] sm:$0xff] }
 0x387   : > { %4124 = vst [vmem:[%s4801_s20 + $0x1a48] sm:$0xff] %v3100_v33  ;;  %v1076_v33 = vld [vmem:[%s4779_s14 + $0x1b08] sm:$0xff]  ;;  %v3123_v38 = vadd.f32 %v2099_v31, %v1075_v30  ;;  %v2119_v27 = vld [vmem:[%s4786_s26 + $0x1ba0] sm:$0xff] }
 0x388   : > { %4125 = vst [vmem:[%s4801_s20 + $0x1a50] sm:$0xff] %v3101_v36  ;;  %v1077_v36 = vld [vmem:[%s4779_s14 + $0x1b10] sm:$0xff]  ;;  %v3124_v41 = vadd.f32 %v2100_v34, %v1076_v33  ;;  %v2120_v30 = vld [vmem:[%s4786_s26 + $0x1ba8] sm:$0xff] }
 0x389   : > { %4126 = vst [vmem:[%s4801_s20 + $0x1a58] sm:$0xff] %v3102_v39  ;;  %v1078_v39 = vld [vmem:[%s4779_s14 + $0x1b18] sm:$0xff]  ;;  %v3125_v44 = vadd.f32 %v2101_v37, %v1077_v36  ;;  %v2121_v33 = vld [vmem:[%s4786_s26 + $0x1bb0] sm:$0xff] }
 0x38a   : > { %4127 = vst [vmem:[%s4801_s20 + $0x1a60] sm:$0xff] %v3103_v42  ;;  %v1079_v42 = vld [vmem:[%s4779_s14 + $0x1b20] sm:$0xff]  ;;  %v3126_v47 = vadd.f32 %v2102_v40, %v1078_v39  ;;  %v2122_v36 = vld [vmem:[%s4786_s26 + $0x1bb8] sm:$0xff] }
 0x38b   : > { %4128 = vst [vmem:[%s4801_s20 + $0x1a68] sm:$0xff] %v3104_v45  ;;  %v1080_v45 = vld [vmem:[%s4779_s14 + $0x1b28] sm:$0xff]  ;;  %v3127_v50 = vadd.f32 %v2103_v43, %v1079_v42  ;;  %v2123_v39 = vld [vmem:[%s4786_s26 + $0x1bc0] sm:$0xff] }
 0x38c   : > { %4129 = vst [vmem:[%s4801_s20 + $0x1a70] sm:$0xff] %v3105_v48  ;;  %v1081_v48 = vld [vmem:[%s4779_s14 + $0x1b30] sm:$0xff]  ;;  %v3128_v53 = vadd.f32 %v2104_v46, %v1080_v45  ;;  %v2124_v42 = vld [vmem:[%s4786_s26 + $0x1bc8] sm:$0xff] }
 0x38d   : > { %4130 = vst [vmem:[%s4801_s20 + $0x1a78] sm:$0xff] %v3106_v51  ;;  %v1082_v51 = vld [vmem:[%s4779_s14 + $0x1b38] sm:$0xff]  ;;  %v3129_v56 = vadd.f32 %v2105_v49, %v1081_v48  ;;  %v2125_v45 = vld [vmem:[%s4786_s26 + $0x1bd0] sm:$0xff] }
 0x38e   : > { %4131 = vst [vmem:[%s4801_s20 + $0x1a80] sm:$0xff] %v3107_v54  ;;  %v1083_v54 = vld [vmem:[%s4779_s14 + $0x1b40] sm:$0xff]  ;;  %v3130_v59 = vadd.f32 %v2106_v52, %v1082_v51  ;;  %v2126_v48 = vld [vmem:[%s4786_s26 + $0x1bd8] sm:$0xff] }
 0x38f   : > { %4132 = vst [vmem:[%s4801_s20 + $0x1a88] sm:$0xff] %v3108_v57  ;;  %v1084_v57 = vld [vmem:[%s4779_s14 + $0x1b48] sm:$0xff]  ;;  %v3131_v62 = vadd.f32 %v2107_v55, %v1083_v54  ;;  %v2127_v51 = vld [vmem:[%s4786_s26 + $0x1be0] sm:$0xff] }
 0x390   : > { %4133 = vst [vmem:[%s4801_s20 + $0x1a90] sm:$0xff] %v3109_v60  ;;  %v1085_v60 = vld [vmem:[%s4779_s14 + $0x1b50] sm:$0xff]  ;;  %v3132_v1 = vadd.f32 %v2108_v58, %v1084_v57  ;;  %v2128_v54 = vld [vmem:[%s4786_s26 + $0x1be8] sm:$0xff] }
 0x391   : > { %4134 = vst [vmem:[%s4801_s20 + $0x1a98] sm:$0xff] %v3110_v63  ;;  %v1086_v63 = vld [vmem:[%s4779_s14 + $0x1b58] sm:$0xff]  ;;  %v3133_v4 = vadd.f32 %v2109_v61, %v1085_v60  ;;  %v2129_v57 = vld [vmem:[%s4786_s26 + $0x1bf0] sm:$0xff] }
 0x392   : > { %4135 = vst [vmem:[%s4801_s20 + $0x1aa0] sm:$0xff] %v3111_v2  ;;  %v1087_v2 = vld [vmem:[%s4779_s14 + $0x1b60] sm:$0xff]  ;;  %v3134_v7 = vadd.f32 %v2110_v0, %v1086_v63  ;;  %v2130_v60 = vld [vmem:[%s4786_s26 + $0x1bf8] sm:$0xff] }
 0x393   : > { %4136 = vst [vmem:[%s4801_s20 + $0x1aa8] sm:$0xff] %v3112_v5  ;;  %v1088_v5 = vld [vmem:[%s4779_s14 + $0x1b68] sm:$0xff]  ;;  %v3135_v10 = vadd.f32 %v2111_v3, %v1087_v2  ;;  %v2131_v63 = vld [vmem:[%s4786_s26 + $0x1c00] sm:$0xff] }
 0x394   : > { %4137 = vst [vmem:[%s4801_s20 + $0x1ab0] sm:$0xff] %v3113_v8  ;;  %v1089_v8 = vld [vmem:[%s4779_s14 + $0x1b70] sm:$0xff]  ;;  %v3136_v13 = vadd.f32 %v2112_v6, %v1088_v5  ;;  %v2132_v2 = vld [vmem:[%s4786_s26 + $0x1c08] sm:$0xff] }
 0x395   : > { %4138 = vst [vmem:[%s4801_s20 + $0x1ab8] sm:$0xff] %v3114_v11  ;;  %v1090_v11 = vld [vmem:[%s4779_s14 + $0x1b78] sm:$0xff]  ;;  %v3137_v16 = vadd.f32 %v2113_v9, %v1089_v8  ;;  %v2133_v5 = vld [vmem:[%s4786_s26 + $0x1c10] sm:$0xff] }
 0x396   : > { %4139 = vst [vmem:[%s4801_s20 + $0x1ac0] sm:$0xff] %v3115_v14  ;;  %v1091_v14 = vld [vmem:[%s4779_s14 + $0x1b80] sm:$0xff]  ;;  %v3138_v19 = vadd.f32 %v2114_v12, %v1090_v11  ;;  %v2134_v8 = vld [vmem:[%s4786_s26 + $0x1c18] sm:$0xff] }
 0x397   : > { %4140 = vst [vmem:[%s4801_s20 + $0x1ac8] sm:$0xff] %v3116_v17  ;;  %v1092_v17 = vld [vmem:[%s4779_s14 + $0x1b88] sm:$0xff]  ;;  %v3139_v22 = vadd.f32 %v2115_v15, %v1091_v14  ;;  %v2135_v11 = vld [vmem:[%s4786_s26 + $0x1c20] sm:$0xff] }
 0x398   : > { %4141 = vst [vmem:[%s4801_s20 + $0x1ad0] sm:$0xff] %v3117_v20  ;;  %v1093_v20 = vld [vmem:[%s4779_s14 + $0x1b90] sm:$0xff]  ;;  %v3140_v25 = vadd.f32 %v2116_v18, %v1092_v17  ;;  %v2136_v14 = vld [vmem:[%s4786_s26 + $0x1c28] sm:$0xff] }
 0x399   : > { %4142 = vst [vmem:[%s4801_s20 + $0x1ad8] sm:$0xff] %v3118_v23  ;;  %v1094_v23 = vld [vmem:[%s4779_s14 + $0x1b98] sm:$0xff]  ;;  %v3141_v28 = vadd.f32 %v2117_v21, %v1093_v20  ;;  %v2137_v17 = vld [vmem:[%s4786_s26 + $0x1c30] sm:$0xff] }
 0x39a   : > { %4143 = vst [vmem:[%s4801_s20 + $0x1ae0] sm:$0xff] %v3119_v26  ;;  %v1095_v26 = vld [vmem:[%s4779_s14 + $0x1ba0] sm:$0xff]  ;;  %v3142_v31 = vadd.f32 %v2118_v24, %v1094_v23  ;;  %v2138_v20 = vld [vmem:[%s4786_s26 + $0x1c38] sm:$0xff] }
 0x39b   : > { %4144 = vst [vmem:[%s4801_s20 + $0x1ae8] sm:$0xff] %v3120_v29  ;;  %v1096_v29 = vld [vmem:[%s4779_s14 + $0x1ba8] sm:$0xff]  ;;  %v3143_v34 = vadd.f32 %v2119_v27, %v1095_v26  ;;  %v2139_v23 = vld [vmem:[%s4786_s26 + $0x1c40] sm:$0xff] }
 0x39c   : > { %4145 = vst [vmem:[%s4801_s20 + $0x1af0] sm:$0xff] %v3121_v32  ;;  %v1097_v32 = vld [vmem:[%s4779_s14 + $0x1bb0] sm:$0xff]  ;;  %v3144_v37 = vadd.f32 %v2120_v30, %v1096_v29  ;;  %v2140_v26 = vld [vmem:[%s4786_s26 + $0x1c48] sm:$0xff] }
 0x39d   : > { %4146 = vst [vmem:[%s4801_s20 + $0x1af8] sm:$0xff] %v3122_v35  ;;  %v1098_v35 = vld [vmem:[%s4779_s14 + $0x1bb8] sm:$0xff]  ;;  %v3145_v40 = vadd.f32 %v2121_v33, %v1097_v32  ;;  %v2141_v29 = vld [vmem:[%s4786_s26 + $0x1c50] sm:$0xff] }
 0x39e   : > { %4147 = vst [vmem:[%s4801_s20 + $0x1b00] sm:$0xff] %v3123_v38  ;;  %v1099_v38 = vld [vmem:[%s4779_s14 + $0x1bc0] sm:$0xff]  ;;  %v3146_v43 = vadd.f32 %v2122_v36, %v1098_v35  ;;  %v2142_v32 = vld [vmem:[%s4786_s26 + $0x1c58] sm:$0xff] }
 0x39f   : > { %4148 = vst [vmem:[%s4801_s20 + $0x1b08] sm:$0xff] %v3124_v41  ;;  %v1100_v41 = vld [vmem:[%s4779_s14 + $0x1bc8] sm:$0xff]  ;;  %v3147_v46 = vadd.f32 %v2123_v39, %v1099_v38  ;;  %v2143_v35 = vld [vmem:[%s4786_s26 + $0x1c60] sm:$0xff] }
 0x3a0   : > { %4149 = vst [vmem:[%s4801_s20 + $0x1b10] sm:$0xff] %v3125_v44  ;;  %v1101_v44 = vld [vmem:[%s4779_s14 + $0x1bd0] sm:$0xff]  ;;  %v3148_v49 = vadd.f32 %v2124_v42, %v1100_v41  ;;  %v2144_v38 = vld [vmem:[%s4786_s26 + $0x1c68] sm:$0xff] }
 0x3a1   : > { %4150 = vst [vmem:[%s4801_s20 + $0x1b18] sm:$0xff] %v3126_v47  ;;  %v1102_v47 = vld [vmem:[%s4779_s14 + $0x1bd8] sm:$0xff]  ;;  %v3149_v52 = vadd.f32 %v2125_v45, %v1101_v44  ;;  %v2145_v41 = vld [vmem:[%s4786_s26 + $0x1c70] sm:$0xff] }
 0x3a2   : > { %4151 = vst [vmem:[%s4801_s20 + $0x1b20] sm:$0xff] %v3127_v50  ;;  %v1103_v50 = vld [vmem:[%s4779_s14 + $0x1be0] sm:$0xff]  ;;  %v3150_v55 = vadd.f32 %v2126_v48, %v1102_v47  ;;  %v2146_v44 = vld [vmem:[%s4786_s26 + $0x1c78] sm:$0xff] }
 0x3a3   : > { %4152 = vst [vmem:[%s4801_s20 + $0x1b28] sm:$0xff] %v3128_v53  ;;  %v1104_v53 = vld [vmem:[%s4779_s14 + $0x1be8] sm:$0xff]  ;;  %v3151_v58 = vadd.f32 %v2127_v51, %v1103_v50  ;;  %v2147_v47 = vld [vmem:[%s4786_s26 + $0x1c80] sm:$0xff] }
 0x3a4   : > { %4153 = vst [vmem:[%s4801_s20 + $0x1b30] sm:$0xff] %v3129_v56  ;;  %v1105_v56 = vld [vmem:[%s4779_s14 + $0x1bf0] sm:$0xff]  ;;  %v3152_v61 = vadd.f32 %v2128_v54, %v1104_v53  ;;  %v2148_v50 = vld [vmem:[%s4786_s26 + $0x1c88] sm:$0xff] }
 0x3a5   : > { %4154 = vst [vmem:[%s4801_s20 + $0x1b38] sm:$0xff] %v3130_v59  ;;  %v1106_v59 = vld [vmem:[%s4779_s14 + $0x1bf8] sm:$0xff]  ;;  %v3153_v0 = vadd.f32 %v2129_v57, %v1105_v56  ;;  %v2149_v53 = vld [vmem:[%s4786_s26 + $0x1c90] sm:$0xff] }
 0x3a6   : > { %4155 = vst [vmem:[%s4801_s20 + $0x1b40] sm:$0xff] %v3131_v62  ;;  %v1107_v62 = vld [vmem:[%s4779_s14 + $0x1c00] sm:$0xff]  ;;  %v3154_v3 = vadd.f32 %v2130_v60, %v1106_v59  ;;  %v2150_v56 = vld [vmem:[%s4786_s26 + $0x1c98] sm:$0xff] }
 0x3a7   : > { %4156 = vst [vmem:[%s4801_s20 + $0x1b48] sm:$0xff] %v3132_v1  ;;  %v1108_v1 = vld [vmem:[%s4779_s14 + $0x1c08] sm:$0xff]  ;;  %v3155_v6 = vadd.f32 %v2131_v63, %v1107_v62  ;;  %v2151_v59 = vld [vmem:[%s4786_s26 + $0x1ca0] sm:$0xff] }
 0x3a8   : > { %4157 = vst [vmem:[%s4801_s20 + $0x1b50] sm:$0xff] %v3133_v4  ;;  %v1109_v4 = vld [vmem:[%s4779_s14 + $0x1c10] sm:$0xff]  ;;  %v3156_v9 = vadd.f32 %v2132_v2, %v1108_v1  ;;  %v2152_v62 = vld [vmem:[%s4786_s26 + $0x1ca8] sm:$0xff] }
 0x3a9   : > { %4158 = vst [vmem:[%s4801_s20 + $0x1b58] sm:$0xff] %v3134_v7  ;;  %v1110_v7 = vld [vmem:[%s4779_s14 + $0x1c18] sm:$0xff]  ;;  %v3157_v12 = vadd.f32 %v2133_v5, %v1109_v4  ;;  %v2153_v1 = vld [vmem:[%s4786_s26 + $0x1cb0] sm:$0xff] }
 0x3aa   : > { %4159 = vst [vmem:[%s4801_s20 + $0x1b60] sm:$0xff] %v3135_v10  ;;  %v1111_v10 = vld [vmem:[%s4779_s14 + $0x1c20] sm:$0xff]  ;;  %v3158_v15 = vadd.f32 %v2134_v8, %v1110_v7  ;;  %v2154_v4 = vld [vmem:[%s4786_s26 + $0x1cb8] sm:$0xff] }
 0x3ab   : > { %4160 = vst [vmem:[%s4801_s20 + $0x1b68] sm:$0xff] %v3136_v13  ;;  %v1112_v13 = vld [vmem:[%s4779_s14 + $0x1c28] sm:$0xff]  ;;  %v3159_v18 = vadd.f32 %v2135_v11, %v1111_v10  ;;  %v2155_v7 = vld [vmem:[%s4786_s26 + $0x1cc0] sm:$0xff] }
 0x3ac   : > { %4161 = vst [vmem:[%s4801_s20 + $0x1b70] sm:$0xff] %v3137_v16  ;;  %v1113_v16 = vld [vmem:[%s4779_s14 + $0x1c30] sm:$0xff]  ;;  %v3160_v21 = vadd.f32 %v2136_v14, %v1112_v13  ;;  %v2156_v10 = vld [vmem:[%s4786_s26 + $0x1cc8] sm:$0xff] }
 0x3ad   : > { %4162 = vst [vmem:[%s4801_s20 + $0x1b78] sm:$0xff] %v3138_v19  ;;  %v1114_v19 = vld [vmem:[%s4779_s14 + $0x1c38] sm:$0xff]  ;;  %v3161_v24 = vadd.f32 %v2137_v17, %v1113_v16  ;;  %v2157_v13 = vld [vmem:[%s4786_s26 + $0x1cd0] sm:$0xff] }
 0x3ae   : > { %4163 = vst [vmem:[%s4801_s20 + $0x1b80] sm:$0xff] %v3139_v22  ;;  %v1115_v22 = vld [vmem:[%s4779_s14 + $0x1c40] sm:$0xff]  ;;  %v3162_v27 = vadd.f32 %v2138_v20, %v1114_v19  ;;  %v2158_v16 = vld [vmem:[%s4786_s26 + $0x1cd8] sm:$0xff] }
 0x3af   : > { %4164 = vst [vmem:[%s4801_s20 + $0x1b88] sm:$0xff] %v3140_v25  ;;  %v1116_v25 = vld [vmem:[%s4779_s14 + $0x1c48] sm:$0xff]  ;;  %v3163_v30 = vadd.f32 %v2139_v23, %v1115_v22  ;;  %v2159_v19 = vld [vmem:[%s4786_s26 + $0x1ce0] sm:$0xff] }
 0x3b0   : > { %4165 = vst [vmem:[%s4801_s20 + $0x1b90] sm:$0xff] %v3141_v28  ;;  %v1117_v28 = vld [vmem:[%s4779_s14 + $0x1c50] sm:$0xff]  ;;  %v3164_v33 = vadd.f32 %v2140_v26, %v1116_v25  ;;  %v2160_v22 = vld [vmem:[%s4786_s26 + $0x1ce8] sm:$0xff] }
 0x3b1   : > { %4166 = vst [vmem:[%s4801_s20 + $0x1b98] sm:$0xff] %v3142_v31  ;;  %v1118_v31 = vld [vmem:[%s4779_s14 + $0x1c58] sm:$0xff]  ;;  %v3165_v36 = vadd.f32 %v2141_v29, %v1117_v28  ;;  %v2161_v25 = vld [vmem:[%s4786_s26 + $0x1cf0] sm:$0xff] }
 0x3b2   : > { %4167 = vst [vmem:[%s4801_s20 + $0x1ba0] sm:$0xff] %v3143_v34  ;;  %v1119_v34 = vld [vmem:[%s4779_s14 + $0x1c60] sm:$0xff]  ;;  %v3166_v39 = vadd.f32 %v2142_v32, %v1118_v31  ;;  %v2162_v28 = vld [vmem:[%s4786_s26 + $0x1cf8] sm:$0xff] }
 0x3b3   : > { %4168 = vst [vmem:[%s4801_s20 + $0x1ba8] sm:$0xff] %v3144_v37  ;;  %v1120_v37 = vld [vmem:[%s4779_s14 + $0x1c68] sm:$0xff]  ;;  %v3167_v42 = vadd.f32 %v2143_v35, %v1119_v34  ;;  %v2163_v31 = vld [vmem:[%s4786_s26 + $0x1d00] sm:$0xff] }
 0x3b4   : > { %4169 = vst [vmem:[%s4801_s20 + $0x1bb0] sm:$0xff] %v3145_v40  ;;  %v1121_v40 = vld [vmem:[%s4779_s14 + $0x1c70] sm:$0xff]  ;;  %v3168_v45 = vadd.f32 %v2144_v38, %v1120_v37  ;;  %v2164_v34 = vld [vmem:[%s4786_s26 + $0x1d08] sm:$0xff] }
 0x3b5   : > { %4170 = vst [vmem:[%s4801_s20 + $0x1bb8] sm:$0xff] %v3146_v43  ;;  %v1122_v43 = vld [vmem:[%s4779_s14 + $0x1c78] sm:$0xff]  ;;  %v3169_v48 = vadd.f32 %v2145_v41, %v1121_v40  ;;  %v2165_v37 = vld [vmem:[%s4786_s26 + $0x1d10] sm:$0xff] }
 0x3b6   : > { %4171 = vst [vmem:[%s4801_s20 + $0x1bc0] sm:$0xff] %v3147_v46  ;;  %v1123_v46 = vld [vmem:[%s4779_s14 + $0x1c80] sm:$0xff]  ;;  %v3170_v51 = vadd.f32 %v2146_v44, %v1122_v43  ;;  %v2166_v40 = vld [vmem:[%s4786_s26 + $0x1d18] sm:$0xff] }
 0x3b7   : > { %4172 = vst [vmem:[%s4801_s20 + $0x1bc8] sm:$0xff] %v3148_v49  ;;  %v1124_v49 = vld [vmem:[%s4779_s14 + $0x1c88] sm:$0xff]  ;;  %v3171_v54 = vadd.f32 %v2147_v47, %v1123_v46  ;;  %v2167_v43 = vld [vmem:[%s4786_s26 + $0x1d20] sm:$0xff] }
 0x3b8   : > { %4173 = vst [vmem:[%s4801_s20 + $0x1bd0] sm:$0xff] %v3149_v52  ;;  %v1125_v52 = vld [vmem:[%s4779_s14 + $0x1c90] sm:$0xff]  ;;  %v3172_v57 = vadd.f32 %v2148_v50, %v1124_v49  ;;  %v2168_v46 = vld [vmem:[%s4786_s26 + $0x1d28] sm:$0xff] }
 0x3b9   : > { %4174 = vst [vmem:[%s4801_s20 + $0x1bd8] sm:$0xff] %v3150_v55  ;;  %v1126_v55 = vld [vmem:[%s4779_s14 + $0x1c98] sm:$0xff]  ;;  %v3173_v60 = vadd.f32 %v2149_v53, %v1125_v52  ;;  %v2169_v49 = vld [vmem:[%s4786_s26 + $0x1d30] sm:$0xff] }
 0x3ba   : > { %4175 = vst [vmem:[%s4801_s20 + $0x1be0] sm:$0xff] %v3151_v58  ;;  %v1127_v58 = vld [vmem:[%s4779_s14 + $0x1ca0] sm:$0xff]  ;;  %v3174_v63 = vadd.f32 %v2150_v56, %v1126_v55  ;;  %v2170_v52 = vld [vmem:[%s4786_s26 + $0x1d38] sm:$0xff] }
 0x3bb   : > { %4176 = vst [vmem:[%s4801_s20 + $0x1be8] sm:$0xff] %v3152_v61  ;;  %v1128_v61 = vld [vmem:[%s4779_s14 + $0x1ca8] sm:$0xff]  ;;  %v3175_v2 = vadd.f32 %v2151_v59, %v1127_v58  ;;  %v2171_v55 = vld [vmem:[%s4786_s26 + $0x1d40] sm:$0xff] }
 0x3bc   : > { %4177 = vst [vmem:[%s4801_s20 + $0x1bf0] sm:$0xff] %v3153_v0  ;;  %v1129_v0 = vld [vmem:[%s4779_s14 + $0x1cb0] sm:$0xff]  ;;  %v3176_v5 = vadd.f32 %v2152_v62, %v1128_v61  ;;  %v2172_v58 = vld [vmem:[%s4786_s26 + $0x1d48] sm:$0xff] }
 0x3bd   : > { %4178 = vst [vmem:[%s4801_s20 + $0x1bf8] sm:$0xff] %v3154_v3  ;;  %v1130_v3 = vld [vmem:[%s4779_s14 + $0x1cb8] sm:$0xff]  ;;  %v3177_v8 = vadd.f32 %v2153_v1, %v1129_v0  ;;  %v2173_v61 = vld [vmem:[%s4786_s26 + $0x1d50] sm:$0xff] }
 0x3be   : > { %4179 = vst [vmem:[%s4801_s20 + $0x1c00] sm:$0xff] %v3155_v6  ;;  %v1131_v6 = vld [vmem:[%s4779_s14 + $0x1cc0] sm:$0xff]  ;;  %v3178_v11 = vadd.f32 %v2154_v4, %v1130_v3  ;;  %v2174_v0 = vld [vmem:[%s4786_s26 + $0x1d58] sm:$0xff] }
 0x3bf   : > { %4180 = vst [vmem:[%s4801_s20 + $0x1c08] sm:$0xff] %v3156_v9  ;;  %v1132_v9 = vld [vmem:[%s4779_s14 + $0x1cc8] sm:$0xff]  ;;  %v3179_v14 = vadd.f32 %v2155_v7, %v1131_v6  ;;  %v2175_v3 = vld [vmem:[%s4786_s26 + $0x1d60] sm:$0xff] }
 0x3c0   : > { %4181 = vst [vmem:[%s4801_s20 + $0x1c10] sm:$0xff] %v3157_v12  ;;  %v1133_v12 = vld [vmem:[%s4779_s14 + $0x1cd0] sm:$0xff]  ;;  %v3180_v17 = vadd.f32 %v2156_v10, %v1132_v9  ;;  %v2176_v6 = vld [vmem:[%s4786_s26 + $0x1d68] sm:$0xff] }
 0x3c1   : > { %4182 = vst [vmem:[%s4801_s20 + $0x1c18] sm:$0xff] %v3158_v15  ;;  %v1134_v15 = vld [vmem:[%s4779_s14 + $0x1cd8] sm:$0xff]  ;;  %v3181_v20 = vadd.f32 %v2157_v13, %v1133_v12  ;;  %v2177_v9 = vld [vmem:[%s4786_s26 + $0x1d70] sm:$0xff] }
 0x3c2   : > { %4183 = vst [vmem:[%s4801_s20 + $0x1c20] sm:$0xff] %v3159_v18  ;;  %v1135_v18 = vld [vmem:[%s4779_s14 + $0x1ce0] sm:$0xff]  ;;  %v3182_v23 = vadd.f32 %v2158_v16, %v1134_v15  ;;  %v2178_v12 = vld [vmem:[%s4786_s26 + $0x1d78] sm:$0xff] }
 0x3c3   : > { %4184 = vst [vmem:[%s4801_s20 + $0x1c28] sm:$0xff] %v3160_v21  ;;  %v1136_v21 = vld [vmem:[%s4779_s14 + $0x1ce8] sm:$0xff]  ;;  %v3183_v26 = vadd.f32 %v2159_v19, %v1135_v18  ;;  %v2179_v15 = vld [vmem:[%s4786_s26 + $0x1d80] sm:$0xff] }
 0x3c4   : > { %4185 = vst [vmem:[%s4801_s20 + $0x1c30] sm:$0xff] %v3161_v24  ;;  %v1137_v24 = vld [vmem:[%s4779_s14 + $0x1cf0] sm:$0xff]  ;;  %v3184_v29 = vadd.f32 %v2160_v22, %v1136_v21  ;;  %v2180_v18 = vld [vmem:[%s4786_s26 + $0x1d88] sm:$0xff] }
 0x3c5   : > { %4186 = vst [vmem:[%s4801_s20 + $0x1c38] sm:$0xff] %v3162_v27  ;;  %v1138_v27 = vld [vmem:[%s4779_s14 + $0x1cf8] sm:$0xff]  ;;  %v3185_v32 = vadd.f32 %v2161_v25, %v1137_v24  ;;  %v2181_v21 = vld [vmem:[%s4786_s26 + $0x1d90] sm:$0xff] }
 0x3c6   : > { %4187 = vst [vmem:[%s4801_s20 + $0x1c40] sm:$0xff] %v3163_v30  ;;  %v1139_v30 = vld [vmem:[%s4779_s14 + $0x1d00] sm:$0xff]  ;;  %v3186_v35 = vadd.f32 %v2162_v28, %v1138_v27  ;;  %v2182_v24 = vld [vmem:[%s4786_s26 + $0x1d98] sm:$0xff] }
 0x3c7   : > { %4188 = vst [vmem:[%s4801_s20 + $0x1c48] sm:$0xff] %v3164_v33  ;;  %v1140_v33 = vld [vmem:[%s4779_s14 + $0x1d08] sm:$0xff]  ;;  %v3187_v38 = vadd.f32 %v2163_v31, %v1139_v30  ;;  %v2183_v27 = vld [vmem:[%s4786_s26 + $0x1da0] sm:$0xff] }
 0x3c8   : > { %4189 = vst [vmem:[%s4801_s20 + $0x1c50] sm:$0xff] %v3165_v36  ;;  %v1141_v36 = vld [vmem:[%s4779_s14 + $0x1d10] sm:$0xff]  ;;  %v3188_v41 = vadd.f32 %v2164_v34, %v1140_v33  ;;  %v2184_v30 = vld [vmem:[%s4786_s26 + $0x1da8] sm:$0xff] }
 0x3c9   : > { %4190 = vst [vmem:[%s4801_s20 + $0x1c58] sm:$0xff] %v3166_v39  ;;  %v1142_v39 = vld [vmem:[%s4779_s14 + $0x1d18] sm:$0xff]  ;;  %v3189_v44 = vadd.f32 %v2165_v37, %v1141_v36  ;;  %v2185_v33 = vld [vmem:[%s4786_s26 + $0x1db0] sm:$0xff] }
 0x3ca   : > { %4191 = vst [vmem:[%s4801_s20 + $0x1c60] sm:$0xff] %v3167_v42  ;;  %v1143_v42 = vld [vmem:[%s4779_s14 + $0x1d20] sm:$0xff]  ;;  %v3190_v47 = vadd.f32 %v2166_v40, %v1142_v39  ;;  %v2186_v36 = vld [vmem:[%s4786_s26 + $0x1db8] sm:$0xff] }
 0x3cb   : > { %4192 = vst [vmem:[%s4801_s20 + $0x1c68] sm:$0xff] %v3168_v45  ;;  %v1144_v45 = vld [vmem:[%s4779_s14 + $0x1d28] sm:$0xff]  ;;  %v3191_v50 = vadd.f32 %v2167_v43, %v1143_v42  ;;  %v2187_v39 = vld [vmem:[%s4786_s26 + $0x1dc0] sm:$0xff] }
 0x3cc   : > { %4193 = vst [vmem:[%s4801_s20 + $0x1c70] sm:$0xff] %v3169_v48  ;;  %v1145_v48 = vld [vmem:[%s4779_s14 + $0x1d30] sm:$0xff]  ;;  %v3192_v53 = vadd.f32 %v2168_v46, %v1144_v45  ;;  %v2188_v42 = vld [vmem:[%s4786_s26 + $0x1dc8] sm:$0xff] }
 0x3cd   : > { %4194 = vst [vmem:[%s4801_s20 + $0x1c78] sm:$0xff] %v3170_v51  ;;  %v1146_v51 = vld [vmem:[%s4779_s14 + $0x1d38] sm:$0xff]  ;;  %v3193_v56 = vadd.f32 %v2169_v49, %v1145_v48  ;;  %v2189_v45 = vld [vmem:[%s4786_s26 + $0x1dd0] sm:$0xff] }
 0x3ce   : > { %4195 = vst [vmem:[%s4801_s20 + $0x1c80] sm:$0xff] %v3171_v54  ;;  %v1147_v54 = vld [vmem:[%s4779_s14 + $0x1d40] sm:$0xff]  ;;  %v3194_v59 = vadd.f32 %v2170_v52, %v1146_v51  ;;  %v2190_v48 = vld [vmem:[%s4786_s26 + $0x1dd8] sm:$0xff] }
 0x3cf   : > { %4196 = vst [vmem:[%s4801_s20 + $0x1c88] sm:$0xff] %v3172_v57  ;;  %v1148_v57 = vld [vmem:[%s4779_s14 + $0x1d48] sm:$0xff]  ;;  %v3195_v62 = vadd.f32 %v2171_v55, %v1147_v54  ;;  %v2191_v51 = vld [vmem:[%s4786_s26 + $0x1de0] sm:$0xff] }
 0x3d0   : > { %4197 = vst [vmem:[%s4801_s20 + $0x1c90] sm:$0xff] %v3173_v60  ;;  %v1149_v60 = vld [vmem:[%s4779_s14 + $0x1d50] sm:$0xff]  ;;  %v3196_v1 = vadd.f32 %v2172_v58, %v1148_v57  ;;  %v2192_v54 = vld [vmem:[%s4786_s26 + $0x1de8] sm:$0xff] }
 0x3d1   : > { %4198 = vst [vmem:[%s4801_s20 + $0x1c98] sm:$0xff] %v3174_v63  ;;  %v1150_v63 = vld [vmem:[%s4779_s14 + $0x1d58] sm:$0xff]  ;;  %v3197_v4 = vadd.f32 %v2173_v61, %v1149_v60  ;;  %v2193_v57 = vld [vmem:[%s4786_s26 + $0x1df0] sm:$0xff] }
 0x3d2   : > { %4199 = vst [vmem:[%s4801_s20 + $0x1ca0] sm:$0xff] %v3175_v2  ;;  %v1151_v2 = vld [vmem:[%s4779_s14 + $0x1d60] sm:$0xff]  ;;  %v3198_v7 = vadd.f32 %v2174_v0, %v1150_v63  ;;  %v2194_v60 = vld [vmem:[%s4786_s26 + $0x1df8] sm:$0xff] }
 0x3d3   : > { %4200 = vst [vmem:[%s4801_s20 + $0x1ca8] sm:$0xff] %v3176_v5  ;;  %v1152_v5 = vld [vmem:[%s4779_s14 + $0x1d68] sm:$0xff]  ;;  %v3199_v10 = vadd.f32 %v2175_v3, %v1151_v2  ;;  %v2195_v63 = vld [vmem:[%s4786_s26 + $0x1e00] sm:$0xff] }
 0x3d4   : > { %4201 = vst [vmem:[%s4801_s20 + $0x1cb0] sm:$0xff] %v3177_v8  ;;  %v1153_v8 = vld [vmem:[%s4779_s14 + $0x1d70] sm:$0xff]  ;;  %v3200_v13 = vadd.f32 %v2176_v6, %v1152_v5  ;;  %v2196_v2 = vld [vmem:[%s4786_s26 + $0x1e08] sm:$0xff] }
 0x3d5   : > { %4202 = vst [vmem:[%s4801_s20 + $0x1cb8] sm:$0xff] %v3178_v11  ;;  %v1154_v11 = vld [vmem:[%s4779_s14 + $0x1d78] sm:$0xff]  ;;  %v3201_v16 = vadd.f32 %v2177_v9, %v1153_v8  ;;  %v2197_v5 = vld [vmem:[%s4786_s26 + $0x1e10] sm:$0xff] }
 0x3d6   : > { %4203 = vst [vmem:[%s4801_s20 + $0x1cc0] sm:$0xff] %v3179_v14  ;;  %v1155_v14 = vld [vmem:[%s4779_s14 + $0x1d80] sm:$0xff]  ;;  %v3202_v19 = vadd.f32 %v2178_v12, %v1154_v11  ;;  %v2198_v8 = vld [vmem:[%s4786_s26 + $0x1e18] sm:$0xff] }
 0x3d7   : > { %4204 = vst [vmem:[%s4801_s20 + $0x1cc8] sm:$0xff] %v3180_v17  ;;  %v1156_v17 = vld [vmem:[%s4779_s14 + $0x1d88] sm:$0xff]  ;;  %v3203_v22 = vadd.f32 %v2179_v15, %v1155_v14  ;;  %v2199_v11 = vld [vmem:[%s4786_s26 + $0x1e20] sm:$0xff] }
 0x3d8   : > { %4205 = vst [vmem:[%s4801_s20 + $0x1cd0] sm:$0xff] %v3181_v20  ;;  %v1157_v20 = vld [vmem:[%s4779_s14 + $0x1d90] sm:$0xff]  ;;  %v3204_v25 = vadd.f32 %v2180_v18, %v1156_v17  ;;  %v2200_v14 = vld [vmem:[%s4786_s26 + $0x1e28] sm:$0xff] }
 0x3d9   : > { %4206 = vst [vmem:[%s4801_s20 + $0x1cd8] sm:$0xff] %v3182_v23  ;;  %v1158_v23 = vld [vmem:[%s4779_s14 + $0x1d98] sm:$0xff]  ;;  %v3205_v28 = vadd.f32 %v2181_v21, %v1157_v20  ;;  %v2201_v17 = vld [vmem:[%s4786_s26 + $0x1e30] sm:$0xff] }
 0x3da   : > { %4207 = vst [vmem:[%s4801_s20 + $0x1ce0] sm:$0xff] %v3183_v26  ;;  %v1159_v26 = vld [vmem:[%s4779_s14 + $0x1da0] sm:$0xff]  ;;  %v3206_v31 = vadd.f32 %v2182_v24, %v1158_v23  ;;  %v2202_v20 = vld [vmem:[%s4786_s26 + $0x1e38] sm:$0xff] }
 0x3db   : > { %4208 = vst [vmem:[%s4801_s20 + $0x1ce8] sm:$0xff] %v3184_v29  ;;  %v1160_v29 = vld [vmem:[%s4779_s14 + $0x1da8] sm:$0xff]  ;;  %v3207_v34 = vadd.f32 %v2183_v27, %v1159_v26  ;;  %v2203_v23 = vld [vmem:[%s4786_s26 + $0x1e40] sm:$0xff] }
 0x3dc   : > { %4209 = vst [vmem:[%s4801_s20 + $0x1cf0] sm:$0xff] %v3185_v32  ;;  %v1161_v32 = vld [vmem:[%s4779_s14 + $0x1db0] sm:$0xff]  ;;  %v3208_v37 = vadd.f32 %v2184_v30, %v1160_v29  ;;  %v2204_v26 = vld [vmem:[%s4786_s26 + $0x1e48] sm:$0xff] }
 0x3dd   : > { %4210 = vst [vmem:[%s4801_s20 + $0x1cf8] sm:$0xff] %v3186_v35  ;;  %v1162_v35 = vld [vmem:[%s4779_s14 + $0x1db8] sm:$0xff]  ;;  %v3209_v40 = vadd.f32 %v2185_v33, %v1161_v32  ;;  %v2205_v29 = vld [vmem:[%s4786_s26 + $0x1e50] sm:$0xff] }
 0x3de   : > { %4211 = vst [vmem:[%s4801_s20 + $0x1d00] sm:$0xff] %v3187_v38  ;;  %v1163_v38 = vld [vmem:[%s4779_s14 + $0x1dc0] sm:$0xff]  ;;  %v3210_v43 = vadd.f32 %v2186_v36, %v1162_v35  ;;  %v2206_v32 = vld [vmem:[%s4786_s26 + $0x1e58] sm:$0xff] }
 0x3df   : > { %4212 = vst [vmem:[%s4801_s20 + $0x1d08] sm:$0xff] %v3188_v41  ;;  %v1164_v41 = vld [vmem:[%s4779_s14 + $0x1dc8] sm:$0xff]  ;;  %v3211_v46 = vadd.f32 %v2187_v39, %v1163_v38  ;;  %v2207_v35 = vld [vmem:[%s4786_s26 + $0x1e60] sm:$0xff] }
 0x3e0   : > { %4213 = vst [vmem:[%s4801_s20 + $0x1d10] sm:$0xff] %v3189_v44  ;;  %v1165_v44 = vld [vmem:[%s4779_s14 + $0x1dd0] sm:$0xff]  ;;  %v3212_v49 = vadd.f32 %v2188_v42, %v1164_v41  ;;  %v2208_v38 = vld [vmem:[%s4786_s26 + $0x1e68] sm:$0xff] }
 0x3e1   : > { %4214 = vst [vmem:[%s4801_s20 + $0x1d18] sm:$0xff] %v3190_v47  ;;  %v1166_v47 = vld [vmem:[%s4779_s14 + $0x1dd8] sm:$0xff]  ;;  %v3213_v52 = vadd.f32 %v2189_v45, %v1165_v44  ;;  %v2209_v41 = vld [vmem:[%s4786_s26 + $0x1e70] sm:$0xff] }
 0x3e2   : > { %4215 = vst [vmem:[%s4801_s20 + $0x1d20] sm:$0xff] %v3191_v50  ;;  %v1167_v50 = vld [vmem:[%s4779_s14 + $0x1de0] sm:$0xff]  ;;  %v3214_v55 = vadd.f32 %v2190_v48, %v1166_v47  ;;  %v2210_v44 = vld [vmem:[%s4786_s26 + $0x1e78] sm:$0xff] }
 0x3e3   : > { %4216 = vst [vmem:[%s4801_s20 + $0x1d28] sm:$0xff] %v3192_v53  ;;  %v1168_v53 = vld [vmem:[%s4779_s14 + $0x1de8] sm:$0xff]  ;;  %v3215_v58 = vadd.f32 %v2191_v51, %v1167_v50  ;;  %v2211_v47 = vld [vmem:[%s4786_s26 + $0x1e80] sm:$0xff] }
 0x3e4   : > { %4217 = vst [vmem:[%s4801_s20 + $0x1d30] sm:$0xff] %v3193_v56  ;;  %v1169_v56 = vld [vmem:[%s4779_s14 + $0x1df0] sm:$0xff]  ;;  %v3216_v61 = vadd.f32 %v2192_v54, %v1168_v53  ;;  %v2212_v50 = vld [vmem:[%s4786_s26 + $0x1e88] sm:$0xff] }
 0x3e5   : > { %4218 = vst [vmem:[%s4801_s20 + $0x1d38] sm:$0xff] %v3194_v59  ;;  %v1170_v59 = vld [vmem:[%s4779_s14 + $0x1df8] sm:$0xff]  ;;  %v3217_v0 = vadd.f32 %v2193_v57, %v1169_v56  ;;  %v2213_v53 = vld [vmem:[%s4786_s26 + $0x1e90] sm:$0xff] }
 0x3e6   : > { %4219 = vst [vmem:[%s4801_s20 + $0x1d40] sm:$0xff] %v3195_v62  ;;  %v1171_v62 = vld [vmem:[%s4779_s14 + $0x1e00] sm:$0xff]  ;;  %v3218_v3 = vadd.f32 %v2194_v60, %v1170_v59  ;;  %v2214_v56 = vld [vmem:[%s4786_s26 + $0x1e98] sm:$0xff] }
 0x3e7   : > { %4220 = vst [vmem:[%s4801_s20 + $0x1d48] sm:$0xff] %v3196_v1  ;;  %v1172_v1 = vld [vmem:[%s4779_s14 + $0x1e08] sm:$0xff]  ;;  %v3219_v6 = vadd.f32 %v2195_v63, %v1171_v62  ;;  %v2215_v59 = vld [vmem:[%s4786_s26 + $0x1ea0] sm:$0xff] }
 0x3e8   : > { %4221 = vst [vmem:[%s4801_s20 + $0x1d50] sm:$0xff] %v3197_v4  ;;  %v1173_v4 = vld [vmem:[%s4779_s14 + $0x1e10] sm:$0xff]  ;;  %v3220_v9 = vadd.f32 %v2196_v2, %v1172_v1  ;;  %v2216_v62 = vld [vmem:[%s4786_s26 + $0x1ea8] sm:$0xff] }
 0x3e9   : > { %4222 = vst [vmem:[%s4801_s20 + $0x1d58] sm:$0xff] %v3198_v7  ;;  %v1174_v7 = vld [vmem:[%s4779_s14 + $0x1e18] sm:$0xff]  ;;  %v3221_v12 = vadd.f32 %v2197_v5, %v1173_v4  ;;  %v2217_v1 = vld [vmem:[%s4786_s26 + $0x1eb0] sm:$0xff] }
 0x3ea   : > { %4223 = vst [vmem:[%s4801_s20 + $0x1d60] sm:$0xff] %v3199_v10  ;;  %v1175_v10 = vld [vmem:[%s4779_s14 + $0x1e20] sm:$0xff]  ;;  %v3222_v15 = vadd.f32 %v2198_v8, %v1174_v7  ;;  %v2218_v4 = vld [vmem:[%s4786_s26 + $0x1eb8] sm:$0xff] }
 0x3eb   : > { %4224 = vst [vmem:[%s4801_s20 + $0x1d68] sm:$0xff] %v3200_v13  ;;  %v1176_v13 = vld [vmem:[%s4779_s14 + $0x1e28] sm:$0xff]  ;;  %v3223_v18 = vadd.f32 %v2199_v11, %v1175_v10  ;;  %v2219_v7 = vld [vmem:[%s4786_s26 + $0x1ec0] sm:$0xff] }
 0x3ec   : > { %4225 = vst [vmem:[%s4801_s20 + $0x1d70] sm:$0xff] %v3201_v16  ;;  %v1177_v16 = vld [vmem:[%s4779_s14 + $0x1e30] sm:$0xff]  ;;  %v3224_v21 = vadd.f32 %v2200_v14, %v1176_v13  ;;  %v2220_v10 = vld [vmem:[%s4786_s26 + $0x1ec8] sm:$0xff] }
 0x3ed   : > { %4226 = vst [vmem:[%s4801_s20 + $0x1d78] sm:$0xff] %v3202_v19  ;;  %v1178_v19 = vld [vmem:[%s4779_s14 + $0x1e38] sm:$0xff]  ;;  %v3225_v24 = vadd.f32 %v2201_v17, %v1177_v16  ;;  %v2221_v13 = vld [vmem:[%s4786_s26 + $0x1ed0] sm:$0xff] }
 0x3ee   : > { %4227 = vst [vmem:[%s4801_s20 + $0x1d80] sm:$0xff] %v3203_v22  ;;  %v1179_v22 = vld [vmem:[%s4779_s14 + $0x1e40] sm:$0xff]  ;;  %v3226_v27 = vadd.f32 %v2202_v20, %v1178_v19  ;;  %v2222_v16 = vld [vmem:[%s4786_s26 + $0x1ed8] sm:$0xff] }
 0x3ef   : > { %4228 = vst [vmem:[%s4801_s20 + $0x1d88] sm:$0xff] %v3204_v25  ;;  %v1180_v25 = vld [vmem:[%s4779_s14 + $0x1e48] sm:$0xff]  ;;  %v3227_v30 = vadd.f32 %v2203_v23, %v1179_v22  ;;  %v2223_v19 = vld [vmem:[%s4786_s26 + $0x1ee0] sm:$0xff] }
 0x3f0   : > { %4229 = vst [vmem:[%s4801_s20 + $0x1d90] sm:$0xff] %v3205_v28  ;;  %v1181_v28 = vld [vmem:[%s4779_s14 + $0x1e50] sm:$0xff]  ;;  %v3228_v33 = vadd.f32 %v2204_v26, %v1180_v25  ;;  %v2224_v22 = vld [vmem:[%s4786_s26 + $0x1ee8] sm:$0xff] }
 0x3f1   : > { %4230 = vst [vmem:[%s4801_s20 + $0x1d98] sm:$0xff] %v3206_v31  ;;  %v1182_v31 = vld [vmem:[%s4779_s14 + $0x1e58] sm:$0xff]  ;;  %v3229_v36 = vadd.f32 %v2205_v29, %v1181_v28  ;;  %v2225_v25 = vld [vmem:[%s4786_s26 + $0x1ef0] sm:$0xff] }
 0x3f2   : > { %4231 = vst [vmem:[%s4801_s20 + $0x1da0] sm:$0xff] %v3207_v34  ;;  %v1183_v34 = vld [vmem:[%s4779_s14 + $0x1e60] sm:$0xff]  ;;  %v3230_v39 = vadd.f32 %v2206_v32, %v1182_v31  ;;  %v2226_v28 = vld [vmem:[%s4786_s26 + $0x1ef8] sm:$0xff] }
 0x3f3   : > { %4232 = vst [vmem:[%s4801_s20 + $0x1da8] sm:$0xff] %v3208_v37  ;;  %v1184_v37 = vld [vmem:[%s4779_s14 + $0x1e68] sm:$0xff]  ;;  %v3231_v42 = vadd.f32 %v2207_v35, %v1183_v34  ;;  %v2227_v31 = vld [vmem:[%s4786_s26 + $0x1f00] sm:$0xff] }
 0x3f4   : > { %4233 = vst [vmem:[%s4801_s20 + $0x1db0] sm:$0xff] %v3209_v40  ;;  %v1185_v40 = vld [vmem:[%s4779_s14 + $0x1e70] sm:$0xff]  ;;  %v3232_v45 = vadd.f32 %v2208_v38, %v1184_v37  ;;  %v2228_v34 = vld [vmem:[%s4786_s26 + $0x1f08] sm:$0xff] }
 0x3f5   : > { %4234 = vst [vmem:[%s4801_s20 + $0x1db8] sm:$0xff] %v3210_v43  ;;  %v1186_v43 = vld [vmem:[%s4779_s14 + $0x1e78] sm:$0xff]  ;;  %v3233_v48 = vadd.f32 %v2209_v41, %v1185_v40  ;;  %v2229_v37 = vld [vmem:[%s4786_s26 + $0x1f10] sm:$0xff] }
 0x3f6   : > { %4235 = vst [vmem:[%s4801_s20 + $0x1dc0] sm:$0xff] %v3211_v46  ;;  %v1187_v46 = vld [vmem:[%s4779_s14 + $0x1e80] sm:$0xff]  ;;  %v3234_v51 = vadd.f32 %v2210_v44, %v1186_v43  ;;  %v2230_v40 = vld [vmem:[%s4786_s26 + $0x1f18] sm:$0xff] }
 0x3f7   : > { %4236 = vst [vmem:[%s4801_s20 + $0x1dc8] sm:$0xff] %v3212_v49  ;;  %v1188_v49 = vld [vmem:[%s4779_s14 + $0x1e88] sm:$0xff]  ;;  %v3235_v54 = vadd.f32 %v2211_v47, %v1187_v46  ;;  %v2231_v43 = vld [vmem:[%s4786_s26 + $0x1f20] sm:$0xff] }
 0x3f8   : > { %4237 = vst [vmem:[%s4801_s20 + $0x1dd0] sm:$0xff] %v3213_v52  ;;  %v1189_v52 = vld [vmem:[%s4779_s14 + $0x1e90] sm:$0xff]  ;;  %v3236_v57 = vadd.f32 %v2212_v50, %v1188_v49  ;;  %v2232_v46 = vld [vmem:[%s4786_s26 + $0x1f28] sm:$0xff] }
 0x3f9   : > { %4238 = vst [vmem:[%s4801_s20 + $0x1dd8] sm:$0xff] %v3214_v55  ;;  %v1190_v55 = vld [vmem:[%s4779_s14 + $0x1e98] sm:$0xff]  ;;  %v3237_v60 = vadd.f32 %v2213_v53, %v1189_v52  ;;  %v2233_v49 = vld [vmem:[%s4786_s26 + $0x1f30] sm:$0xff] }
 0x3fa   : > { %4239 = vst [vmem:[%s4801_s20 + $0x1de0] sm:$0xff] %v3215_v58  ;;  %v1191_v58 = vld [vmem:[%s4779_s14 + $0x1ea0] sm:$0xff]  ;;  %v3238_v63 = vadd.f32 %v2214_v56, %v1190_v55  ;;  %v2234_v52 = vld [vmem:[%s4786_s26 + $0x1f38] sm:$0xff] }
 0x3fb   : > { %4240 = vst [vmem:[%s4801_s20 + $0x1de8] sm:$0xff] %v3216_v61  ;;  %v1192_v61 = vld [vmem:[%s4779_s14 + $0x1ea8] sm:$0xff]  ;;  %v3239_v2 = vadd.f32 %v2215_v59, %v1191_v58  ;;  %v2235_v55 = vld [vmem:[%s4786_s26 + $0x1f40] sm:$0xff] }
 0x3fc   : > { %4241 = vst [vmem:[%s4801_s20 + $0x1df0] sm:$0xff] %v3217_v0  ;;  %v1193_v0 = vld [vmem:[%s4779_s14 + $0x1eb0] sm:$0xff]  ;;  %v3240_v5 = vadd.f32 %v2216_v62, %v1192_v61  ;;  %v2236_v58 = vld [vmem:[%s4786_s26 + $0x1f48] sm:$0xff] }
 0x3fd   : > { %4242 = vst [vmem:[%s4801_s20 + $0x1df8] sm:$0xff] %v3218_v3  ;;  %v1194_v3 = vld [vmem:[%s4779_s14 + $0x1eb8] sm:$0xff]  ;;  %v3241_v8 = vadd.f32 %v2217_v1, %v1193_v0  ;;  %v2237_v61 = vld [vmem:[%s4786_s26 + $0x1f50] sm:$0xff] }
 0x3fe   : > { %4243 = vst [vmem:[%s4801_s20 + $0x1e00] sm:$0xff] %v3219_v6  ;;  %v1195_v6 = vld [vmem:[%s4779_s14 + $0x1ec0] sm:$0xff]  ;;  %v3242_v11 = vadd.f32 %v2218_v4, %v1194_v3  ;;  %v2238_v0 = vld [vmem:[%s4786_s26 + $0x1f58] sm:$0xff] }
 0x3ff   : > { %4244 = vst [vmem:[%s4801_s20 + $0x1e08] sm:$0xff] %v3220_v9  ;;  %v1196_v9 = vld [vmem:[%s4779_s14 + $0x1ec8] sm:$0xff]  ;;  %v3243_v14 = vadd.f32 %v2219_v7, %v1195_v6  ;;  %v2239_v3 = vld [vmem:[%s4786_s26 + $0x1f60] sm:$0xff] }
 0x400   : > { %4245 = vst [vmem:[%s4801_s20 + $0x1e10] sm:$0xff] %v3221_v12  ;;  %v1197_v12 = vld [vmem:[%s4779_s14 + $0x1ed0] sm:$0xff]  ;;  %v3244_v17 = vadd.f32 %v2220_v10, %v1196_v9  ;;  %v2240_v6 = vld [vmem:[%s4786_s26 + $0x1f68] sm:$0xff] }
 0x401   : > { %4246 = vst [vmem:[%s4801_s20 + $0x1e18] sm:$0xff] %v3222_v15  ;;  %v1198_v15 = vld [vmem:[%s4779_s14 + $0x1ed8] sm:$0xff]  ;;  %v3245_v20 = vadd.f32 %v2221_v13, %v1197_v12  ;;  %v2241_v9 = vld [vmem:[%s4786_s26 + $0x1f70] sm:$0xff] }
 0x402   : > { %4247 = vst [vmem:[%s4801_s20 + $0x1e20] sm:$0xff] %v3223_v18  ;;  %v1199_v18 = vld [vmem:[%s4779_s14 + $0x1ee0] sm:$0xff]  ;;  %v3246_v23 = vadd.f32 %v2222_v16, %v1198_v15  ;;  %v2242_v12 = vld [vmem:[%s4786_s26 + $0x1f78] sm:$0xff] }
 0x403   : > { %4248 = vst [vmem:[%s4801_s20 + $0x1e28] sm:$0xff] %v3224_v21  ;;  %v1200_v21 = vld [vmem:[%s4779_s14 + $0x1ee8] sm:$0xff]  ;;  %v3247_v26 = vadd.f32 %v2223_v19, %v1199_v18  ;;  %v2243_v15 = vld [vmem:[%s4786_s26 + $0x1f80] sm:$0xff] }
 0x404   : > { %4249 = vst [vmem:[%s4801_s20 + $0x1e30] sm:$0xff] %v3225_v24  ;;  %v1201_v24 = vld [vmem:[%s4779_s14 + $0x1ef0] sm:$0xff]  ;;  %v3248_v29 = vadd.f32 %v2224_v22, %v1200_v21  ;;  %v2244_v18 = vld [vmem:[%s4786_s26 + $0x1f88] sm:$0xff] }
 0x405   : > { %4250 = vst [vmem:[%s4801_s20 + $0x1e38] sm:$0xff] %v3226_v27  ;;  %v1202_v27 = vld [vmem:[%s4779_s14 + $0x1ef8] sm:$0xff]  ;;  %v3249_v32 = vadd.f32 %v2225_v25, %v1201_v24  ;;  %v2245_v21 = vld [vmem:[%s4786_s26 + $0x1f90] sm:$0xff] }
 0x406   : > { %4251 = vst [vmem:[%s4801_s20 + $0x1e40] sm:$0xff] %v3227_v30  ;;  %v1203_v30 = vld [vmem:[%s4779_s14 + $0x1f00] sm:$0xff]  ;;  %v3250_v35 = vadd.f32 %v2226_v28, %v1202_v27  ;;  %v2246_v24 = vld [vmem:[%s4786_s26 + $0x1f98] sm:$0xff] }
 0x407   : > { %4252 = vst [vmem:[%s4801_s20 + $0x1e48] sm:$0xff] %v3228_v33  ;;  %v1204_v33 = vld [vmem:[%s4779_s14 + $0x1f08] sm:$0xff]  ;;  %v3251_v38 = vadd.f32 %v2227_v31, %v1203_v30  ;;  %v2247_v27 = vld [vmem:[%s4786_s26 + $0x1fa0] sm:$0xff] }
 0x408   : > { %4253 = vst [vmem:[%s4801_s20 + $0x1e50] sm:$0xff] %v3229_v36  ;;  %v1205_v36 = vld [vmem:[%s4779_s14 + $0x1f10] sm:$0xff]  ;;  %v3252_v41 = vadd.f32 %v2228_v34, %v1204_v33  ;;  %v2248_v30 = vld [vmem:[%s4786_s26 + $0x1fa8] sm:$0xff] }
 0x409   : > { %4254 = vst [vmem:[%s4801_s20 + $0x1e58] sm:$0xff] %v3230_v39  ;;  %v1206_v39 = vld [vmem:[%s4779_s14 + $0x1f18] sm:$0xff]  ;;  %v3253_v44 = vadd.f32 %v2229_v37, %v1205_v36  ;;  %v2249_v33 = vld [vmem:[%s4786_s26 + $0x1fb0] sm:$0xff] }
 0x40a   : > { %4255 = vst [vmem:[%s4801_s20 + $0x1e60] sm:$0xff] %v3231_v42  ;;  %v1207_v42 = vld [vmem:[%s4779_s14 + $0x1f20] sm:$0xff]  ;;  %v3254_v47 = vadd.f32 %v2230_v40, %v1206_v39  ;;  %v2250_v36 = vld [vmem:[%s4786_s26 + $0x1fb8] sm:$0xff] }
 0x40b   : > { %4256 = vst [vmem:[%s4801_s20 + $0x1e68] sm:$0xff] %v3232_v45  ;;  %v1208_v45 = vld [vmem:[%s4779_s14 + $0x1f28] sm:$0xff]  ;;  %v3255_v50 = vadd.f32 %v2231_v43, %v1207_v42  ;;  %v2251_v39 = vld [vmem:[%s4786_s26 + $0x1fc0] sm:$0xff] }
 0x40c   : > { %4257 = vst [vmem:[%s4801_s20 + $0x1e70] sm:$0xff] %v3233_v48  ;;  %v1209_v48 = vld [vmem:[%s4779_s14 + $0x1f30] sm:$0xff]  ;;  %v3256_v53 = vadd.f32 %v2232_v46, %v1208_v45  ;;  %v2252_v42 = vld [vmem:[%s4786_s26 + $0x1fc8] sm:$0xff] }
 0x40d   : > { %4258 = vst [vmem:[%s4801_s20 + $0x1e78] sm:$0xff] %v3234_v51  ;;  %v1210_v51 = vld [vmem:[%s4779_s14 + $0x1f38] sm:$0xff]  ;;  %v3257_v56 = vadd.f32 %v2233_v49, %v1209_v48  ;;  %v2253_v45 = vld [vmem:[%s4786_s26 + $0x1fd0] sm:$0xff] }
 0x40e   : > { %4259 = vst [vmem:[%s4801_s20 + $0x1e80] sm:$0xff] %v3235_v54  ;;  %v1211_v54 = vld [vmem:[%s4779_s14 + $0x1f40] sm:$0xff]  ;;  %v3258_v59 = vadd.f32 %v2234_v52, %v1210_v51  ;;  %v2254_v48 = vld [vmem:[%s4786_s26 + $0x1fd8] sm:$0xff] }
 0x40f   : > { %4260 = vst [vmem:[%s4801_s20 + $0x1e88] sm:$0xff] %v3236_v57  ;;  %v1212_v57 = vld [vmem:[%s4779_s14 + $0x1f48] sm:$0xff]  ;;  %v3259_v62 = vadd.f32 %v2235_v55, %v1211_v54  ;;  %v2255_v51 = vld [vmem:[%s4786_s26 + $0x1fe0] sm:$0xff] }
 0x410   : > { %4261 = vst [vmem:[%s4801_s20 + $0x1e90] sm:$0xff] %v3237_v60  ;;  %v1213_v60 = vld [vmem:[%s4779_s14 + $0x1f50] sm:$0xff]  ;;  %v3260_v1 = vadd.f32 %v2236_v58, %v1212_v57  ;;  %v2256_v54 = vld [vmem:[%s4786_s26 + $0x1fe8] sm:$0xff] }
 0x411   : > { %4262 = vst [vmem:[%s4801_s20 + $0x1e98] sm:$0xff] %v3238_v63  ;;  %v1214_v63 = vld [vmem:[%s4779_s14 + $0x1f58] sm:$0xff]  ;;  %v3261_v4 = vadd.f32 %v2237_v61, %v1213_v60  ;;  %v2257_v57 = vld [vmem:[%s4786_s26 + $0x1ff0] sm:$0xff] }
 0x412   : > { %4263 = vst [vmem:[%s4801_s20 + $0x1ea0] sm:$0xff] %v3239_v2  ;;  %v1215_v2 = vld [vmem:[%s4779_s14 + $0x1f60] sm:$0xff]  ;;  %v3262_v7 = vadd.f32 %v2238_v0, %v1214_v63  ;;  %v2258_v60 = vld [vmem:[%s4786_s26 + $0x1ff8] sm:$0xff] }
 0x413   : > { %4264 = vst [vmem:[%s4801_s20 + $0x1ea8] sm:$0xff] %v3240_v5  ;;  %v1216_v5 = vld [vmem:[%s4779_s14 + $0x1f68] sm:$0xff]  ;;  %v3263_v10 = vadd.f32 %v2239_v3, %v1215_v2 }
 0x414   : > { %4265 = vst [vmem:[%s4801_s20 + $0x1eb0] sm:$0xff] %v3241_v8  ;;  %v1217_v8 = vld [vmem:[%s4779_s14 + $0x1f70] sm:$0xff]  ;;  %v3264_v13 = vadd.f32 %v2240_v6, %v1216_v5 }
 0x415   : > { %4266 = vst [vmem:[%s4801_s20 + $0x1eb8] sm:$0xff] %v3242_v11  ;;  %v1218_v11 = vld [vmem:[%s4779_s14 + $0x1f78] sm:$0xff]  ;;  %v3265_v16 = vadd.f32 %v2241_v9, %v1217_v8 }
 0x416   : > { %4267 = vst [vmem:[%s4801_s20 + $0x1ec0] sm:$0xff] %v3243_v14  ;;  %v1219_v14 = vld [vmem:[%s4779_s14 + $0x1f80] sm:$0xff]  ;;  %v3266_v19 = vadd.f32 %v2242_v12, %v1218_v11 }
 0x417   : > { %4268 = vst [vmem:[%s4801_s20 + $0x1ec8] sm:$0xff] %v3244_v17  ;;  %v1220_v17 = vld [vmem:[%s4779_s14 + $0x1f88] sm:$0xff]  ;;  %v3267_v22 = vadd.f32 %v2243_v15, %v1219_v14 }
 0x418   : > { %4269 = vst [vmem:[%s4801_s20 + $0x1ed0] sm:$0xff] %v3245_v20  ;;  %v1221_v20 = vld [vmem:[%s4779_s14 + $0x1f90] sm:$0xff]  ;;  %v3268_v25 = vadd.f32 %v2244_v18, %v1220_v17 }
 0x419   : > { %4270 = vst [vmem:[%s4801_s20 + $0x1ed8] sm:$0xff] %v3246_v23  ;;  %v1222_v23 = vld [vmem:[%s4779_s14 + $0x1f98] sm:$0xff]  ;;  %v3269_v28 = vadd.f32 %v2245_v21, %v1221_v20 }
 0x41a   : > { %4271 = vst [vmem:[%s4801_s20 + $0x1ee0] sm:$0xff] %v3247_v26  ;;  %v1223_v26 = vld [vmem:[%s4779_s14 + $0x1fa0] sm:$0xff]  ;;  %v3270_v31 = vadd.f32 %v2246_v24, %v1222_v23 }
 0x41b   : > { %4272 = vst [vmem:[%s4801_s20 + $0x1ee8] sm:$0xff] %v3248_v29  ;;  %v1224_v29 = vld [vmem:[%s4779_s14 + $0x1fa8] sm:$0xff]  ;;  %v3271_v34 = vadd.f32 %v2247_v27, %v1223_v26 }
 0x41c   : > { %4273 = vst [vmem:[%s4801_s20 + $0x1ef0] sm:$0xff] %v3249_v32  ;;  %v1225_v32 = vld [vmem:[%s4779_s14 + $0x1fb0] sm:$0xff]  ;;  %v3272_v37 = vadd.f32 %v2248_v30, %v1224_v29 }
 0x41d   : > { %4274 = vst [vmem:[%s4801_s20 + $0x1ef8] sm:$0xff] %v3250_v35  ;;  %v1226_v35 = vld [vmem:[%s4779_s14 + $0x1fb8] sm:$0xff]  ;;  %v3273_v40 = vadd.f32 %v2249_v33, %v1225_v32 }
 0x41e   : > { %4275 = vst [vmem:[%s4801_s20 + $0x1f00] sm:$0xff] %v3251_v38  ;;  %v1227_v38 = vld [vmem:[%s4779_s14 + $0x1fc0] sm:$0xff]  ;;  %v3274_v43 = vadd.f32 %v2250_v36, %v1226_v35 }
 0x41f   : > { %4276 = vst [vmem:[%s4801_s20 + $0x1f08] sm:$0xff] %v3252_v41  ;;  %v1228_v41 = vld [vmem:[%s4779_s14 + $0x1fc8] sm:$0xff]  ;;  %v3275_v46 = vadd.f32 %v2251_v39, %v1227_v38 }
 0x420   : > { %4277 = vst [vmem:[%s4801_s20 + $0x1f10] sm:$0xff] %v3253_v44  ;;  %v1229_v44 = vld [vmem:[%s4779_s14 + $0x1fd0] sm:$0xff]  ;;  %v3276_v49 = vadd.f32 %v2252_v42, %v1228_v41 }
 0x421   : > { %4278 = vst [vmem:[%s4801_s20 + $0x1f18] sm:$0xff] %v3254_v47  ;;  %v1230_v47 = vld [vmem:[%s4779_s14 + $0x1fd8] sm:$0xff]  ;;  %v3277_v52 = vadd.f32 %v2253_v45, %v1229_v44 }
 0x422   : > { %4279 = vst [vmem:[%s4801_s20 + $0x1f20] sm:$0xff] %v3255_v50  ;;  %v1231_v50 = vld [vmem:[%s4779_s14 + $0x1fe0] sm:$0xff]  ;;  %v3278_v55 = vadd.f32 %v2254_v48, %v1230_v47 }
 0x423   : > { %4280 = vst [vmem:[%s4801_s20 + $0x1f28] sm:$0xff] %v3256_v53  ;;  %v1232_v53 = vld [vmem:[%s4779_s14 + $0x1fe8] sm:$0xff]  ;;  %v3279_v58 = vadd.f32 %v2255_v51, %v1231_v50 }
 0x424   : > { %4281 = vst [vmem:[%s4801_s20 + $0x1f30] sm:$0xff] %v3257_v56  ;;  %v1233_v56 = vld [vmem:[%s4779_s14 + $0x1ff0] sm:$0xff]  ;;  %v3280_v61 = vadd.f32 %v2256_v54, %v1232_v53 }
 0x425   : > { %4282 = vst [vmem:[%s4801_s20 + $0x1f38] sm:$0xff] %v3258_v59  ;;  %v1234_v59 = vld [vmem:[%s4779_s14 + $0x1ff8] sm:$0xff] }
 0x426   : > { %4283 = vst [vmem:[%s4801_s20 + $0x1f40] sm:$0xff] %v3259_v62  ;;  %v3281_v62 = vadd.f32 %v2257_v57, %v1233_v56  ;;  %v3282_v63 = vadd.f32 %v2258_v60, %v1234_v59 }
 0x427   : > { %4284 = vst [vmem:[%s4801_s20 + $0x1f48] sm:$0xff] %v3260_v1 }
 0x428   : > { %4285 = vst [vmem:[%s4801_s20 + $0x1f50] sm:$0xff] %v3261_v4 }
 0x429   : > { %4286 = vst [vmem:[%s4801_s20 + $0x1f58] sm:$0xff] %v3262_v7 }
 0x42a   : > { %4287 = vst [vmem:[%s4801_s20 + $0x1f60] sm:$0xff] %v3263_v10 }
 0x42b   : > { %4288 = vst [vmem:[%s4801_s20 + $0x1f68] sm:$0xff] %v3264_v13 }
 0x42c   : > { %4289 = vst [vmem:[%s4801_s20 + $0x1f70] sm:$0xff] %v3265_v16 }
 0x42d   : > { %4290 = vst [vmem:[%s4801_s20 + $0x1f78] sm:$0xff] %v3266_v19 }
 0x42e   : > { %4291 = vst [vmem:[%s4801_s20 + $0x1f80] sm:$0xff] %v3267_v22 }
 0x42f   : > { %4292 = vst [vmem:[%s4801_s20 + $0x1f88] sm:$0xff] %v3268_v25 }
 0x430   : > { %4293 = vst [vmem:[%s4801_s20 + $0x1f90] sm:$0xff] %v3269_v28 }
 0x431   : > { %4294 = vst [vmem:[%s4801_s20 + $0x1f98] sm:$0xff] %v3270_v31 }
 0x432   : > { %4295 = vst [vmem:[%s4801_s20 + $0x1fa0] sm:$0xff] %v3271_v34 }
 0x433   : > { %4296 = vst [vmem:[%s4801_s20 + $0x1fa8] sm:$0xff] %v3272_v37 }
 0x434   : > { %4297 = vst [vmem:[%s4801_s20 + $0x1fb0] sm:$0xff] %v3273_v40 }
 0x435   : > { %4298 = vst [vmem:[%s4801_s20 + $0x1fb8] sm:$0xff] %v3274_v43 }
 0x436   : > { %4299 = vst [vmem:[%s4801_s20 + $0x1fc0] sm:$0xff] %v3275_v46 }
 0x437   : > { %4300 = vst [vmem:[%s4801_s20 + $0x1fc8] sm:$0xff] %v3276_v49 }
 0x438   : > { %4301 = vst [vmem:[%s4801_s20 + $0x1fd0] sm:$0xff] %v3277_v52 }
 0x439   : > { %4302 = vst [vmem:[%s4801_s20 + $0x1fd8] sm:$0xff] %v3278_v55 }
 0x43a   : > { %4303 = vst [vmem:[%s4801_s20 + $0x1fe0] sm:$0xff] %v3279_v58 }
 0x43b   : > { %4304 = vst [vmem:[%s4801_s20 + $0x1fe8] sm:$0xff] %v3280_v61 }
 0x43c   : > { %4305 = vst [vmem:[%s4801_s20 + $0x1ff0] sm:$0xff] %v3281_v62 }
 0x43d   : > { %4306 = vst [vmem:[%s4801_s20 + $0x1ff8] sm:$0xff] %v3282_v63 }
 0x43e   : > { %4589 = shalt.err (!%p4586_p0)
}
 0x43f   : > { %s4636_s23 = smov 1024   ;;  %s4637_s7 = smov 64  }
 0x440   : > { %4451 = dma.vmem_to_hbm [thread:$0]  (%p4703_p11), %s4322_s16, 131072, %s4324_s17, %s4308_s19, %s4636_s23, %s4636_s23, %s4637_s7  }
 0x441 PF: > { %s4338_s14 = sand.u32 1, %s4620_s9   ;;  %p7909_p1 = scmp.ge.s32.totalorder %s4632_s12, 2 }
 0x442   : > { %s4339_s4 = scalar_lea.sflag [#allocation4], %s4338_s14 }
 0x443   : > { %p4461_p4 = pnand %p7909_p1, %p4707_p12 }
 0x445   : > { %p4462_p7 = pneg %p4461_p4 }
 0x447   : > { %4615 = dma.done.wait (%p4462_p7), %s4339_s4, 131072  }
 0x448   : > { %4617 = vsyncadd (%p4462_p7), %s4339_s4, 4294836224  ;;  %p18_p5 = scmp.ge.s32.totalorder %s4678_s15, 4   ;;  %s7910_s9 = smov %s4624_s10 }
 0x449   : > { %s7911_s10 = smov %s4628_s11  ;;  %s7912_s11 = smov %s4690_s18 }
 0x44a   : > { %s7913_s12 = smov %s4678_s15  ;;  %20 = sbr.rel (!%p18_p5) target bundleno = 7 (0x7), region = 86 }
 0x44f   :  { %4345 = vsyncpa [#allocation3], 1 }
 0x450   :  { %4347 = vsyncpa [#allocation3 + $0x1], 1 }
 0x451   :  { %4348 = vsyncpa [#allocation6], 1 }
 0x452   :  { %4350 = vsyncpa [#allocation6 + $0x1], 1 }
 0x453   :  { %4351 = vsyncpa [#allocation4], 1 }
 0x454   :  { %4353 = vsyncpa [#allocation4 + $0x1], 1 }

</bundles_post_ra>
